<compile_context>
chip_gen: v7x
topology: tpu7x:2x2x1
jax: 0.10.0
libtpu: 0.0.40
codegen_flags: <defaults>
</compile_context>

<pallas_src>
import jax
import jax.numpy as jnp
from jax import lax
from jax.experimental import pallas as pl
from jax.experimental.pallas import tpu as pltpu

# ------------------------- small model config -------------------------
BATCH = 2
IMG = 16
CHANS = 3
PATCH = 4
N_PATCH = (IMG // PATCH) ** 2          # 16 patches per image
SEQ = N_PATCH + 1                      # 17 real tokens (patches + cls)
SEQ_PAD = 24                           # per-batch padded sequence (multiple of 8)
EMBED = 64                             # backbone "in_features"
HEADS = 4
HEAD_DIM = EMBED // HEADS              # 16
DEPTH = 2
MLP_HIDDEN = 4 * EMBED                 # 256
LN_EPS_BACKBONE = 1e-6                 # timm ViT LayerNorm eps
LN_EPS_HEAD = 1e-5                     # nn.LayerNorm default eps
OUT_PAD = 128                          # lane-dense padded width of gaze output
NEG_INF = -1e30


# ------------------------- in-kernel math helpers -------------------------
def _erf(x):
    # erf via Abramowitz & Stegun 7.1.26 (max abs err ~1.5e-7); only uses
    # exp/abs/where so it lowers cleanly on Mosaic (matches exact torch GELU
    # to ~float32 precision).
    a1, a2, a3, a4, a5 = 0.254829592, -0.284496736, 1.421413741, -1.453152027, 1.061405429
    pconst = 0.3275911
    ax = jnp.abs(x)
    t = 1.0 / (1.0 + pconst * ax)
    poly = ((((a5 * t + a4) * t + a3) * t + a2) * t + a1) * t
    y = 1.0 - poly * jnp.exp(-ax * ax)
    return jnp.where(x >= 0.0, y, -y)


def _gelu(x):
    # exact (erf-based) GELU, matching torch.nn.GELU() default
    return 0.5 * x * (1.0 + _erf(x * 0.7071067811865476))


def _layernorm(x, g, b, eps):
    mu = jnp.mean(x, axis=-1, keepdims=True)
    xc = x - mu
    var = jnp.mean(xc * xc, axis=-1, keepdims=True)
    return xc * lax.rsqrt(var + eps) * g + b


# ------------------------- the fused kernel -------------------------
def _fused_vit_gaze_kernel(patches_ref, pw_ref, pb_ref, clspos_ref, pospatch_ref,
                           *rest):
    # rest = 12*DEPTH block refs, lnf_g, lnf_b, 10 head refs, out_ref, x_scr
    n_blk = 12 * DEPTH
    blk_refs = rest[:n_blk]
    lnf_g_ref, lnf_b_ref = rest[n_blk], rest[n_blk + 1]
    head_refs = rest[n_blk + 2:n_blk + 12]
    out_ref = rest[n_blk + 12]
    x_scr = rest[n_blk + 13]

    f32 = jnp.float32
    batch = x_scr.shape[0] // SEQ_PAD
    scale = 1.0 / (HEAD_DIM ** 0.5)

    # ---- patch embedding (Conv2d stride==kernel as a matmul) ----
    tok = jnp.dot(patches_ref[...], pw_ref[...],
                  preferred_element_type=f32) + pb_ref[...]          # (B*N_PATCH, E)

    # ---- assemble the padded token buffer in VMEM scratch ----
    # Per-batch slab of SEQ_PAD rows: [16 patch tokens | cls token | 7 zero rows].
    # (Token order inside a slab does not matter: attention is order-free and
    #  positional embeddings are added per actual position.)
    x_scr[...] = jnp.zeros_like(x_scr)
    pos_patch = pospatch_ref[...]                                    # (N_PATCH, E)
    cls_tok = clspos_ref[...]                                        # (1, E) = cls + pos[0]
    for b in range(batch):
        x_scr[pl.ds(b * SEQ_PAD, N_PATCH), :] = (
            tok[b * N_PATCH:(b + 1) * N_PATCH, :] + pos_patch)
        x_scr[pl.ds(b * SEQ_PAD + N_PATCH, 1), :] = cls_tok
    x = x_scr[...]                                                   # (B*SEQ_PAD, E)

    # Key mask: within a slab only the first SEQ rows are real tokens (hoisted).
    key_valid = lax.broadcasted_iota(jnp.int32, (SEQ_PAD, SEQ_PAD), 1) < SEQ

    # ---- pre-LN transformer blocks (fully unrolled) ----
    for d in range(DEPTH):
        (ln1_g, ln1_b, qkv_w, qkv_b, proj_w, proj_b,
         ln2_g, ln2_b, fc1_w, fc1_b, fc2_w, fc2_b) = blk_refs[12 * d:12 * (d + 1)]

        # --- multi-head self attention ---
        h = _layernorm(x, ln1_g[...], ln1_b[...], LN_EPS_BACKBONE)
        qkv = jnp.dot(h, qkv_w[...], preferred_element_type=f32) + qkv_b[...]

        proj_w_v = proj_w[...]
        slabs = []
        for b in range(batch):
            qkv_b_ = qkv[b * SEQ_PAD:(b + 1) * SEQ_PAD, :]           # (SP, 3E)
            acc = jnp.zeros((SEQ_PAD, EMBED), f32)
            for hd in range(HEADS):
                off = hd * HEAD_DIM
                qh = qkv_b_[:, off:off + HEAD_DIM]                   # (SP, Dh)
                kh = qkv_b_[:, EMBED + off:EMBED + off + HEAD_DIM]
                vh = qkv_b_[:, 2 * EMBED + off:2 * EMBED + off + HEAD_DIM]
                s = lax.dot_general(qh, kh, (((1,), (1,)), ((), ())),
                                    preferred_element_type=f32) * scale
                s = jnp.where(key_valid, s, NEG_INF)
                s = s - jnp.max(s, axis=-1, keepdims=True)
                p = jnp.exp(s)
                p = p * pl.reciprocal(jnp.sum(p, axis=-1, keepdims=True),
                                      approx=True)
                oh = jnp.dot(p, vh, preferred_element_type=f32)      # (SP, Dh)
                # fold the output projection per head: sum_h o_h @ W_proj[h]
                acc = acc + jnp.dot(oh, proj_w_v[off:off + HEAD_DIM, :],
                                    preferred_element_type=f32)
            slabs.append(acc)
        x = x + jnp.concatenate(slabs, axis=0) + proj_b[...]

        # --- MLP ---
        h = _layernorm(x, ln2_g[...], ln2_b[...], LN_EPS_BACKBONE)
        h = _gelu(jnp.dot(h, fc1_w[...], preferred_element_type=f32) + fc1_b[...])
        x = x + jnp.dot(h, fc2_w[...], preferred_element_type=f32) + fc2_b[...]

    # ---- final LN + cls-token feature extraction (selection matmul) ----
    xf = _layernorm(x, lnf_g_ref[...], lnf_b_ref[...], LN_EPS_BACKBONE)
    rows = lax.broadcasted_iota(jnp.int32, (batch, batch * SEQ_PAD), 0)
    cols = lax.broadcasted_iota(jnp.int32, (batch, batch * SEQ_PAD), 1)
    sel = jnp.where(cols == rows * SEQ_PAD + N_PATCH, 1.0, 0.0).astype(f32)
    feats = jnp.dot(sel, xf, preferred_element_type=f32)             # (B, E)

    # ---- gaze head: LN -> 256 -> GELU -> 128 -> GELU -> (Drop) -> 64 -> GELU
    #      -> (Drop) -> 2 (lane-padded to 128); Dropout == identity (eval) ----
    (hln_g, hln_b, w1, b1, w2, b2, w3, b3, w4, b4) = head_refs
    g = _layernorm(feats, hln_g[...], hln_b[...], LN_EPS_HEAD)
    g = _gelu(jnp.dot(g, w1[...], preferred_element_type=f32) + b1[...])
    g = _gelu(jnp.dot(g, w2[...], preferred_element_type=f32) + b2[...])
    g = _gelu(jnp.dot(g, w3[...], preferred_element_type=f32) + b3[...])
    out_ref[...] = jnp.dot(g, w4[...], preferred_element_type=f32) + b4[...]


# ------------------------- parameters (deterministic synthetic init) -------------------------
# TODO(synk): pretrained timm checkpoint weights are not loadable here; the
# backbone is a structurally-equivalent small ViT with deterministic init.
def init_params(key):
    keys = iter(jax.random.split(key, 32))

    def nrm(shape, scale=0.02):
        return scale * jax.random.normal(next(keys), shape, dtype=jnp.float32)

    def zeros(*shape):
        return jnp.zeros(shape, jnp.float32)

    def ones(*shape):
        return jnp.ones(shape, jnp.float32)

    params = {
        "patch_w": nrm((CHANS * PATCH * PATCH, EMBED)),
        "patch_b": zeros(EMBED),
        "cls": nrm((1, 1, EMBED)),
        "pos": nrm((1, SEQ, EMBED)),
        "lnf_g": ones(EMBED),
        "lnf_b": zeros(EMBED),
        "blocks": [],
        "head": {},
    }
    for _ in range(DEPTH):
        params["blocks"].append({
            "ln1_g": ones(EMBED), "ln1_b": zeros(EMBED),
            "qkv_w": nrm((EMBED, 3 * EMBED)), "qkv_b": zeros(3 * EMBED),
            "proj_w": nrm((EMBED, EMBED)), "proj_b": zeros(EMBED),
            "ln2_g": ones(EMBED), "ln2_b": zeros(EMBED),
            "fc1_w": nrm((EMBED, MLP_HIDDEN)), "fc1_b": zeros(MLP_HIDDEN),
            "fc2_w": nrm((MLP_HIDDEN, EMBED)), "fc2_b": zeros(EMBED),
        })
    params["head"] = {
        "ln_g": ones(EMBED), "ln_b": zeros(EMBED),
        "w1": nrm((EMBED, 256)), "b1": zeros(256),
        "w2": nrm((256, 128)), "b2": zeros(128),
        "w3": nrm((128, 64)), "b3": zeros(64),
        "w4": nrm((64, 2)), "b4": zeros(2),
    }
    return params


# ------------------------- forward pass (one fused pallas_call) -------------------------
def vit_gaze_forward(x_nchw, params):
    B, C, H, W = x_nchw.shape
    p = PATCH
    hp, wp = H // p, W // p
    # Patchify (conv stride==kernel as matmul); flatten each patch channel-major
    # to match torch Conv2d weight flattening. Tiny one-time XLA relayout.
    patches = x_nchw.reshape(B, C, hp, p, wp, p)
    patches = patches.transpose(0, 2, 4, 1, 3, 5).reshape(B * hp * wp, C * p * p)

    head = params["head"]
    # Lane-dense padded final projection (2 -> 128 columns, zeros elsewhere).
    w4p = jnp.zeros((64, OUT_PAD), jnp.float32).at[:, :2].set(head["w4"])
    b4p = jnp.zeros((1, OUT_PAD), jnp.float32).at[0, :2].set(head["b4"])

    cls_pos = params["cls"].reshape(1, EMBED) + params["pos"][0, 0:1, :]   # (1, E)
    pos_patch = params["pos"][0, 1:, :]                                     # (N_PATCH, E)

    ins = [patches,
           params["patch_w"], params["patch_b"].reshape(1, EMBED),
           cls_pos, pos_patch]
    for blk in params["blocks"]:
        ins += [blk["ln1_g"].reshape(1, -1), blk["ln1_b"].reshape(1, -1),
                blk["qkv_w"], blk["qkv_b"].reshape(1, -1),
                blk["proj_w"], blk["proj_b"].reshape(1, -1),
                blk["ln2_g"].reshape(1, -1), blk["ln2_b"].reshape(1, -1),
                blk["fc1_w"], blk["fc1_b"].reshape(1, -1),
                blk["fc2_w"], blk["fc2_b"].reshape(1, -1)]
    ins += [params["lnf_g"].reshape(1, -1), params["lnf_b"].reshape(1, -1)]
    ins += [head["ln_g"].reshape(1, -1), head["ln_b"].reshape(1, -1),
            head["w1"], head["b1"].reshape(1, -1),
            head["w2"], head["b2"].reshape(1, -1),
            head["w3"], head["b3"].reshape(1, -1),
            w4p, b4p]

    out_padded = pl.pallas_call(
        _fused_vit_gaze_kernel,
        out_shape=jax.ShapeDtypeStruct((B, OUT_PAD), jnp.float32),
        grid=(1,),
        in_specs=[pl.BlockSpec(a.shape, lambda i, n=a.ndim: (0,) * n) for a in ins],
        out_specs=pl.BlockSpec((B, OUT_PAD), lambda i: (0, 0)),
        scratch_shapes=[pltpu.VMEM((B * SEQ_PAD, EMBED), jnp.float32)],
        compiler_params=pltpu.CompilerParams(
            dimension_semantics=("arbitrary",)),
    )(*ins)
    return out_padded[:, :2]


if __name__ == "__main__":
    key = jax.random.PRNGKey(0)
    pkey, xkey = jax.random.split(key)
    params = init_params(pkey)
    x = jax.random.normal(xkey, (BATCH, CHANS, IMG, IMG), dtype=jnp.float32)

    gaze = jax.jit(vit_gaze_forward)(x, params)
    gaze = jax.block_until_ready(gaze)
    assert gaze.shape == (BATCH, 2) and gaze.dtype == jnp.float32
    assert bool(jnp.all(jnp.isfinite(gaze)))
    print("KERNEL_OK")
</pallas_src>

<mosaic_0001>
module attributes {stable_mosaic.version = 11 : i64} {
  func.func @_fused_vit_gaze_kernel(%arg0: i32, %arg1: memref<32x48xf32, #tpu.memory_space<vmem>>, %arg2: memref<48x64xf32, #tpu.memory_space<vmem>>, %arg3: memref<1x64xf32, #tpu.memory_space<vmem>>, %arg4: memref<1x64xf32, #tpu.memory_space<vmem>>, %arg5: memref<16x64xf32, #tpu.memory_space<vmem>>, %arg6: memref<1x64xf32, #tpu.memory_space<vmem>>, %arg7: memref<1x64xf32, #tpu.memory_space<vmem>>, %arg8: memref<64x192xf32, #tpu.memory_space<vmem>>, %arg9: memref<1x192xf32, #tpu.memory_space<vmem>>, %arg10: memref<64x64xf32, #tpu.memory_space<vmem>>, %arg11: memref<1x64xf32, #tpu.memory_space<vmem>>, %arg12: memref<1x64xf32, #tpu.memory_space<vmem>>, %arg13: memref<1x64xf32, #tpu.memory_space<vmem>>, %arg14: memref<64x256xf32, #tpu.memory_space<vmem>>, %arg15: memref<1x256xf32, #tpu.memory_space<vmem>>, %arg16: memref<256x64xf32, #tpu.memory_space<vmem>>, %arg17: memref<1x64xf32, #tpu.memory_space<vmem>>, %arg18: memref<1x64xf32, #tpu.memory_space<vmem>>, %arg19: memref<1x64xf32, #tpu.memory_space<vmem>>, %arg20: memref<64x192xf32, #tpu.memory_space<vmem>>, %arg21: memref<1x192xf32, #tpu.memory_space<vmem>>, %arg22: memref<64x64xf32, #tpu.memory_space<vmem>>, %arg23: memref<1x64xf32, #tpu.memory_space<vmem>>, %arg24: memref<1x64xf32, #tpu.memory_space<vmem>>, %arg25: memref<1x64xf32, #tpu.memory_space<vmem>>, %arg26: memref<64x256xf32, #tpu.memory_space<vmem>>, %arg27: memref<1x256xf32, #tpu.memory_space<vmem>>, %arg28: memref<256x64xf32, #tpu.memory_space<vmem>>, %arg29: memref<1x64xf32, #tpu.memory_space<vmem>>, %arg30: memref<1x64xf32, #tpu.memory_space<vmem>>, %arg31: memref<1x64xf32, #tpu.memory_space<vmem>>, %arg32: memref<1x64xf32, #tpu.memory_space<vmem>>, %arg33: memref<1x64xf32, #tpu.memory_space<vmem>>, %arg34: memref<64x256xf32, #tpu.memory_space<vmem>>, %arg35: memref<1x256xf32, #tpu.memory_space<vmem>>, %arg36: memref<256x128xf32, #tpu.memory_space<vmem>>, %arg37: memref<1x128xf32, #tpu.memory_space<vmem>>, %arg38: memref<128x64xf32, #tpu.memory_space<vmem>>, %arg39: memref<1x64xf32, #tpu.memory_space<vmem>>, %arg40: memref<64x128xf32, #tpu.memory_space<vmem>>, %arg41: memref<1x128xf32, #tpu.memory_space<vmem>>, %arg42: memref<2x128xf32, #tpu.memory_space<vmem>>, %arg43: memref<48x64xf32, #tpu.memory_space<vmem>>) attributes {dimension_semantics = [#tpu.dimension_semantics<arbitrary>], iteration_bounds = array<i64: 1>, scalar_prefetch = 0 : i64, scratch_operands = 1 : i64, tpu.core_type = #tpu.core_type<tc>, window_params = [{pipeline_mode = #tpu.pipeline_mode<synchronous>, transform_indices = @transform_0, window_bounds = array<i64: 32, 48>}, {pipeline_mode = #tpu.pipeline_mode<synchronous>, transform_indices = @transform_1, window_bounds = array<i64: 48, 64>}, {pipeline_mode = #tpu.pipeline_mode<synchronous>, transform_indices = @transform_2, window_bounds = array<i64: 1, 64>}, {pipeline_mode = #tpu.pipeline_mode<synchronous>, transform_indices = @transform_3, window_bounds = array<i64: 1, 64>}, {pipeline_mode = #tpu.pipeline_mode<synchronous>, transform_indices = @transform_4, window_bounds = array<i64: 16, 64>}, {pipeline_mode = #tpu.pipeline_mode<synchronous>, transform_indices = @transform_5, window_bounds = array<i64: 1, 64>}, {pipeline_mode = #tpu.pipeline_mode<synchronous>, transform_indices = @transform_6, window_bounds = array<i64: 1, 64>}, {pipeline_mode = #tpu.pipeline_mode<synchronous>, transform_indices = @transform_7, window_bounds = array<i64: 64, 192>}, {pipeline_mode = #tpu.pipeline_mode<synchronous>, transform_indices = @transform_8, window_bounds = array<i64: 1, 192>}, {pipeline_mode = #tpu.pipeline_mode<synchronous>, transform_indices = @transform_9, window_bounds = array<i64: 64, 64>}, {pipeline_mode = #tpu.pipeline_mode<synchronous>, transform_indices = @transform_10, window_bounds = array<i64: 1, 64>}, {pipeline_mode = #tpu.pipeline_mode<synchronous>, transform_indices = @transform_11, window_bounds = array<i64: 1, 64>}, {pipeline_mode = #tpu.pipeline_mode<synchronous>, transform_indices = @transform_12, window_bounds = array<i64: 1, 64>}, {pipeline_mode = #tpu.pipeline_mode<synchronous>, transform_indices = @transform_13, window_bounds = array<i64: 64, 256>}, {pipeline_mode = #tpu.pipeline_mode<synchronous>, transform_indices = @transform_14, window_bounds = array<i64: 1, 256>}, {pipeline_mode = #tpu.pipeline_mode<synchronous>, transform_indices = @transform_15, window_bounds = array<i64: 256, 64>}, {pipeline_mode = #tpu.pipeline_mode<synchronous>, transform_indices = @transform_16, window_bounds = array<i64: 1, 64>}, {pipeline_mode = #tpu.pipeline_mode<synchronous>, transform_indices = @transform_17, window_bounds = array<i64: 1, 64>}, {pipeline_mode = #tpu.pipeline_mode<synchronous>, transform_indices = @transform_18, window_bounds = array<i64: 1, 64>}, {pipeline_mode = #tpu.pipeline_mode<synchronous>, transform_indices = @transform_19, window_bounds = array<i64: 64, 192>}, {pipeline_mode = #tpu.pipeline_mode<synchronous>, transform_indices = @transform_20, window_bounds = array<i64: 1, 192>}, {pipeline_mode = #tpu.pipeline_mode<synchronous>, transform_indices = @transform_21, window_bounds = array<i64: 64, 64>}, {pipeline_mode = #tpu.pipeline_mode<synchronous>, transform_indices = @transform_22, window_bounds = array<i64: 1, 64>}, {pipeline_mode = #tpu.pipeline_mode<synchronous>, transform_indices = @transform_23, window_bounds = array<i64: 1, 64>}, {pipeline_mode = #tpu.pipeline_mode<synchronous>, transform_indices = @transform_24, window_bounds = array<i64: 1, 64>}, {pipeline_mode = #tpu.pipeline_mode<synchronous>, transform_indices = @transform_25, window_bounds = array<i64: 64, 256>}, {pipeline_mode = #tpu.pipeline_mode<synchronous>, transform_indices = @transform_26, window_bounds = array<i64: 1, 256>}, {pipeline_mode = #tpu.pipeline_mode<synchronous>, transform_indices = @transform_27, window_bounds = array<i64: 256, 64>}, {pipeline_mode = #tpu.pipeline_mode<synchronous>, transform_indices = @transform_28, window_bounds = array<i64: 1, 64>}, {pipeline_mode = #tpu.pipeline_mode<synchronous>, transform_indices = @transform_29, window_bounds = array<i64: 1, 64>}, {pipeline_mode = #tpu.pipeline_mode<synchronous>, transform_indices = @transform_30, window_bounds = array<i64: 1, 64>}, {pipeline_mode = #tpu.pipeline_mode<synchronous>, transform_indices = @transform_31, window_bounds = array<i64: 1, 64>}, {pipeline_mode = #tpu.pipeline_mode<synchronous>, transform_indices = @transform_32, window_bounds = array<i64: 1, 64>}, {pipeline_mode = #tpu.pipeline_mode<synchronous>, transform_indices = @transform_33, window_bounds = array<i64: 64, 256>}, {pipeline_mode = #tpu.pipeline_mode<synchronous>, transform_indices = @transform_34, window_bounds = array<i64: 1, 256>}, {pipeline_mode = #tpu.pipeline_mode<synchronous>, transform_indices = @transform_35, window_bounds = array<i64: 256, 128>}, {pipeline_mode = #tpu.pipeline_mode<synchronous>, transform_indices = @transform_36, window_bounds = array<i64: 1, 128>}, {pipeline_mode = #tpu.pipeline_mode<synchronous>, transform_indices = @transform_37, window_bounds = array<i64: 128, 64>}, {pipeline_mode = #tpu.pipeline_mode<synchronous>, transform_indices = @transform_38, window_bounds = array<i64: 1, 64>}, {pipeline_mode = #tpu.pipeline_mode<synchronous>, transform_indices = @transform_39, window_bounds = array<i64: 64, 128>}, {pipeline_mode = #tpu.pipeline_mode<synchronous>, transform_indices = @transform_40, window_bounds = array<i64: 1, 128>}, {pipeline_mode = #tpu.pipeline_mode<synchronous>, transform_indices = @transform_41, window_bounds = array<i64: 2, 128>}]} {
    %c0 = arith.constant 0 : index
    %c0_0 = arith.constant 0 : index
    %0 = vector.load %arg1[%c0, %c0_0] : memref<32x48xf32, #tpu.memory_space<vmem>>, vector<32x48xf32>
    %c0_1 = arith.constant 0 : index
    %c0_2 = arith.constant 0 : index
    %1 = vector.load %arg2[%c0_1, %c0_2] : memref<48x64xf32, #tpu.memory_space<vmem>>, vector<48x64xf32>
    %cst = arith.constant dense<0.000000e+00> : vector<32x64xf32>
    %2 = tpu.matmul %0, %1, %cst {dimension_numbers = #tpu.dot_dimension_numbers<[1], [0], [0], [1], [0, 0, 1, 1], [], []>} : vector<32x48xf32>, vector<48x64xf32>, vector<32x64xf32> -> vector<32x64xf32>
    %c0_3 = arith.constant 0 : index
    %c0_4 = arith.constant 0 : index
    %3 = vector.load %arg3[%c0_3, %c0_4] : memref<1x64xf32, #tpu.memory_space<vmem>>, vector<1x64xf32>
    %4 = vector.broadcast %3 : vector<1x64xf32> to vector<32x64xf32>
    %5 = arith.addf %2, %4 : vector<32x64xf32>
    %cst_5 = arith.constant 0.000000e+00 : f32
    %6 = vector.broadcast %cst_5 : f32 to vector<48x64xf32>
    %c0_6 = arith.constant 0 : index
    %c0_7 = arith.constant 0 : index
    %7 = vector.load %arg43[%c0_6, %c0_7] : memref<48x64xf32, #tpu.memory_space<vmem>>, vector<48x64xf32>
    tpu.vector_store %arg43[%c0_6, %c0_7], %6 {strides = array<i32>} : memref<48x64xf32, #tpu.memory_space<vmem>>, vector<48x64xf32>,
    %c0_8 = arith.constant 0 : index
    %c0_9 = arith.constant 0 : index
    %8 = vector.load %arg5[%c0_8, %c0_9] : memref<16x64xf32, #tpu.memory_space<vmem>>, vector<16x64xf32>
    %c0_10 = arith.constant 0 : index
    %c0_11 = arith.constant 0 : index
    %9 = vector.load %arg4[%c0_10, %c0_11] : memref<1x64xf32, #tpu.memory_space<vmem>>, vector<1x64xf32>
    %10 = vector.extract_strided_slice %5 {offsets = [0, 0], sizes = [16, 64], strides = [1, 1]} : vector<32x64xf32> to vector<16x64xf32>
    %11 = arith.addf %10, %8 : vector<16x64xf32>
    %c0_12 = arith.constant 0 : index
    %c0_13 = arith.constant 0 : index
    %12 = vector.load %arg43[%c0_12, %c0_13] : memref<48x64xf32, #tpu.memory_space<vmem>>, vector<16x64xf32>
    tpu.vector_store %arg43[%c0_12, %c0_13], %11 {strides = array<i32>} : memref<48x64xf32, #tpu.memory_space<vmem>>, vector<16x64xf32>,
    %c16 = arith.constant 16 : index
    %c0_14 = arith.constant 0 : index
    %13 = vector.load %arg43[%c16, %c0_14] : memref<48x64xf32, #tpu.memory_space<vmem>>, vector<1x64xf32>
    tpu.vector_store %arg43[%c16, %c0_14], %9 {strides = array<i32>} : memref<48x64xf32, #tpu.memory_space<vmem>>, vector<1x64xf32>,
    %14 = vector.extract_strided_slice %5 {offsets = [16, 0], sizes = [16, 64], strides = [1, 1]} : vector<32x64xf32> to vector<16x64xf32>
    %15 = arith.addf %14, %8 : vector<16x64xf32>
    %c24 = arith.constant 24 : index
    %c0_15 = arith.constant 0 : index
    %16 = vector.load %arg43[%c24, %c0_15] : memref<48x64xf32, #tpu.memory_space<vmem>>, vector<16x64xf32>
    tpu.vector_store %arg43[%c24, %c0_15], %15 {strides = array<i32>} : memref<48x64xf32, #tpu.memory_space<vmem>>, vector<16x64xf32>,
    %c40 = arith.constant 40 : index
    %c0_16 = arith.constant 0 : index
    %17 = vector.load %arg43[%c40, %c0_16] : memref<48x64xf32, #tpu.memory_space<vmem>>, vector<1x64xf32>
    tpu.vector_store %arg43[%c40, %c0_16], %9 {strides = array<i32>} : memref<48x64xf32, #tpu.memory_space<vmem>>, vector<1x64xf32>,
    %c0_17 = arith.constant 0 : index
    %c0_18 = arith.constant 0 : index
    %18 = vector.load %arg43[%c0_17, %c0_18] : memref<48x64xf32, #tpu.memory_space<vmem>>, vector<48x64xf32>
    %19 = tpu.iota {dimensions = array<i32: 1>} : vector<24x24xi32>
    %c17_i32 = arith.constant 17 : i32
    %20 = vector.broadcast %c17_i32 : i32 to vector<24x24xi32>
    %21 = arith.cmpi slt, %19, %20 : vector<24x24xi32>
    %c0_19 = arith.constant 0 : index
    %c0_20 = arith.constant 0 : index
    %22 = vector.load %arg6[%c0_19, %c0_20] : memref<1x64xf32, #tpu.memory_space<vmem>>, vector<1x64xf32>
    %c0_21 = arith.constant 0 : index
    %c0_22 = arith.constant 0 : index
    %23 = vector.load %arg7[%c0_21, %c0_22] : memref<1x64xf32, #tpu.memory_space<vmem>>, vector<1x64xf32>
    %cst_23 = arith.constant dense<0.000000e+00> : vector<48xf32>
    %24 = vector.multi_reduction <add>, %18, %cst_23 [1] : vector<48x64xf32> to vector<48xf32>
    %25 = vector.shape_cast %24 : vector<48xf32> to vector<48x1xf32>
    %cst_24 = arith.constant 6.400000e+01 : f32
    %26 = vector.broadcast %cst_24 : f32 to vector<48x1xf32>
    %27 = arith.divf %25, %26 : vector<48x1xf32>
    %28 = vector.broadcast %27 : vector<48x1xf32> to vector<48x64xf32>
    %29 = arith.subf %18, %28 : vector<48x64xf32>
    %30 = arith.mulf %29, %29 : vector<48x64xf32>
    %cst_25 = arith.constant dense<0.000000e+00> : vector<48xf32>
    %31 = vector.multi_reduction <add>, %30, %cst_25 [1] : vector<48x64xf32> to vector<48xf32>
    %32 = vector.shape_cast %31 : vector<48xf32> to vector<48x1xf32>
    %cst_26 = arith.constant 6.400000e+01 : f32
    %33 = vector.broadcast %cst_26 : f32 to vector<48x1xf32>
    %34 = arith.divf %32, %33 : vector<48x1xf32>
    %cst_27 = arith.constant 9.99999997E-7 : f32
    %35 = vector.broadcast %cst_27 : f32 to vector<48x1xf32>
    %36 = arith.addf %34, %35 : vector<48x1xf32>
    %37 = math.rsqrt %36 : vector<48x1xf32>
    %38 = vector.broadcast %37 : vector<48x1xf32> to vector<48x64xf32>
    %39 = arith.mulf %29, %38 : vector<48x64xf32>
    %40 = vector.broadcast %22 : vector<1x64xf32> to vector<48x64xf32>
    %41 = arith.mulf %39, %40 : vector<48x64xf32>
    %42 = vector.broadcast %23 : vector<1x64xf32> to vector<48x64xf32>
    %43 = arith.addf %41, %42 : vector<48x64xf32>
    %c0_28 = arith.constant 0 : index
    %c0_29 = arith.constant 0 : index
    %44 = vector.load %arg8[%c0_28, %c0_29] : memref<64x192xf32, #tpu.memory_space<vmem>>, vector<64x192xf32>
    %cst_30 = arith.constant dense<0.000000e+00> : vector<48x192xf32>
    %45 = tpu.matmul %43, %44, %cst_30 {dimension_numbers = #tpu.dot_dimension_numbers<[1], [0], [0], [1], [0, 0, 1, 1], [], []>} : vector<48x64xf32>, vector<64x192xf32>, vector<48x192xf32> -> vector<48x192xf32>
    %c0_31 = arith.constant 0 : index
    %c0_32 = arith.constant 0 : index
    %46 = vector.load %arg9[%c0_31, %c0_32] : memref<1x192xf32, #tpu.memory_space<vmem>>, vector<1x192xf32>
    %47 = vector.broadcast %46 : vector<1x192xf32> to vector<48x192xf32>
    %48 = arith.addf %45, %47 : vector<48x192xf32>
    %c0_33 = arith.constant 0 : index
    %c0_34 = arith.constant 0 : index
    %49 = vector.load %arg10[%c0_33, %c0_34] : memref<64x64xf32, #tpu.memory_space<vmem>>, vector<64x64xf32>
    %50 = vector.extract_strided_slice %48 {offsets = [0, 0], sizes = [24, 192], strides = [1, 1]} : vector<48x192xf32> to vector<24x192xf32>
    %cst_35 = arith.constant 0.000000e+00 : f32
    %51 = vector.broadcast %cst_35 : f32 to vector<24x64xf32>
    %52 = vector.extract_strided_slice %50 {offsets = [0, 0], sizes = [24, 16], strides = [1, 1]} : vector<24x192xf32> to vector<24x16xf32>
    %53 = vector.extract_strided_slice %50 {offsets = [0, 64], sizes = [24, 16], strides = [1, 1]} : vector<24x192xf32> to vector<24x16xf32>
    %54 = vector.extract_strided_slice %50 {offsets = [0, 128], sizes = [24, 16], strides = [1, 1]} : vector<24x192xf32> to vector<24x16xf32>
    %cst_36 = arith.constant dense<0.000000e+00> : vector<24x24xf32>
    %55 = tpu.matmul %52, %53, %cst_36 {dimension_numbers = #tpu.dot_dimension_numbers<[1], [1], [0], [0], [0, 0, 1, 0], [], []>} : vector<24x16xf32>, vector<24x16xf32>, vector<24x24xf32> -> vector<24x24xf32>
    %cst_37 = arith.constant 2.500000e-01 : f32
    %56 = vector.broadcast %cst_37 : f32 to vector<24x24xf32>
    %57 = arith.mulf %55, %56 : vector<24x24xf32>
    %cst_38 = arith.constant -1.000000e+30 : f32
    %58 = vector.broadcast %cst_38 : f32 to vector<24x24xf32>
    %59 = arith.select %21, %57, %58 : vector<24x24xi1>, vector<24x24xf32>
    %cst_39 = arith.constant dense<0xFF800000> : vector<24xf32>
    %60 = vector.multi_reduction <maximumf>, %59, %cst_39 [1] : vector<24x24xf32> to vector<24xf32>
    %61 = vector.shape_cast %60 : vector<24xf32> to vector<24x1xf32>
    %62 = vector.broadcast %61 : vector<24x1xf32> to vector<24x24xf32>
    %63 = arith.subf %59, %62 : vector<24x24xf32>
    %64 = math.exp %63 : vector<24x24xf32>
    %cst_40 = arith.constant dense<0.000000e+00> : vector<24xf32>
    %65 = vector.multi_reduction <add>, %64, %cst_40 [1] : vector<24x24xf32> to vector<24xf32>
    %66 = vector.shape_cast %65 : vector<24xf32> to vector<24x1xf32>
    %67 = tpu.reciprocal %66 {approx = true} : vector<24x1xf32> -> vector<24x1xf32>
    %68 = vector.broadcast %67 : vector<24x1xf32> to vector<24x24xf32>
    %69 = arith.mulf %64, %68 : vector<24x24xf32>
    %cst_41 = arith.constant dense<0.000000e+00> : vector<24x16xf32>
    %70 = tpu.matmul %69, %54, %cst_41 {dimension_numbers = #tpu.dot_dimension_numbers<[1], [0], [0], [1], [0, 0, 1, 1], [], []>} : vector<24x24xf32>, vector<24x16xf32>, vector<24x16xf32> -> vector<24x16xf32>
    %71 = vector.extract_strided_slice %49 {offsets = [0, 0], sizes = [16, 64], strides = [1, 1]} : vector<64x64xf32> to vector<16x64xf32>
    %cst_42 = arith.constant dense<0.000000e+00> : vector<24x64xf32>
    %72 = tpu.matmul %70, %71, %cst_42 {dimension_numbers = #tpu.dot_dimension_numbers<[1], [0], [0], [1], [0, 0, 1, 1], [], []>} : vector<24x16xf32>, vector<16x64xf32>, vector<24x64xf32> -> vector<24x64xf32>
    %73 = arith.addf %51, %72 : vector<24x64xf32>
    %74 = vector.extract_strided_slice %50 {offsets = [0, 16], sizes = [24, 16], strides = [1, 1]} : vector<24x192xf32> to vector<24x16xf32>
    %75 = vector.extract_strided_slice %50 {offsets = [0, 80], sizes = [24, 16], strides = [1, 1]} : vector<24x192xf32> to vector<24x16xf32>
    %76 = vector.extract_strided_slice %50 {offsets = [0, 144], sizes = [24, 16], strides = [1, 1]} : vector<24x192xf32> to vector<24x16xf32>
    %cst_43 = arith.constant dense<0.000000e+00> : vector<24x24xf32>
    %77 = tpu.matmul %74, %75, %cst_43 {dimension_numbers = #tpu.dot_dimension_numbers<[1], [1], [0], [0], [0, 0, 1, 0], [], []>} : vector<24x16xf32>, vector<24x16xf32>, vector<24x24xf32> -> vector<24x24xf32>
    %cst_44 = arith.constant 2.500000e-01 : f32
    %78 = vector.broadcast %cst_44 : f32 to vector<24x24xf32>
    %79 = arith.mulf %77, %78 : vector<24x24xf32>
    %cst_45 = arith.constant -1.000000e+30 : f32
    %80 = vector.broadcast %cst_45 : f32 to vector<24x24xf32>
    %81 = arith.select %21, %79, %80 : vector<24x24xi1>, vector<24x24xf32>
    %cst_46 = arith.constant dense<0xFF800000> : vector<24xf32>
    %82 = vector.multi_reduction <maximumf>, %81, %cst_46 [1] : vector<24x24xf32> to vector<24xf32>
    %83 = vector.shape_cast %82 : vector<24xf32> to vector<24x1xf32>
    %84 = vector.broadcast %83 : vector<24x1xf32> to vector<24x24xf32>
    %85 = arith.subf %81, %84 : vector<24x24xf32>
    %86 = math.exp %85 : vector<24x24xf32>
    %cst_47 = arith.constant dense<0.000000e+00> : vector<24xf32>
    %87 = vector.multi_reduction <add>, %86, %cst_47 [1] : vector<24x24xf32> to vector<24xf32>
    %88 = vector.shape_cast %87 : vector<24xf32> to vector<24x1xf32>
    %89 = tpu.reciprocal %88 {approx = true} : vector<24x1xf32> -> vector<24x1xf32>
    %90 = vector.broadcast %89 : vector<24x1xf32> to vector<24x24xf32>
    %91 = arith.mulf %86, %90 : vector<24x24xf32>
    %cst_48 = arith.constant dense<0.000000e+00> : vector<24x16xf32>
    %92 = tpu.matmul %91, %76, %cst_48 {dimension_numbers = #tpu.dot_dimension_numbers<[1], [0], [0], [1], [0, 0, 1, 1], [], []>} : vector<24x24xf32>, vector<24x16xf32>, vector<24x16xf32> -> vector<24x16xf32>
    %93 = vector.extract_strided_slice %49 {offsets = [16, 0], sizes = [16, 64], strides = [1, 1]} : vector<64x64xf32> to vector<16x64xf32>
    %cst_49 = arith.constant dense<0.000000e+00> : vector<24x64xf32>
    %94 = tpu.matmul %92, %93, %cst_49 {dimension_numbers = #tpu.dot_dimension_numbers<[1], [0], [0], [1], [0, 0, 1, 1], [], []>} : vector<24x16xf32>, vector<16x64xf32>, vector<24x64xf32> -> vector<24x64xf32>
    %95 = arith.addf %73, %94 : vector<24x64xf32>
    %96 = vector.extract_strided_slice %50 {offsets = [0, 32], sizes = [24, 16], strides = [1, 1]} : vector<24x192xf32> to vector<24x16xf32>
    %97 = vector.extract_strided_slice %50 {offsets = [0, 96], sizes = [24, 16], strides = [1, 1]} : vector<24x192xf32> to vector<24x16xf32>
    %98 = vector.extract_strided_slice %50 {offsets = [0, 160], sizes = [24, 16], strides = [1, 1]} : vector<24x192xf32> to vector<24x16xf32>
    %cst_50 = arith.constant dense<0.000000e+00> : vector<24x24xf32>
    %99 = tpu.matmul %96, %97, %cst_50 {dimension_numbers = #tpu.dot_dimension_numbers<[1], [1], [0], [0], [0, 0, 1, 0], [], []>} : vector<24x16xf32>, vector<24x16xf32>, vector<24x24xf32> -> vector<24x24xf32>
    %cst_51 = arith.constant 2.500000e-01 : f32
    %100 = vector.broadcast %cst_51 : f32 to vector<24x24xf32>
    %101 = arith.mulf %99, %100 : vector<24x24xf32>
    %cst_52 = arith.constant -1.000000e+30 : f32
    %102 = vector.broadcast %cst_52 : f32 to vector<24x24xf32>
    %103 = arith.select %21, %101, %102 : vector<24x24xi1>, vector<24x24xf32>
    %cst_53 = arith.constant dense<0xFF800000> : vector<24xf32>
    %104 = vector.multi_reduction <maximumf>, %103, %cst_53 [1] : vector<24x24xf32> to vector<24xf32>
    %105 = vector.shape_cast %104 : vector<24xf32> to vector<24x1xf32>
    %106 = vector.broadcast %105 : vector<24x1xf32> to vector<24x24xf32>
    %107 = arith.subf %103, %106 : vector<24x24xf32>
    %108 = math.exp %107 : vector<24x24xf32>
    %cst_54 = arith.constant dense<0.000000e+00> : vector<24xf32>
    %109 = vector.multi_reduction <add>, %108, %cst_54 [1] : vector<24x24xf32> to vector<24xf32>
    %110 = vector.shape_cast %109 : vector<24xf32> to vector<24x1xf32>
    %111 = tpu.reciprocal %110 {approx = true} : vector<24x1xf32> -> vector<24x1xf32>
    %112 = vector.broadcast %111 : vector<24x1xf32> to vector<24x24xf32>
    %113 = arith.mulf %108, %112 : vector<24x24xf32>
    %cst_55 = arith.constant dense<0.000000e+00> : vector<24x16xf32>
    %114 = tpu.matmul %113, %98, %cst_55 {dimension_numbers = #tpu.dot_dimension_numbers<[1], [0], [0], [1], [0, 0, 1, 1], [], []>} : vector<24x24xf32>, vector<24x16xf32>, vector<24x16xf32> -> vector<24x16xf32>
    %115 = vector.extract_strided_slice %49 {offsets = [32, 0], sizes = [16, 64], strides = [1, 1]} : vector<64x64xf32> to vector<16x64xf32>
    %cst_56 = arith.constant dense<0.000000e+00> : vector<24x64xf32>
    %116 = tpu.matmul %114, %115, %cst_56 {dimension_numbers = #tpu.dot_dimension_numbers<[1], [0], [0], [1], [0, 0, 1, 1], [], []>} : vector<24x16xf32>, vector<16x64xf32>, vector<24x64xf32> -> vector<24x64xf32>
    %117 = arith.addf %95, %116 : vector<24x64xf32>
    %118 = vector.extract_strided_slice %50 {offsets = [0, 48], sizes = [24, 16], strides = [1, 1]} : vector<24x192xf32> to vector<24x16xf32>
    %119 = vector.extract_strided_slice %50 {offsets = [0, 112], sizes = [24, 16], strides = [1, 1]} : vector<24x192xf32> to vector<24x16xf32>
    %120 = vector.extract_strided_slice %50 {offsets = [0, 176], sizes = [24, 16], strides = [1, 1]} : vector<24x192xf32> to vector<24x16xf32>
    %cst_57 = arith.constant dense<0.000000e+00> : vector<24x24xf32>
    %121 = tpu.matmul %118, %119, %cst_57 {dimension_numbers = #tpu.dot_dimension_numbers<[1], [1], [0], [0], [0, 0, 1, 0], [], []>} : vector<24x16xf32>, vector<24x16xf32>, vector<24x24xf32> -> vector<24x24xf32>
    %cst_58 = arith.constant 2.500000e-01 : f32
    %122 = vector.broadcast %cst_58 : f32 to vector<24x24xf32>
    %123 = arith.mulf %121, %122 : vector<24x24xf32>
    %cst_59 = arith.constant -1.000000e+30 : f32
    %124 = vector.broadcast %cst_59 : f32 to vector<24x24xf32>
    %125 = arith.select %21, %123, %124 : vector<24x24xi1>, vector<24x24xf32>
    %cst_60 = arith.constant dense<0xFF800000> : vector<24xf32>
    %126 = vector.multi_reduction <maximumf>, %125, %cst_60 [1] : vector<24x24xf32> to vector<24xf32>
    %127 = vector.shape_cast %126 : vector<24xf32> to vector<24x1xf32>
    %128 = vector.broadcast %127 : vector<24x1xf32> to vector<24x24xf32>
    %129 = arith.subf %125, %128 : vector<24x24xf32>
    %130 = math.exp %129 : vector<24x24xf32>
    %cst_61 = arith.constant dense<0.000000e+00> : vector<24xf32>
    %131 = vector.multi_reduction <add>, %130, %cst_61 [1] : vector<24x24xf32> to vector<24xf32>
    %132 = vector.shape_cast %131 : vector<24xf32> to vector<24x1xf32>
    %133 = tpu.reciprocal %132 {approx = true} : vector<24x1xf32> -> vector<24x1xf32>
    %134 = vector.broadcast %133 : vector<24x1xf32> to vector<24x24xf32>
    %135 = arith.mulf %130, %134 : vector<24x24xf32>
    %cst_62 = arith.constant dense<0.000000e+00> : vector<24x16xf32>
    %136 = tpu.matmul %135, %120, %cst_62 {dimension_numbers = #tpu.dot_dimension_numbers<[1], [0], [0], [1], [0, 0, 1, 1], [], []>} : vector<24x24xf32>, vector<24x16xf32>, vector<24x16xf32> -> vector<24x16xf32>
    %137 = vector.extract_strided_slice %49 {offsets = [48, 0], sizes = [16, 64], strides = [1, 1]} : vector<64x64xf32> to vector<16x64xf32>
    %cst_63 = arith.constant dense<0.000000e+00> : vector<24x64xf32>
    %138 = tpu.matmul %136, %137, %cst_63 {dimension_numbers = #tpu.dot_dimension_numbers<[1], [0], [0], [1], [0, 0, 1, 1], [], []>} : vector<24x16xf32>, vector<16x64xf32>, vector<24x64xf32> -> vector<24x64xf32>
    %139 = arith.addf %117, %138 : vector<24x64xf32>
    %140 = vector.extract_strided_slice %48 {offsets = [24, 0], sizes = [24, 192], strides = [1, 1]} : vector<48x192xf32> to vector<24x192xf32>
    %cst_64 = arith.constant 0.000000e+00 : f32
    %141 = vector.broadcast %cst_64 : f32 to vector<24x64xf32>
    %142 = vector.extract_strided_slice %140 {offsets = [0, 0], sizes = [24, 16], strides = [1, 1]} : vector<24x192xf32> to vector<24x16xf32>
    %143 = vector.extract_strided_slice %140 {offsets = [0, 64], sizes = [24, 16], strides = [1, 1]} : vector<24x192xf32> to vector<24x16xf32>
    %144 = vector.extract_strided_slice %140 {offsets = [0, 128], sizes = [24, 16], strides = [1, 1]} : vector<24x192xf32> to vector<24x16xf32>
    %cst_65 = arith.constant dense<0.000000e+00> : vector<24x24xf32>
    %145 = tpu.matmul %142, %143, %cst_65 {dimension_numbers = #tpu.dot_dimension_numbers<[1], [1], [0], [0], [0, 0, 1, 0], [], []>} : vector<24x16xf32>, vector<24x16xf32>, vector<24x24xf32> -> vector<24x24xf32>
    %cst_66 = arith.constant 2.500000e-01 : f32
    %146 = vector.broadcast %cst_66 : f32 to vector<24x24xf32>
    %147 = arith.mulf %145, %146 : vector<24x24xf32>
    %cst_67 = arith.constant -1.000000e+30 : f32
    %148 = vector.broadcast %cst_67 : f32 to vector<24x24xf32>
    %149 = arith.select %21, %147, %148 : vector<24x24xi1>, vector<24x24xf32>
    %cst_68 = arith.constant dense<0xFF800000> : vector<24xf32>
    %150 = vector.multi_reduction <maximumf>, %149, %cst_68 [1] : vector<24x24xf32> to vector<24xf32>
    %151 = vector.shape_cast %150 : vector<24xf32> to vector<24x1xf32>
    %152 = vector.broadcast %151 : vector<24x1xf32> to vector<24x24xf32>
    %153 = arith.subf %149, %152 : vector<24x24xf32>
    %154 = math.exp %153 : vector<24x24xf32>
    %cst_69 = arith.constant dense<0.000000e+00> : vector<24xf32>
    %155 = vector.multi_reduction <add>, %154, %cst_69 [1] : vector<24x24xf32> to vector<24xf32>
    %156 = vector.shape_cast %155 : vector<24xf32> to vector<24x1xf32>
    %157 = tpu.reciprocal %156 {approx = true} : vector<24x1xf32> -> vector<24x1xf32>
    %158 = vector.broadcast %157 : vector<24x1xf32> to vector<24x24xf32>
    %159 = arith.mulf %154, %158 : vector<24x24xf32>
    %cst_70 = arith.constant dense<0.000000e+00> : vector<24x16xf32>
    %160 = tpu.matmul %159, %144, %cst_70 {dimension_numbers = #tpu.dot_dimension_numbers<[1], [0], [0], [1], [0, 0, 1, 1], [], []>} : vector<24x24xf32>, vector<24x16xf32>, vector<24x16xf32> -> vector<24x16xf32>
    %161 = vector.extract_strided_slice %49 {offsets = [0, 0], sizes = [16, 64], strides = [1, 1]} : vector<64x64xf32> to vector<16x64xf32>
    %cst_71 = arith.constant dense<0.000000e+00> : vector<24x64xf32>
    %162 = tpu.matmul %160, %161, %cst_71 {dimension_numbers = #tpu.dot_dimension_numbers<[1], [0], [0], [1], [0, 0, 1, 1], [], []>} : vector<24x16xf32>, vector<16x64xf32>, vector<24x64xf32> -> vector<24x64xf32>
    %163 = arith.addf %141, %162 : vector<24x64xf32>
    %164 = vector.extract_strided_slice %140 {offsets = [0, 16], sizes = [24, 16], strides = [1, 1]} : vector<24x192xf32> to vector<24x16xf32>
    %165 = vector.extract_strided_slice %140 {offsets = [0, 80], sizes = [24, 16], strides = [1, 1]} : vector<24x192xf32> to vector<24x16xf32>
    %166 = vector.extract_strided_slice %140 {offsets = [0, 144], sizes = [24, 16], strides = [1, 1]} : vector<24x192xf32> to vector<24x16xf32>
    %cst_72 = arith.constant dense<0.000000e+00> : vector<24x24xf32>
    %167 = tpu.matmul %164, %165, %cst_72 {dimension_numbers = #tpu.dot_dimension_numbers<[1], [1], [0], [0], [0, 0, 1, 0], [], []>} : vector<24x16xf32>, vector<24x16xf32>, vector<24x24xf32> -> vector<24x24xf32>
    %cst_73 = arith.constant 2.500000e-01 : f32
    %168 = vector.broadcast %cst_73 : f32 to vector<24x24xf32>
    %169 = arith.mulf %167, %168 : vector<24x24xf32>
    %cst_74 = arith.constant -1.000000e+30 : f32
    %170 = vector.broadcast %cst_74 : f32 to vector<24x24xf32>
    %171 = arith.select %21, %169, %170 : vector<24x24xi1>, vector<24x24xf32>
    %cst_75 = arith.constant dense<0xFF800000> : vector<24xf32>
    %172 = vector.multi_reduction <maximumf>, %171, %cst_75 [1] : vector<24x24xf32> to vector<24xf32>
    %173 = vector.shape_cast %172 : vector<24xf32> to vector<24x1xf32>
    %174 = vector.broadcast %173 : vector<24x1xf32> to vector<24x24xf32>
    %175 = arith.subf %171, %174 : vector<24x24xf32>
    %176 = math.exp %175 : vector<24x24xf32>
    %cst_76 = arith.constant dense<0.000000e+00> : vector<24xf32>
    %177 = vector.multi_reduction <add>, %176, %cst_76 [1] : vector<24x24xf32> to vector<24xf32>
    %178 = vector.shape_cast %177 : vector<24xf32> to vector<24x1xf32>
    %179 = tpu.reciprocal %178 {approx = true} : vector<24x1xf32> -> vector<24x1xf32>
    %180 = vector.broadcast %179 : vector<24x1xf32> to vector<24x24xf32>
    %181 = arith.mulf %176, %180 : vector<24x24xf32>
    %cst_77 = arith.constant dense<0.000000e+00> : vector<24x16xf32>
    %182 = tpu.matmul %181, %166, %cst_77 {dimension_numbers = #tpu.dot_dimension_numbers<[1], [0], [0], [1], [0, 0, 1, 1], [], []>} : vector<24x24xf32>, vector<24x16xf32>, vector<24x16xf32> -> vector<24x16xf32>
    %183 = vector.extract_strided_slice %49 {offsets = [16, 0], sizes = [16, 64], strides = [1, 1]} : vector<64x64xf32> to vector<16x64xf32>
    %cst_78 = arith.constant dense<0.000000e+00> : vector<24x64xf32>
    %184 = tpu.matmul %182, %183, %cst_78 {dimension_numbers = #tpu.dot_dimension_numbers<[1], [0], [0], [1], [0, 0, 1, 1], [], []>} : vector<24x16xf32>, vector<16x64xf32>, vector<24x64xf32> -> vector<24x64xf32>
    %185 = arith.addf %163, %184 : vector<24x64xf32>
    %186 = vector.extract_strided_slice %140 {offsets = [0, 32], sizes = [24, 16], strides = [1, 1]} : vector<24x192xf32> to vector<24x16xf32>
    %187 = vector.extract_strided_slice %140 {offsets = [0, 96], sizes = [24, 16], strides = [1, 1]} : vector<24x192xf32> to vector<24x16xf32>
    %188 = vector.extract_strided_slice %140 {offsets = [0, 160], sizes = [24, 16], strides = [1, 1]} : vector<24x192xf32> to vector<24x16xf32>
    %cst_79 = arith.constant dense<0.000000e+00> : vector<24x24xf32>
    %189 = tpu.matmul %186, %187, %cst_79 {dimension_numbers = #tpu.dot_dimension_numbers<[1], [1], [0], [0], [0, 0, 1, 0], [], []>} : vector<24x16xf32>, vector<24x16xf32>, vector<24x24xf32> -> vector<24x24xf32>
    %cst_80 = arith.constant 2.500000e-01 : f32
    %190 = vector.broadcast %cst_80 : f32 to vector<24x24xf32>
    %191 = arith.mulf %189, %190 : vector<24x24xf32>
    %cst_81 = arith.constant -1.000000e+30 : f32
    %192 = vector.broadcast %cst_81 : f32 to vector<24x24xf32>
    %193 = arith.select %21, %191, %192 : vector<24x24xi1>, vector<24x24xf32>
    %cst_82 = arith.constant dense<0xFF800000> : vector<24xf32>
    %194 = vector.multi_reduction <maximumf>, %193, %cst_82 [1] : vector<24x24xf32> to vector<24xf32>
    %195 = vector.shape_cast %194 : vector<24xf32> to vector<24x1xf32>
    %196 = vector.broadcast %195 : vector<24x1xf32> to vector<24x24xf32>
    %197 = arith.subf %193, %196 : vector<24x24xf32>
    %198 = math.exp %197 : vector<24x24xf32>
    %cst_83 = arith.constant dense<0.000000e+00> : vector<24xf32>
    %199 = vector.multi_reduction <add>, %198, %cst_83 [1] : vector<24x24xf32> to vector<24xf32>
    %200 = vector.shape_cast %199 : vector<24xf32> to vector<24x1xf32>
    %201 = tpu.reciprocal %200 {approx = true} : vector<24x1xf32> -> vector<24x1xf32>
    %202 = vector.broadcast %201 : vector<24x1xf32> to vector<24x24xf32>
    %203 = arith.mulf %198, %202 : vector<24x24xf32>
    %cst_84 = arith.constant dense<0.000000e+00> : vector<24x16xf32>
    %204 = tpu.matmul %203, %188, %cst_84 {dimension_numbers = #tpu.dot_dimension_numbers<[1], [0], [0], [1], [0, 0, 1, 1], [], []>} : vector<24x24xf32>, vector<24x16xf32>, vector<24x16xf32> -> vector<24x16xf32>
    %205 = vector.extract_strided_slice %49 {offsets = [32, 0], sizes = [16, 64], strides = [1, 1]} : vector<64x64xf32> to vector<16x64xf32>
    %cst_85 = arith.constant dense<0.000000e+00> : vector<24x64xf32>
    %206 = tpu.matmul %204, %205, %cst_85 {dimension_numbers = #tpu.dot_dimension_numbers<[1], [0], [0], [1], [0, 0, 1, 1], [], []>} : vector<24x16xf32>, vector<16x64xf32>, vector<24x64xf32> -> vector<24x64xf32>
    %207 = arith.addf %185, %206 : vector<24x64xf32>
    %208 = vector.extract_strided_slice %140 {offsets = [0, 48], sizes = [24, 16], strides = [1, 1]} : vector<24x192xf32> to vector<24x16xf32>
    %209 = vector.extract_strided_slice %140 {offsets = [0, 112], sizes = [24, 16], strides = [1, 1]} : vector<24x192xf32> to vector<24x16xf32>
    %210 = vector.extract_strided_slice %140 {offsets = [0, 176], sizes = [24, 16], strides = [1, 1]} : vector<24x192xf32> to vector<24x16xf32>
    %cst_86 = arith.constant dense<0.000000e+00> : vector<24x24xf32>
    %211 = tpu.matmul %208, %209, %cst_86 {dimension_numbers = #tpu.dot_dimension_numbers<[1], [1], [0], [0], [0, 0, 1, 0], [], []>} : vector<24x16xf32>, vector<24x16xf32>, vector<24x24xf32> -> vector<24x24xf32>
    %cst_87 = arith.constant 2.500000e-01 : f32
    %212 = vector.broadcast %cst_87 : f32 to vector<24x24xf32>
    %213 = arith.mulf %211, %212 : vector<24x24xf32>
    %cst_88 = arith.constant -1.000000e+30 : f32
    %214 = vector.broadcast %cst_88 : f32 to vector<24x24xf32>
    %215 = arith.select %21, %213, %214 : vector<24x24xi1>, vector<24x24xf32>
    %cst_89 = arith.constant dense<0xFF800000> : vector<24xf32>
    %216 = vector.multi_reduction <maximumf>, %215, %cst_89 [1] : vector<24x24xf32> to vector<24xf32>
    %217 = vector.shape_cast %216 : vector<24xf32> to vector<24x1xf32>
    %218 = vector.broadcast %217 : vector<24x1xf32> to vector<24x24xf32>
    %219 = arith.subf %215, %218 : vector<24x24xf32>
    %220 = math.exp %219 : vector<24x24xf32>
    %cst_90 = arith.constant dense<0.000000e+00> : vector<24xf32>
    %221 = vector.multi_reduction <add>, %220, %cst_90 [1] : vector<24x24xf32> to vector<24xf32>
    %222 = vector.shape_cast %221 : vector<24xf32> to vector<24x1xf32>
    %223 = tpu.reciprocal %222 {approx = true} : vector<24x1xf32> -> vector<24x1xf32>
    %224 = vector.broadcast %223 : vector<24x1xf32> to vector<24x24xf32>
    %225 = arith.mulf %220, %224 : vector<24x24xf32>
    %cst_91 = arith.constant dense<0.000000e+00> : vector<24x16xf32>
    %226 = tpu.matmul %225, %210, %cst_91 {dimension_numbers = #tpu.dot_dimension_numbers<[1], [0], [0], [1], [0, 0, 1, 1], [], []>} : vector<24x24xf32>, vector<24x16xf32>, vector<24x16xf32> -> vector<24x16xf32>
    %227 = vector.extract_strided_slice %49 {offsets = [48, 0], sizes = [16, 64], strides = [1, 1]} : vector<64x64xf32> to vector<16x64xf32>
    %cst_92 = arith.constant dense<0.000000e+00> : vector<24x64xf32>
    %228 = tpu.matmul %226, %227, %cst_92 {dimension_numbers = #tpu.dot_dimension_numbers<[1], [0], [0], [1], [0, 0, 1, 1], [], []>} : vector<24x16xf32>, vector<16x64xf32>, vector<24x64xf32> -> vector<24x64xf32>
    %229 = arith.addf %207, %228 : vector<24x64xf32>
    %230 = tpu.concatenate %139, %229 in 0 : vector<24x64xf32>, vector<24x64xf32> -> vector<48x64xf32>
    %231 = arith.addf %18, %230 : vector<48x64xf32>
    %c0_93 = arith.constant 0 : index
    %c0_94 = arith.constant 0 : index
    %232 = vector.load %arg11[%c0_93, %c0_94] : memref<1x64xf32, #tpu.memory_space<vmem>>, vector<1x64xf32>
    %233 = vector.broadcast %232 : vector<1x64xf32> to vector<48x64xf32>
    %234 = arith.addf %231, %233 : vector<48x64xf32>
    %c0_95 = arith.constant 0 : index
    %c0_96 = arith.constant 0 : index
    %235 = vector.load %arg12[%c0_95, %c0_96] : memref<1x64xf32, #tpu.memory_space<vmem>>, vector<1x64xf32>
    %c0_97 = arith.constant 0 : index
    %c0_98 = arith.constant 0 : index
    %236 = vector.load %arg13[%c0_97, %c0_98] : memref<1x64xf32, #tpu.memory_space<vmem>>, vector<1x64xf32>
    %cst_99 = arith.constant dense<0.000000e+00> : vector<48xf32>
    %237 = vector.multi_reduction <add>, %234, %cst_99 [1] : vector<48x64xf32> to vector<48xf32>
    %238 = vector.shape_cast %237 : vector<48xf32> to vector<48x1xf32>
    %cst_100 = arith.constant 6.400000e+01 : f32
    %239 = vector.broadcast %cst_100 : f32 to vector<48x1xf32>
    %240 = arith.divf %238, %239 : vector<48x1xf32>
    %241 = vector.broadcast %240 : vector<48x1xf32> to vector<48x64xf32>
    %242 = arith.subf %234, %241 : vector<48x64xf32>
    %243 = arith.mulf %242, %242 : vector<48x64xf32>
    %cst_101 = arith.constant dense<0.000000e+00> : vector<48xf32>
    %244 = vector.multi_reduction <add>, %243, %cst_101 [1] : vector<48x64xf32> to vector<48xf32>
    %245 = vector.shape_cast %244 : vector<48xf32> to vector<48x1xf32>
    %cst_102 = arith.constant 6.400000e+01 : f32
    %246 = vector.broadcast %cst_102 : f32 to vector<48x1xf32>
    %247 = arith.divf %245, %246 : vector<48x1xf32>
    %cst_103 = arith.constant 9.99999997E-7 : f32
    %248 = vector.broadcast %cst_103 : f32 to vector<48x1xf32>
    %249 = arith.addf %247, %248 : vector<48x1xf32>
    %250 = math.rsqrt %249 : vector<48x1xf32>
    %251 = vector.broadcast %250 : vector<48x1xf32> to vector<48x64xf32>
    %252 = arith.mulf %242, %251 : vector<48x64xf32>
    %253 = vector.broadcast %235 : vector<1x64xf32> to vector<48x64xf32>
    %254 = arith.mulf %252, %253 : vector<48x64xf32>
    %255 = vector.broadcast %236 : vector<1x64xf32> to vector<48x64xf32>
    %256 = arith.addf %254, %255 : vector<48x64xf32>
    %c0_104 = arith.constant 0 : index
    %c0_105 = arith.constant 0 : index
    %257 = vector.load %arg14[%c0_104, %c0_105] : memref<64x256xf32, #tpu.memory_space<vmem>>, vector<64x256xf32>
    %cst_106 = arith.constant dense<0.000000e+00> : vector<48x256xf32>
    %258 = tpu.matmul %256, %257, %cst_106 {dimension_numbers = #tpu.dot_dimension_numbers<[1], [0], [0], [1], [0, 0, 1, 1], [], []>} : vector<48x64xf32>, vector<64x256xf32>, vector<48x256xf32> -> vector<48x256xf32>
    %c0_107 = arith.constant 0 : index
    %c0_108 = arith.constant 0 : index
    %259 = vector.load %arg15[%c0_107, %c0_108] : memref<1x256xf32, #tpu.memory_space<vmem>>, vector<1x256xf32>
    %260 = vector.broadcast %259 : vector<1x256xf32> to vector<48x256xf32>
    %261 = arith.addf %258, %260 : vector<48x256xf32>
    %cst_109 = arith.constant 5.000000e-01 : f32
    %262 = vector.broadcast %cst_109 : f32 to vector<48x256xf32>
    %263 = arith.mulf %262, %261 : vector<48x256xf32>
    %cst_110 = arith.constant 0.707106769 : f32
    %264 = vector.broadcast %cst_110 : f32 to vector<48x256xf32>
    %265 = arith.mulf %261, %264 : vector<48x256xf32>
    %266 = math.absf %265 : vector<48x256xf32>
    %cst_111 = arith.constant 0.327591091 : f32
    %267 = vector.broadcast %cst_111 : f32 to vector<48x256xf32>
    %268 = arith.mulf %267, %266 : vector<48x256xf32>
    %cst_112 = arith.constant 1.000000e+00 : f32
    %269 = vector.broadcast %cst_112 : f32 to vector<48x256xf32>
    %270 = arith.addf %269, %268 : vector<48x256xf32>
    %cst_113 = arith.constant 1.000000e+00 : f32
    %271 = vector.broadcast %cst_113 : f32 to vector<48x256xf32>
    %272 = arith.divf %271, %270 : vector<48x256xf32>
    %cst_114 = arith.constant 1.06140542 : f32
    %273 = vector.broadcast %cst_114 : f32 to vector<48x256xf32>
    %274 = arith.mulf %273, %272 : vector<48x256xf32>
    %cst_115 = arith.constant -1.45315206 : f32
    %275 = vector.broadcast %cst_115 : f32 to vector<48x256xf32>
    %276 = arith.addf %274, %275 : vector<48x256xf32>
    %277 = arith.mulf %276, %272 : vector<48x256xf32>
    %cst_116 = arith.constant 1.42141378 : f32
    %278 = vector.broadcast %cst_116 : f32 to vector<48x256xf32>
    %279 = arith.addf %277, %278 : vector<48x256xf32>
    %280 = arith.mulf %279, %272 : vector<48x256xf32>
    %cst_117 = arith.constant -0.284496725 : f32
    %281 = vector.broadcast %cst_117 : f32 to vector<48x256xf32>
    %282 = arith.addf %280, %281 : vector<48x256xf32>
    %283 = arith.mulf %282, %272 : vector<48x256xf32>
    %cst_118 = arith.constant 0.254829586 : f32
    %284 = vector.broadcast %cst_118 : f32 to vector<48x256xf32>
    %285 = arith.addf %283, %284 : vector<48x256xf32>
    %286 = arith.mulf %285, %272 : vector<48x256xf32>
    %cst_119 = arith.constant 0.000000e+00 : f32
    %287 = vector.broadcast %cst_119 : f32 to vector<48x256xf32>
    %288 = arith.subf %287, %266 : vector<48x256xf32>
    %289 = arith.mulf %288, %266 : vector<48x256xf32>
    %290 = math.exp %289 : vector<48x256xf32>
    %291 = arith.mulf %286, %290 : vector<48x256xf32>
    %cst_120 = arith.constant 1.000000e+00 : f32
    %292 = vector.broadcast %cst_120 : f32 to vector<48x256xf32>
    %293 = arith.subf %292, %291 : vector<48x256xf32>
    %cst_121 = arith.constant 0.000000e+00 : f32
    %294 = vector.broadcast %cst_121 : f32 to vector<48x256xf32>
    %295 = arith.cmpf oge, %265, %294 : vector<48x256xf32>
    %cst_122 = arith.constant 0.000000e+00 : f32
    %296 = vector.broadcast %cst_122 : f32 to vector<48x256xf32>
    %297 = arith.subf %296, %293 : vector<48x256xf32>
    %298 = arith.select %295, %293, %297 : vector<48x256xi1>, vector<48x256xf32>
    %cst_123 = arith.constant 1.000000e+00 : f32
    %299 = vector.broadcast %cst_123 : f32 to vector<48x256xf32>
    %300 = arith.addf %299, %298 : vector<48x256xf32>
    %301 = arith.mulf %263, %300 : vector<48x256xf32>
    %c0_124 = arith.constant 0 : index
    %c0_125 = arith.constant 0 : index
    %302 = vector.load %arg16[%c0_124, %c0_125] : memref<256x64xf32, #tpu.memory_space<vmem>>, vector<256x64xf32>
    %cst_126 = arith.constant dense<0.000000e+00> : vector<48x64xf32>
    %303 = tpu.matmul %301, %302, %cst_126 {dimension_numbers = #tpu.dot_dimension_numbers<[1], [0], [0], [1], [0, 0, 1, 1], [], []>} : vector<48x256xf32>, vector<256x64xf32>, vector<48x64xf32> -> vector<48x64xf32>
    %304 = arith.addf %234, %303 : vector<48x64xf32>
    %c0_127 = arith.constant 0 : index
    %c0_128 = arith.constant 0 : index
    %305 = vector.load %arg17[%c0_127, %c0_128] : memref<1x64xf32, #tpu.memory_space<vmem>>, vector<1x64xf32>
    %306 = vector.broadcast %305 : vector<1x64xf32> to vector<48x64xf32>
    %307 = arith.addf %304, %306 : vector<48x64xf32>
    %c0_129 = arith.constant 0 : index
    %c0_130 = arith.constant 0 : index
    %308 = vector.load %arg18[%c0_129, %c0_130] : memref<1x64xf32, #tpu.memory_space<vmem>>, vector<1x64xf32>
    %c0_131 = arith.constant 0 : index
    %c0_132 = arith.constant 0 : index
    %309 = vector.load %arg19[%c0_131, %c0_132] : memref<1x64xf32, #tpu.memory_space<vmem>>, vector<1x64xf32>
    %cst_133 = arith.constant dense<0.000000e+00> : vector<48xf32>
    %310 = vector.multi_reduction <add>, %307, %cst_133 [1] : vector<48x64xf32> to vector<48xf32>
    %311 = vector.shape_cast %310 : vector<48xf32> to vector<48x1xf32>
    %cst_134 = arith.constant 6.400000e+01 : f32
    %312 = vector.broadcast %cst_134 : f32 to vector<48x1xf32>
    %313 = arith.divf %311, %312 : vector<48x1xf32>
    %314 = vector.broadcast %313 : vector<48x1xf32> to vector<48x64xf32>
    %315 = arith.subf %307, %314 : vector<48x64xf32>
    %316 = arith.mulf %315, %315 : vector<48x64xf32>
    %cst_135 = arith.constant dense<0.000000e+00> : vector<48xf32>
    %317 = vector.multi_reduction <add>, %316, %cst_135 [1] : vector<48x64xf32> to vector<48xf32>
    %318 = vector.shape_cast %317 : vector<48xf32> to vector<48x1xf32>
    %cst_136 = arith.constant 6.400000e+01 : f32
    %319 = vector.broadcast %cst_136 : f32 to vector<48x1xf32>
    %320 = arith.divf %318, %319 : vector<48x1xf32>
    %cst_137 = arith.constant 9.99999997E-7 : f32
    %321 = vector.broadcast %cst_137 : f32 to vector<48x1xf32>
    %322 = arith.addf %320, %321 : vector<48x1xf32>
    %323 = math.rsqrt %322 : vector<48x1xf32>
    %324 = vector.broadcast %323 : vector<48x1xf32> to vector<48x64xf32>
    %325 = arith.mulf %315, %324 : vector<48x64xf32>
    %326 = vector.broadcast %308 : vector<1x64xf32> to vector<48x64xf32>
    %327 = arith.mulf %325, %326 : vector<48x64xf32>
    %328 = vector.broadcast %309 : vector<1x64xf32> to vector<48x64xf32>
    %329 = arith.addf %327, %328 : vector<48x64xf32>
    %c0_138 = arith.constant 0 : index
    %c0_139 = arith.constant 0 : index
    %330 = vector.load %arg20[%c0_138, %c0_139] : memref<64x192xf32, #tpu.memory_space<vmem>>, vector<64x192xf32>
    %cst_140 = arith.constant dense<0.000000e+00> : vector<48x192xf32>
    %331 = tpu.matmul %329, %330, %cst_140 {dimension_numbers = #tpu.dot_dimension_numbers<[1], [0], [0], [1], [0, 0, 1, 1], [], []>} : vector<48x64xf32>, vector<64x192xf32>, vector<48x192xf32> -> vector<48x192xf32>
    %c0_141 = arith.constant 0 : index
    %c0_142 = arith.constant 0 : index
    %332 = vector.load %arg21[%c0_141, %c0_142] : memref<1x192xf32, #tpu.memory_space<vmem>>, vector<1x192xf32>
    %333 = vector.broadcast %332 : vector<1x192xf32> to vector<48x192xf32>
    %334 = arith.addf %331, %333 : vector<48x192xf32>
    %c0_143 = arith.constant 0 : index
    %c0_144 = arith.constant 0 : index
    %335 = vector.load %arg22[%c0_143, %c0_144] : memref<64x64xf32, #tpu.memory_space<vmem>>, vector<64x64xf32>
    %336 = vector.extract_strided_slice %334 {offsets = [0, 0], sizes = [24, 192], strides = [1, 1]} : vector<48x192xf32> to vector<24x192xf32>
    %cst_145 = arith.constant 0.000000e+00 : f32
    %337 = vector.broadcast %cst_145 : f32 to vector<24x64xf32>
    %338 = vector.extract_strided_slice %336 {offsets = [0, 0], sizes = [24, 16], strides = [1, 1]} : vector<24x192xf32> to vector<24x16xf32>
    %339 = vector.extract_strided_slice %336 {offsets = [0, 64], sizes = [24, 16], strides = [1, 1]} : vector<24x192xf32> to vector<24x16xf32>
    %340 = vector.extract_strided_slice %336 {offsets = [0, 128], sizes = [24, 16], strides = [1, 1]} : vector<24x192xf32> to vector<24x16xf32>
    %cst_146 = arith.constant dense<0.000000e+00> : vector<24x24xf32>
    %341 = tpu.matmul %338, %339, %cst_146 {dimension_numbers = #tpu.dot_dimension_numbers<[1], [1], [0], [0], [0, 0, 1, 0], [], []>} : vector<24x16xf32>, vector<24x16xf32>, vector<24x24xf32> -> vector<24x24xf32>
    %cst_147 = arith.constant 2.500000e-01 : f32
    %342 = vector.broadcast %cst_147 : f32 to vector<24x24xf32>
    %343 = arith.mulf %341, %342 : vector<24x24xf32>
    %cst_148 = arith.constant -1.000000e+30 : f32
    %344 = vector.broadcast %cst_148 : f32 to vector<24x24xf32>
    %345 = arith.select %21, %343, %344 : vector<24x24xi1>, vector<24x24xf32>
    %cst_149 = arith.constant dense<0xFF800000> : vector<24xf32>
    %346 = vector.multi_reduction <maximumf>, %345, %cst_149 [1] : vector<24x24xf32> to vector<24xf32>
    %347 = vector.shape_cast %346 : vector<24xf32> to vector<24x1xf32>
    %348 = vector.broadcast %347 : vector<24x1xf32> to vector<24x24xf32>
    %349 = arith.subf %345, %348 : vector<24x24xf32>
    %350 = math.exp %349 : vector<24x24xf32>
    %cst_150 = arith.constant dense<0.000000e+00> : vector<24xf32>
    %351 = vector.multi_reduction <add>, %350, %cst_150 [1] : vector<24x24xf32> to vector<24xf32>
    %352 = vector.shape_cast %351 : vector<24xf32> to vector<24x1xf32>
    %353 = tpu.reciprocal %352 {approx = true} : vector<24x1xf32> -> vector<24x1xf32>
    %354 = vector.broadcast %353 : vector<24x1xf32> to vector<24x24xf32>
    %355 = arith.mulf %350, %354 : vector<24x24xf32>
    %cst_151 = arith.constant dense<0.000000e+00> : vector<24x16xf32>
    %356 = tpu.matmul %355, %340, %cst_151 {dimension_numbers = #tpu.dot_dimension_numbers<[1], [0], [0], [1], [0, 0, 1, 1], [], []>} : vector<24x24xf32>, vector<24x16xf32>, vector<24x16xf32> -> vector<24x16xf32>
    %357 = vector.extract_strided_slice %335 {offsets = [0, 0], sizes = [16, 64], strides = [1, 1]} : vector<64x64xf32> to vector<16x64xf32>
    %cst_152 = arith.constant dense<0.000000e+00> : vector<24x64xf32>
    %358 = tpu.matmul %356, %357, %cst_152 {dimension_numbers = #tpu.dot_dimension_numbers<[1], [0], [0], [1], [0, 0, 1, 1], [], []>} : vector<24x16xf32>, vector<16x64xf32>, vector<24x64xf32> -> vector<24x64xf32>
    %359 = arith.addf %337, %358 : vector<24x64xf32>
    %360 = vector.extract_strided_slice %336 {offsets = [0, 16], sizes = [24, 16], strides = [1, 1]} : vector<24x192xf32> to vector<24x16xf32>
    %361 = vector.extract_strided_slice %336 {offsets = [0, 80], sizes = [24, 16], strides = [1, 1]} : vector<24x192xf32> to vector<24x16xf32>
    %362 = vector.extract_strided_slice %336 {offsets = [0, 144], sizes = [24, 16], strides = [1, 1]} : vector<24x192xf32> to vector<24x16xf32>
    %cst_153 = arith.constant dense<0.000000e+00> : vector<24x24xf32>
    %363 = tpu.matmul %360, %361, %cst_153 {dimension_numbers = #tpu.dot_dimension_numbers<[1], [1], [0], [0], [0, 0, 1, 0], [], []>} : vector<24x16xf32>, vector<24x16xf32>, vector<24x24xf32> -> vector<24x24xf32>
    %cst_154 = arith.constant 2.500000e-01 : f32
    %364 = vector.broadcast %cst_154 : f32 to vector<24x24xf32>
    %365 = arith.mulf %363, %364 : vector<24x24xf32>
    %cst_155 = arith.constant -1.000000e+30 : f32
    %366 = vector.broadcast %cst_155 : f32 to vector<24x24xf32>
    %367 = arith.select %21, %365, %366 : vector<24x24xi1>, vector<24x24xf32>
    %cst_156 = arith.constant dense<0xFF800000> : vector<24xf32>
    %368 = vector.multi_reduction <maximumf>, %367, %cst_156 [1] : vector<24x24xf32> to vector<24xf32>
    %369 = vector.shape_cast %368 : vector<24xf32> to vector<24x1xf32>
    %370 = vector.broadcast %369 : vector<24x1xf32> to vector<24x24xf32>
    %371 = arith.subf %367, %370 : vector<24x24xf32>
    %372 = math.exp %371 : vector<24x24xf32>
    %cst_157 = arith.constant dense<0.000000e+00> : vector<24xf32>
    %373 = vector.multi_reduction <add>, %372, %cst_157 [1] : vector<24x24xf32> to vector<24xf32>
    %374 = vector.shape_cast %373 : vector<24xf32> to vector<24x1xf32>
    %375 = tpu.reciprocal %374 {approx = true} : vector<24x1xf32> -> vector<24x1xf32>
    %376 = vector.broadcast %375 : vector<24x1xf32> to vector<24x24xf32>
    %377 = arith.mulf %372, %376 : vector<24x24xf32>
    %cst_158 = arith.constant dense<0.000000e+00> : vector<24x16xf32>
    %378 = tpu.matmul %377, %362, %cst_158 {dimension_numbers = #tpu.dot_dimension_numbers<[1], [0], [0], [1], [0, 0, 1, 1], [], []>} : vector<24x24xf32>, vector<24x16xf32>, vector<24x16xf32> -> vector<24x16xf32>
    %379 = vector.extract_strided_slice %335 {offsets = [16, 0], sizes = [16, 64], strides = [1, 1]} : vector<64x64xf32> to vector<16x64xf32>
    %cst_159 = arith.constant dense<0.000000e+00> : vector<24x64xf32>
    %380 = tpu.matmul %378, %379, %cst_159 {dimension_numbers = #tpu.dot_dimension_numbers<[1], [0], [0], [1], [0, 0, 1, 1], [], []>} : vector<24x16xf32>, vector<16x64xf32>, vector<24x64xf32> -> vector<24x64xf32>
    %381 = arith.addf %359, %380 : vector<24x64xf32>
    %382 = vector.extract_strided_slice %336 {offsets = [0, 32], sizes = [24, 16], strides = [1, 1]} : vector<24x192xf32> to vector<24x16xf32>
    %383 = vector.extract_strided_slice %336 {offsets = [0, 96], sizes = [24, 16], strides = [1, 1]} : vector<24x192xf32> to vector<24x16xf32>
    %384 = vector.extract_strided_slice %336 {offsets = [0, 160], sizes = [24, 16], strides = [1, 1]} : vector<24x192xf32> to vector<24x16xf32>
    %cst_160 = arith.constant dense<0.000000e+00> : vector<24x24xf32>
    %385 = tpu.matmul %382, %383, %cst_160 {dimension_numbers = #tpu.dot_dimension_numbers<[1], [1], [0], [0], [0, 0, 1, 0], [], []>} : vector<24x16xf32>, vector<24x16xf32>, vector<24x24xf32> -> vector<24x24xf32>
    %cst_161 = arith.constant 2.500000e-01 : f32
    %386 = vector.broadcast %cst_161 : f32 to vector<24x24xf32>
    %387 = arith.mulf %385, %386 : vector<24x24xf32>
    %cst_162 = arith.constant -1.000000e+30 : f32
    %388 = vector.broadcast %cst_162 : f32 to vector<24x24xf32>
    %389 = arith.select %21, %387, %388 : vector<24x24xi1>, vector<24x24xf32>
    %cst_163 = arith.constant dense<0xFF800000> : vector<24xf32>
    %390 = vector.multi_reduction <maximumf>, %389, %cst_163 [1] : vector<24x24xf32> to vector<24xf32>
    %391 = vector.shape_cast %390 : vector<24xf32> to vector<24x1xf32>
    %392 = vector.broadcast %391 : vector<24x1xf32> to vector<24x24xf32>
    %393 = arith.subf %389, %392 : vector<24x24xf32>
    %394 = math.exp %393 : vector<24x24xf32>
    %cst_164 = arith.constant dense<0.000000e+00> : vector<24xf32>
    %395 = vector.multi_reduction <add>, %394, %cst_164 [1] : vector<24x24xf32> to vector<24xf32>
    %396 = vector.shape_cast %395 : vector<24xf32> to vector<24x1xf32>
    %397 = tpu.reciprocal %396 {approx = true} : vector<24x1xf32> -> vector<24x1xf32>
    %398 = vector.broadcast %397 : vector<24x1xf32> to vector<24x24xf32>
    %399 = arith.mulf %394, %398 : vector<24x24xf32>
    %cst_165 = arith.constant dense<0.000000e+00> : vector<24x16xf32>
    %400 = tpu.matmul %399, %384, %cst_165 {dimension_numbers = #tpu.dot_dimension_numbers<[1], [0], [0], [1], [0, 0, 1, 1], [], []>} : vector<24x24xf32>, vector<24x16xf32>, vector<24x16xf32> -> vector<24x16xf32>
    %401 = vector.extract_strided_slice %335 {offsets = [32, 0], sizes = [16, 64], strides = [1, 1]} : vector<64x64xf32> to vector<16x64xf32>
    %cst_166 = arith.constant dense<0.000000e+00> : vector<24x64xf32>
    %402 = tpu.matmul %400, %401, %cst_166 {dimension_numbers = #tpu.dot_dimension_numbers<[1], [0], [0], [1], [0, 0, 1, 1], [], []>} : vector<24x16xf32>, vector<16x64xf32>, vector<24x64xf32> -> vector<24x64xf32>
    %403 = arith.addf %381, %402 : vector<24x64xf32>
    %404 = vector.extract_strided_slice %336 {offsets = [0, 48], sizes = [24, 16], strides = [1, 1]} : vector<24x192xf32> to vector<24x16xf32>
    %405 = vector.extract_strided_slice %336 {offsets = [0, 112], sizes = [24, 16], strides = [1, 1]} : vector<24x192xf32> to vector<24x16xf32>
    %406 = vector.extract_strided_slice %336 {offsets = [0, 176], sizes = [24, 16], strides = [1, 1]} : vector<24x192xf32> to vector<24x16xf32>
    %cst_167 = arith.constant dense<0.000000e+00> : vector<24x24xf32>
    %407 = tpu.matmul %404, %405, %cst_167 {dimension_numbers = #tpu.dot_dimension_numbers<[1], [1], [0], [0], [0, 0, 1, 0], [], []>} : vector<24x16xf32>, vector<24x16xf32>, vector<24x24xf32> -> vector<24x24xf32>
    %cst_168 = arith.constant 2.500000e-01 : f32
    %408 = vector.broadcast %cst_168 : f32 to vector<24x24xf32>
    %409 = arith.mulf %407, %408 : vector<24x24xf32>
    %cst_169 = arith.constant -1.000000e+30 : f32
    %410 = vector.broadcast %cst_169 : f32 to vector<24x24xf32>
    %411 = arith.select %21, %409, %410 : vector<24x24xi1>, vector<24x24xf32>
    %cst_170 = arith.constant dense<0xFF800000> : vector<24xf32>
    %412 = vector.multi_reduction <maximumf>, %411, %cst_170 [1] : vector<24x24xf32> to vector<24xf32>
    %413 = vector.shape_cast %412 : vector<24xf32> to vector<24x1xf32>
    %414 = vector.broadcast %413 : vector<24x1xf32> to vector<24x24xf32>
    %415 = arith.subf %411, %414 : vector<24x24xf32>
    %416 = math.exp %415 : vector<24x24xf32>
    %cst_171 = arith.constant dense<0.000000e+00> : vector<24xf32>
    %417 = vector.multi_reduction <add>, %416, %cst_171 [1] : vector<24x24xf32> to vector<24xf32>
    %418 = vector.shape_cast %417 : vector<24xf32> to vector<24x1xf32>
    %419 = tpu.reciprocal %418 {approx = true} : vector<24x1xf32> -> vector<24x1xf32>
    %420 = vector.broadcast %419 : vector<24x1xf32> to vector<24x24xf32>
    %421 = arith.mulf %416, %420 : vector<24x24xf32>
    %cst_172 = arith.constant dense<0.000000e+00> : vector<24x16xf32>
    %422 = tpu.matmul %421, %406, %cst_172 {dimension_numbers = #tpu.dot_dimension_numbers<[1], [0], [0], [1], [0, 0, 1, 1], [], []>} : vector<24x24xf32>, vector<24x16xf32>, vector<24x16xf32> -> vector<24x16xf32>
    %423 = vector.extract_strided_slice %335 {offsets = [48, 0], sizes = [16, 64], strides = [1, 1]} : vector<64x64xf32> to vector<16x64xf32>
    %cst_173 = arith.constant dense<0.000000e+00> : vector<24x64xf32>
    %424 = tpu.matmul %422, %423, %cst_173 {dimension_numbers = #tpu.dot_dimension_numbers<[1], [0], [0], [1], [0, 0, 1, 1], [], []>} : vector<24x16xf32>, vector<16x64xf32>, vector<24x64xf32> -> vector<24x64xf32>
    %425 = arith.addf %403, %424 : vector<24x64xf32>
    %426 = vector.extract_strided_slice %334 {offsets = [24, 0], sizes = [24, 192], strides = [1, 1]} : vector<48x192xf32> to vector<24x192xf32>
    %cst_174 = arith.constant 0.000000e+00 : f32
    %427 = vector.broadcast %cst_174 : f32 to vector<24x64xf32>
    %428 = vector.extract_strided_slice %426 {offsets = [0, 0], sizes = [24, 16], strides = [1, 1]} : vector<24x192xf32> to vector<24x16xf32>
    %429 = vector.extract_strided_slice %426 {offsets = [0, 64], sizes = [24, 16], strides = [1, 1]} : vector<24x192xf32> to vector<24x16xf32>
    %430 = vector.extract_strided_slice %426 {offsets = [0, 128], sizes = [24, 16], strides = [1, 1]} : vector<24x192xf32> to vector<24x16xf32>
    %cst_175 = arith.constant dense<0.000000e+00> : vector<24x24xf32>
    %431 = tpu.matmul %428, %429, %cst_175 {dimension_numbers = #tpu.dot_dimension_numbers<[1], [1], [0], [0], [0, 0, 1, 0], [], []>} : vector<24x16xf32>, vector<24x16xf32>, vector<24x24xf32> -> vector<24x24xf32>
    %cst_176 = arith.constant 2.500000e-01 : f32
    %432 = vector.broadcast %cst_176 : f32 to vector<24x24xf32>
    %433 = arith.mulf %431, %432 : vector<24x24xf32>
    %cst_177 = arith.constant -1.000000e+30 : f32
    %434 = vector.broadcast %cst_177 : f32 to vector<24x24xf32>
    %435 = arith.select %21, %433, %434 : vector<24x24xi1>, vector<24x24xf32>
    %cst_178 = arith.constant dense<0xFF800000> : vector<24xf32>
    %436 = vector.multi_reduction <maximumf>, %435, %cst_178 [1] : vector<24x24xf32> to vector<24xf32>
    %437 = vector.shape_cast %436 : vector<24xf32> to vector<24x1xf32>
    %438 = vector.broadcast %437 : vector<24x1xf32> to vector<24x24xf32>
    %439 = arith.subf %435, %438 : vector<24x24xf32>
    %440 = math.exp %439 : vector<24x24xf32>
    %cst_179 = arith.constant dense<0.000000e+00> : vector<24xf32>
    %441 = vector.multi_reduction <add>, %440, %cst_179 [1] : vector<24x24xf32> to vector<24xf32>
    %442 = vector.shape_cast %441 : vector<24xf32> to vector<24x1xf32>
    %443 = tpu.reciprocal %442 {approx = true} : vector<24x1xf32> -> vector<24x1xf32>
    %444 = vector.broadcast %443 : vector<24x1xf32> to vector<24x24xf32>
    %445 = arith.mulf %440, %444 : vector<24x24xf32>
    %cst_180 = arith.constant dense<0.000000e+00> : vector<24x16xf32>
    %446 = tpu.matmul %445, %430, %cst_180 {dimension_numbers = #tpu.dot_dimension_numbers<[1], [0], [0], [1], [0, 0, 1, 1], [], []>} : vector<24x24xf32>, vector<24x16xf32>, vector<24x16xf32> -> vector<24x16xf32>
    %447 = vector.extract_strided_slice %335 {offsets = [0, 0], sizes = [16, 64], strides = [1, 1]} : vector<64x64xf32> to vector<16x64xf32>
    %cst_181 = arith.constant dense<0.000000e+00> : vector<24x64xf32>
    %448 = tpu.matmul %446, %447, %cst_181 {dimension_numbers = #tpu.dot_dimension_numbers<[1], [0], [0], [1], [0, 0, 1, 1], [], []>} : vector<24x16xf32>, vector<16x64xf32>, vector<24x64xf32> -> vector<24x64xf32>
    %449 = arith.addf %427, %448 : vector<24x64xf32>
    %450 = vector.extract_strided_slice %426 {offsets = [0, 16], sizes = [24, 16], strides = [1, 1]} : vector<24x192xf32> to vector<24x16xf32>
    %451 = vector.extract_strided_slice %426 {offsets = [0, 80], sizes = [24, 16], strides = [1, 1]} : vector<24x192xf32> to vector<24x16xf32>
    %452 = vector.extract_strided_slice %426 {offsets = [0, 144], sizes = [24, 16], strides = [1, 1]} : vector<24x192xf32> to vector<24x16xf32>
    %cst_182 = arith.constant dense<0.000000e+00> : vector<24x24xf32>
    %453 = tpu.matmul %450, %451, %cst_182 {dimension_numbers = #tpu.dot_dimension_numbers<[1], [1], [0], [0], [0, 0, 1, 0], [], []>} : vector<24x16xf32>, vector<24x16xf32>, vector<24x24xf32> -> vector<24x24xf32>
    %cst_183 = arith.constant 2.500000e-01 : f32
    %454 = vector.broadcast %cst_183 : f32 to vector<24x24xf32>
    %455 = arith.mulf %453, %454 : vector<24x24xf32>
    %cst_184 = arith.constant -1.000000e+30 : f32
    %456 = vector.broadcast %cst_184 : f32 to vector<24x24xf32>
    %457 = arith.select %21, %455, %456 : vector<24x24xi1>, vector<24x24xf32>
    %cst_185 = arith.constant dense<0xFF800000> : vector<24xf32>
    %458 = vector.multi_reduction <maximumf>, %457, %cst_185 [1] : vector<24x24xf32> to vector<24xf32>
    %459 = vector.shape_cast %458 : vector<24xf32> to vector<24x1xf32>
    %460 = vector.broadcast %459 : vector<24x1xf32> to vector<24x24xf32>
    %461 = arith.subf %457, %460 : vector<24x24xf32>
    %462 = math.exp %461 : vector<24x24xf32>
    %cst_186 = arith.constant dense<0.000000e+00> : vector<24xf32>
    %463 = vector.multi_reduction <add>, %462, %cst_186 [1] : vector<24x24xf32> to vector<24xf32>
    %464 = vector.shape_cast %463 : vector<24xf32> to vector<24x1xf32>
    %465 = tpu.reciprocal %464 {approx = true} : vector<24x1xf32> -> vector<24x1xf32>
    %466 = vector.broadcast %465 : vector<24x1xf32> to vector<24x24xf32>
    %467 = arith.mulf %462, %466 : vector<24x24xf32>
    %cst_187 = arith.constant dense<0.000000e+00> : vector<24x16xf32>
    %468 = tpu.matmul %467, %452, %cst_187 {dimension_numbers = #tpu.dot_dimension_numbers<[1], [0], [0], [1], [0, 0, 1, 1], [], []>} : vector<24x24xf32>, vector<24x16xf32>, vector<24x16xf32> -> vector<24x16xf32>
    %469 = vector.extract_strided_slice %335 {offsets = [16, 0], sizes = [16, 64], strides = [1, 1]} : vector<64x64xf32> to vector<16x64xf32>
    %cst_188 = arith.constant dense<0.000000e+00> : vector<24x64xf32>
    %470 = tpu.matmul %468, %469, %cst_188 {dimension_numbers = #tpu.dot_dimension_numbers<[1], [0], [0], [1], [0, 0, 1, 1], [], []>} : vector<24x16xf32>, vector<16x64xf32>, vector<24x64xf32> -> vector<24x64xf32>
    %471 = arith.addf %449, %470 : vector<24x64xf32>
    %472 = vector.extract_strided_slice %426 {offsets = [0, 32], sizes = [24, 16], strides = [1, 1]} : vector<24x192xf32> to vector<24x16xf32>
    %473 = vector.extract_strided_slice %426 {offsets = [0, 96], sizes = [24, 16], strides = [1, 1]} : vector<24x192xf32> to vector<24x16xf32>
    %474 = vector.extract_strided_slice %426 {offsets = [0, 160], sizes = [24, 16], strides = [1, 1]} : vector<24x192xf32> to vector<24x16xf32>
    %cst_189 = arith.constant dense<0.000000e+00> : vector<24x24xf32>
    %475 = tpu.matmul %472, %473, %cst_189 {dimension_numbers = #tpu.dot_dimension_numbers<[1], [1], [0], [0], [0, 0, 1, 0], [], []>} : vector<24x16xf32>, vector<24x16xf32>, vector<24x24xf32> -> vector<24x24xf32>
    %cst_190 = arith.constant 2.500000e-01 : f32
    %476 = vector.broadcast %cst_190 : f32 to vector<24x24xf32>
    %477 = arith.mulf %475, %476 : vector<24x24xf32>
    %cst_191 = arith.constant -1.000000e+30 : f32
    %478 = vector.broadcast %cst_191 : f32 to vector<24x24xf32>
    %479 = arith.select %21, %477, %478 : vector<24x24xi1>, vector<24x24xf32>
    %cst_192 = arith.constant dense<0xFF800000> : vector<24xf32>
    %480 = vector.multi_reduction <maximumf>, %479, %cst_192 [1] : vector<24x24xf32> to vector<24xf32>
    %481 = vector.shape_cast %480 : vector<24xf32> to vector<24x1xf32>
    %482 = vector.broadcast %481 : vector<24x1xf32> to vector<24x24xf32>
    %483 = arith.subf %479, %482 : vector<24x24xf32>
    %484 = math.exp %483 : vector<24x24xf32>
    %cst_193 = arith.constant dense<0.000000e+00> : vector<24xf32>
    %485 = vector.multi_reduction <add>, %484, %cst_193 [1] : vector<24x24xf32> to vector<24xf32>
    %486 = vector.shape_cast %485 : vector<24xf32> to vector<24x1xf32>
    %487 = tpu.reciprocal %486 {approx = true} : vector<24x1xf32> -> vector<24x1xf32>
    %488 = vector.broadcast %487 : vector<24x1xf32> to vector<24x24xf32>
    %489 = arith.mulf %484, %488 : vector<24x24xf32>
    %cst_194 = arith.constant dense<0.000000e+00> : vector<24x16xf32>
    %490 = tpu.matmul %489, %474, %cst_194 {dimension_numbers = #tpu.dot_dimension_numbers<[1], [0], [0], [1], [0, 0, 1, 1], [], []>} : vector<24x24xf32>, vector<24x16xf32>, vector<24x16xf32> -> vector<24x16xf32>
    %491 = vector.extract_strided_slice %335 {offsets = [32, 0], sizes = [16, 64], strides = [1, 1]} : vector<64x64xf32> to vector<16x64xf32>
    %cst_195 = arith.constant dense<0.000000e+00> : vector<24x64xf32>
    %492 = tpu.matmul %490, %491, %cst_195 {dimension_numbers = #tpu.dot_dimension_numbers<[1], [0], [0], [1], [0, 0, 1, 1], [], []>} : vector<24x16xf32>, vector<16x64xf32>, vector<24x64xf32> -> vector<24x64xf32>
    %493 = arith.addf %471, %492 : vector<24x64xf32>
    %494 = vector.extract_strided_slice %426 {offsets = [0, 48], sizes = [24, 16], strides = [1, 1]} : vector<24x192xf32> to vector<24x16xf32>
    %495 = vector.extract_strided_slice %426 {offsets = [0, 112], sizes = [24, 16], strides = [1, 1]} : vector<24x192xf32> to vector<24x16xf32>
    %496 = vector.extract_strided_slice %426 {offsets = [0, 176], sizes = [24, 16], strides = [1, 1]} : vector<24x192xf32> to vector<24x16xf32>
    %cst_196 = arith.constant dense<0.000000e+00> : vector<24x24xf32>
    %497 = tpu.matmul %494, %495, %cst_196 {dimension_numbers = #tpu.dot_dimension_numbers<[1], [1], [0], [0], [0, 0, 1, 0], [], []>} : vector<24x16xf32>, vector<24x16xf32>, vector<24x24xf32> -> vector<24x24xf32>
    %cst_197 = arith.constant 2.500000e-01 : f32
    %498 = vector.broadcast %cst_197 : f32 to vector<24x24xf32>
    %499 = arith.mulf %497, %498 : vector<24x24xf32>
    %cst_198 = arith.constant -1.000000e+30 : f32
    %500 = vector.broadcast %cst_198 : f32 to vector<24x24xf32>
    %501 = arith.select %21, %499, %500 : vector<24x24xi1>, vector<24x24xf32>
    %cst_199 = arith.constant dense<0xFF800000> : vector<24xf32>
    %502 = vector.multi_reduction <maximumf>, %501, %cst_199 [1] : vector<24x24xf32> to vector<24xf32>
    %503 = vector.shape_cast %502 : vector<24xf32> to vector<24x1xf32>
    %504 = vector.broadcast %503 : vector<24x1xf32> to vector<24x24xf32>
    %505 = arith.subf %501, %504 : vector<24x24xf32>
    %506 = math.exp %505 : vector<24x24xf32>
    %cst_200 = arith.constant dense<0.000000e+00> : vector<24xf32>
    %507 = vector.multi_reduction <add>, %506, %cst_200 [1] : vector<24x24xf32> to vector<24xf32>
    %508 = vector.shape_cast %507 : vector<24xf32> to vector<24x1xf32>
    %509 = tpu.reciprocal %508 {approx = true} : vector<24x1xf32> -> vector<24x1xf32>
    %510 = vector.broadcast %509 : vector<24x1xf32> to vector<24x24xf32>
    %511 = arith.mulf %506, %510 : vector<24x24xf32>
    %cst_201 = arith.constant dense<0.000000e+00> : vector<24x16xf32>
    %512 = tpu.matmul %511, %496, %cst_201 {dimension_numbers = #tpu.dot_dimension_numbers<[1], [0], [0], [1], [0, 0, 1, 1], [], []>} : vector<24x24xf32>, vector<24x16xf32>, vector<24x16xf32> -> vector<24x16xf32>
    %513 = vector.extract_strided_slice %335 {offsets = [48, 0], sizes = [16, 64], strides = [1, 1]} : vector<64x64xf32> to vector<16x64xf32>
    %cst_202 = arith.constant dense<0.000000e+00> : vector<24x64xf32>
    %514 = tpu.matmul %512, %513, %cst_202 {dimension_numbers = #tpu.dot_dimension_numbers<[1], [0], [0], [1], [0, 0, 1, 1], [], []>} : vector<24x16xf32>, vector<16x64xf32>, vector<24x64xf32> -> vector<24x64xf32>
    %515 = arith.addf %493, %514 : vector<24x64xf32>
    %516 = tpu.concatenate %425, %515 in 0 : vector<24x64xf32>, vector<24x64xf32> -> vector<48x64xf32>
    %517 = arith.addf %307, %516 : vector<48x64xf32>
    %c0_203 = arith.constant 0 : index
    %c0_204 = arith.constant 0 : index
    %518 = vector.load %arg23[%c0_203, %c0_204] : memref<1x64xf32, #tpu.memory_space<vmem>>, vector<1x64xf32>
    %519 = vector.broadcast %518 : vector<1x64xf32> to vector<48x64xf32>
    %520 = arith.addf %517, %519 : vector<48x64xf32>
    %c0_205 = arith.constant 0 : index
    %c0_206 = arith.constant 0 : index
    %521 = vector.load %arg24[%c0_205, %c0_206] : memref<1x64xf32, #tpu.memory_space<vmem>>, vector<1x64xf32>
    %c0_207 = arith.constant 0 : index
    %c0_208 = arith.constant 0 : index
    %522 = vector.load %arg25[%c0_207, %c0_208] : memref<1x64xf32, #tpu.memory_space<vmem>>, vector<1x64xf32>
    %cst_209 = arith.constant dense<0.000000e+00> : vector<48xf32>
    %523 = vector.multi_reduction <add>, %520, %cst_209 [1] : vector<48x64xf32> to vector<48xf32>
    %524 = vector.shape_cast %523 : vector<48xf32> to vector<48x1xf32>
    %cst_210 = arith.constant 6.400000e+01 : f32
    %525 = vector.broadcast %cst_210 : f32 to vector<48x1xf32>
    %526 = arith.divf %524, %525 : vector<48x1xf32>
    %527 = vector.broadcast %526 : vector<48x1xf32> to vector<48x64xf32>
    %528 = arith.subf %520, %527 : vector<48x64xf32>
    %529 = arith.mulf %528, %528 : vector<48x64xf32>
    %cst_211 = arith.constant dense<0.000000e+00> : vector<48xf32>
    %530 = vector.multi_reduction <add>, %529, %cst_211 [1] : vector<48x64xf32> to vector<48xf32>
    %531 = vector.shape_cast %530 : vector<48xf32> to vector<48x1xf32>
    %cst_212 = arith.constant 6.400000e+01 : f32
    %532 = vector.broadcast %cst_212 : f32 to vector<48x1xf32>
    %533 = arith.divf %531, %532 : vector<48x1xf32>
    %cst_213 = arith.constant 9.99999997E-7 : f32
    %534 = vector.broadcast %cst_213 : f32 to vector<48x1xf32>
    %535 = arith.addf %533, %534 : vector<48x1xf32>
    %536 = math.rsqrt %535 : vector<48x1xf32>
    %537 = vector.broadcast %536 : vector<48x1xf32> to vector<48x64xf32>
    %538 = arith.mulf %528, %537 : vector<48x64xf32>
    %539 = vector.broadcast %521 : vector<1x64xf32> to vector<48x64xf32>
    %540 = arith.mulf %538, %539 : vector<48x64xf32>
    %541 = vector.broadcast %522 : vector<1x64xf32> to vector<48x64xf32>
    %542 = arith.addf %540, %541 : vector<48x64xf32>
    %c0_214 = arith.constant 0 : index
    %c0_215 = arith.constant 0 : index
    %543 = vector.load %arg26[%c0_214, %c0_215] : memref<64x256xf32, #tpu.memory_space<vmem>>, vector<64x256xf32>
    %cst_216 = arith.constant dense<0.000000e+00> : vector<48x256xf32>
    %544 = tpu.matmul %542, %543, %cst_216 {dimension_numbers = #tpu.dot_dimension_numbers<[1], [0], [0], [1], [0, 0, 1, 1], [], []>} : vector<48x64xf32>, vector<64x256xf32>, vector<48x256xf32> -> vector<48x256xf32>
    %c0_217 = arith.constant 0 : index
    %c0_218 = arith.constant 0 : index
    %545 = vector.load %arg27[%c0_217, %c0_218] : memref<1x256xf32, #tpu.memory_space<vmem>>, vector<1x256xf32>
    %546 = vector.broadcast %545 : vector<1x256xf32> to vector<48x256xf32>
    %547 = arith.addf %544, %546 : vector<48x256xf32>
    %cst_219 = arith.constant 5.000000e-01 : f32
    %548 = vector.broadcast %cst_219 : f32 to vector<48x256xf32>
    %549 = arith.mulf %548, %547 : vector<48x256xf32>
    %cst_220 = arith.constant 0.707106769 : f32
    %550 = vector.broadcast %cst_220 : f32 to vector<48x256xf32>
    %551 = arith.mulf %547, %550 : vector<48x256xf32>
    %552 = math.absf %551 : vector<48x256xf32>
    %cst_221 = arith.constant 0.327591091 : f32
    %553 = vector.broadcast %cst_221 : f32 to vector<48x256xf32>
    %554 = arith.mulf %553, %552 : vector<48x256xf32>
    %cst_222 = arith.constant 1.000000e+00 : f32
    %555 = vector.broadcast %cst_222 : f32 to vector<48x256xf32>
    %556 = arith.addf %555, %554 : vector<48x256xf32>
    %cst_223 = arith.constant 1.000000e+00 : f32
    %557 = vector.broadcast %cst_223 : f32 to vector<48x256xf32>
    %558 = arith.divf %557, %556 : vector<48x256xf32>
    %cst_224 = arith.constant 1.06140542 : f32
    %559 = vector.broadcast %cst_224 : f32 to vector<48x256xf32>
    %560 = arith.mulf %559, %558 : vector<48x256xf32>
    %cst_225 = arith.constant -1.45315206 : f32
    %561 = vector.broadcast %cst_225 : f32 to vector<48x256xf32>
    %562 = arith.addf %560, %561 : vector<48x256xf32>
    %563 = arith.mulf %562, %558 : vector<48x256xf32>
    %cst_226 = arith.constant 1.42141378 : f32
    %564 = vector.broadcast %cst_226 : f32 to vector<48x256xf32>
    %565 = arith.addf %563, %564 : vector<48x256xf32>
    %566 = arith.mulf %565, %558 : vector<48x256xf32>
    %cst_227 = arith.constant -0.284496725 : f32
    %567 = vector.broadcast %cst_227 : f32 to vector<48x256xf32>
    %568 = arith.addf %566, %567 : vector<48x256xf32>
    %569 = arith.mulf %568, %558 : vector<48x256xf32>
    %cst_228 = arith.constant 0.254829586 : f32
    %570 = vector.broadcast %cst_228 : f32 to vector<48x256xf32>
    %571 = arith.addf %569, %570 : vector<48x256xf32>
    %572 = arith.mulf %571, %558 : vector<48x256xf32>
    %cst_229 = arith.constant 0.000000e+00 : f32
    %573 = vector.broadcast %cst_229 : f32 to vector<48x256xf32>
    %574 = arith.subf %573, %552 : vector<48x256xf32>
    %575 = arith.mulf %574, %552 : vector<48x256xf32>
    %576 = math.exp %575 : vector<48x256xf32>
    %577 = arith.mulf %572, %576 : vector<48x256xf32>
    %cst_230 = arith.constant 1.000000e+00 : f32
    %578 = vector.broadcast %cst_230 : f32 to vector<48x256xf32>
    %579 = arith.subf %578, %577 : vector<48x256xf32>
    %cst_231 = arith.constant 0.000000e+00 : f32
    %580 = vector.broadcast %cst_231 : f32 to vector<48x256xf32>
    %581 = arith.cmpf oge, %551, %580 : vector<48x256xf32>
    %cst_232 = arith.constant 0.000000e+00 : f32
    %582 = vector.broadcast %cst_232 : f32 to vector<48x256xf32>
    %583 = arith.subf %582, %579 : vector<48x256xf32>
    %584 = arith.select %581, %579, %583 : vector<48x256xi1>, vector<48x256xf32>
    %cst_233 = arith.constant 1.000000e+00 : f32
    %585 = vector.broadcast %cst_233 : f32 to vector<48x256xf32>
    %586 = arith.addf %585, %584 : vector<48x256xf32>
    %587 = arith.mulf %549, %586 : vector<48x256xf32>
    %c0_234 = arith.constant 0 : index
    %c0_235 = arith.constant 0 : index
    %588 = vector.load %arg28[%c0_234, %c0_235] : memref<256x64xf32, #tpu.memory_space<vmem>>, vector<256x64xf32>
    %cst_236 = arith.constant dense<0.000000e+00> : vector<48x64xf32>
    %589 = tpu.matmul %587, %588, %cst_236 {dimension_numbers = #tpu.dot_dimension_numbers<[1], [0], [0], [1], [0, 0, 1, 1], [], []>} : vector<48x256xf32>, vector<256x64xf32>, vector<48x64xf32> -> vector<48x64xf32>
    %590 = arith.addf %520, %589 : vector<48x64xf32>
    %c0_237 = arith.constant 0 : index
    %c0_238 = arith.constant 0 : index
    %591 = vector.load %arg29[%c0_237, %c0_238] : memref<1x64xf32, #tpu.memory_space<vmem>>, vector<1x64xf32>
    %592 = vector.broadcast %591 : vector<1x64xf32> to vector<48x64xf32>
    %593 = arith.addf %590, %592 : vector<48x64xf32>
    %c0_239 = arith.constant 0 : index
    %c0_240 = arith.constant 0 : index
    %594 = vector.load %arg30[%c0_239, %c0_240] : memref<1x64xf32, #tpu.memory_space<vmem>>, vector<1x64xf32>
    %c0_241 = arith.constant 0 : index
    %c0_242 = arith.constant 0 : index
    %595 = vector.load %arg31[%c0_241, %c0_242] : memref<1x64xf32, #tpu.memory_space<vmem>>, vector<1x64xf32>
    %cst_243 = arith.constant dense<0.000000e+00> : vector<48xf32>
    %596 = vector.multi_reduction <add>, %593, %cst_243 [1] : vector<48x64xf32> to vector<48xf32>
    %597 = vector.shape_cast %596 : vector<48xf32> to vector<48x1xf32>
    %cst_244 = arith.constant 6.400000e+01 : f32
    %598 = vector.broadcast %cst_244 : f32 to vector<48x1xf32>
    %599 = arith.divf %597, %598 : vector<48x1xf32>
    %600 = vector.broadcast %599 : vector<48x1xf32> to vector<48x64xf32>
    %601 = arith.subf %593, %600 : vector<48x64xf32>
    %602 = arith.mulf %601, %601 : vector<48x64xf32>
    %cst_245 = arith.constant dense<0.000000e+00> : vector<48xf32>
    %603 = vector.multi_reduction <add>, %602, %cst_245 [1] : vector<48x64xf32> to vector<48xf32>
    %604 = vector.shape_cast %603 : vector<48xf32> to vector<48x1xf32>
    %cst_246 = arith.constant 6.400000e+01 : f32
    %605 = vector.broadcast %cst_246 : f32 to vector<48x1xf32>
    %606 = arith.divf %604, %605 : vector<48x1xf32>
    %cst_247 = arith.constant 9.99999997E-7 : f32
    %607 = vector.broadcast %cst_247 : f32 to vector<48x1xf32>
    %608 = arith.addf %606, %607 : vector<48x1xf32>
    %609 = math.rsqrt %608 : vector<48x1xf32>
    %610 = vector.broadcast %609 : vector<48x1xf32> to vector<48x64xf32>
    %611 = arith.mulf %601, %610 : vector<48x64xf32>
    %612 = vector.broadcast %594 : vector<1x64xf32> to vector<48x64xf32>
    %613 = arith.mulf %611, %612 : vector<48x64xf32>
    %614 = vector.broadcast %595 : vector<1x64xf32> to vector<48x64xf32>
    %615 = arith.addf %613, %614 : vector<48x64xf32>
    %616 = tpu.iota {dimensions = array<i32: 0>} : vector<2x48xi32>
    %617 = tpu.iota {dimensions = array<i32: 1>} : vector<2x48xi32>
    %c24_i32 = arith.constant 24 : i32
    %618 = vector.broadcast %c24_i32 : i32 to vector<2x48xi32>
    %619 = arith.muli %616, %618 : vector<2x48xi32>
    %c16_i32 = arith.constant 16 : i32
    %620 = vector.broadcast %c16_i32 : i32 to vector<2x48xi32>
    %621 = arith.addi %619, %620 : vector<2x48xi32>
    %622 = arith.cmpi eq, %617, %621 : vector<2x48xi32>
    %cst_248 = arith.constant 1.000000e+00 : f32
    %cst_249 = arith.constant 0.000000e+00 : f32
    %623 = vector.broadcast %cst_248 : f32 to vector<2x48xf32>
    %624 = vector.broadcast %cst_249 : f32 to vector<2x48xf32>
    %625 = arith.select %622, %623, %624 : vector<2x48xi1>, vector<2x48xf32>
    %cst_250 = arith.constant dense<0.000000e+00> : vector<2x64xf32>
    %626 = tpu.matmul %625, %615, %cst_250 {dimension_numbers = #tpu.dot_dimension_numbers<[1], [0], [0], [1], [0, 0, 1, 1], [], []>} : vector<2x48xf32>, vector<48x64xf32>, vector<2x64xf32> -> vector<2x64xf32>
    %c0_251 = arith.constant 0 : index
    %c0_252 = arith.constant 0 : index
    %627 = vector.load %arg32[%c0_251, %c0_252] : memref<1x64xf32, #tpu.memory_space<vmem>>, vector<1x64xf32>
    %c0_253 = arith.constant 0 : index
    %c0_254 = arith.constant 0 : index
    %628 = vector.load %arg33[%c0_253, %c0_254] : memref<1x64xf32, #tpu.memory_space<vmem>>, vector<1x64xf32>
    %cst_255 = arith.constant dense<0.000000e+00> : vector<2xf32>
    %629 = vector.multi_reduction <add>, %626, %cst_255 [1] : vector<2x64xf32> to vector<2xf32>
    %630 = vector.shape_cast %629 : vector<2xf32> to vector<2x1xf32>
    %cst_256 = arith.constant 6.400000e+01 : f32
    %631 = vector.broadcast %cst_256 : f32 to vector<2x1xf32>
    %632 = arith.divf %630, %631 : vector<2x1xf32>
    %633 = vector.broadcast %632 : vector<2x1xf32> to vector<2x64xf32>
    %634 = arith.subf %626, %633 : vector<2x64xf32>
    %635 = arith.mulf %634, %634 : vector<2x64xf32>
    %cst_257 = arith.constant dense<0.000000e+00> : vector<2xf32>
    %636 = vector.multi_reduction <add>, %635, %cst_257 [1] : vector<2x64xf32> to vector<2xf32>
    %637 = vector.shape_cast %636 : vector<2xf32> to vector<2x1xf32>
    %cst_258 = arith.constant 6.400000e+01 : f32
    %638 = vector.broadcast %cst_258 : f32 to vector<2x1xf32>
    %639 = arith.divf %637, %638 : vector<2x1xf32>
    %cst_259 = arith.constant 9.99999974E-6 : f32
    %640 = vector.broadcast %cst_259 : f32 to vector<2x1xf32>
    %641 = arith.addf %639, %640 : vector<2x1xf32>
    %642 = math.rsqrt %641 : vector<2x1xf32>
    %643 = vector.broadcast %642 : vector<2x1xf32> to vector<2x64xf32>
    %644 = arith.mulf %634, %643 : vector<2x64xf32>
    %645 = vector.broadcast %627 : vector<1x64xf32> to vector<2x64xf32>
    %646 = arith.mulf %644, %645 : vector<2x64xf32>
    %647 = vector.broadcast %628 : vector<1x64xf32> to vector<2x64xf32>
    %648 = arith.addf %646, %647 : vector<2x64xf32>
    %c0_260 = arith.constant 0 : index
    %c0_261 = arith.constant 0 : index
    %649 = vector.load %arg34[%c0_260, %c0_261] : memref<64x256xf32, #tpu.memory_space<vmem>>, vector<64x256xf32>
    %cst_262 = arith.constant dense<0.000000e+00> : vector<2x256xf32>
    %650 = tpu.matmul %648, %649, %cst_262 {dimension_numbers = #tpu.dot_dimension_numbers<[1], [0], [0], [1], [0, 0, 1, 1], [], []>} : vector<2x64xf32>, vector<64x256xf32>, vector<2x256xf32> -> vector<2x256xf32>
    %c0_263 = arith.constant 0 : index
    %c0_264 = arith.constant 0 : index
    %651 = vector.load %arg35[%c0_263, %c0_264] : memref<1x256xf32, #tpu.memory_space<vmem>>, vector<1x256xf32>
    %652 = vector.broadcast %651 : vector<1x256xf32> to vector<2x256xf32>
    %653 = arith.addf %650, %652 : vector<2x256xf32>
    %cst_265 = arith.constant 5.000000e-01 : f32
    %654 = vector.broadcast %cst_265 : f32 to vector<2x256xf32>
    %655 = arith.mulf %654, %653 : vector<2x256xf32>
    %cst_266 = arith.constant 0.707106769 : f32
    %656 = vector.broadcast %cst_266 : f32 to vector<2x256xf32>
    %657 = arith.mulf %653, %656 : vector<2x256xf32>
    %658 = math.absf %657 : vector<2x256xf32>
    %cst_267 = arith.constant 0.327591091 : f32
    %659 = vector.broadcast %cst_267 : f32 to vector<2x256xf32>
    %660 = arith.mulf %659, %658 : vector<2x256xf32>
    %cst_268 = arith.constant 1.000000e+00 : f32
    %661 = vector.broadcast %cst_268 : f32 to vector<2x256xf32>
    %662 = arith.addf %661, %660 : vector<2x256xf32>
    %cst_269 = arith.constant 1.000000e+00 : f32
    %663 = vector.broadcast %cst_269 : f32 to vector<2x256xf32>
    %664 = arith.divf %663, %662 : vector<2x256xf32>
    %cst_270 = arith.constant 1.06140542 : f32
    %665 = vector.broadcast %cst_270 : f32 to vector<2x256xf32>
    %666 = arith.mulf %665, %664 : vector<2x256xf32>
    %cst_271 = arith.constant -1.45315206 : f32
    %667 = vector.broadcast %cst_271 : f32 to vector<2x256xf32>
    %668 = arith.addf %666, %667 : vector<2x256xf32>
    %669 = arith.mulf %668, %664 : vector<2x256xf32>
    %cst_272 = arith.constant 1.42141378 : f32
    %670 = vector.broadcast %cst_272 : f32 to vector<2x256xf32>
    %671 = arith.addf %669, %670 : vector<2x256xf32>
    %672 = arith.mulf %671, %664 : vector<2x256xf32>
    %cst_273 = arith.constant -0.284496725 : f32
    %673 = vector.broadcast %cst_273 : f32 to vector<2x256xf32>
    %674 = arith.addf %672, %673 : vector<2x256xf32>
    %675 = arith.mulf %674, %664 : vector<2x256xf32>
    %cst_274 = arith.constant 0.254829586 : f32
    %676 = vector.broadcast %cst_274 : f32 to vector<2x256xf32>
    %677 = arith.addf %675, %676 : vector<2x256xf32>
    %678 = arith.mulf %677, %664 : vector<2x256xf32>
    %cst_275 = arith.constant 0.000000e+00 : f32
    %679 = vector.broadcast %cst_275 : f32 to vector<2x256xf32>
    %680 = arith.subf %679, %658 : vector<2x256xf32>
    %681 = arith.mulf %680, %658 : vector<2x256xf32>
    %682 = math.exp %681 : vector<2x256xf32>
    %683 = arith.mulf %678, %682 : vector<2x256xf32>
    %cst_276 = arith.constant 1.000000e+00 : f32
    %684 = vector.broadcast %cst_276 : f32 to vector<2x256xf32>
    %685 = arith.subf %684, %683 : vector<2x256xf32>
    %cst_277 = arith.constant 0.000000e+00 : f32
    %686 = vector.broadcast %cst_277 : f32 to vector<2x256xf32>
    %687 = arith.cmpf oge, %657, %686 : vector<2x256xf32>
    %cst_278 = arith.constant 0.000000e+00 : f32
    %688 = vector.broadcast %cst_278 : f32 to vector<2x256xf32>
    %689 = arith.subf %688, %685 : vector<2x256xf32>
    %690 = arith.select %687, %685, %689 : vector<2x256xi1>, vector<2x256xf32>
    %cst_279 = arith.constant 1.000000e+00 : f32
    %691 = vector.broadcast %cst_279 : f32 to vector<2x256xf32>
    %692 = arith.addf %691, %690 : vector<2x256xf32>
    %693 = arith.mulf %655, %692 : vector<2x256xf32>
    %c0_280 = arith.constant 0 : index
    %c0_281 = arith.constant 0 : index
    %694 = vector.load %arg36[%c0_280, %c0_281] : memref<256x128xf32, #tpu.memory_space<vmem>>, vector<256x128xf32>
    %cst_282 = arith.constant dense<0.000000e+00> : vector<2x128xf32>
    %695 = tpu.matmul %693, %694, %cst_282 {dimension_numbers = #tpu.dot_dimension_numbers<[1], [0], [0], [1], [0, 0, 1, 1], [], []>} : vector<2x256xf32>, vector<256x128xf32>, vector<2x128xf32> -> vector<2x128xf32>
    %c0_283 = arith.constant 0 : index
    %c0_284 = arith.constant 0 : index
    %696 = vector.load %arg37[%c0_283, %c0_284] : memref<1x128xf32, #tpu.memory_space<vmem>>, vector<1x128xf32>
    %697 = vector.broadcast %696 : vector<1x128xf32> to vector<2x128xf32>
    %698 = arith.addf %695, %697 : vector<2x128xf32>
    %cst_285 = arith.constant 5.000000e-01 : f32
    %699 = vector.broadcast %cst_285 : f32 to vector<2x128xf32>
    %700 = arith.mulf %699, %698 : vector<2x128xf32>
    %cst_286 = arith.constant 0.707106769 : f32
    %701 = vector.broadcast %cst_286 : f32 to vector<2x128xf32>
    %702 = arith.mulf %698, %701 : vector<2x128xf32>
    %703 = math.absf %702 : vector<2x128xf32>
    %cst_287 = arith.constant 0.327591091 : f32
    %704 = vector.broadcast %cst_287 : f32 to vector<2x128xf32>
    %705 = arith.mulf %704, %703 : vector<2x128xf32>
    %cst_288 = arith.constant 1.000000e+00 : f32
    %706 = vector.broadcast %cst_288 : f32 to vector<2x128xf32>
    %707 = arith.addf %706, %705 : vector<2x128xf32>
    %cst_289 = arith.constant 1.000000e+00 : f32
    %708 = vector.broadcast %cst_289 : f32 to vector<2x128xf32>
    %709 = arith.divf %708, %707 : vector<2x128xf32>
    %cst_290 = arith.constant 1.06140542 : f32
    %710 = vector.broadcast %cst_290 : f32 to vector<2x128xf32>
    %711 = arith.mulf %710, %709 : vector<2x128xf32>
    %cst_291 = arith.constant -1.45315206 : f32
    %712 = vector.broadcast %cst_291 : f32 to vector<2x128xf32>
    %713 = arith.addf %711, %712 : vector<2x128xf32>
    %714 = arith.mulf %713, %709 : vector<2x128xf32>
    %cst_292 = arith.constant 1.42141378 : f32
    %715 = vector.broadcast %cst_292 : f32 to vector<2x128xf32>
    %716 = arith.addf %714, %715 : vector<2x128xf32>
    %717 = arith.mulf %716, %709 : vector<2x128xf32>
    %cst_293 = arith.constant -0.284496725 : f32
    %718 = vector.broadcast %cst_293 : f32 to vector<2x128xf32>
    %719 = arith.addf %717, %718 : vector<2x128xf32>
    %720 = arith.mulf %719, %709 : vector<2x128xf32>
    %cst_294 = arith.constant 0.254829586 : f32
    %721 = vector.broadcast %cst_294 : f32 to vector<2x128xf32>
    %722 = arith.addf %720, %721 : vector<2x128xf32>
    %723 = arith.mulf %722, %709 : vector<2x128xf32>
    %cst_295 = arith.constant 0.000000e+00 : f32
    %724 = vector.broadcast %cst_295 : f32 to vector<2x128xf32>
    %725 = arith.subf %724, %703 : vector<2x128xf32>
    %726 = arith.mulf %725, %703 : vector<2x128xf32>
    %727 = math.exp %726 : vector<2x128xf32>
    %728 = arith.mulf %723, %727 : vector<2x128xf32>
    %cst_296 = arith.constant 1.000000e+00 : f32
    %729 = vector.broadcast %cst_296 : f32 to vector<2x128xf32>
    %730 = arith.subf %729, %728 : vector<2x128xf32>
    %cst_297 = arith.constant 0.000000e+00 : f32
    %731 = vector.broadcast %cst_297 : f32 to vector<2x128xf32>
    %732 = arith.cmpf oge, %702, %731 : vector<2x128xf32>
    %cst_298 = arith.constant 0.000000e+00 : f32
    %733 = vector.broadcast %cst_298 : f32 to vector<2x128xf32>
    %734 = arith.subf %733, %730 : vector<2x128xf32>
    %735 = arith.select %732, %730, %734 : vector<2x128xi1>, vector<2x128xf32>
    %cst_299 = arith.constant 1.000000e+00 : f32
    %736 = vector.broadcast %cst_299 : f32 to vector<2x128xf32>
    %737 = arith.addf %736, %735 : vector<2x128xf32>
    %738 = arith.mulf %700, %737 : vector<2x128xf32>
    %c0_300 = arith.constant 0 : index
    %c0_301 = arith.constant 0 : index
    %739 = vector.load %arg38[%c0_300, %c0_301] : memref<128x64xf32, #tpu.memory_space<vmem>>, vector<128x64xf32>
    %cst_302 = arith.constant dense<0.000000e+00> : vector<2x64xf32>
    %740 = tpu.matmul %738, %739, %cst_302 {dimension_numbers = #tpu.dot_dimension_numbers<[1], [0], [0], [1], [0, 0, 1, 1], [], []>} : vector<2x128xf32>, vector<128x64xf32>, vector<2x64xf32> -> vector<2x64xf32>
    %c0_303 = arith.constant 0 : index
    %c0_304 = arith.constant 0 : index
    %741 = vector.load %arg39[%c0_303, %c0_304] : memref<1x64xf32, #tpu.memory_space<vmem>>, vector<1x64xf32>
    %742 = vector.broadcast %741 : vector<1x64xf32> to vector<2x64xf32>
    %743 = arith.addf %740, %742 : vector<2x64xf32>
    %cst_305 = arith.constant 5.000000e-01 : f32
    %744 = vector.broadcast %cst_305 : f32 to vector<2x64xf32>
    %745 = arith.mulf %744, %743 : vector<2x64xf32>
    %cst_306 = arith.constant 0.707106769 : f32
    %746 = vector.broadcast %cst_306 : f32 to vector<2x64xf32>
    %747 = arith.mulf %743, %746 : vector<2x64xf32>
    %748 = math.absf %747 : vector<2x64xf32>
    %cst_307 = arith.constant 0.327591091 : f32
    %749 = vector.broadcast %cst_307 : f32 to vector<2x64xf32>
    %750 = arith.mulf %749, %748 : vector<2x64xf32>
    %cst_308 = arith.constant 1.000000e+00 : f32
    %751 = vector.broadcast %cst_308 : f32 to vector<2x64xf32>
    %752 = arith.addf %751, %750 : vector<2x64xf32>
    %cst_309 = arith.constant 1.000000e+00 : f32
    %753 = vector.broadcast %cst_309 : f32 to vector<2x64xf32>
    %754 = arith.divf %753, %752 : vector<2x64xf32>
    %cst_310 = arith.constant 1.06140542 : f32
    %755 = vector.broadcast %cst_310 : f32 to vector<2x64xf32>
    %756 = arith.mulf %755, %754 : vector<2x64xf32>
    %cst_311 = arith.constant -1.45315206 : f32
    %757 = vector.broadcast %cst_311 : f32 to vector<2x64xf32>
    %758 = arith.addf %756, %757 : vector<2x64xf32>
    %759 = arith.mulf %758, %754 : vector<2x64xf32>
    %cst_312 = arith.constant 1.42141378 : f32
    %760 = vector.broadcast %cst_312 : f32 to vector<2x64xf32>
    %761 = arith.addf %759, %760 : vector<2x64xf32>
    %762 = arith.mulf %761, %754 : vector<2x64xf32>
    %cst_313 = arith.constant -0.284496725 : f32
    %763 = vector.broadcast %cst_313 : f32 to vector<2x64xf32>
    %764 = arith.addf %762, %763 : vector<2x64xf32>
    %765 = arith.mulf %764, %754 : vector<2x64xf32>
    %cst_314 = arith.constant 0.254829586 : f32
    %766 = vector.broadcast %cst_314 : f32 to vector<2x64xf32>
    %767 = arith.addf %765, %766 : vector<2x64xf32>
    %768 = arith.mulf %767, %754 : vector<2x64xf32>
    %cst_315 = arith.constant 0.000000e+00 : f32
    %769 = vector.broadcast %cst_315 : f32 to vector<2x64xf32>
    %770 = arith.subf %769, %748 : vector<2x64xf32>
    %771 = arith.mulf %770, %748 : vector<2x64xf32>
    %772 = math.exp %771 : vector<2x64xf32>
    %773 = arith.mulf %768, %772 : vector<2x64xf32>
    %cst_316 = arith.constant 1.000000e+00 : f32
    %774 = vector.broadcast %cst_316 : f32 to vector<2x64xf32>
    %775 = arith.subf %774, %773 : vector<2x64xf32>
    %cst_317 = arith.constant 0.000000e+00 : f32
    %776 = vector.broadcast %cst_317 : f32 to vector<2x64xf32>
    %777 = arith.cmpf oge, %747, %776 : vector<2x64xf32>
    %cst_318 = arith.constant 0.000000e+00 : f32
    %778 = vector.broadcast %cst_318 : f32 to vector<2x64xf32>
    %779 = arith.subf %778, %775 : vector<2x64xf32>
    %780 = arith.select %777, %775, %779 : vector<2x64xi1>, vector<2x64xf32>
    %cst_319 = arith.constant 1.000000e+00 : f32
    %781 = vector.broadcast %cst_319 : f32 to vector<2x64xf32>
    %782 = arith.addf %781, %780 : vector<2x64xf32>
    %783 = arith.mulf %745, %782 : vector<2x64xf32>
    %c0_320 = arith.constant 0 : index
    %c0_321 = arith.constant 0 : index
    %784 = vector.load %arg40[%c0_320, %c0_321] : memref<64x128xf32, #tpu.memory_space<vmem>>, vector<64x128xf32>
    %cst_322 = arith.constant dense<0.000000e+00> : vector<2x128xf32>
    %785 = tpu.matmul %783, %784, %cst_322 {dimension_numbers = #tpu.dot_dimension_numbers<[1], [0], [0], [1], [0, 0, 1, 1], [], []>} : vector<2x64xf32>, vector<64x128xf32>, vector<2x128xf32> -> vector<2x128xf32>
    %c0_323 = arith.constant 0 : index
    %c0_324 = arith.constant 0 : index
    %786 = vector.load %arg41[%c0_323, %c0_324] : memref<1x128xf32, #tpu.memory_space<vmem>>, vector<1x128xf32>
    %787 = vector.broadcast %786 : vector<1x128xf32> to vector<2x128xf32>
    %788 = arith.addf %785, %787 : vector<2x128xf32>
    %c0_325 = arith.constant 0 : index
    %c0_326 = arith.constant 0 : index
    %789 = vector.load %arg42[%c0_325, %c0_326] : memref<2x128xf32, #tpu.memory_space<vmem>>, vector<2x128xf32>
    tpu.vector_store %arg42[%c0_325, %c0_326], %788 {strides = array<i32>} : memref<2x128xf32, #tpu.memory_space<vmem>>, vector<2x128xf32>,
    return
  }
  func.func @transform_0(%arg0: i32) -> (i32, i32) {
    %c0_i32 = arith.constant 0 : i32
    %c0_i32_0 = arith.constant 0 : i32
    %c0_i32_1 = arith.constant 0 : i32
    return %c0_i32, %c0_i32_0 : i32, i32
  }
  func.func @transform_1(%arg0: i32) -> (i32, i32) {
    %c0_i32 = arith.constant 0 : i32
    %c0_i32_0 = arith.constant 0 : i32
    %c0_i32_1 = arith.constant 0 : i32
    return %c0_i32, %c0_i32_0 : i32, i32
  }
  func.func @transform_2(%arg0: i32) -> (i32, i32) {
    %c0_i32 = arith.constant 0 : i32
    %c0_i32_0 = arith.constant 0 : i32
    %c0_i32_1 = arith.constant 0 : i32
    return %c0_i32, %c0_i32_0 : i32, i32
  }
  func.func @transform_3(%arg0: i32) -> (i32, i32) {
    %c0_i32 = arith.constant 0 : i32
    %c0_i32_0 = arith.constant 0 : i32
    %c0_i32_1 = arith.constant 0 : i32
    return %c0_i32, %c0_i32_0 : i32, i32
  }
  func.func @transform_4(%arg0: i32) -> (i32, i32) {
    %c0_i32 = arith.constant 0 : i32
    %c0_i32_0 = arith.constant 0 : i32
    %c0_i32_1 = arith.constant 0 : i32
    return %c0_i32, %c0_i32_0 : i32, i32
  }
  func.func @transform_5(%arg0: i32) -> (i32, i32) {
    %c0_i32 = arith.constant 0 : i32
    %c0_i32_0 = arith.constant 0 : i32
    %c0_i32_1 = arith.constant 0 : i32
    return %c0_i32, %c0_i32_0 : i32, i32
  }
  func.func @transform_6(%arg0: i32) -> (i32, i32) {
    %c0_i32 = arith.constant 0 : i32
    %c0_i32_0 = arith.constant 0 : i32
    %c0_i32_1 = arith.constant 0 : i32
    return %c0_i32, %c0_i32_0 : i32, i32
  }
  func.func @transform_7(%arg0: i32) -> (i32, i32) {
    %c0_i32 = arith.constant 0 : i32
    %c0_i32_0 = arith.constant 0 : i32
    %c0_i32_1 = arith.constant 0 : i32
    return %c0_i32, %c0_i32_0 : i32, i32
  }
  func.func @transform_8(%arg0: i32) -> (i32, i32) {
    %c0_i32 = arith.constant 0 : i32
    %c0_i32_0 = arith.constant 0 : i32
    %c0_i32_1 = arith.constant 0 : i32
    return %c0_i32, %c0_i32_0 : i32, i32
  }
  func.func @transform_9(%arg0: i32) -> (i32, i32) {
    %c0_i32 = arith.constant 0 : i32
    %c0_i32_0 = arith.constant 0 : i32
    %c0_i32_1 = arith.constant 0 : i32
    return %c0_i32, %c0_i32_0 : i32, i32
  }
  func.func @transform_10(%arg0: i32) -> (i32, i32) {
    %c0_i32 = arith.constant 0 : i32
    %c0_i32_0 = arith.constant 0 : i32
    %c0_i32_1 = arith.constant 0 : i32
    return %c0_i32, %c0_i32_0 : i32, i32
  }
  func.func @transform_11(%arg0: i32) -> (i32, i32) {
    %c0_i32 = arith.constant 0 : i32
    %c0_i32_0 = arith.constant 0 : i32
    %c0_i32_1 = arith.constant 0 : i32
    return %c0_i32, %c0_i32_0 : i32, i32
  }
  func.func @transform_12(%arg0: i32) -> (i32, i32) {
    %c0_i32 = arith.constant 0 : i32
    %c0_i32_0 = arith.constant 0 : i32
    %c0_i32_1 = arith.constant 0 : i32
    return %c0_i32, %c0_i32_0 : i32, i32
  }
  func.func @transform_13(%arg0: i32) -> (i32, i32) {
    %c0_i32 = arith.constant 0 : i32
    %c0_i32_0 = arith.constant 0 : i32
    %c0_i32_1 = arith.constant 0 : i32
    return %c0_i32, %c0_i32_0 : i32, i32
  }
  func.func @transform_14(%arg0: i32) -> (i32, i32) {
    %c0_i32 = arith.constant 0 : i32
    %c0_i32_0 = arith.constant 0 : i32
    %c0_i32_1 = arith.constant 0 : i32
    return %c0_i32, %c0_i32_0 : i32, i32
  }
  func.func @transform_15(%arg0: i32) -> (i32, i32) {
    %c0_i32 = arith.constant 0 : i32
    %c0_i32_0 = arith.constant 0 : i32
    %c0_i32_1 = arith.constant 0 : i32
    return %c0_i32, %c0_i32_0 : i32, i32
  }
  func.func @transform_16(%arg0: i32) -> (i32, i32) {
    %c0_i32 = arith.constant 0 : i32
    %c0_i32_0 = arith.constant 0 : i32
    %c0_i32_1 = arith.constant 0 : i32
    return %c0_i32, %c0_i32_0 : i32, i32
  }
  func.func @transform_17(%arg0: i32) -> (i32, i32) {
    %c0_i32 = arith.constant 0 : i32
    %c0_i32_0 = arith.constant 0 : i32
    %c0_i32_1 = arith.constant 0 : i32
    return %c0_i32, %c0_i32_0 : i32, i32
  }
  func.func @transform_18(%arg0: i32) -> (i32, i32) {
    %c0_i32 = arith.constant 0 : i32
    %c0_i32_0 = arith.constant 0 : i32
    %c0_i32_1 = arith.constant 0 : i32
    return %c0_i32, %c0_i32_0 : i32, i32
  }
  func.func @transform_19(%arg0: i32) -> (i32, i32) {
    %c0_i32 = arith.constant 0 : i32
    %c0_i32_0 = arith.constant 0 : i32
    %c0_i32_1 = arith.constant 0 : i32
    return %c0_i32, %c0_i32_0 : i32, i32
  }
  func.func @transform_20(%arg0: i32) -> (i32, i32) {
    %c0_i32 = arith.constant 0 : i32
    %c0_i32_0 = arith.constant 0 : i32
    %c0_i32_1 = arith.constant 0 : i32
    return %c0_i32, %c0_i32_0 : i32, i32
  }
  func.func @transform_21(%arg0: i32) -> (i32, i32) {
    %c0_i32 = arith.constant 0 : i32
    %c0_i32_0 = arith.constant 0 : i32
    %c0_i32_1 = arith.constant 0 : i32
    return %c0_i32, %c0_i32_0 : i32, i32
  }
  func.func @transform_22(%arg0: i32) -> (i32, i32) {
    %c0_i32 = arith.constant 0 : i32
    %c0_i32_0 = arith.constant 0 : i32
    %c0_i32_1 = arith.constant 0 : i32
    return %c0_i32, %c0_i32_0 : i32, i32
  }
  func.func @transform_23(%arg0: i32) -> (i32, i32) {
    %c0_i32 = arith.constant 0 : i32
    %c0_i32_0 = arith.constant 0 : i32
    %c0_i32_1 = arith.constant 0 : i32
    return %c0_i32, %c0_i32_0 : i32, i32
  }
  func.func @transform_24(%arg0: i32) -> (i32, i32) {
    %c0_i32 = arith.constant 0 : i32
    %c0_i32_0 = arith.constant 0 : i32
    %c0_i32_1 = arith.constant 0 : i32
    return %c0_i32, %c0_i32_0 : i32, i32
  }
  func.func @transform_25(%arg0: i32) -> (i32, i32) {
    %c0_i32 = arith.constant 0 : i32
    %c0_i32_0 = arith.constant 0 : i32
    %c0_i32_1 = arith.constant 0 : i32
    return %c0_i32, %c0_i32_0 : i32, i32
  }
  func.func @transform_26(%arg0: i32) -> (i32, i32) {
    %c0_i32 = arith.constant 0 : i32
    %c0_i32_0 = arith.constant 0 : i32
    %c0_i32_1 = arith.constant 0 : i32
    return %c0_i32, %c0_i32_0 : i32, i32
  }
  func.func @transform_27(%arg0: i32) -> (i32, i32) {
    %c0_i32 = arith.constant 0 : i32
    %c0_i32_0 = arith.constant 0 : i32
    %c0_i32_1 = arith.constant 0 : i32
    return %c0_i32, %c0_i32_0 : i32, i32
  }
  func.func @transform_28(%arg0: i32) -> (i32, i32) {
    %c0_i32 = arith.constant 0 : i32
    %c0_i32_0 = arith.constant 0 : i32
    %c0_i32_1 = arith.constant 0 : i32
    return %c0_i32, %c0_i32_0 : i32, i32
  }
  func.func @transform_29(%arg0: i32) -> (i32, i32) {
    %c0_i32 = arith.constant 0 : i32
    %c0_i32_0 = arith.constant 0 : i32
    %c0_i32_1 = arith.constant 0 : i32
    return %c0_i32, %c0_i32_0 : i32, i32
  }
  func.func @transform_30(%arg0: i32) -> (i32, i32) {
    %c0_i32 = arith.constant 0 : i32
    %c0_i32_0 = arith.constant 0 : i32
    %c0_i32_1 = arith.constant 0 : i32
    return %c0_i32, %c0_i32_0 : i32, i32
  }
  func.func @transform_31(%arg0: i32) -> (i32, i32) {
    %c0_i32 = arith.constant 0 : i32
    %c0_i32_0 = arith.constant 0 : i32
    %c0_i32_1 = arith.constant 0 : i32
    return %c0_i32, %c0_i32_0 : i32, i32
  }
  func.func @transform_32(%arg0: i32) -> (i32, i32) {
    %c0_i32 = arith.constant 0 : i32
    %c0_i32_0 = arith.constant 0 : i32
    %c0_i32_1 = arith.constant 0 : i32
    return %c0_i32, %c0_i32_0 : i32, i32
  }
  func.func @transform_33(%arg0: i32) -> (i32, i32) {
    %c0_i32 = arith.constant 0 : i32
    %c0_i32_0 = arith.constant 0 : i32
    %c0_i32_1 = arith.constant 0 : i32
    return %c0_i32, %c0_i32_0 : i32, i32
  }
  func.func @transform_34(%arg0: i32) -> (i32, i32) {
    %c0_i32 = arith.constant 0 : i32
    %c0_i32_0 = arith.constant 0 : i32
    %c0_i32_1 = arith.constant 0 : i32
    return %c0_i32, %c0_i32_0 : i32, i32
  }
  func.func @transform_35(%arg0: i32) -> (i32, i32) {
    %c0_i32 = arith.constant 0 : i32
    %c0_i32_0 = arith.constant 0 : i32
    %c0_i32_1 = arith.constant 0 : i32
    return %c0_i32, %c0_i32_0 : i32, i32
  }
  func.func @transform_36(%arg0: i32) -> (i32, i32) {
    %c0_i32 = arith.constant 0 : i32
    %c0_i32_0 = arith.constant 0 : i32
    %c0_i32_1 = arith.constant 0 : i32
    return %c0_i32, %c0_i32_0 : i32, i32
  }
  func.func @transform_37(%arg0: i32) -> (i32, i32) {
    %c0_i32 = arith.constant 0 : i32
    %c0_i32_0 = arith.constant 0 : i32
    %c0_i32_1 = arith.constant 0 : i32
    return %c0_i32, %c0_i32_0 : i32, i32
  }
  func.func @transform_38(%arg0: i32) -> (i32, i32) {
    %c0_i32 = arith.constant 0 : i32
    %c0_i32_0 = arith.constant 0 : i32
    %c0_i32_1 = arith.constant 0 : i32
    return %c0_i32, %c0_i32_0 : i32, i32
  }
  func.func @transform_39(%arg0: i32) -> (i32, i32) {
    %c0_i32 = arith.constant 0 : i32
    %c0_i32_0 = arith.constant 0 : i32
    %c0_i32_1 = arith.constant 0 : i32
    return %c0_i32, %c0_i32_0 : i32, i32
  }
  func.func @transform_40(%arg0: i32) -> (i32, i32) {
    %c0_i32 = arith.constant 0 : i32
    %c0_i32_0 = arith.constant 0 : i32
    %c0_i32_1 = arith.constant 0 : i32
    return %c0_i32, %c0_i32_0 : i32, i32
  }
  func.func @transform_41(%arg0: i32) -> (i32, i32) {
    %c0_i32 = arith.constant 0 : i32
    %c0_i32_0 = arith.constant 0 : i32
    %c0_i32_1 = arith.constant 0 : i32
    return %c0_i32, %c0_i32_0 : i32, i32
  }
}

</mosaic_0001>

<bundles_post_ra>
// kernel: vit_gaze_forward.1
= control target key start
LH: loop header
LB: loop body
LE: loop exit
PB: predicated region body
PF: predicated region fallthrough
CT: control target
= control target key end

     0   :  { %s10807_s6 = smov 1   ;;  %s10808_s10 = smov 2   ;;  %s13375_s0 = inlined_call_operand.smem [shape: u32[42], index: -1, kind: input, shape index: {}] }
   0x1   :  { %s10867_s5 = sld [smem:[%s13375_s0]]   ;;  %s10809_s14 = smov 3  }
   0x2   :  { %s10872_s9 = sld [smem:[%s13375_s0 + %s10807_s6]]   ;;  %s10810_s18 = smov 4  }
   0x3   :  { %s10877_s13 = sld [smem:[%s13375_s0 + %s10808_s10]]   ;;  %s10811_s22 = smov 5  }
   0x4   :  { %s10882_s17 = sld [smem:[%s13375_s0 + %s10809_s14]]   ;;  %s10812_s26 = smov 6  }
   0x5   :  { %s10887_s21 = sld [smem:[%s13375_s0 + %s10810_s18]]   ;;  %s10813_s30 = smov 7  }
   0x6   :  { %s10892_s25 = sld [smem:[%s13375_s0 + %s10811_s22]]   ;;  %s10814_s4 = smov 8  }
   0x7   :  { %s10897_s29 = sld [smem:[%s13375_s0 + %s10812_s26]]   ;;  %s10815_s10 = smov 9  }
   0x8   :  { %s10902_s3 = sld [smem:[%s13375_s0 + %s10813_s30]]   ;;  %s10816_s15 = smov 10  }
   0x9   :  { %s10907_s8 = sld [smem:[%s13375_s0 + %s10814_s4]]   ;;  %s10817_s20 = smov 11  }
   0xa   :  { %s10912_s14 = sld [smem:[%s13375_s0 + %s10815_s10]]   ;;  %s10818_s26 = smov 12  }
   0xb   :  { %s10917_s19 = sld [smem:[%s13375_s0 + %s10816_s15]]   ;;  %s10819_s1 = smov 13  }
   0xc   :  { %s10922_s24 = sld [smem:[%s13375_s0 + %s10817_s20]]   ;;  %s10820_s7 = smov 14  }
   0xd   :  { %s10927_s30 = sld [smem:[%s13375_s0 + %s10818_s26]]   ;;  %s10821_s15 = smov 15  }
   0xe   :  { %s10932_s6 = sld [smem:[%s13375_s0 + %s10819_s1]]   ;;  %s10822_s22 = smov 16  }
   0xf   :  { %s10937_s12 = sld [smem:[%s13375_s0 + %s10820_s7]]   ;;  %s10823_s28 = smov 17  }
  0x10   :  { %s10942_s20 = sld [smem:[%s13375_s0 + %s10821_s15]]   ;;  %s10824_s7 = smov 18  }
  0x11   :  { %s10947_s27 = sld [smem:[%s13375_s0 + %s10822_s22]]   ;;  %s10825_s15 = smov 19  }
  0x12   :  { %s10952_s4 = sld [smem:[%s13375_s0 + %s10823_s28]]   ;;  %s10826_s22 = smov 20  }
  0x13   :  { %s10827_s28 = smov 21  }
  0x15   :  { %13384 = sst [smem:[#allocation6_spill]] %s10937_s12 }
  0x16   :  { %13385 = sst [smem:[#allocation7_spill]] %s10942_s20 }
  0x17   :  { %13386 = sst [smem:[#allocation8_spill]] %s10947_s27 }
  0x18   :  { %13387 = sst [smem:[#allocation9_spill]] %s10952_s4 }
  0x19   :  { %s10957_s12 = sld [smem:[%s13375_s0 + %s10824_s7]]   ;;  %s10828_s7 = smov 22  }
  0x1a   :  { %s10962_s20 = sld [smem:[%s13375_s0 + %s10825_s15]]   ;;  %s10829_s15 = smov 23  }
  0x1b   :  { %s10967_s27 = sld [smem:[%s13375_s0 + %s10826_s22]]   ;;  %s10830_s22 = smov 24  }
  0x1c   :  { %s10972_s4 = sld [smem:[%s13375_s0 + %s10827_s28]]   ;;  %s10831_s28 = smov 25  }
  0x1f   :  { %13388 = sst [smem:[#allocation10_spill]] %s10957_s12 }
  0x20   :  { %13389 = sst [smem:[#allocation11_spill]] %s10962_s20 }
  0x21   :  { %13390 = sst [smem:[#allocation12_spill]] %s10967_s27 }
  0x22   :  { %13391 = sst [smem:[#allocation13_spill]] %s10972_s4 }
  0x23   :  { %s10977_s12 = sld [smem:[%s13375_s0 + %s10828_s7]]   ;;  %s10832_s7 = smov 26  }
  0x24   :  { %s10982_s20 = sld [smem:[%s13375_s0 + %s10829_s15]]   ;;  %s10833_s15 = smov 27  }
  0x25   :  { %s10987_s27 = sld [smem:[%s13375_s0 + %s10830_s22]]   ;;  %s10834_s22 = smov 28  }
  0x26   :  { %s10992_s4 = sld [smem:[%s13375_s0 + %s10831_s28]]   ;;  %s10835_s28 = smov 29  }
  0x29   :  { %13392 = sst [smem:[#allocation14_spill]] %s10977_s12 }
  0x2a   :  { %13393 = sst [smem:[#allocation15_spill]] %s10982_s20 }
  0x2b   :  { %13394 = sst [smem:[#allocation16_spill]] %s10987_s27 }
  0x2c   :  { %13395 = sst [smem:[#allocation17_spill]] %s10992_s4 }
  0x2d   :  { %s10997_s12 = sld [smem:[%s13375_s0 + %s10832_s7]]   ;;  %s10836_s7 = smov 30  }
  0x2e   :  { %s11002_s20 = sld [smem:[%s13375_s0 + %s10833_s15]]   ;;  %s10837_s15 = smov 31  }
  0x2f   :  { %s11007_s27 = sld [smem:[%s13375_s0 + %s10834_s22]]   ;;  %s10838_s22 = smov 32  }
  0x30   :  { %s11012_s4 = sld [smem:[%s13375_s0 + %s10835_s28]]   ;;  %s10839_s28 = smov 33  }
  0x33   :  { %13396 = sst [smem:[#allocation18_spill]] %s10997_s12 }
  0x34   :  { %13397 = sst [smem:[#allocation19_spill]] %s11002_s20 }
  0x35   :  { %13398 = sst [smem:[#allocation20_spill]] %s11007_s27 }
  0x36   :  { %13399 = sst [smem:[#allocation21_spill]] %s11012_s4 }
  0x37   :  { %s11017_s12 = sld [smem:[%s13375_s0 + %s10836_s7]]   ;;  %s10840_s7 = smov 34  }
  0x38   :  { %s11022_s20 = sld [smem:[%s13375_s0 + %s10837_s15]]   ;;  %s10841_s15 = smov 35  }
  0x39   :  { %s11027_s27 = sld [smem:[%s13375_s0 + %s10838_s22]]   ;;  %s10842_s22 = smov 36  }
  0x3a   :  { %s11032_s4 = sld [smem:[%s13375_s0 + %s10839_s28]]   ;;  %s10843_s28 = smov 37  }
  0x3d   :  { %13400 = sst [smem:[#allocation22_spill]] %s11017_s12 }
  0x3e   :  { %13401 = sst [smem:[#allocation23_spill]] %s11022_s20 }
  0x3f   :  { %13402 = sst [smem:[#allocation24_spill]] %s11027_s27 }
  0x40   :  { %13403 = sst [smem:[#allocation25_spill]] %s11032_s4 }
  0x41   :  { %s11037_s12 = sld [smem:[%s13375_s0 + %s10840_s7]]   ;;  %s10844_s7 = smov 38  }
  0x42   :  { %s11042_s20 = sld [smem:[%s13375_s0 + %s10841_s15]]   ;;  %s10845_s15 = smov 39  }
  0x43   :  { %s11047_s27 = sld [smem:[%s13375_s0 + %s10842_s22]]   ;;  %s10846_s22 = smov 40  }
  0x44   :  { %s11052_s4 = sld [smem:[%s13375_s0 + %s10843_s28]]   ;;  %s10847_s28 = smov 41  }
  0x47   :  { %13404 = sst [smem:[#allocation26_spill]] %s11037_s12 }
  0x48   :  { %13405 = sst [smem:[#allocation27_spill]] %s11042_s20 }
  0x49   :  { %13406 = sst [smem:[#allocation28_spill]] %s11047_s27 }
  0x4a   :  { %13407 = sst [smem:[#allocation29_spill]] %s11052_s4 }
  0x4b   :  { %s11057_s12 = sld [smem:[%s13375_s0 + %s10844_s7]]  }
  0x4c   :  { %s11062_s20 = sld [smem:[%s13375_s0 + %s10845_s15]]  }
  0x4d   :  { %s11067_s27 = sld [smem:[%s13375_s0 + %s10846_s22]]  }
  0x4e   :  { %s11072_s4 = sld [smem:[%s13375_s0 + %s10847_s28]]  }
  0x4f   :  { %v175_v0 = vld [vmem:[%s10872_s9] sm:$0xff]  ;;  %v176_v1 = vld [vmem:[%s10872_s9 + $0x8] sm:$0xff]  ;;  %v177_v2 = vld [vmem:[%s10872_s9 + $0x10] sm:$0xff]  ;;  %vm188_vm0 = vcmask 392192  }
  0x50   :  { %v9822_v3 = vpack.c.bf16 %v176_v1, %v175_v0  ;;  %v178_v4 = vld [vmem:[%s10872_s9 + $0x18] sm:$0xff]  ;;  %v179_v6 = vld [vmem:[%s10872_s9 + $0x20] sm:$0xff]  ;;  %v180_v7 = vld [vmem:[%s10872_s9 + $0x28] sm:$0xff] }
  0x51   :  { %v9826_v5 = vpack.c.bf16 %v178_v4, %v177_v2  ;;  %v171_v8 = vld [vmem:[%s10867_s5] sm:$0xff] }
  0x52   :  { %9823 = vmatprep.subr.bf16.mxu0 %v9822_v3  ;;  %9059 = vmatprep.mubr.msk.f32.mxu0 %vm188_vm0, %v171_v8 }
  0x53   :  { %88 = vsyncpa [#allocation4], 0  ;;  %9825 = vmatpush3.bf16.msra.mxu0 %v9822_v3  ;;  %v9830_v9 = vpack.c.bf16 %v180_v7, %v179_v6  ;;  %v172_v10 = vld [vmem:[%s10867_s5 + $0x8] sm:$0xff]  ;;  %v173_v11 = vld [vmem:[%s10867_s5 + $0x10] sm:$0xff]  ;;  %vm286_vm1 = vcmask 523264   ;;  %v10848_v13 = vmov 0.0  }
  0x54   :  { %9827 = vmatprep.subr.bf16.mxu0 %v9826_v5  ;;  %v174_v12 = vld [vmem:[%s10867_s5 + $0x18] sm:$0xff]  ;;  %288 = vst.msk [vmem:[#allocation2 + $0x8] sm:$0xff] %vm286_vm1, %v10848_v13  ;;  %287 = vst.msk [vmem:[#allocation2] sm:$0xff] %vm286_vm1, %v10848_v13  ;;  %531 = vmatprep.mubr.f32.mxu1 %v10848_v13  ;;  %v295_v14 = vld [vmem:[%s10882_s17] sm:$0x1]  ;;  %vm300_vm2 = vcmask 516096  }
  0x55   :  { %289 = vst.msk [vmem:[#allocation2 + $0x10] sm:$0xff] %vm286_vm1, %v10848_v13  ;;  %290 = vst.msk [vmem:[#allocation2 + $0x18] sm:$0xff] %vm286_vm1, %v10848_v13  ;;  %v8354_v17 = vld [vmem:[%s10877_s13] ss:$0 sm:$0xff]  ;;  %v294_v19 = vld [vmem:[%s10887_s21 + $0x8] sm:$0xff]  ;;  %s10850_s0 = smov 64  }
  0x56   :  { %291 = vst.msk [vmem:[#allocation2 + $0x20] sm:$0xff] %vm286_vm1, %v10848_v13  ;;  %292 = vst.msk [vmem:[#allocation2 + $0x28] sm:$0xff] %vm286_vm1, %v10848_v13  ;;  %v293_v22 = vld [vmem:[%s10887_s21] sm:$0xff]  ;;  %v422_v57 = vld [vmem:[%s10902_s3 + $0x8] sm:$0xff]  ;;  %vm10851_vm3 = vmmov 0   ;;  %s10852_s5 = smov 112  }
  0x57   :  { %9829 = vmatpush3.bf16.msra.mxu0 %v9826_v5  ;;  %301 = vst.msk [vmem:[#allocation2 + $0x10] sm:$0x1] %vm300_vm2, %v295_v14  ;;  %306 = vst.msk [vmem:[#allocation2 + $0x28] sm:$0x1] %vm300_vm2, %v295_v14  ;;  %v424_v58 = vld [vmem:[%s10902_s3 + $0x18] sm:$0xff]  ;;  %v421_v60 = vld [vmem:[%s10902_s3] sm:$0xff] }
  0x58   :  { %9831 = vmatprep.subr.bf16.mxu0 %v9830_v9  ;;  %v9834_v59 = vpack.c.bf16 %v424_v58, %v422_v57  ;;  %v423_v61 = vld [vmem:[%s10902_s3 + $0x10] sm:$0xff]  ;;  %v426_v63 = vld [vmem:[%s10902_s3 + $0x28] sm:$0xff]  ;;  %v428_v0 = vld [vmem:[%s10902_s3 + $0x38] sm:$0xff]  ;;  %s10853_s9 = smov 48   ;;  %vm585_vm4 = vcmask 130048   ;;  %vm684_vm7 = vcmask 195584  }
  0x59   :  { %v9836_v62 = vpack.c.bf16 %v423_v61, %v421_v60  ;;  %v9838_v1 = vpack.c.bf16 %v428_v0, %v426_v63  ;;  %v425_v2 = vld [vmem:[%s10902_s3 + $0x20] sm:$0xff]  ;;  %v427_v3 = vld [vmem:[%s10902_s3 + $0x30] sm:$0xff]  ;;  %v430_v5 = vld [vmem:[%s10902_s3 + $0x48] sm:$0xff]  ;;  %s10854_s13 = smov 32   ;;  %s10855_s17 = smov 96  }
  0x5a   :  { %9835 = vmatprep.subr.bf16.mxu1 %v9834_v59  ;;  %v9840_v4 = vpack.c.bf16 %v427_v3, %v425_v2  ;;  %v432_v6 = vld [vmem:[%s10902_s3 + $0x58] sm:$0xff]  ;;  %v429_v8 = vld [vmem:[%s10902_s3 + $0x40] sm:$0xff]  ;;  %vm11220_vm5 = vmpackc.low %vm585_vm4, %vm585_vm4  ;;  %s10856_s21 = smov 16   ;;  %s13418_s7 = sld [smem:[#allocation14_spill]] }
  0x5b   :  { %9833 = vmatpush3.bf16.msra.mxu0 %v9830_v9  ;;  %9837 = vmatpush1.bf16.msra.mxu1 %v9836_v62  ;;  %v9842_v7 = vpack.c.bf16 %v432_v6, %v430_v5  ;;  %v431_v9 = vld [vmem:[%s10902_s3 + $0x50] sm:$0xff]  ;;  %v433_v14 = vld [vmem:[%s10902_s3 + $0x60] sm:$0xff]  ;;  %s13419_s10 = sld [smem:[#allocation17_spill]]  ;;  %s13420_s11 = sld [smem:[#allocation15_spill]] }
  0x5c   :  { %9839 = vmatprep.subr.bf16.mxu1 %v9838_v1  ;;  %s13421_s15 = sld [smem:[#allocation16_spill]]  ;;  %s13422_s16 = sld [smem:[#allocation19_spill]] }
  0x5d   :  { %s13423_s18 = sld [smem:[#allocation18_spill]]  ;;  %s13424_s22 = sld [smem:[#allocation20_spill]] }
  0x5e   :  { %9060 = vmatmul.mubr.msk.f32.vlgmr.msra.gmra.mrb[0].mxu0 %vm188_vm0, %v172_v10  ;;  %v309_v15 = vld [vmem:[#allocation2 + $0x10] sm:$0xff]  ;;  %v312_v55 = vld [vmem:[#allocation2 + $0x28] sm:$0xff]  ;;  %v9844_v10 = vpack.c.bf16 %v431_v9, %v429_v8  ;;  %s13425_s23 = sld [smem:[#allocation21_spill]]  ;;  %s13426_s26 = sld [smem:[#allocation22_spill]] }
  0x5f   :  { %9062 = vmatprep.mubr.msk.f32.mxu0 %vm188_vm0, %v173_v11  ;;  %v324_v16 = vsel %vm286_vm1, %v309_v15, 0.0  ;;  %v333_v56 = vsel %vm286_vm1, %v312_v55, 0.0  ;;  %9841 = vmatpush1.bf16.msra.mxu1 %v9840_v4  ;;  %v434_v11 = vld [vmem:[%s10902_s3 + $0x68] sm:$0xff]  ;;  %s13427_s28 = sld [smem:[#allocation25_spill]]  ;;  %s13428_s1 = sld [smem:[#allocation23_spill]] }
  0x60   :  { %325 = vadd.xlane.f32.xlu1 %v324_v16  ;;  %9843 = vmatprep.subr.bf16.mxu1 %v9842_v7  ;;  %v435_v16 = vld [vmem:[%s10902_s3 + $0x70] sm:$0xff]  ;;  %s13429_s2 = sld [smem:[#allocation24_spill]] }
  0x62   :  { %9063 = vmatmul.mubr.msk.f32.gmra.mrb[2].mxu0 %vm188_vm0, %v174_v12  ;;  %v436_v12 = vld [vmem:[%s10902_s3 + $0x78] sm:$0xff]  ;;  %s13411_s3 = sld [smem:[#allocation6_spill]] }
  0x63   :  { %9845 = vmatpush1.bf16.msra.mxu1 %v9844_v10  ;;  %9071 = vmatprep.mubr.msk.f32.mxu0 %vm10851_vm3, %v10848_v13 }
  0xed   :  { %v326_v36 = vpop.xlane.xlu1 %325 }
  0xee   :  { %v339_v37 = vmul.f32 0.015625, %v326_v36 }
  0xf0   :  { %v11112_v40 = vsub.f32 %v309_v15, %v339_v37  ;;  %v9846_v15 = vpack.c.bf16 %v436_v12, %v434_v11 }
  0xf2   :  { %v351_v45 = vmul.f32 %v11112_v40, %v11112_v40  ;;  %9847 = vmatprep.subr.bf16.mxu1 %v9846_v15 }
  0xf4   :  { %v361_v48 = vsel %vm286_vm1, %v351_v45, 0.0 }
 0x131   :  { %v9061_v18 = vpop.f32.mrb[0].mxu0 }
 0x132   :  { %v273_v20 = vadd.f32 %v9061_v18, %v8354_v17  ;;  %v267_v21 = vpop.f32.mrb[1].mxu0 }
 0x133   :  { %v268_v23 = vadd.f32 %v8354_v17, %v267_v21 }
 0x134   :  { %v297_v24 = vadd.f32 %v294_v19, %v273_v20 }
 0x135   :  { %v296_v25 = vadd.f32 %v293_v22, %v268_v23  ;;  %v9064_v30 = vpop.f32.mrb[2].mxu0 }
 0x136   :  { %299 = vst.msk [vmem:[#allocation2 + $0x8] sm:$0xff] %vm286_vm1, %v297_v24  ;;  %v277_v31 = vpop.f32.mrb[3].mxu0  ;;  %v283_v32 = vadd.f32 %v9064_v30, %v8354_v17 }
 0x137   :  { %298 = vst.msk [vmem:[#allocation2] sm:$0xff] %vm286_vm1, %v296_v25  ;;  %v278_v33 = vadd.f32 %v8354_v17, %v277_v31  ;;  %v9848_v17 = vpack.c.bf16 %v435_v16, %v433_v14  ;;  %v313_v14 = vlaneseq }
 0x138   :  { %v303_v34 = vadd.f32 %v294_v19, %v283_v32 }
 0x139   :  { %v302_v35 = vadd.f32 %v293_v22, %v278_v33  ;;  %9849 = vmatpush1.bf16.msra.mxu1 %v9848_v17  ;;  %v11166_v15 = vshrl.u32 %v313_v14, 7  ;;  %v437_v17 = vld [vmem:[%s10907_s8] sm:$0x3]  ;;  %s13412_s8 = sld [smem:[#allocation8_spill]] }
 0x13a   :  { %305 = vst.msk [vmem:[#allocation2 + $0x20] sm:$0xff] %vm286_vm1, %v303_v34 }
 0x13b   :  { %304 = vst.msk [vmem:[#allocation2 + $0x18] sm:$0xff] %vm286_vm1, %v302_v35  ;;  %v11169_v16 = vsub.s32 0, %v11166_v15 }
 0x13d   :  { %v308_v28 = vld [vmem:[#allocation2 + $0x8] sm:$0xff] }
 0x13e   :  { %v307_v26 = vld [vmem:[#allocation2] sm:$0xff]  ;;  %v321_v29 = vsel %vm286_vm1, %v308_v28, 0.0 }
 0x13f   :  { %v318_v27 = vsel %vm286_vm1, %v307_v26, 0.0 }
 0x140   :  { %319 = vadd.xlane.f32.xlu0 %v318_v27 }
 0x141   :  { %v311_v50 = vld [vmem:[#allocation2 + $0x20] sm:$0xff] }
 0x142   :  { %v310_v51 = vld [vmem:[#allocation2 + $0x18] sm:$0xff]  ;;  %v330_v53 = vsel %vm286_vm1, %v311_v50, 0.0 }
 0x143   :  { %v327_v54 = vsel %vm286_vm1, %v310_v51, 0.0 }
 0x144   :  { %322 = vadd.xlane.f32.xlu0 %v321_v29 }
 0x1cd   :  { %v320_v38 = vpop.xlane.xlu0 %319 }
 0x1ce   :  { %v337_v39 = vmul.f32 0.015625, %v320_v38 }
 0x1d0   :  { %v11114_v41 = vsub.f32 %v307_v26, %v337_v39  ;;  %v8359_v39 = vld [vmem:[%s10892_s25] ss:$0 sm:$0xff]  ;;  %s10857_s25 = smov 80  }
 0x1d1   :  { %v323_v42 = vpop.xlane.xlu0 %322 }
 0x1d2   :  { %v338_v43 = vmul.f32 0.015625, %v323_v42  ;;  %v349_v44 = vmul.f32 %v11114_v41, %v11114_v41 }
 0x1d4   :  { %v11120_v46 = vsub.f32 %v308_v28, %v338_v43  ;;  %v355_v47 = vsel %vm286_vm1, %v349_v44, 0.0  ;;  %v8360_v44 = vld [vmem:[%s10897_s29] ss:$0 sm:$0xff]  ;;  %s13410_s29 = sld [smem:[#allocation7_spill]] }
 0x1d5   :  { %356 = vadd.xlane.f32.xlu1 %v355_v47 }
 0x1d6   :  { %v350_v49 = vmul.f32 %v11120_v46, %v11120_v46 }
 0x1d8   :  { %v358_v52 = vsel %vm286_vm1, %v350_v49, 0.0 }
 0x1d9   :  { %362 = vadd.xlane.f32.xlu1 %v361_v48  ;;  %359 = vadd.xlane.f32.xlu0 %v358_v52 }
 0x1dd   :  { %331 = vadd.xlane.f32.xlu1 %v330_v53  ;;  %328 = vadd.xlane.f32.xlu0 %v327_v54 }
 0x1e1   :  { %334 = vadd.xlane.f32.xlu0 %v333_v56 }
 0x262   :  { %v357_v18 = vpop.xlane.xlu1 %356 }
 0x263   :  { %v373_v19 = vmul.f32 0.015625, %v357_v18  ;;  %v11173_v18 = vsub.s32 1, %v11166_v15 }
 0x265   :  { %v379_v20 = vadd.f32 1e-06, %v373_v19 }
 0x266   :  { %v363_v21 = vpop.xlane.xlu1 %362  ;;  %v360_v22 = vpop.xlane.xlu0 %359 }
 0x267   :  { %10411 = vrsqrt.f32 %v379_v20  ;;  %v375_v23 = vmul.f32 0.015625, %v363_v21  ;;  %v374_v24 = vmul.f32 0.015625, %v360_v22  ;;  %v10849_v20 = vmov 0.0|0.0  }
 0x268   :  { %9850 = vmatprep.subr.bf16.mxu0 %v10849_v20  ;;  %9857 = vmatprep.subr.bf16.mxu1 %v10849_v20  ;;  %v11178_v22 = vrot.slane %v437_v17, %v11169_v16 }
 0x269   :  { %v381_v25 = vadd.f32 1e-06, %v375_v23  ;;  %v380_v26 = vadd.f32 1e-06, %v374_v24  ;;  %v11181_v23 = vrot.slane %v437_v17, %v11173_v18 }
 0x26a   :  { %v332_v27 = vpop.xlane.xlu1 %331  ;;  %v329_v28 = vpop.xlane.xlu0 %328 }
 0x26b   :  { %10413 = vrsqrt.f32 %v381_v25  ;;  %v341_v29 = vmul.f32 0.015625, %v332_v27  ;;  %v340_v30 = vmul.f32 0.015625, %v329_v28 }
 0x26c   :  { %10415 = vrsqrt.f32 %v380_v26 }
 0x26d   :  { %v347_v31 = vsub.f32 %v311_v50, %v341_v29  ;;  %v346_v33 = vsub.f32 %v310_v51, %v340_v30 }
 0x26e   :  { %v335_v32 = vpop.xlane.xlu0 %334 }
 0x26f   :  { %v342_v34 = vmul.f32 0.015625, %v335_v32  ;;  %v353_v35 = vmul.f32 %v347_v31, %v347_v31  ;;  %v352_v45 = vmul.f32 %v346_v33, %v346_v33 }
 0x271   :  { %v10412_v36 = vpop.eup %10411  ;;  %v348_v37 = vsub.f32 %v312_v55, %v342_v34  ;;  %v367_v38 = vsel %vm286_vm1, %v353_v35, 0.0  ;;  %v364_v52 = vsel %vm286_vm1, %v352_v45, 0.0 }
 0x272   :  { %368 = vadd.xlane.f32.xlu0 %v367_v38  ;;  %v391_v42 = vmul.f32 %v10412_v36, %v11114_v41 }
 0x273   :  { %v354_v43 = vmul.f32 %v348_v37, %v348_v37 }
 0x274   :  { %v403_v47 = vmul.f32 %v8359_v39, %v391_v42 }
 0x275   :  { %v10414_v48 = vpop.eup %10413  ;;  %v370_v49 = vsel %vm286_vm1, %v354_v43, 0.0 }
 0x276   :  { %v10416_v50 = vpop.eup %10415  ;;  %371 = vadd.xlane.f32.xlu1 %v370_v49  ;;  %v415_v51 = vadd.f32 %v8360_v44, %v403_v47  ;;  %v393_v54 = vmul.f32 %v10414_v48, %v11112_v40 }
 0x277   :  { %v392_v53 = vmul.f32 %v10416_v50, %v11120_v46 }
 0x278   :  { %8361 = vmatmul.mubr.msk.f32.vlgmr.msra.gmra.mrb[0].mxu1 %vm286_vm1, %v415_v51  ;;  %v405_v56 = vmul.f32 %v8359_v39, %v393_v54 }
 0x279   :  { %537 = vmatprep.mubr.f32.mxu1 %v10848_v13  ;;  %v404_v41 = vmul.f32 %v8359_v39, %v392_v53 }
 0x27a   :  { %365 = vadd.xlane.f32.xlu1 %v364_v52  ;;  %v417_v57 = vadd.f32 %v8360_v44, %v405_v56 }
 0x27b   :  { %v416_v55 = vadd.f32 %v8360_v44, %v404_v41 }
 0x27d   :  { %8362 = vmatmul.mubr.msk.f32.gmra.mrb[2].mxu1 %vm286_vm1, %v416_v55 }
 0x27e   :  { %543 = vmatprep.mubr.f32.mxu1 %v10848_v13 }
 0x281   :  { %8363 = vmatmul.mubr.msk.f32.gmra.mrb[4].mxu1 %vm286_vm1, %v417_v57 }
 0x282   :  { %549 = vmatprep.mubr.f32.mxu1 %v10848_v13 }
 0x2ff   :  { %v369_v46 = vpop.xlane.xlu0 %368 }
 0x300   :  { %v377_v58 = vmul.f32 0.015625, %v369_v46 }
 0x302   :  { %v383_v60 = vadd.f32 1e-06, %v377_v58 }
 0x303   :  { %v372_v40 = vpop.xlane.xlu1 %371 }
 0x304   :  { %v378_v59 = vmul.f32 0.015625, %v372_v40  ;;  %10417 = vrsqrt.f32 %v383_v60 }
 0x306   :  { %v384_v61 = vadd.f32 1e-06, %v378_v59 }
 0x307   :  { %v366_v62 = vpop.xlane.xlu1 %365 }
 0x308   :  { %v376_v63 = vmul.f32 0.015625, %v366_v62  ;;  %10419 = vrsqrt.f32 %v384_v61  ;;  %v11282_v61 = vand.u32 127, %v313_v14 }
 0x30a   :  { %v382_v0 = vadd.f32 1e-06, %v376_v63  ;;  %vm315_vm6 = vcmp.lt.s32.totalorder %v11282_v61, 17 }
 0x30c   :  { %10421 = vrsqrt.f32 %v382_v0 }
 0x30e   :  { %v10418_v1 = vpop.eup %10417 }
 0x30f   :  { %v395_v5 = vmul.f32 %v10418_v1, %v347_v31 }
 0x311   :  { %v407_v9 = vmul.f32 %v8359_v39, %v395_v5 }
 0x312   :  { %v10420_v2 = vpop.eup %10419 }
 0x313   :  { %v396_v7 = vmul.f32 %v10420_v2, %v348_v37  ;;  %v419_v11 = vadd.f32 %v8360_v44, %v407_v9 }
 0x315   :  { %v408_v10 = vmul.f32 %v8359_v39, %v396_v7 }
 0x316   :  { %v10422_v3 = vpop.eup %10421 }
 0x317   :  { %v394_v4 = vmul.f32 %v10422_v3, %v346_v33  ;;  %v420_v12 = vadd.f32 %v8360_v44, %v408_v10 }
 0x319   :  { %v406_v6 = vmul.f32 %v8359_v39, %v394_v4 }
 0x31b   :  { %v418_v8 = vadd.f32 %v8360_v44, %v406_v6 }
 0x31d   :  { %8364 = vmatmul.mubr.msk.f32.gmra.mrb[6].mxu1 %vm286_vm1, %v418_v8 }
 0x31e   :  { %555 = vmatprep.mubr.f32.mxu1 %v10848_v13 }
 0x321   :  { %8365 = vmatmul.mubr.msk.f32.gmra.mrb[8].mxu1 %vm286_vm1, %v419_v11 }
 0x322   :  { %561 = vmatprep.mubr.f32.mxu1 %v10848_v13 }
 0x325   :  { %8366 = vmatmul.mubr.msk.f32.gmra.mrb[10].mxu1 %vm286_vm1, %v420_v12 }
 0x326   :  { %9101 = vmatprep.mubr.msk.f32.mxu1 %vm10851_vm3, %v10848_v13 }
 0x34b   :  { %v533_v19 = vpop.f32.mrb[0].mxu1 }
 0x34c   :  { %v535_v21 = vpop.f32.mrb[1].mxu1  ;;  %v11184_v25 = vadd.f32 %v533_v19, %v11178_v22 }
 0x34d   :  { %v536_v28 = vadd.f32 %v535_v21, %v11181_v23 }
 0x350   :  { %v539_v24 = vpop.f32.mrb[2].mxu1 }
 0x351   :  { %v11187_v26 = vadd.f32 %v539_v24, %v11178_v22  ;;  %v541_v27 = vpop.f32.mrb[3].mxu1 }
 0x352   :  { %v542_v29 = vadd.f32 %v541_v27, %v11181_v23 }
 0x353   :  { %v11193_v30 = vpack.i.bf16 %v11187_v26, %v11184_v25 }
 0x354   :  { %v545_v31 = vpop.f32.mrb[4].mxu1  ;;  %v9855_v32 = vpack.c.bf16 %v542_v29, %v536_v28  ;;  %v11195_v33 = vpack.i.bf16 %v542_v29, %v536_v28 }
 0x355   :  { %v11198_v34 = vadd.f32 %v545_v31, %v11178_v22  ;;  %v547_v35 = vpop.f32.mrb[5].mxu1  ;;  %10272 = vrot.lane.b32.xlu0 %v11193_v30, %s10850_s0 }
 0x356   :  { %v11238_v50 = vadd.f32 %v547_v35, %v11181_v23 }
 0x357   :  { %583 = vrot.lane.b32.xlu1 %v11198_v34, %s10850_s0 }
 0x359   :  { %807 = vrot.lane.b32.xlu0 %v11184_v25, %s10852_s5 }
 0x35b   :  { %10277 = vrot.lane.b32.xlu1 %v11193_v30, %s10853_s9 }
 0x35d   :  { %811 = vrot.lane.b32.xlu0 %v11198_v34, %s10852_s5 }
 0x35f   :  { %817 = vrot.lane.b32.xlu1 %v11198_v34, %s10853_s9 }
 0x363   :  { %809 = vrot.lane.b32.xlu1 %v11187_v26, %s10852_s5 }
 0x3c7   :  { %v10273_v36 = vpop.permute.xlu0 %10272 }
 0x3c8   :  { %v10275_v37 = vunpack.i.h.bf16 %v10273_v36  ;;  %v10274_v38 = vunpack.i.l.bf16 %v10273_v36 }
 0x3c9   :  { %v584_v39 = vpop.permute.xlu1 %583 }
 0x3ca   :  { %v9851_v43 = vpack.c.bf16 %v10275_v37, %v10274_v38 }
 0x3cb   :  { %v808_v51 = vpop.permute.xlu0 %807 }
 0x3cc   :  { %9853 = vmatpush3.bf16.xpose.msk.msra.mxu0 %vm11220_vm5, %v9851_v43 }
 0x3cd   :  { %v10278_v44 = vpop.permute.xlu1 %10277  ;;  %9069 = vmatprep.subr.mxu0 %v10848_v13 }
 0x3ce   :  { %v10280_v45 = vunpack.i.h.bf16 %v10278_v44  ;;  %v10279_v47 = vunpack.i.l.bf16 %v10278_v44 }
 0x3cf   :  { %v812_v53 = vpop.permute.xlu0 %811 }
 0x3d0   :  { %v9858_v48 = vpack.c.bf16 %v10280_v45, %v10279_v47 }
 0x3d1   :  { %v818_v49 = vpop.permute.xlu1 %817 }
 0x3d2   :  { %9860 = vmatpush3.bf16.xpose.msk.msra.mxu1 %vm11220_vm5, %v9858_v48 }
 0x3d3   :  { %9099 = vmatprep.subr.mxu1 %v10848_v13 }
 0x3d4   :  { %9070 = vmatpush3.xpose.msk.msra.mxu0 %vm585_vm4, %v584_v39 }
 0x3d5   :  { %9854 = vmatprep.subr.bf16.mxu0 %v10849_v20  ;;  %v810_v52 = vpop.permute.xlu1 %809 }
 0x3d7   :  { %9072 = vmatmul.mubr.msk.f32.vlgmr.msra.gmra.mrb[4].mxu0 %vm585_vm4, %v11184_v25 }
 0x3d8   :  { %9856 = vmatpush3.bf16.msra.mxu0 %v9855_v32  ;;  %9074 = vmatprep.mubr.msk.f32.mxu0 %vm10851_vm3, %v10848_v13 }
 0x3d9   :  { %9084 = vmatprep.subr.mxu0 %v10848_v13 }
 0x3da   :  { %9100 = vmatpush3.xpose.msk.msra.mxu1 %vm585_vm4, %v818_v49 }
 0x3db   :  { %9075 = vmatmul.mubr.msk.f32.gmra.mrb[6].mxu0 %vm585_vm4, %v11187_v26  ;;  %10215 = vmatprep.subr.bf16.mxu1 %v10849_v20 }
 0x3dc   :  { %9085 = vmatpush3.msra.mxu0 %v11238_v50  ;;  %9077 = vmatprep.mubr.msk.f32.mxu0 %vm10851_vm3, %v10848_v13 }
 0x3dd   :  { %9102 = vmatmul.mubr.msk.f32.vlgmr.msra.gmra.mrb[12].mxu1 %vm585_vm4, %v808_v51  ;;  %9861 = vmatprep.subr.bf16.mxu0 %v10849_v20 }
 0x3de   :  { %9104 = vmatprep.mubr.msk.f32.mxu1 %vm10851_vm3, %v10848_v13 }
 0x3df   :  { %9078 = vmatmul.mubr.msk.f32.gmra.mrb[8].mxu0 %vm585_vm4, %v11198_v34 }
 0x3e0   :  { %9086 = vmatprep.mubr.msk.f32.mxu0 %vm10851_vm3, %v10848_v13 }
 0x3e1   :  { %9105 = vmatmul.mubr.msk.f32.gmra.mrb[14].mxu1 %vm585_vm4, %v810_v52 }
 0x3e2   :  { %9107 = vmatprep.mubr.msk.f32.mxu1 %vm10851_vm3, %v10848_v13 }
 0x3e5   :  { %9108 = vmatmul.mubr.msk.f32.gmra.mrb[16].mxu1 %vm585_vm4, %v812_v53 }
 0x3e6   :  { %9122 = vmatprep.mubr.msk.f32.mxu1 %vm10851_vm3, %v10848_v13 }
 0x3f0   :  { %v11261_v54 = vpop.f32.mrb[6].mxu1 }
 0x3f1   :  { %v553_v41 = vpop.f32.mrb[7].mxu1 }
 0x3f2   :  { %v11266_v57 = vadd.f32 %v553_v41, %v11181_v23 }
 0x3f4   :  { %v11263_v55 = vpop.f32.mrb[8].mxu1 }
 0x3f5   :  { %v559_v56 = vpop.f32.mrb[9].mxu1 }
 0x3f6   :  { %v11269_v46 = vadd.f32 %v559_v56, %v11181_v23 }
 0x3f8   :  { %v11271_v58 = vpop.f32.mrb[10].mxu1  ;;  %v9895_v40 = vpack.c.bf16 %v11269_v46, %v11266_v57  ;;  %v11277_v59 = vpack.i.bf16 %v11269_v46, %v11266_v57 }
 0x3f9   :  { %v11279_v60 = vpop.f32.mrb[11].mxu1 }
 0x4aa   :  { %v664_v62 = vpop.f32.mrb[4].mxu0 }
 0x4ab   :  { %v678_v63 = vmul.f32 0.25, %v664_v62  ;;  %v9073_v0 = vpop.f32.mrb[5].mxu0 }
 0x4ad   :  { %v681_v1 = vsel %vm315_vm6, %v678_v63, -1e+30 }
 0x4ae   :  { %v669_v2 = vpop.f32.mrb[6].mxu0  ;;  %v685_v3 = vsel %vm684_vm7, %v681_v1, -inf }
 0x4af   :  { %v679_v4 = vmul.f32 0.25, %v669_v2  ;;  %686 = vmax.xlane.f32.xlu1 %v685_v3  ;;  %v9076_v5 = vpop.f32.mrb[7].mxu0 }
 0x4b0   :  { %v897_v6 = vpop.f32.mrb[12].mxu1 }
 0x4b1   :  { %v9103_v7 = vpop.f32.mrb[13].mxu1  ;;  %v682_v8 = vsel %vm315_vm6, %v679_v4, -1e+30  ;;  %v911_v11 = vmul.f32 0.25, %v897_v6 }
 0x4b2   :  { %v674_v9 = vpop.f32.mrb[8].mxu0  ;;  %v688_v10 = vsel %vm684_vm7, %v682_v8, -inf }
 0x4b3   :  { %v680_v12 = vmul.f32 0.25, %v674_v9  ;;  %689 = vmax.xlane.f32.xlu0 %v688_v10  ;;  %v9079_v14 = vpop.f32.mrb[9].mxu0  ;;  %v914_v29 = vsel %vm315_vm6, %v911_v11, -1e+30 }
 0x4b4   :  { %v902_v17 = vpop.f32.mrb[14].mxu1  ;;  %v917_v37 = vsel %vm684_vm7, %v914_v29, -inf }
 0x4b5   :  { %v912_v19 = vmul.f32 0.25, %v902_v17  ;;  %v9106_v21 = vpop.f32.mrb[15].mxu1  ;;  %v683_v24 = vsel %vm315_vm6, %v680_v12, -1e+30 }
 0x4b6   :  { %v691_v27 = vsel %vm684_vm7, %v683_v24, -inf }
 0x4b7   :  { %692 = vmax.xlane.f32.xlu0 %v691_v27  ;;  %v915_v28 = vsel %vm315_vm6, %v912_v19, -1e+30 }
 0x4b8   :  { %v907_v31 = vpop.f32.mrb[16].mxu1  ;;  %v920_v32 = vsel %vm684_vm7, %v915_v28, -inf }
 0x4b9   :  { %v913_v35 = vmul.f32 0.25, %v907_v31  ;;  %v9109_v36 = vpop.f32.mrb[17].mxu1  ;;  %921 = vmax.xlane.f32.xlu1 %v920_v32 }
 0x4bb   :  { %918 = vmax.xlane.f32.xlu0 %v917_v37  ;;  %v916_v38 = vsel %vm315_vm6, %v913_v35, -1e+30 }
 0x4bc   :  { %v923_v39 = vsel %vm684_vm7, %v916_v38, -inf }
 0x4bf   :  { %924 = vmax.xlane.f32.xlu0 %v923_v39 }
 0x53c   :  { %v687_v43 = vpop.xlane.xlu1 %686 }
 0x53d   :  { %v694_v44 = vsub.f32 %v681_v1, %v687_v43 }
 0x53f   :  { %v697_v45 = vmul.f32 1.442695, %v694_v44 }
 0x540   :  { %v690_v47 = vpop.xlane.xlu0 %689 }
 0x541   :  { %10423 = vpow2.f32 %v697_v45  ;;  %v695_v52 = vsub.f32 %v682_v8, %v690_v47 }
 0x543   :  { %v699_v2 = vmul.f32 1.442695, %v695_v52 }
 0x544   :  { %v693_v48 = vpop.xlane.xlu0 %692 }
 0x545   :  { %v696_v49 = vsub.f32 %v683_v24, %v693_v48 }
 0x546   :  { %v922_v51 = vpop.xlane.xlu1 %921 }
 0x547   :  { %v927_v53 = vsub.f32 %v915_v28, %v922_v51  ;;  %v701_v41 = vmul.f32 1.442695, %v696_v49 }
 0x548   :  { %v919_v56 = vpop.xlane.xlu0 %918 }
 0x549   :  { %v931_v62 = vmul.f32 1.442695, %v927_v53  ;;  %v926_v63 = vsub.f32 %v914_v29, %v919_v56  ;;  %v568_v53 = vld [vmem:[%s10912_s14] sm:$0xff] }
 0x54b   :  { %v10424_v0 = vpop.eup %10423  ;;  %10425 = vpow2.f32 %v931_v62  ;;  %v929_v3 = vmul.f32 1.442695, %v926_v63 }
 0x54c   :  { %10427 = vpow2.f32 %v701_v41  ;;  %v925_v4 = vpop.xlane.xlu0 %924  ;;  %v703_v1 = vsel %vm684_vm7, %v10424_v0, 0.0  ;;  %v569_v41 = vld [vmem:[%s10912_s14 + $0x8] sm:$0xff] }
 0x54d   :  { %10429 = vpow2.f32 %v929_v3  ;;  %v928_v5 = vsub.f32 %v916_v38, %v925_v4  ;;  %704 = vadd.xlane.f32.xlu1 %v703_v1  ;;  %v11345_v62 = vpack.c.bf16 %v569_v41, %v568_v53  ;;  %v570_v3 = vld [vmem:[%s10912_s14 + $0x10] sm:$0xff]  ;;  %v571_v4 = vld [vmem:[%s10912_s14 + $0x18] sm:$0xff] }
 0x54e   :  { %10431 = vpow2.f32 %v699_v2  ;;  %v11361_v1 = vpack.c.bf16 %v571_v4, %v570_v3 }
 0x54f   :  { %v933_v6 = vmul.f32 1.442695, %v928_v5 }
 0x551   :  { %10433 = vpow2.f32 %v933_v6 }
 0x555   :  { %v11304_v7 = vpop.eup %10425 }
 0x556   :  { %v10428_v8 = vpop.eup %10427  ;;  %v938_v9 = vsel %vm684_vm7, %v11304_v7, 0.0 }
 0x557   :  { %v11308_v10 = vpop.eup %10429  ;;  %939 = vadd.xlane.f32.xlu1 %v938_v9  ;;  %v709_v14 = vsel %vm684_vm7, %v10428_v8, 0.0 }
 0x558   :  { %v935_v11 = vsel %vm684_vm7, %v11308_v10, 0.0  ;;  %v10432_v12 = vpop.eup %10431 }
 0x559   :  { %936 = vadd.xlane.f32.xlu0 %v935_v11  ;;  %v706_v17 = vsel %vm684_vm7, %v10432_v12, 0.0 }
 0x55b   :  { %710 = vadd.xlane.f32.xlu1 %v709_v14  ;;  %v10434_v19 = vpop.eup %10433 }
 0x55c   :  { %v941_v21 = vsel %vm684_vm7, %v10434_v19, 0.0 }
 0x55d   :  { %707 = vadd.xlane.f32.xlu0 %v706_v17 }
 0x561   :  { %942 = vadd.xlane.f32.xlu0 %v941_v21 }
 0x56c   :  { %10282 = vrot.lane.b32.xlu1 %v11195_v33, %s10852_s5 }
 0x570   :  { %10287 = vrot.lane.b32.xlu1 %v11193_v30, %s10854_s13 }
 0x574   :  { %1239 = vrot.lane.b32.xlu1 %v11198_v34, %s10854_s13 }
 0x577   :  { %957 = vrot.lane.b32.xlu0 %v11238_v50, %s10852_s5 }
 0x578   :  { %1229 = vrot.lane.b32.xlu1 %v11184_v25, %s10855_s17 }
 0x57b   :  { %1231 = vrot.lane.b32.xlu0 %v11187_v26, %s10855_s17 }
 0x57c   :  { %1233 = vrot.lane.b32.xlu1 %v11198_v34, %s10855_s17 }
 0x5da   :  { %v705_v24 = vpop.xlane.xlu1 %704 }
 0x5db   :  { %10435 = vrcp.f32 %v705_v24 }
 0x5e4   :  { %v940_v27 = vpop.xlane.xlu1 %939 }
 0x5e5   :  { %v10436_v28 = vpop.eup %10435 }
 0x5e6   :  { %v715_v29 = vmul.f32 %v10436_v28, %v10424_v0  ;;  %v937_v31 = vpop.xlane.xlu0 %936 }
 0x5e8   :  { %9087 = vmatmul.mubr.msk.f32.vlgmr.msra.gmra.mrb[10].mxu0 %vm684_vm7, %v715_v29  ;;  %v711_v32 = vpop.xlane.xlu1 %710 }
 0x5e9   :  { %9089 = vmatprep.mubr.msk.f32.mxu0 %vm10851_vm3, %v10848_v13 }
 0x5ea   :  { %v708_v35 = vpop.xlane.xlu0 %707 }
 0x5eb   :  { %10437 = vrcp.f32 %v708_v35 }
 0x5ec   :  { %v10283_v36 = vpop.permute.xlu1 %10282  ;;  %10439 = vrcp.f32 %v711_v32 }
 0x5ed   :  { %v10285_v37 = vunpack.i.h.bf16 %v10283_v36  ;;  %v10284_v38 = vunpack.i.l.bf16 %v10283_v36 }
 0x5ee   :  { %v943_v39 = vpop.xlane.xlu0 %942 }
 0x5ef   :  { %v9862_v43 = vpack.c.bf16 %v10285_v37, %v10284_v38  ;;  %10441 = vrcp.f32 %v943_v39 }
 0x5f0   :  { %10443 = vrcp.f32 %v937_v31 }
 0x5f1   :  { %9863 = vmatpush3.bf16.msra.mxu0 %v9862_v43  ;;  %10217 = vmatpush3.bf16.msra.mxu1 %v9862_v43  ;;  %10445 = vrcp.f32 %v940_v27 }
 0x5f2   :  { %9114 = vmatprep.subr.mxu0 %v10848_v13  ;;  %10216 = vmatprep.subr.mxu1 %v10848_v13  ;;  %v958_v44 = vpop.permute.xlu0 %957 }
 0x5f5   :  { %v10438_v45 = vpop.eup %10437  ;;  %9115 = vmatpush3.msra.mxu0 %v958_v44  ;;  %10218 = vmatpush3.msra.mxu1 %v958_v44 }
 0x5f6   :  { %v716_v47 = vmul.f32 %v10438_v45, %v10432_v12  ;;  %9867 = vmatprep.subr.bf16.mxu0 %v10849_v20  ;;  %9864 = vmatprep.subr.bf16.mxu1 %v10849_v20  ;;  %v10440_v48 = vpop.eup %10439  ;;  %v1232_v35 = vpop.permute.xlu0 %1231 }
 0x5f7   :  { %v717_v52 = vmul.f32 %v10440_v48, %v10428_v8  ;;  %v10288_v8 = vpop.permute.xlu1 %10287 }
 0x5f8   :  { %9090 = vmatmul.mubr.msk.f32.gmra.mrb[12].mxu0 %vm684_vm7, %v716_v47  ;;  %v10289_v11 = vunpack.i.l.bf16 %v10288_v8 }
 0x5f9   :  { %v10442_v49 = vpop.eup %10441  ;;  %9092 = vmatprep.mubr.msk.f32.mxu0 %vm10851_vm3, %v10848_v13 }
 0x5fa   :  { %v949_v51 = vmul.f32 %v10442_v49, %v10434_v19  ;;  %v10444_v56 = vpop.eup %10443 }
 0x5fb   :  { %v947_v63 = vmul.f32 %v10444_v56, %v11308_v10  ;;  %v10446_v0 = vpop.eup %10445  ;;  %v10290_v10 = vunpack.i.h.bf16 %v10288_v8  ;;  %v1240_v31 = vpop.permute.xlu1 %1239 }
 0x5fc   :  { %9093 = vmatmul.mubr.msk.f32.gmra.mrb[14].mxu0 %vm684_vm7, %v717_v52  ;;  %9123 = vmatmul.mubr.msk.f32.vlgmr.msra.gmra.mrb[18].mxu1 %vm684_vm7, %v949_v51  ;;  %v948_v2 = vmul.f32 %v10446_v0, %v11304_v7 }
 0x5fd   :  { %9116 = vmatprep.mubr.msk.f32.mxu0 %vm10851_vm3, %v10848_v13  ;;  %9129 = vmatprep.mubr.msk.f32.mxu1 %vm10851_vm3, %v10848_v13  ;;  %v9871_v21 = vpack.c.bf16 %v10290_v10, %v10289_v11 }
 0x5fe   :  { %9866 = vmatpush3.bf16.msra.mxu1 %v11361_v1 }
 0x5ff   :  { %9870 = vmatprep.subr.bf16.mxu1 %v10849_v20  ;;  %v1230_v32 = vpop.permute.xlu1 %1229 }
 0x600   :  { %9117 = vmatmul.mubr.msk.f32.vlgmr.msra.gmra.mrb[16].mxu0 %vm684_vm7, %v947_v63 }
 0x601   :  { %9119 = vmatprep.mubr.msk.f32.mxu0 %vm10851_vm3, %v10848_v13  ;;  %9869 = vmatpush3.bf16.msra.mxu0 %v11345_v62 }
 0x602   :  { %9874 = vmatprep.subr.bf16.mxu0 %v10849_v20 }
 0x603   :  { %v1234_v36 = vpop.permute.xlu1 %1233 }
 0x604   :  { %9120 = vmatmul.mubr.msk.f32.gmra.mrb[18].mxu0 %vm684_vm7, %v948_v2 }
 0x605   :  { %9142 = vmatprep.mubr.msk.f32.mxu0 %vm10851_vm3, %v10848_v13 }
 0x6bb   :  { %v793_v5 = vpop.f32.mrb[10].mxu0 }
 0x6bc   :  { %v9088_v6 = vpop.f32.mrb[11].mxu0  ;;  %9143 = vmatmul.mubr.msk.f32.vlgmr.msra.gmra.mrb[20].mxu0 %vm585_vm4, %v793_v5 }
 0x6bd   :  { %9145 = vmatprep.mubr.msk.f32.mxu0 %vm10851_vm3, %v10848_v13 }
 0x6cb   :  { %v798_v7 = vpop.f32.mrb[12].mxu0 }
 0x6cc   :  { %v9091_v9 = vpop.f32.mrb[13].mxu0  ;;  %9146 = vmatmul.mubr.msk.f32.gmra.mrb[22].mxu0 %vm585_vm4, %v798_v7 }
 0x6cd   :  { %9148 = vmatprep.mubr.msk.f32.mxu0 %vm10851_vm3, %v10848_v13 }
 0x6cf   :  { %v803_v12 = vpop.f32.mrb[14].mxu0  ;;  %v1047_v14 = vpop.f32.mrb[18].mxu1 }
 0x6d0   :  { %v9094_v17 = vpop.f32.mrb[15].mxu0  ;;  %v9124_v19 = vpop.f32.mrb[19].mxu1  ;;  %9149 = vmatmul.mubr.msk.f32.gmra.mrb[24].mxu0 %vm585_vm4, %v803_v12 }
 0x6d1   :  { %9172 = vmatprep.mubr.msk.f32.mxu0 %vm10851_vm3, %v10848_v13 }
 0x6d3   :  { %v1037_v24 = vpop.f32.mrb[16].mxu0 }
 0x6d4   :  { %v9118_v27 = vpop.f32.mrb[17].mxu0  ;;  %9130 = vmatmul.mubr.msk.f32.vlgmr.msra.gmra.mrb[20].mxu1 %vm585_vm4, %v1037_v24 }
 0x6d5   :  { %9873 = vmatpush3.bf16.xpose.msk.msra.mxu1 %vm11220_vm5, %v9871_v21  ;;  %9132 = vmatprep.mubr.msk.f32.mxu1 %vm10851_vm3, %v10848_v13 }
 0x6d6   :  { %9155 = vmatprep.subr.mxu1 %v10848_v13 }
 0x6d7   :  { %v1042_v28 = vpop.f32.mrb[18].mxu0 }
 0x6d8   :  { %v9121_v29 = vpop.f32.mrb[19].mxu0  ;;  %9133 = vmatmul.mubr.msk.f32.gmra.mrb[22].mxu1 %vm585_vm4, %v1042_v28 }
 0x6d9   :  { %9135 = vmatprep.mubr.msk.f32.mxu1 %vm10851_vm3, %v10848_v13 }
 0x6dc   :  { %9136 = vmatmul.mubr.msk.f32.gmra.mrb[24].mxu1 %vm585_vm4, %v1047_v14 }
 0x6dd   :  { %9156 = vmatpush3.xpose.msk.msra.mxu1 %vm585_vm4, %v1240_v31  ;;  %9157 = vmatprep.mubr.msk.f32.mxu1 %vm10851_vm3, %v10848_v13 }
 0x6de   :  { %9877 = vmatprep.subr.bf16.mxu1 %v10849_v20 }
 0x6e0   :  { %9158 = vmatmul.mubr.msk.f32.vlgmr.msra.gmra.mrb[26].mxu1 %vm585_vm4, %v1230_v32 }
 0x6e1   :  { %9160 = vmatprep.mubr.msk.f32.mxu1 %vm10851_vm3, %v10848_v13 }
 0x6e4   :  { %9161 = vmatmul.mubr.msk.f32.gmra.mrb[28].mxu1 %vm585_vm4, %v1232_v35 }
 0x6e5   :  { %9163 = vmatprep.mubr.msk.f32.mxu1 %vm10851_vm3, %v10848_v13 }
 0x6e8   :  { %9164 = vmatmul.mubr.msk.f32.gmra.mrb[30].mxu1 %vm585_vm4, %v1234_v36 }
 0x6e9   :  { %9185 = vmatprep.mubr.msk.f32.mxu1 %vm10851_vm3, %v10848_v13 }
 0x78f   :  { %v1215_v37 = vpop.f32.mrb[20].mxu0 }
 0x790   :  { %v9144_v38 = vpop.f32.mrb[21].mxu0 }
 0x79f   :  { %v1220_v39 = vpop.f32.mrb[22].mxu0 }
 0x7a0   :  { %v9147_v43 = vpop.f32.mrb[23].mxu0 }
 0x7a3   :  { %v1225_v44 = vpop.f32.mrb[24].mxu0 }
 0x7a4   :  { %v9150_v45 = vpop.f32.mrb[25].mxu0 }
 0x7a5   :  { %v572_v45 = vld [vmem:[%s10912_s14 + $0x20] sm:$0xff] }
 0x7a7   :  { %v1126_v47 = vpop.f32.mrb[20].mxu1 }
 0x7a8   :  { %v11397_v48 = vadd.f32 %v1215_v37, %v1126_v47  ;;  %v9131_v49 = vpop.f32.mrb[21].mxu1  ;;  %v573_v47 = vld [vmem:[%s10912_s14 + $0x28] sm:$0xff] }
 0x7a9   :  { %v11431_v49 = vpack.c.bf16 %v573_v47, %v572_v45 }
 0x7ab   :  { %v1131_v51 = vpop.f32.mrb[22].mxu1  ;;  %9879 = vmatpush3.bf16.msra.mxu1 %v11431_v49 }
 0x7ac   :  { %v11399_v52 = vadd.f32 %v1220_v39, %v1131_v51  ;;  %v9134_v53 = vpop.f32.mrb[23].mxu1  ;;  %9884 = vmatprep.subr.bf16.mxu1 %v10849_v20 }
 0x7af   :  { %v1136_v41 = vpop.f32.mrb[24].mxu1 }
 0x7b0   :  { %v11401_v56 = vadd.f32 %v1225_v44, %v1136_v41  ;;  %v9137_v63 = vpop.f32.mrb[25].mxu1 }
 0x7b3   :  { %v1319_v0 = vpop.f32.mrb[26].mxu1 }
 0x7b4   :  { %v1333_v2 = vmul.f32 0.25, %v1319_v0  ;;  %v9159_v3 = vpop.f32.mrb[27].mxu1 }
 0x7b6   :  { %v1336_v4 = vsel %vm315_vm6, %v1333_v2, -1e+30 }
 0x7b7   :  { %v1324_v5 = vpop.f32.mrb[28].mxu1  ;;  %v1339_v6 = vsel %vm684_vm7, %v1336_v4, -inf }
 0x7b8   :  { %v1334_v7 = vmul.f32 0.25, %v1324_v5  ;;  %1340 = vmax.xlane.f32.xlu0 %v1339_v6  ;;  %v9162_v8 = vpop.f32.mrb[29].mxu1 }
 0x7ba   :  { %v1337_v9 = vsel %vm315_vm6, %v1334_v7, -1e+30 }
 0x7bb   :  { %v1329_v10 = vpop.f32.mrb[30].mxu1  ;;  %v1342_v11 = vsel %vm684_vm7, %v1337_v9, -inf }
 0x7bc   :  { %v1335_v12 = vmul.f32 0.25, %v1329_v10  ;;  %1343 = vmax.xlane.f32.xlu1 %v1342_v11  ;;  %v9165_v14 = vpop.f32.mrb[31].mxu1 }
 0x7be   :  { %v1338_v17 = vsel %vm315_vm6, %v1335_v12, -1e+30 }
 0x7bf   :  { %v1345_v19 = vsel %vm684_vm7, %v1338_v17, -inf }
 0x7c0   :  { %1346 = vmax.xlane.f32.xlu0 %v1345_v19 }
 0x7cd   :  { %1376 = vrot.lane.b32.xlu1 %v11238_v50, %s10855_s17 }
 0x7d1   :  { %10297 = vrot.lane.b32.xlu1 %v11193_v30, %s10856_s21 }
 0x7d5   :  { %1572 = vrot.lane.b32.xlu1 %v11198_v34, %s10856_s21 }
 0x845   :  { %v1341_v21 = vpop.xlane.xlu0 %1340 }
 0x846   :  { %v1348_v24 = vsub.f32 %v1336_v4, %v1341_v21 }
 0x848   :  { %v1351_v27 = vmul.f32 1.442695, %v1348_v24 }
 0x849   :  { %v1344_v28 = vpop.xlane.xlu1 %1343 }
 0x84a   :  { %10447 = vpow2.f32 %v1351_v27  ;;  %v1349_v29 = vsub.f32 %v1337_v9, %v1344_v28 }
 0x84c   :  { %v1353_v31 = vmul.f32 1.442695, %v1349_v29 }
 0x84d   :  { %v1347_v32 = vpop.xlane.xlu0 %1346  ;;  %v1377_v51 = vpop.permute.xlu1 %1376 }
 0x84e   :  { %10449 = vpow2.f32 %v1353_v31  ;;  %v1350_v35 = vsub.f32 %v1338_v17, %v1347_v32 }
 0x850   :  { %v1355_v36 = vmul.f32 1.442695, %v1350_v35 }
 0x851   :  { %v10298_v53 = vpop.permute.xlu1 %10297 }
 0x852   :  { %10451 = vpow2.f32 %v1355_v36  ;;  %v10300_v7 = vunpack.i.h.bf16 %v10298_v53  ;;  %v10299_v8 = vunpack.i.l.bf16 %v10298_v53 }
 0x854   :  { %v10448_v37 = vpop.eup %10447  ;;  %v9881_v11 = vpack.c.bf16 %v10300_v7, %v10299_v8 }
 0x855   :  { %v1357_v30 = vsel %vm684_vm7, %v10448_v37, 0.0  ;;  %v1573_v41 = vpop.permute.xlu1 %1572 }
 0x856   :  { %1358 = vadd.xlane.f32.xlu0 %v1357_v30 }
 0x858   :  { %v10450_v38 = vpop.eup %10449 }
 0x859   :  { %v1360_v39 = vsel %vm684_vm7, %v10450_v38, 0.0 }
 0x85a   :  { %1361 = vadd.xlane.f32.xlu0 %v1360_v39 }
 0x85c   :  { %v10452_v43 = vpop.eup %10451 }
 0x85d   :  { %v1363_v44 = vsel %vm684_vm7, %v10452_v43, 0.0 }
 0x85e   :  { %1364 = vadd.xlane.f32.xlu1 %v1363_v44 }
 0x86f   :  { %1564 = vrot.lane.b32.xlu1 %v11187_v26, %s10857_s25 }
 0x870   :  { %10292 = vrot.lane.b32.xlu0 %v11195_v33, %s10855_s17 }
 0x874   :  { %1562 = vrot.lane.b32.xlu0 %v11184_v25, %s10857_s25 }
 0x878   :  { %1566 = vrot.lane.b32.xlu0 %v11198_v34, %s10857_s25 }
 0x8e3   :  { %v1359_v26 = vpop.xlane.xlu0 %1358 }
 0x8e4   :  { %10453 = vrcp.f32 %v1359_v26 }
 0x8e7   :  { %v1362_v63 = vpop.xlane.xlu0 %1361 }
 0x8e8   :  { %10455 = vrcp.f32 %v1362_v63 }
 0x8eb   :  { %v1365_v0 = vpop.xlane.xlu1 %1364  ;;  %v10293_v25 = vpop.permute.xlu0 %10292 }
 0x8ec   :  { %v10295_v2 = vunpack.i.h.bf16 %v10293_v25  ;;  %v10294_v3 = vunpack.i.l.bf16 %v10293_v25  ;;  %10457 = vrcp.f32 %v1365_v0 }
 0x8ee   :  { %v9875_v34 = vpack.c.bf16 %v10295_v2, %v10294_v3  ;;  %v10454_v4 = vpop.eup %10453 }
 0x8ef   :  { %v1369_v5 = vmul.f32 %v10454_v4, %v10448_v37  ;;  %v1563_v14 = vpop.permute.xlu0 %1562  ;;  %v1565_v17 = vpop.permute.xlu1 %1564 }
 0x8f0   :  { %9876 = vmatpush3.bf16.msra.mxu0 %v9875_v34 }
 0x8f1   :  { %9170 = vmatprep.subr.mxu0 %v10848_v13 }
 0x8f2   :  { %v10456_v6 = vpop.eup %10455 }
 0x8f3   :  { %v1370_v9 = vmul.f32 %v10456_v6, %v10450_v38  ;;  %v1567_v19 = vpop.permute.xlu0 %1566 }
 0x8f4   :  { %9171 = vmatpush3.msra.mxu0 %v1377_v51 }
 0x8f5   :  { %9173 = vmatmul.mubr.msk.f32.vlgmr.msra.gmra.mrb[26].mxu0 %vm684_vm7, %v1369_v5  ;;  %9880 = vmatprep.subr.bf16.mxu0 %v10849_v20 }
 0x8f6   :  { %9175 = vmatprep.mubr.msk.f32.mxu0 %vm10851_vm3, %v10848_v13  ;;  %v10458_v10 = vpop.eup %10457 }
 0x8f7   :  { %v1371_v12 = vmul.f32 %v10458_v10, %v10452_v43 }
 0x8f9   :  { %9176 = vmatmul.mubr.msk.f32.gmra.mrb[28].mxu0 %vm684_vm7, %v1370_v9 }
 0x8fa   :  { %9178 = vmatprep.mubr.msk.f32.mxu0 %vm10851_vm3, %v10848_v13 }
 0x8fb   :  { %9883 = vmatpush3.bf16.xpose.msk.msra.mxu0 %vm11220_vm5, %v9881_v11 }
 0x8fc   :  { %9198 = vmatprep.subr.mxu0 %v10848_v13 }
 0x8fd   :  { %9179 = vmatmul.mubr.msk.f32.gmra.mrb[30].mxu0 %vm684_vm7, %v1371_v12 }
 0x8fe   :  { %9200 = vmatprep.mubr.msk.f32.mxu0 %vm10851_vm3, %v10848_v13 }
 0x903   :  { %9199 = vmatpush3.xpose.msk.msra.mxu0 %vm585_vm4, %v1573_v41 }
 0x904   :  { %9887 = vmatprep.subr.bf16.mxu0 %v10849_v20 }
 0x906   :  { %9201 = vmatmul.mubr.msk.f32.vlgmr.msra.gmra.mrb[32].mxu0 %vm585_vm4, %v1563_v14 }
 0x907   :  { %9203 = vmatprep.mubr.msk.f32.mxu0 %vm10851_vm3, %v10848_v13 }
 0x90a   :  { %9204 = vmatmul.mubr.msk.f32.gmra.mrb[34].mxu0 %vm585_vm4, %v1565_v17 }
 0x90b   :  { %9206 = vmatprep.mubr.msk.f32.mxu0 %vm10851_vm3, %v10848_v13 }
 0x90e   :  { %9207 = vmatmul.mubr.msk.f32.gmra.mrb[36].mxu0 %vm585_vm4, %v1567_v19 }
 0x90f   :  { %9228 = vmatprep.mubr.msk.f32.mxu0 %vm10851_vm3, %v10848_v13 }
 0x9c8   :  { %v1456_v21 = vpop.f32.mrb[26].mxu0 }
 0x9c9   :  { %v9174_v24 = vpop.f32.mrb[27].mxu0  ;;  %9186 = vmatmul.mubr.msk.f32.vlgmr.msra.gmra.mrb[32].mxu1 %vm585_vm4, %v1456_v21  ;;  %v11486_v21 = vadd.f32 %v11263_v55, %v11178_v22 }
 0x9ca   :  { %9188 = vmatprep.mubr.msk.f32.mxu1 %vm10851_vm3, %v10848_v13  ;;  %v11490_v24 = vadd.f32 %v11261_v54, %v11178_v22 }
 0x9cc   :  { %v1461_v27 = vpop.f32.mrb[28].mxu0 }
 0x9cd   :  { %v9177_v28 = vpop.f32.mrb[29].mxu0  ;;  %9189 = vmatmul.mubr.msk.f32.gmra.mrb[34].mxu1 %vm585_vm4, %v1461_v27  ;;  %v11494_v27 = vpack.i.bf16 %v11486_v21, %v11490_v24 }
 0x9ce   :  { %9191 = vmatprep.mubr.msk.f32.mxu1 %vm10851_vm3, %v10848_v13  ;;  %v11500_v28 = vadd.f32 %v11271_v58, %v11178_v22 }
 0x9d0   :  { %v1466_v29 = vpop.f32.mrb[30].mxu0 }
 0x9d1   :  { %v9180_v31 = vpop.f32.mrb[31].mxu0  ;;  %9192 = vmatmul.mubr.msk.f32.gmra.mrb[36].mxu1 %vm585_vm4, %v1466_v29 }
 0x9d2   :  { %9215 = vmatprep.mubr.msk.f32.mxu1 %vm10851_vm3, %v10848_v13 }
 0x9d9   :  { %v1652_v32 = vpop.f32.mrb[32].mxu0 }
 0x9da   :  { %v1666_v35 = vmul.f32 0.25, %v1652_v32  ;;  %v9202_v36 = vpop.f32.mrb[33].mxu0 }
 0x9db   :  { %v575_v36 = vld [vmem:[%s10912_s14 + $0x38] sm:$0xff] }
 0x9dc   :  { %v1669_v37 = vsel %vm315_vm6, %v1666_v35, -1e+30  ;;  %v574_v35 = vld [vmem:[%s10912_s14 + $0x30] sm:$0xff]  ;;  %s13413_s14 = sld [smem:[#allocation11_spill]] }
 0x9dd   :  { %v1657_v30 = vpop.f32.mrb[34].mxu0  ;;  %v1672_v38 = vsel %vm684_vm7, %v1669_v37, -inf }
 0x9de   :  { %v1667_v39 = vmul.f32 0.25, %v1657_v30  ;;  %1673 = vmax.xlane.f32.xlu1 %v1672_v38  ;;  %v9205_v43 = vpop.f32.mrb[35].mxu0 }
 0x9e0   :  { %v1670_v44 = vsel %vm315_vm6, %v1667_v39, -1e+30 }
 0x9e1   :  { %v1662_v45 = vpop.f32.mrb[36].mxu0  ;;  %v1675_v47 = vsel %vm684_vm7, %v1670_v44, -inf }
 0x9e2   :  { %v1668_v51 = vmul.f32 0.25, %v1662_v45  ;;  %1676 = vmax.xlane.f32.xlu0 %v1675_v47  ;;  %v9208_v53 = vpop.f32.mrb[37].mxu0 }
 0x9e4   :  { %v1671_v26 = vsel %vm315_vm6, %v1668_v51, -1e+30 }
 0x9e5   :  { %v1678_v41 = vsel %vm684_vm7, %v1671_v26, -inf }
 0x9e6   :  { %1679 = vmax.xlane.f32.xlu0 %v1678_v41 }
 0x9ef   :  { %10302 = vrot.lane.b32.xlu1 %v11195_v33, %s10857_s25 }
 0xa6b   :  { %v1674_v63 = vpop.xlane.xlu1 %1673 }
 0xa6c   :  { %v1681_v0 = vsub.f32 %v1669_v37, %v1674_v63  ;;  %v11527_v37 = vpack.c.bf16 %v575_v36, %v574_v35 }
 0xa6e   :  { %v1684_v25 = vmul.f32 1.442695, %v1681_v0  ;;  %9889 = vmatpush3.bf16.msra.mxu0 %v11527_v37 }
 0xa6f   :  { %v10303_v2 = vpop.permute.xlu1 %10302  ;;  %v1677_v3 = vpop.xlane.xlu0 %1676  ;;  %9894 = vmatprep.subr.bf16.mxu0 %v10849_v20 }
 0xa70   :  { %10459 = vpow2.f32 %v1684_v25  ;;  %v10305_v34 = vunpack.i.h.bf16 %v10303_v2  ;;  %v10304_v4 = vunpack.i.l.bf16 %v10303_v2  ;;  %v1682_v5 = vsub.f32 %v1670_v44, %v1677_v3 }
 0xa72   :  { %v9885_v6 = vpack.c.bf16 %v10305_v34, %v10304_v4  ;;  %v1686_v7 = vmul.f32 1.442695, %v1682_v5 }
 0xa73   :  { %v1680_v8 = vpop.xlane.xlu0 %1679 }
 0xa74   :  { %10461 = vpow2.f32 %v1686_v7  ;;  %v1683_v9 = vsub.f32 %v1671_v26, %v1680_v8  ;;  %9886 = vmatpush3.bf16.msra.mxu1 %v9885_v6 }
 0xa75   :  { %9213 = vmatprep.subr.mxu1 %v10848_v13 }
 0xa76   :  { %v1688_v10 = vmul.f32 1.442695, %v1683_v9 }
 0xa78   :  { %10463 = vpow2.f32 %v1688_v10 }
 0xa7a   :  { %v10460_v33 = vpop.eup %10459 }
 0xa7b   :  { %v1690_v11 = vsel %vm684_vm7, %v10460_v33, 0.0 }
 0xa7c   :  { %1691 = vadd.xlane.f32.xlu0 %v1690_v11 }
 0xa7e   :  { %v10462_v12 = vpop.eup %10461 }
 0xa7f   :  { %v1693_v14 = vsel %vm684_vm7, %v10462_v12, 0.0 }
 0xa80   :  { %1694 = vadd.xlane.f32.xlu1 %v1693_v14 }
 0xa82   :  { %v10464_v17 = vpop.eup %10463 }
 0xa83   :  { %v1696_v19 = vsel %vm684_vm7, %v10464_v17, 0.0 }
 0xa84   :  { %1697 = vadd.xlane.f32.xlu0 %v1696_v19 }
 0xa91   :  { %10307 = vrot.lane.b32.xlu1 %v11494_v27, %s10850_s0 }
 0xa95   :  { %1902 = vrot.lane.b32.xlu1 %v11500_v28, %s10850_s0 }
 0xa99   :  { %10312 = vrot.lane.b32.xlu1 %v11494_v27, %s10853_s9 }
 0xa9a   :  { %1709 = vrot.lane.b32.xlu0 %v11238_v50, %s10857_s25 }
 0xa9c   :  { %v1545_v54 = vpop.f32.mrb[32].mxu1 }
 0xa9d   :  { %v11509_v55 = vadd.f32 %v1545_v54, %v11397_v48  ;;  %v9187_v29 = vpop.f32.mrb[33].mxu1  ;;  %2124 = vrot.lane.b32.xlu1 %v11490_v24, %s10852_s5 }
 0xa9e   :  { %2134 = vrot.lane.b32.xlu0 %v11500_v28, %s10853_s9 }
 0xaa0   :  { %v1550_v22 = vpop.f32.mrb[34].mxu1 }
 0xaa1   :  { %v11516_v58 = vadd.f32 %v1550_v22, %v11399_v52  ;;  %v9190_v31 = vpop.f32.mrb[35].mxu1  ;;  %2128 = vrot.lane.b32.xlu1 %v11500_v28, %s10852_s5 }
 0xaa2   :  { %2126 = vrot.lane.b32.xlu0 %v11486_v21, %s10852_s5 }
 0xaa4   :  { %v1555_v50 = vpop.f32.mrb[36].mxu1 }
 0xaa5   :  { %v11523_v48 = vadd.f32 %v1555_v50, %v11401_v56  ;;  %v9193_v32 = vpop.f32.mrb[37].mxu1 }
 0xb09   :  { %v1692_v52 = vpop.xlane.xlu0 %1691 }
 0xb0a   :  { %10465 = vrcp.f32 %v1692_v52 }
 0xb0d   :  { %v1695_v30 = vpop.xlane.xlu1 %1694 }
 0xb0e   :  { %10467 = vrcp.f32 %v1695_v30 }
 0xb11   :  { %v1698_v38 = vpop.xlane.xlu0 %1697  ;;  %v10308_v43 = vpop.permute.xlu1 %10307 }
 0xb12   :  { %10469 = vrcp.f32 %v1698_v38  ;;  %v10310_v45 = vunpack.i.h.bf16 %v10308_v43  ;;  %v10309_v47 = vunpack.i.l.bf16 %v10308_v43 }
 0xb14   :  { %v10466_v39 = vpop.eup %10465  ;;  %v9891_v41 = vpack.c.bf16 %v10310_v45, %v10309_v47 }
 0xb15   :  { %v1702_v44 = vmul.f32 %v10466_v39, %v10460_v33  ;;  %v1710_v56 = vpop.permute.xlu0 %1709  ;;  %v1903_v26 = vpop.permute.xlu1 %1902 }
 0xb16   :  { %9214 = vmatpush3.msra.mxu1 %v1710_v56 }
 0xb17   :  { %9216 = vmatmul.mubr.msk.f32.vlgmr.msra.gmra.mrb[38].mxu1 %vm684_vm7, %v1702_v44  ;;  %9890 = vmatprep.subr.bf16.mxu1 %v10849_v20 }
 0xb18   :  { %v10468_v51 = vpop.eup %10467  ;;  %9218 = vmatprep.mubr.msk.f32.mxu1 %vm10851_vm3, %v10848_v13 }
 0xb19   :  { %v1703_v53 = vmul.f32 %v10468_v51, %v10462_v12  ;;  %v10313_v25 = vpop.permute.xlu1 %10312  ;;  %v2135_v4 = vpop.permute.xlu0 %2134 }
 0xb1a   :  { %v10315_v2 = vunpack.i.h.bf16 %v10313_v25  ;;  %v10314_v3 = vunpack.i.l.bf16 %v10313_v25 }
 0xb1b   :  { %9219 = vmatmul.mubr.msk.f32.gmra.mrb[40].mxu1 %vm684_vm7, %v1703_v53 }
 0xb1c   :  { %v10470_v63 = vpop.eup %10469  ;;  %9221 = vmatprep.mubr.msk.f32.mxu1 %vm10851_vm3, %v10848_v13  ;;  %v9898_v34 = vpack.c.bf16 %v10315_v2, %v10314_v3 }
 0xb1d   :  { %9893 = vmatpush3.bf16.xpose.msk.msra.mxu1 %vm11220_vm5, %v9891_v41  ;;  %v1704_v0 = vmul.f32 %v10470_v63, %v10464_v17  ;;  %v2125_v5 = vpop.permute.xlu1 %2124  ;;  %v2127_v6 = vpop.permute.xlu0 %2126 }
 0xb1e   :  { %9241 = vmatprep.subr.mxu1 %v10848_v13 }
 0xb1f   :  { %9222 = vmatmul.mubr.msk.f32.gmra.mrb[42].mxu1 %vm684_vm7, %v1704_v0 }
 0xb20   :  { %9243 = vmatprep.mubr.msk.f32.mxu1 %vm10851_vm3, %v10848_v13 }
 0xb21   :  { %v2129_v7 = vpop.permute.xlu1 %2128 }
 0xb25   :  { %9242 = vmatpush3.xpose.msk.msra.mxu1 %vm585_vm4, %v1903_v26 }
 0xb26   :  { %9897 = vmatprep.subr.bf16.mxu1 %v10849_v20 }
 0xb28   :  { %9244 = vmatmul.mubr.msk.f32.vlgmr.msra.gmra.mrb[44].mxu1 %vm585_vm4, %v11490_v24 }
 0xb29   :  { %9900 = vmatpush3.bf16.xpose.msk.msra.mxu1 %vm11220_vm5, %v9898_v34  ;;  %9246 = vmatprep.mubr.msk.f32.mxu1 %vm10851_vm3, %v10848_v13 }
 0xb2a   :  { %9271 = vmatprep.subr.mxu1 %v10848_v13 }
 0xb2c   :  { %9247 = vmatmul.mubr.msk.f32.gmra.mrb[46].mxu1 %vm585_vm4, %v11486_v21 }
 0xb2d   :  { %9249 = vmatprep.mubr.msk.f32.mxu1 %vm10851_vm3, %v10848_v13 }
 0xb30   :  { %9250 = vmatmul.mubr.msk.f32.gmra.mrb[48].mxu1 %vm585_vm4, %v11500_v28 }
 0xb31   :  { %9272 = vmatpush3.xpose.msk.msra.mxu1 %vm585_vm4, %v2135_v4  ;;  %9273 = vmatprep.mubr.msk.f32.mxu1 %vm10851_vm3, %v10848_v13 }
 0xb32   :  { %9904 = vmatprep.subr.bf16.mxu1 %v10849_v20 }
 0xb34   :  { %9274 = vmatmul.mubr.msk.f32.vlgmr.msra.gmra.mrb[50].mxu1 %vm585_vm4, %v2125_v5 }
 0xb35   :  { %9276 = vmatprep.mubr.msk.f32.mxu1 %vm10851_vm3, %v10848_v13  ;;  %9906 = vmatpush3.bf16.msra.mxu1 %v11361_v1  ;;  %v11583_v1 = vadd.f32 %v11279_v60, %v11181_v23 }
 0xb36   :  { %9910 = vmatprep.subr.bf16.mxu1 %v10849_v20 }
 0xb38   :  { %9277 = vmatmul.mubr.msk.f32.gmra.mrb[52].mxu1 %vm585_vm4, %v2127_v6 }
 0xb39   :  { %9279 = vmatprep.mubr.msk.f32.mxu1 %vm10851_vm3, %v10848_v13 }
 0xb3c   :  { %9280 = vmatmul.mubr.msk.f32.gmra.mrb[54].mxu1 %vm585_vm4, %v2129_v7 }
 0xb3d   :  { %9301 = vmatprep.mubr.msk.f32.mxu1 %vm10851_vm3, %v10848_v13 }
 0xbea   :  { %v1789_v8 = vpop.f32.mrb[38].mxu1 }
 0xbeb   :  { %v9217_v9 = vpop.f32.mrb[39].mxu1  ;;  %9229 = vmatmul.mubr.msk.f32.vlgmr.msra.gmra.mrb[38].mxu0 %vm585_vm4, %v1789_v8 }
 0xbec   :  { %9896 = vmatpush3.bf16.msra.mxu0 %v9895_v40  ;;  %9231 = vmatprep.mubr.msk.f32.mxu0 %vm10851_vm3, %v10848_v13 }
 0xbed   :  { %9256 = vmatprep.subr.mxu0 %v10848_v13 }
 0xbee   :  { %v1794_v10 = vpop.f32.mrb[40].mxu1 }
 0xbef   :  { %v9220_v33 = vpop.f32.mrb[41].mxu1  ;;  %9232 = vmatmul.mubr.msk.f32.gmra.mrb[40].mxu0 %vm585_vm4, %v1794_v10 }
 0xbf0   :  { %9257 = vmatpush3.msra.mxu0 %v11583_v1  ;;  %9234 = vmatprep.mubr.msk.f32.mxu0 %vm10851_vm3, %v10848_v13 }
 0xbf1   :  { %9901 = vmatprep.subr.bf16.mxu0 %v10849_v20 }
 0xbf2   :  { %v1799_v57 = vpop.f32.mrb[42].mxu1 }
 0xbf3   :  { %v9223_v46 = vpop.f32.mrb[43].mxu1  ;;  %9235 = vmatmul.mubr.msk.f32.gmra.mrb[42].mxu0 %vm585_vm4, %v1799_v57 }
 0xbf4   :  { %9258 = vmatprep.mubr.msk.f32.mxu0 %vm10851_vm3, %v10848_v13 }
 0xbfb   :  { %v1982_v23 = vpop.f32.mrb[44].mxu1 }
 0xbfc   :  { %v1996_v40 = vmul.f32 0.25, %v1982_v23  ;;  %v9245_v60 = vpop.f32.mrb[45].mxu1 }
 0xbfe   :  { %v1999_v11 = vsel %vm315_vm6, %v1996_v40, -1e+30 }
 0xbff   :  { %v1987_v12 = vpop.f32.mrb[46].mxu1  ;;  %v2002_v14 = vsel %vm684_vm7, %v1999_v11, -inf }
 0xc00   :  { %v1997_v17 = vmul.f32 0.25, %v1987_v12  ;;  %2003 = vmax.xlane.f32.xlu0 %v2002_v14  ;;  %v9248_v19 = vpop.f32.mrb[47].mxu1 }
 0xc02   :  { %v2000_v54 = vsel %vm315_vm6, %v1997_v17, -1e+30 }
 0xc03   :  { %v1992_v29 = vpop.f32.mrb[48].mxu1  ;;  %v2005_v22 = vsel %vm684_vm7, %v2000_v54, -inf }
 0xc04   :  { %v1998_v31 = vmul.f32 0.25, %v1992_v29  ;;  %2006 = vmax.xlane.f32.xlu1 %v2005_v22  ;;  %v9251_v50 = vpop.f32.mrb[49].mxu1 }
 0xc06   :  { %v2001_v32 = vsel %vm315_vm6, %v1998_v31, -1e+30 }
 0xc07   :  { %v2214_v35 = vpop.f32.mrb[50].mxu1  ;;  %v2008_v36 = vsel %vm684_vm7, %v2001_v32, -inf }
 0xc08   :  { %v2228_v52 = vmul.f32 0.25, %v2214_v35  ;;  %2009 = vmax.xlane.f32.xlu0 %v2008_v36  ;;  %v9275_v30 = vpop.f32.mrb[51].mxu1 }
 0xc0a   :  { %v2231_v38 = vsel %vm315_vm6, %v2228_v52, -1e+30 }
 0xc0b   :  { %v2219_v39 = vpop.f32.mrb[52].mxu1  ;;  %v2234_v43 = vsel %vm684_vm7, %v2231_v38, -inf }
 0xc0c   :  { %v2229_v44 = vmul.f32 0.25, %v2219_v39  ;;  %2235 = vmax.xlane.f32.xlu0 %v2234_v43  ;;  %v9278_v56 = vpop.f32.mrb[53].mxu1 }
 0xc0e   :  { %v2232_v45 = vsel %vm315_vm6, %v2229_v44, -1e+30 }
 0xc0f   :  { %v2224_v47 = vpop.f32.mrb[54].mxu1  ;;  %v2237_v51 = vsel %vm684_vm7, %v2232_v45, -inf }
 0xc10   :  { %v2230_v53 = vmul.f32 0.25, %v2224_v47  ;;  %2238 = vmax.xlane.f32.xlu0 %v2237_v51  ;;  %v9281_v26 = vpop.f32.mrb[55].mxu1 }
 0xc12   :  { %v2233_v41 = vsel %vm315_vm6, %v2230_v53, -1e+30 }
 0xc13   :  { %v2240_v63 = vsel %vm684_vm7, %v2233_v41, -inf }
 0xc14   :  { %2241 = vmax.xlane.f32.xlu1 %v2240_v63 }
 0xc8d   :  { %v2004_v0 = vpop.xlane.xlu0 %2003 }
 0xc8e   :  { %v2011_v25 = vsub.f32 %v1999_v11, %v2004_v0 }
 0xc90   :  { %v2014_v2 = vmul.f32 1.442695, %v2011_v25 }
 0xc91   :  { %v2007_v3 = vpop.xlane.xlu1 %2006 }
 0xc92   :  { %10471 = vpow2.f32 %v2014_v2  ;;  %v2012_v34 = vsub.f32 %v2000_v54, %v2007_v3 }
 0xc94   :  { %v2016_v4 = vmul.f32 1.442695, %v2012_v34 }
 0xc95   :  { %v2010_v5 = vpop.xlane.xlu0 %2009 }
 0xc96   :  { %10473 = vpow2.f32 %v2016_v4  ;;  %v2013_v6 = vsub.f32 %v2001_v32, %v2010_v5 }
 0xc98   :  { %v2018_v7 = vmul.f32 1.442695, %v2013_v6 }
 0xc99   :  { %v2236_v8 = vpop.xlane.xlu0 %2235 }
 0xc9a   :  { %10475 = vpow2.f32 %v2018_v7  ;;  %v2243_v9 = vsub.f32 %v2231_v38, %v2236_v8 }
 0xc9c   :  { %v10472_v10 = vpop.eup %10471  ;;  %v2246_v33 = vmul.f32 1.442695, %v2243_v9 }
 0xc9d   :  { %v2239_v57 = vpop.xlane.xlu0 %2238  ;;  %v2020_v46 = vsel %vm684_vm7, %v10472_v10, 0.0 }
 0xc9e   :  { %10477 = vpow2.f32 %v2246_v33  ;;  %v2244_v23 = vsub.f32 %v2232_v45, %v2239_v57  ;;  %2021 = vadd.xlane.f32.xlu0 %v2020_v46 }
 0xca0   :  { %v10474_v40 = vpop.eup %10473  ;;  %v2248_v60 = vmul.f32 1.442695, %v2244_v23 }
 0xca1   :  { %v2242_v11 = vpop.xlane.xlu1 %2241  ;;  %v2023_v12 = vsel %vm684_vm7, %v10474_v40, 0.0 }
 0xca2   :  { %10479 = vpow2.f32 %v2248_v60  ;;  %v2245_v14 = vsub.f32 %v2233_v41, %v2242_v11  ;;  %2024 = vadd.xlane.f32.xlu1 %v2023_v12 }
 0xca4   :  { %v10476_v17 = vpop.eup %10475  ;;  %v2250_v19 = vmul.f32 1.442695, %v2245_v14 }
 0xca5   :  { %v2026_v54 = vsel %vm684_vm7, %v10476_v17, 0.0 }
 0xca6   :  { %10481 = vpow2.f32 %v2250_v19  ;;  %2027 = vadd.xlane.f32.xlu0 %v2026_v54 }
 0xca8   :  { %v10478_v29 = vpop.eup %10477 }
 0xca9   :  { %v2252_v22 = vsel %vm684_vm7, %v10478_v29, 0.0 }
 0xcaa   :  { %2253 = vadd.xlane.f32.xlu1 %v2252_v22 }
 0xcac   :  { %v10480_v31 = vpop.eup %10479 }
 0xcad   :  { %v2255_v50 = vsel %vm684_vm7, %v10480_v31, 0.0 }
 0xcae   :  { %2256 = vadd.xlane.f32.xlu0 %v2255_v50 }
 0xcb0   :  { %v11616_v32 = vpop.eup %10481 }
 0xcb1   :  { %v2258_v35 = vsel %vm684_vm7, %v11616_v32, 0.0 }
 0xcb2   :  { %2259 = vadd.xlane.f32.xlu1 %v2258_v35 }
 0xcbe   :  { %v1878_v36 = vpop.f32.mrb[38].mxu0 }
 0xcbf   :  { %v11621_v52 = vadd.f32 %v1878_v36, %v11509_v55  ;;  %v9230_v30 = vpop.f32.mrb[39].mxu0 }
 0xcc2   :  { %v1883_v38 = vpop.f32.mrb[40].mxu0 }
 0xcc3   :  { %v11624_v39 = vadd.f32 %v1883_v38, %v11516_v58  ;;  %2274 = vrot.lane.b32.xlu1 %v11583_v1, %s10852_s5  ;;  %v9233_v43 = vpop.f32.mrb[41].mxu0 }
 0xcc4   :  { %10317 = vrot.lane.b32.xlu0 %v11277_v59, %s10852_s5 }
 0xcc6   :  { %v1888_v44 = vpop.f32.mrb[42].mxu0 }
 0xcc7   :  { %v11631_v56 = vadd.f32 %v1888_v44, %v11523_v48  ;;  %10322 = vrot.lane.b32.xlu1 %v11494_v27, %s10854_s13  ;;  %v9236_v55 = vpop.f32.mrb[43].mxu0 }
 0xcc8   :  { %2546 = vrot.lane.b32.xlu0 %v11490_v24, %s10855_s17 }
 0xccb   :  { %2556 = vrot.lane.b32.xlu1 %v11500_v28, %s10854_s13 }
 0xccc   :  { %2550 = vrot.lane.b32.xlu0 %v11500_v28, %s10855_s17 }
 0xccf   :  { %2548 = vrot.lane.b32.xlu1 %v11486_v21, %s10855_s17 }
 0xd2b   :  { %v2022_v58 = vpop.xlane.xlu0 %2021 }
 0xd2c   :  { %10483 = vrcp.f32 %v2022_v58 }
 0xd2f   :  { %v2025_v48 = vpop.xlane.xlu1 %2024 }
 0xd30   :  { %10485 = vrcp.f32 %v2025_v48 }
 0xd33   :  { %v2028_v45 = vpop.xlane.xlu0 %2027 }
 0xd34   :  { %10487 = vrcp.f32 %v2028_v45 }
 0xd36   :  { %v10484_v47 = vpop.eup %10483 }
 0xd37   :  { %v2032_v51 = vmul.f32 %v10484_v47, %v10472_v10  ;;  %v2254_v53 = vpop.xlane.xlu1 %2253 }
 0xd38   :  { %10489 = vrcp.f32 %v2254_v53 }
 0xd39   :  { %9259 = vmatmul.mubr.msk.f32.vlgmr.msra.gmra.mrb[44].mxu0 %vm684_vm7, %v2032_v51 }
 0xd3a   :  { %v10486_v26 = vpop.eup %10485  ;;  %9261 = vmatprep.mubr.msk.f32.mxu0 %vm10851_vm3, %v10848_v13 }
 0xd3b   :  { %v2257_v41 = vpop.xlane.xlu0 %2256  ;;  %v2033_v63 = vmul.f32 %v10486_v26, %v10474_v40 }
 0xd3c   :  { %10491 = vrcp.f32 %v2257_v41 }
 0xd3d   :  { %9262 = vmatmul.mubr.msk.f32.gmra.mrb[46].mxu0 %vm684_vm7, %v2033_v63 }
 0xd3e   :  { %v10488_v0 = vpop.eup %10487  ;;  %9264 = vmatprep.mubr.msk.f32.mxu0 %vm10851_vm3, %v10848_v13 }
 0xd3f   :  { %v2260_v25 = vpop.xlane.xlu1 %2259  ;;  %v10318_v2 = vpop.permute.xlu0 %10317  ;;  %v2034_v3 = vmul.f32 %v10488_v0, %v10476_v17 }
 0xd40   :  { %v10320_v34 = vunpack.i.h.bf16 %v10318_v2  ;;  %v10319_v4 = vunpack.i.l.bf16 %v10318_v2  ;;  %10493 = vrcp.f32 %v2260_v25 }
 0xd41   :  { %9265 = vmatmul.mubr.msk.f32.gmra.mrb[48].mxu0 %vm684_vm7, %v2034_v3 }
 0xd42   :  { %v9902_v5 = vpack.c.bf16 %v10320_v34, %v10319_v4  ;;  %9288 = vmatprep.mubr.msk.f32.mxu0 %vm10851_vm3, %v10848_v13  ;;  %v10490_v6 = vpop.eup %10489 }
 0xd43   :  { %v2264_v7 = vmul.f32 %v10490_v6, %v10478_v29  ;;  %v2275_v8 = vpop.permute.xlu1 %2274  ;;  %v2547_v36 = vpop.permute.xlu0 %2546 }
 0xd44   :  { %9903 = vmatpush3.bf16.msra.mxu0 %v9902_v5 }
 0xd45   :  { %9286 = vmatprep.subr.mxu0 %v10848_v13 }
 0xd46   :  { %v10492_v9 = vpop.eup %10491 }
 0xd47   :  { %v2265_v10 = vmul.f32 %v10492_v9, %v10480_v31  ;;  %v10323_v11 = vpop.permute.xlu1 %10322  ;;  %v2551_v38 = vpop.permute.xlu0 %2550 }
 0xd48   :  { %9287 = vmatpush3.msra.mxu0 %v2275_v8  ;;  %v10325_v14 = vunpack.i.h.bf16 %v10323_v11  ;;  %v10324_v17 = vunpack.i.l.bf16 %v10323_v11 }
 0xd49   :  { %9289 = vmatmul.mubr.msk.f32.vlgmr.msra.gmra.mrb[50].mxu0 %vm684_vm7, %v2264_v7  ;;  %9907 = vmatprep.subr.bf16.mxu0 %v10849_v20 }
 0xd4a   :  { %9291 = vmatprep.mubr.msk.f32.mxu0 %vm10851_vm3, %v10848_v13  ;;  %9909 = vmatpush3.bf16.msra.mxu0 %v11345_v62  ;;  %v10494_v33 = vpop.eup %10493  ;;  %v9911_v19 = vpack.c.bf16 %v10325_v14, %v10324_v17 }
 0xd4b   :  { %9914 = vmatprep.subr.bf16.mxu0 %v10849_v20  ;;  %v2266_v57 = vmul.f32 %v10494_v33, %v11616_v32  ;;  %v2557_v32 = vpop.permute.xlu1 %2556 }
 0xd4d   :  { %9292 = vmatmul.mubr.msk.f32.gmra.mrb[52].mxu0 %vm684_vm7, %v2265_v10 }
 0xd4e   :  { %9294 = vmatprep.mubr.msk.f32.mxu0 %vm10851_vm3, %v10848_v13 }
 0xd4f   :  { %v2549_v30 = vpop.permute.xlu1 %2548 }
 0xd51   :  { %9295 = vmatmul.mubr.msk.f32.gmra.mrb[54].mxu0 %vm684_vm7, %v2266_v57 }
 0xd52   :  { %9314 = vmatprep.mubr.msk.f32.mxu0 %vm10851_vm3, %v10848_v13 }
 0xe0c   :  { %v2110_v46 = vpop.f32.mrb[44].mxu0 }
 0xe0d   :  { %v9260_v23 = vpop.f32.mrb[45].mxu0  ;;  %9315 = vmatmul.mubr.msk.f32.vlgmr.msra.gmra.mrb[56].mxu0 %vm585_vm4, %v2110_v46 }
 0xe0e   :  { %9317 = vmatprep.mubr.msk.f32.mxu0 %vm10851_vm3, %v10848_v13 }
 0xe10   :  { %v2115_v62 = vpop.f32.mrb[46].mxu0 }
 0xe11   :  { %v9263_v40 = vpop.f32.mrb[47].mxu0  ;;  %9318 = vmatmul.mubr.msk.f32.gmra.mrb[58].mxu0 %vm585_vm4, %v2115_v62 }
 0xe12   :  { %9320 = vmatprep.mubr.msk.f32.mxu0 %vm10851_vm3, %v10848_v13 }
 0xe14   :  { %v2120_v60 = vpop.f32.mrb[48].mxu0 }
 0xe15   :  { %v9266_v12 = vpop.f32.mrb[49].mxu0  ;;  %9321 = vmatmul.mubr.msk.f32.gmra.mrb[60].mxu0 %vm585_vm4, %v2120_v60 }
 0xe16   :  { %9344 = vmatprep.mubr.msk.f32.mxu0 %vm10851_vm3, %v10848_v13 }
 0xe1c   :  { %v2354_v54 = vpop.f32.mrb[50].mxu0 }
 0xe1d   :  { %v9290_v29 = vpop.f32.mrb[51].mxu0  ;;  %9302 = vmatmul.mubr.msk.f32.vlgmr.msra.gmra.mrb[56].mxu1 %vm585_vm4, %v2354_v54 }
 0xe1e   :  { %9913 = vmatpush3.bf16.xpose.msk.msra.mxu1 %vm11220_vm5, %v9911_v19  ;;  %9304 = vmatprep.mubr.msk.f32.mxu1 %vm10851_vm3, %v10848_v13 }
 0xe1f   :  { %9327 = vmatprep.subr.mxu1 %v10848_v13 }
 0xe20   :  { %v2359_v22 = vpop.f32.mrb[52].mxu0 }
 0xe21   :  { %v9293_v31 = vpop.f32.mrb[53].mxu0  ;;  %9305 = vmatmul.mubr.msk.f32.gmra.mrb[58].mxu1 %vm585_vm4, %v2359_v22 }
 0xe22   :  { %9307 = vmatprep.mubr.msk.f32.mxu1 %vm10851_vm3, %v10848_v13 }
 0xe24   :  { %v2364_v50 = vpop.f32.mrb[54].mxu0 }
 0xe25   :  { %v9296_v35 = vpop.f32.mrb[55].mxu0  ;;  %9308 = vmatmul.mubr.msk.f32.gmra.mrb[60].mxu1 %vm585_vm4, %v2364_v50 }
 0xe26   :  { %9328 = vmatpush3.xpose.msk.msra.mxu1 %vm585_vm4, %v2557_v32  ;;  %9329 = vmatprep.mubr.msk.f32.mxu1 %vm10851_vm3, %v10848_v13 }
 0xe27   :  { %9917 = vmatprep.subr.bf16.mxu1 %v10849_v20 }
 0xe29   :  { %9330 = vmatmul.mubr.msk.f32.vlgmr.msra.gmra.mrb[62].mxu1 %vm585_vm4, %v2547_v36 }
 0xe2a   :  { %9332 = vmatprep.mubr.msk.f32.mxu1 %vm10851_vm3, %v10848_v13  ;;  %9919 = vmatpush3.bf16.msra.mxu1 %v11431_v49 }
 0xe2b   :  { %9924 = vmatprep.subr.bf16.mxu1 %v10849_v20 }
 0xe2d   :  { %9333 = vmatmul.mubr.msk.f32.gmra.mrb[64].mxu1 %vm585_vm4, %v2549_v30 }
 0xe2e   :  { %9335 = vmatprep.mubr.msk.f32.mxu1 %vm10851_vm3, %v10848_v13 }
 0xe31   :  { %9336 = vmatmul.mubr.msk.f32.gmra.mrb[66].mxu1 %vm585_vm4, %v2551_v38 }
 0xe32   :  { %9357 = vmatprep.mubr.msk.f32.mxu1 %vm10851_vm3, %v10848_v13 }
 0xee0   :  { %v2532_v43 = vpop.f32.mrb[56].mxu0 }
 0xee1   :  { %v9316_v44 = vpop.f32.mrb[57].mxu0 }
 0xee4   :  { %v2537_v55 = vpop.f32.mrb[58].mxu0 }
 0xee5   :  { %v9319_v58 = vpop.f32.mrb[59].mxu0 }
 0xee8   :  { %v2542_v48 = vpop.f32.mrb[60].mxu0 }
 0xee9   :  { %v9322_v49 = vpop.f32.mrb[61].mxu0 }
 0xef0   :  { %v2443_v45 = vpop.f32.mrb[56].mxu1 }
 0xef1   :  { %v11700_v47 = vadd.f32 %v2532_v43, %v2443_v45  ;;  %v9303_v51 = vpop.f32.mrb[57].mxu1 }
 0xef4   :  { %v2448_v53 = vpop.f32.mrb[58].mxu1 }
 0xef5   :  { %v11702_v26 = vadd.f32 %v2537_v55, %v2448_v53  ;;  %v9306_v41 = vpop.f32.mrb[59].mxu1 }
 0xef8   :  { %v2453_v63 = vpop.f32.mrb[60].mxu1 }
 0xef9   :  { %v11704_v0 = vadd.f32 %v2542_v48, %v2453_v63  ;;  %v9309_v25 = vpop.f32.mrb[61].mxu1 }
 0xefc   :  { %v2636_v2 = vpop.f32.mrb[62].mxu1 }
 0xefd   :  { %v2650_v3 = vmul.f32 0.25, %v2636_v2  ;;  %v9331_v34 = vpop.f32.mrb[63].mxu1 }
 0xeff   :  { %v2653_v4 = vsel %vm315_vm6, %v2650_v3, -1e+30 }
 0xf00   :  { %v2641_v5 = vpop.f32.mrb[64].mxu1  ;;  %v2656_v6 = vsel %vm684_vm7, %v2653_v4, -inf }
 0xf01   :  { %v2651_v7 = vmul.f32 0.25, %v2641_v5  ;;  %2657 = vmax.xlane.f32.xlu1 %v2656_v6  ;;  %v9334_v8 = vpop.f32.mrb[65].mxu1 }
 0xf03   :  { %v2654_v9 = vsel %vm315_vm6, %v2651_v7, -1e+30 }
 0xf04   :  { %v2646_v10 = vpop.f32.mrb[66].mxu1  ;;  %v2659_v33 = vsel %vm684_vm7, %v2654_v9, -inf }
 0xf05   :  { %v2652_v57 = vmul.f32 0.25, %v2646_v10  ;;  %2660 = vmax.xlane.f32.xlu0 %v2659_v33  ;;  %v9337_v46 = vpop.f32.mrb[67].mxu1 }
 0xf07   :  { %v2655_v23 = vsel %vm315_vm6, %v2652_v57, -1e+30 }
 0xf08   :  { %v2662_v62 = vsel %vm684_vm7, %v2655_v23, -inf }
 0xf09   :  { %2663 = vmax.xlane.f32.xlu0 %v2662_v62 }
 0xf12   :  { %10327 = vrot.lane.b32.xlu1 %v11277_v59, %s10855_s17 }
 0xf8e   :  { %v2658_v40 = vpop.xlane.xlu1 %2657 }
 0xf8f   :  { %v2665_v60 = vsub.f32 %v2653_v4, %v2658_v40 }
 0xf91   :  { %v2668_v11 = vmul.f32 1.442695, %v2665_v60 }
 0xf92   :  { %v10328_v12 = vpop.permute.xlu1 %10327  ;;  %v2661_v14 = vpop.xlane.xlu0 %2660 }
 0xf93   :  { %10495 = vpow2.f32 %v2668_v11  ;;  %v10330_v17 = vunpack.i.h.bf16 %v10328_v12  ;;  %v10329_v19 = vunpack.i.l.bf16 %v10328_v12  ;;  %v2666_v54 = vsub.f32 %v2654_v9, %v2661_v14  ;;  %v11772_v14 = vld [vmem:[%s10917_s19] ss:$0 sm:$0xff]  ;;  %s13414_s19 = sld [smem:[#allocation9_spill]] }
 0xf95   :  { %v9915_v29 = vpack.c.bf16 %v10330_v17, %v10329_v19  ;;  %v2670_v22 = vmul.f32 1.442695, %v2666_v54  ;;  %v10778_v19 = vld [vmem:[#allocation2] sm:$0xff] }
 0xf96   :  { %v2664_v31 = vpop.xlane.xlu0 %2663  ;;  %v3212_v54 = vadd.f32 %v10778_v19, %v11621_v52 }
 0xf97   :  { %10497 = vpow2.f32 %v2670_v22  ;;  %v2667_v50 = vsub.f32 %v2655_v23, %v2664_v31  ;;  %9916 = vmatpush3.bf16.msra.mxu0 %v9915_v29  ;;  %v10777_v23 = vld [vmem:[#allocation2 + $0x10] sm:$0xff] }
 0xf98   :  { %9342 = vmatprep.subr.mxu0 %v10848_v13  ;;  %v3214_v62 = vadd.f32 %v10777_v23, %v11631_v56 }
 0xf99   :  { %v2672_v32 = vmul.f32 1.442695, %v2667_v50 }
 0xf9a   :  { %v11778_v29 = vadd.f32 %v11772_v14, %v3214_v62 }
 0xf9b   :  { %10499 = vpow2.f32 %v2672_v32 }
 0xf9c   :  { %v3239_v52 = vsel %vm286_vm1, %v11778_v29, 0.0 }
 0xf9d   :  { %v10496_v35 = vpop.eup %10495 }
 0xf9e   :  { %v2674_v36 = vsel %vm684_vm7, %v10496_v35, 0.0 }
 0xf9f   :  { %2675 = vadd.xlane.f32.xlu0 %v2674_v36  ;;  %v10779_v36 = vld [vmem:[#allocation2 + $0x8] sm:$0xff] }
 0xfa1   :  { %v10498_v30 = vpop.eup %10497 }
 0xfa2   :  { %v2677_v38 = vsel %vm684_vm7, %v10498_v30, 0.0 }
 0xfa3   :  { %2678 = vadd.xlane.f32.xlu1 %v2677_v38 }
 0xfa5   :  { %v10500_v43 = vpop.eup %10499 }
 0xfa6   :  { %v2680_v44 = vsel %vm684_vm7, %v10500_v43, 0.0 }
 0xfa7   :  { %2681 = vadd.xlane.f32.xlu0 %v2680_v44 }
 0xfb4   :  { %10332 = vrot.lane.b32.xlu1 %v11494_v27, %s10856_s21 }
 0xfb8   :  { %2889 = vrot.lane.b32.xlu1 %v11500_v28, %s10856_s21 }
 0xfbc   :  { %2879 = vrot.lane.b32.xlu1 %v11490_v24, %s10857_s25 }
 0xfbd   :  { %2693 = vrot.lane.b32.xlu0 %v11583_v1, %s10855_s17 }
 0xfc0   :  { %2883 = vrot.lane.b32.xlu1 %v11500_v28, %s10857_s25 }
 0xfc1   :  { %2881 = vrot.lane.b32.xlu0 %v11486_v21, %s10857_s25 }
0x102c   :  { %v2676_v55 = vpop.xlane.xlu0 %2675 }
0x102d   :  { %10501 = vrcp.f32 %v2676_v55 }
0x1030   :  { %v2679_v58 = vpop.xlane.xlu1 %2678 }
0x1031   :  { %10503 = vrcp.f32 %v2679_v58 }
0x1034   :  { %v2682_v27 = vpop.xlane.xlu0 %2681  ;;  %v10333_v49 = vpop.permute.xlu1 %10332 }
0x1035   :  { %10505 = vrcp.f32 %v2682_v27  ;;  %v10335_v24 = vunpack.i.h.bf16 %v10333_v49  ;;  %v10334_v53 = vunpack.i.l.bf16 %v10333_v49 }
0x1037   :  { %v10502_v48 = vpop.eup %10501  ;;  %v9921_v41 = vpack.c.bf16 %v10335_v24, %v10334_v53 }
0x1038   :  { %v2686_v45 = vmul.f32 %v10502_v48, %v10496_v35  ;;  %v2694_v51 = vpop.permute.xlu0 %2693  ;;  %v2890_v2 = vpop.permute.xlu1 %2889  ;;  %v11784_v35 = vadd.f32 %v11772_v14, %v3212_v54 }
0x1039   :  { %9343 = vmatpush3.msra.mxu0 %v2694_v51 }
0x103a   :  { %9345 = vmatmul.mubr.msk.f32.vlgmr.msra.gmra.mrb[62].mxu0 %vm684_vm7, %v2686_v45  ;;  %9920 = vmatprep.subr.bf16.mxu0 %v10849_v20  ;;  %v3233_v44 = vsel %vm286_vm1, %v11784_v35, 0.0 }
0x103b   :  { %v10504_v28 = vpop.eup %10503  ;;  %9347 = vmatprep.mubr.msk.f32.mxu0 %vm10851_vm3, %v10848_v13 }
0x103c   :  { %v2687_v21 = vmul.f32 %v10504_v28, %v10498_v30  ;;  %v2880_v3 = vpop.permute.xlu1 %2879  ;;  %v2882_v34 = vpop.permute.xlu0 %2881  ;;  %v3213_v30 = vadd.f32 %v10779_v36, %v11624_v39 }
0x103e   :  { %9348 = vmatmul.mubr.msk.f32.gmra.mrb[64].mxu0 %vm684_vm7, %v2687_v21 }
0x103f   :  { %v10506_v63 = vpop.eup %10505  ;;  %9350 = vmatprep.mubr.msk.f32.mxu0 %vm10851_vm3, %v10848_v13 }
0x1040   :  { %9923 = vmatpush3.bf16.xpose.msk.msra.mxu0 %vm11220_vm5, %v9921_v41  ;;  %v2688_v25 = vmul.f32 %v10506_v63, %v10500_v43  ;;  %v2884_v4 = vpop.permute.xlu1 %2883  ;;  %v11791_v43 = vadd.f32 %v11772_v14, %v3213_v30 }
0x1041   :  { %9370 = vmatprep.subr.mxu0 %v10848_v13 }
0x1042   :  { %9351 = vmatmul.mubr.msk.f32.gmra.mrb[66].mxu0 %vm684_vm7, %v2688_v25  ;;  %v3236_v55 = vsel %vm286_vm1, %v11791_v43, 0.0 }
0x1043   :  { %9372 = vmatprep.mubr.msk.f32.mxu0 %vm10851_vm3, %v10848_v13 }
0x1048   :  { %9371 = vmatpush3.xpose.msk.msra.mxu0 %vm585_vm4, %v2890_v2 }
0x1049   :  { %9927 = vmatprep.subr.bf16.mxu0 %v10849_v20 }
0x104b   :  { %9373 = vmatmul.mubr.msk.f32.vlgmr.msra.gmra.mrb[68].mxu0 %vm585_vm4, %v2880_v3 }
0x104c   :  { %9375 = vmatprep.mubr.msk.f32.mxu0 %vm10851_vm3, %v10848_v13  ;;  %9929 = vmatpush3.bf16.msra.mxu0 %v11527_v37 }
0x104f   :  { %9376 = vmatmul.mubr.msk.f32.gmra.mrb[70].mxu0 %vm585_vm4, %v2882_v34 }
0x1050   :  { %9378 = vmatprep.mubr.msk.f32.mxu0 %vm10851_vm3, %v10848_v13 }
0x1053   :  { %9379 = vmatmul.mubr.msk.f32.gmra.mrb[72].mxu0 %vm585_vm4, %v2884_v4 }
0x1054   :  { %9400 = vmatprep.mubr.msk.f32.mxu0 %vm10851_vm3, %v10848_v13 }
0x110d   :  { %v2773_v5 = vpop.f32.mrb[62].mxu0 }
0x110e   :  { %v9346_v6 = vpop.f32.mrb[63].mxu0  ;;  %9358 = vmatmul.mubr.msk.f32.vlgmr.msra.gmra.mrb[68].mxu1 %vm585_vm4, %v2773_v5 }
0x110f   :  { %9360 = vmatprep.mubr.msk.f32.mxu1 %vm10851_vm3, %v10848_v13 }
0x1111   :  { %v2778_v37 = vpop.f32.mrb[64].mxu0 }
0x1112   :  { %v9349_v7 = vpop.f32.mrb[65].mxu0  ;;  %9361 = vmatmul.mubr.msk.f32.gmra.mrb[70].mxu1 %vm585_vm4, %v2778_v37 }
0x1113   :  { %9363 = vmatprep.mubr.msk.f32.mxu1 %vm10851_vm3, %v10848_v13 }
0x1115   :  { %v2783_v8 = vpop.f32.mrb[66].mxu0 }
0x1116   :  { %v9352_v9 = vpop.f32.mrb[67].mxu0  ;;  %9364 = vmatmul.mubr.msk.f32.gmra.mrb[72].mxu1 %vm585_vm4, %v2783_v8 }
0x1117   :  { %9387 = vmatprep.mubr.msk.f32.mxu1 %vm10851_vm3, %v10848_v13 }
0x111e   :  { %v2969_v10 = vpop.f32.mrb[68].mxu0 }
0x111f   :  { %v2983_v33 = vmul.f32 0.25, %v2969_v10  ;;  %v9374_v57 = vpop.f32.mrb[69].mxu0 }
0x1121   :  { %v2986_v46 = vsel %vm315_vm6, %v2983_v33, -1e+30 }
0x1122   :  { %v2974_v40 = vpop.f32.mrb[70].mxu0  ;;  %v2989_v60 = vsel %vm684_vm7, %v2986_v46, -inf }
0x1123   :  { %v2984_v11 = vmul.f32 0.25, %v2974_v40  ;;  %2990 = vmax.xlane.f32.xlu0 %v2989_v60  ;;  %v9377_v12 = vpop.f32.mrb[71].mxu0 }
0x1125   :  { %v2987_v17 = vsel %vm315_vm6, %v2984_v11, -1e+30 }
0x1126   :  { %v2979_v22 = vpop.f32.mrb[72].mxu0  ;;  %v2992_v56 = vsel %vm684_vm7, %v2987_v17, -inf }
0x1127   :  { %v2985_v31 = vmul.f32 0.25, %v2979_v22  ;;  %2993 = vmax.xlane.f32.xlu1 %v2992_v56  ;;  %v9380_v50 = vpop.f32.mrb[73].mxu0 }
0x1129   :  { %v2988_v32 = vsel %vm315_vm6, %v2985_v31, -1e+30 }
0x112a   :  { %v2995_v38 = vsel %vm684_vm7, %v2988_v32, -inf }
0x112b   :  { %3240 = vadd.xlane.f32.xlu1 %v3239_v52  ;;  %2996 = vmax.xlane.f32.xlu0 %v2995_v38 }
0x112f   :  { %3234 = vadd.xlane.f32.xlu0 %v3233_v44 }
0x1133   :  { %3237 = vadd.xlane.f32.xlu0 %v3236_v55  ;;  %v3336_v55 = vld [vmem:[%s10932_s6 + $0x8] sm:$0xff] }
0x11b0   :  { %v2991_v58 = vpop.xlane.xlu0 %2990 }
0x11b1   :  { %v2998_v48 = vsub.f32 %v2986_v46, %v2991_v58  ;;  %v3338_v58 = vld [vmem:[%s10932_s6 + $0x18] sm:$0xff] }
0x11b3   :  { %v3001_v24 = vmul.f32 1.442695, %v2998_v48 }
0x11b4   :  { %v2994_v39 = vpop.xlane.xlu1 %2993 }
0x11b5   :  { %v2999_v27 = vsub.f32 %v2987_v17, %v2994_v39  ;;  %v9930_v39 = vpack.c.bf16 %v3338_v58, %v3336_v55  ;;  %v3806_v58 = vld [vmem:[%s13410_s29] sm:$0xff] }
0x11b7   :  { %v3003_v49 = vmul.f32 1.442695, %v2999_v27 }
0x11b8   :  { %v2997_v45 = vpop.xlane.xlu0 %2996  ;;  %v3241_v63 = vpop.xlane.xlu1 %3240 }
0x11b9   :  { %10507 = vpow2.f32 %v3003_v49  ;;  %v3000_v51 = vsub.f32 %v2988_v32, %v2997_v45  ;;  %v3253_v4 = vmul.f32 0.015625, %v3241_v63  ;;  %v3335_v45 = vld [vmem:[%s10932_s6] sm:$0xff] }
0x11bb   :  { %v3005_v53 = vmul.f32 1.442695, %v3000_v51  ;;  %v11815_v9 = vsub.f32 %v11778_v29, %v3253_v4  ;;  %v3337_v51 = vld [vmem:[%s10932_s6 + $0x10] sm:$0xff] }
0x11bc   :  { %v3235_v28 = vpop.xlane.xlu0 %3234  ;;  %v9932_v63 = vpack.c.bf16 %v3337_v51, %v3335_v45  ;;  %v3341_v4 = vld [vmem:[%s10932_s6 + $0x30] sm:$0xff] }
0x11bd   :  { %10509 = vpow2.f32 %v3005_v53  ;;  %v3251_v21 = vmul.f32 0.015625, %v3235_v28  ;;  %v3265_v23 = vmul.f32 %v11815_v9, %v11815_v9  ;;  %v3342_v53 = vld [vmem:[%s10932_s6 + $0x38] sm:$0xff]  ;;  %v3808_v51 = vld [vmem:[%s13410_s29 + $0x10] sm:$0xff] }
0x11be   :  { %10511 = vpow2.f32 %v3001_v24  ;;  %v3340_v24 = vld [vmem:[%s10932_s6 + $0x28] sm:$0xff] }
0x11bf   :  { %v11798_v41 = vsub.f32 %v11784_v35, %v3251_v21  ;;  %v3275_v62 = vsel %vm286_vm1, %v3265_v23, 0.0  ;;  %v3343_v23 = vld [vmem:[%s10932_s6 + $0x40] sm:$0xff] }
0x11c0   :  { %v3238_v25 = vpop.xlane.xlu0 %3237 }
0x11c1   :  { %v3252_v2 = vmul.f32 0.015625, %v3238_v25  ;;  %v3263_v3 = vmul.f32 %v11798_v41, %v11798_v41 }
0x11c3   :  { %v11802_v34 = vpop.eup %10507  ;;  %v11805_v5 = vsub.f32 %v11791_v43, %v3252_v2  ;;  %v3269_v6 = vsel %vm286_vm1, %v3263_v3, 0.0  ;;  %v9934_v2 = vpack.c.bf16 %v3342_v53, %v3340_v24  ;;  %v3339_v3 = vld [vmem:[%s10932_s6 + $0x20] sm:$0xff]  ;;  %v3809_v24 = vld [vmem:[%s13410_s29 + $0x18] sm:$0xff] }
0x11c4   :  { %3270 = vadd.xlane.f32.xlu0 %v3269_v6  ;;  %v3010_v37 = vsel %vm684_vm7, %v11802_v34, 0.0 }
0x11c5   :  { %3011 = vadd.xlane.f32.xlu1 %v3010_v37  ;;  %v3264_v7 = vmul.f32 %v11805_v5, %v11805_v5  ;;  %v3344_v37 = vld [vmem:[%s10932_s6 + $0x48] sm:$0xff] }
0x11c7   :  { %v11812_v8 = vpop.eup %10509  ;;  %v3272_v10 = vsel %vm286_vm1, %v3264_v7, 0.0  ;;  %v3346_v7 = vld [vmem:[%s10932_s6 + $0x58] sm:$0xff] }
0x11c8   :  { %v10512_v33 = vpop.eup %10511  ;;  %3273 = vadd.xlane.f32.xlu0 %v3272_v10  ;;  %v3013_v57 = vsel %vm684_vm7, %v11812_v8, 0.0  ;;  %v9936_v10 = vpack.c.bf16 %v3341_v4, %v3339_v3  ;;  %v3810_v3 = vld [vmem:[%s13410_s29 + $0x20] sm:$0xff]  ;;  %v3811_v4 = vld [vmem:[%s13410_s29 + $0x28] sm:$0xff] }
0x11c9   :  { %3014 = vadd.xlane.f32.xlu1 %v3013_v57  ;;  %v3007_v46 = vsel %vm684_vm7, %v10512_v33, 0.0 }
0x11cc   :  { %3008 = vadd.xlane.f32.xlu0 %v3007_v46  ;;  %v9938_v46 = vpack.c.bf16 %v3346_v7, %v3344_v37  ;;  %v3828_v37 = vld [vmem:[%s13410_s29 + $0xb0] sm:$0xff]  ;;  %v3829_v7 = vld [vmem:[%s13410_s29 + $0xb8] sm:$0xff] }
0x11d0   :  { %3276 = vadd.xlane.f32.xlu0 %v3275_v62  ;;  %v3345_v62 = vld [vmem:[%s10932_s6 + $0x50] sm:$0xff] }
0x11da   :  { %10337 = vrot.lane.b32.xlu1 %v11277_v59, %s10857_s25 }
0x11e1   :  { %v2862_v40 = vpop.f32.mrb[68].mxu1 }
0x11e2   :  { %v11827_v60 = vadd.f32 %v2862_v40, %v11700_v47  ;;  %v9359_v11 = vpop.f32.mrb[69].mxu1 }
0x11e3   :  { %v3348_v11 = vld [vmem:[%s10932_s6 + $0x68] sm:$0xff] }
0x11e5   :  { %v2867_v12 = vpop.f32.mrb[70].mxu1 }
0x11e6   :  { %v11830_v17 = vadd.f32 %v2867_v12, %v11702_v26  ;;  %v9362_v19 = vpop.f32.mrb[71].mxu1  ;;  %3026 = vrot.lane.b32.xlu0 %v11583_v1, %s10857_s25  ;;  %v3350_v12 = vld [vmem:[%s10932_s6 + $0x78] sm:$0xff] }
0x11e7   :  { %v9940_v19 = vpack.c.bf16 %v3345_v62, %v3343_v23  ;;  %v3813_v23 = vld [vmem:[%s13410_s29 + $0x38] sm:$0xff] }
0x11e9   :  { %v2872_v54 = vpop.f32.mrb[72].mxu1 }
0x11ea   :  { %v11835_v22 = vadd.f32 %v2872_v54, %v11704_v0  ;;  %v9365_v56 = vpop.f32.mrb[73].mxu1 }
0x11eb   :  { %v9942_v56 = vpack.c.bf16 %v3350_v12, %v3348_v11  ;;  %v3831_v11 = vld [vmem:[%s13410_s29 + $0xc8] sm:$0xff] }
0x1251   :  { %v3271_v59 = vpop.xlane.xlu0 %3270 }
0x1252   :  { %v3012_v31 = vpop.xlane.xlu1 %3011  ;;  %v3287_v32 = vmul.f32 0.015625, %v3271_v59  ;;  %v3347_v59 = vld [vmem:[%s10932_s6 + $0x60] sm:$0xff] }
0x1254   :  { %v3293_v38 = vadd.f32 1e-06, %v3287_v32 }
0x1255   :  { %v3274_v47 = vpop.xlane.xlu0 %3273 }
0x1256   :  { %v3015_v50 = vpop.xlane.xlu1 %3014  ;;  %v3288_v1 = vmul.f32 0.015625, %v3274_v47 }
0x1258   :  { %v3294_v27 = vadd.f32 1e-06, %v3288_v1 }
0x1259   :  { %v3009_v36 = vpop.xlane.xlu0 %3008 }
0x125a   :  { %v10338_v30 = vpop.permute.xlu1 %10337  ;;  %10513 = vrcp.f32 %v3009_v36 }
0x125b   :  { %v10340_v26 = vunpack.i.h.bf16 %v10338_v30  ;;  %v10339_v52 = vunpack.i.l.bf16 %v10338_v30  ;;  %10515 = vrcp.f32 %v3012_v31  ;;  %v3349_v31 = vld [vmem:[%s10932_s6 + $0x70] sm:$0xff]  ;;  %s13417_s6 = sld [smem:[#allocation13_spill]] }
0x125c   :  { %10517 = vrsqrt.f32 %v3293_v38  ;;  %v9944_v32 = vpack.c.bf16 %v3349_v31, %v3347_v59  ;;  %v3815_v59 = vld [vmem:[%s13410_s29 + $0x48] sm:$0xff]  ;;  %v3832_v31 = vld [vmem:[%s13410_s29 + $0xd0] sm:$0xff] }
0x125d   :  { %v9925_v0 = vpack.c.bf16 %v10340_v26, %v10339_v52  ;;  %v3277_v44 = vpop.xlane.xlu0 %3276  ;;  %10519 = vrcp.f32 %v3015_v50  ;;  %v11864_v50 = vld [vmem:[%s10922_s24] ss:$0 sm:$0xff]  ;;  %s13415_s24 = sld [smem:[#allocation10_spill]] }
0x125e   :  { %v3289_v48 = vmul.f32 0.015625, %v3277_v44  ;;  %10521 = vrsqrt.f32 %v3294_v27  ;;  %v3823_v44 = vld [vmem:[%s13410_s29 + $0x88] sm:$0xff]  ;;  %v3824_v27 = vld [vmem:[%s13410_s29 + $0x90] sm:$0xff] }
0x125f   :  { %9926 = vmatpush3.bf16.msra.mxu1 %v9925_v0 }
0x1260   :  { %9385 = vmatprep.subr.mxu1 %v10848_v13  ;;  %v3295_v21 = vadd.f32 1e-06, %v3289_v48  ;;  %v3825_v48 = vld [vmem:[%s13410_s29 + $0x98] sm:$0xff] }
0x1261   :  { %v3027_v49 = vpop.permute.xlu0 %3026  ;;  %v9950_v45 = vpack.c.bf16 %v3825_v48, %v3824_v27  ;;  %v3818_v27 = vld [vmem:[%s13410_s29 + $0x60] sm:$0xff]  ;;  %v3819_v48 = vld [vmem:[%s13410_s29 + $0x68] sm:$0xff] }
0x1262   :  { %10523 = vrsqrt.f32 %v3295_v21  ;;  %v3827_v21 = vld [vmem:[%s13410_s29 + $0xa8] sm:$0xff] }
0x1263   :  { %9386 = vmatpush3.msra.mxu1 %v3027_v49 }
0x1264   :  { %9931 = vmatprep.subr.bf16.mxu1 %v9930_v39  ;;  %v10514_v28 = vpop.eup %10513  ;;  %v3807_v39 = vld [vmem:[%s13410_s29 + $0x8] sm:$0xff] }
0x1265   :  { %v3019_v25 = vmul.f32 %v10514_v28, %v10512_v33  ;;  %v10516_v6 = vpop.eup %10515  ;;  %v9948_v49 = vpack.c.bf16 %v3807_v39, %v3806_v58  ;;  %v3826_v28 = vld [vmem:[%s13410_s29 + $0xa0] sm:$0xff] }
0x1266   :  { %v10518_v57 = vpop.eup %10517  ;;  %v3020_v33 = vmul.f32 %v10516_v6, %v11802_v34 }
0x1267   :  { %9388 = vmatmul.mubr.msk.f32.vlgmr.msra.gmra.mrb[74].mxu1 %vm684_vm7, %v3019_v25  ;;  %v10520_v40 = vpop.eup %10519  ;;  %v3305_v54 = vmul.f32 %v10518_v57, %v11798_v41  ;;  %v9952_v25 = vpack.c.bf16 %v3809_v24, %v3808_v51  ;;  %v9956_v57 = vpack.c.bf16 %v3811_v4, %v3810_v3  ;;  %v3836_v51 = vld [vmem:[%s13410_s29 + $0xf0] sm:$0xff]  ;;  %v3837_v24 = vld [vmem:[%s13410_s29 + $0xf8] sm:$0xff] }
0x1268   :  { %9933 = vmatpush1.bf16.msra.mxu1 %v9932_v63  ;;  %9390 = vmatprep.mubr.msk.f32.mxu1 %vm10851_vm3, %v10848_v13  ;;  %v3021_v34 = vmul.f32 %v10520_v40, %v11812_v8  ;;  %v10522_v47 = vpop.eup %10521  ;;  %v11871_v8 = vld [vmem:[%s10927_s30] ss:$0 sm:$0xff]  ;;  %s13416_s30 = sld [smem:[#allocation12_spill]] }
0x1269   :  { %9935 = vmatprep.subr.bf16.mxu1 %v9934_v2  ;;  %v3317_v36 = vmul.f32 %v11864_v50, %v3305_v54  ;;  %v3306_v41 = vmul.f32 %v10522_v47, %v11805_v5  ;;  %v9954_v2 = vpack.c.bf16 %v3827_v21, %v3826_v28  ;;  %v3830_v40 = vld [vmem:[%s13410_s29 + $0xc0] sm:$0xff]  ;;  %v3833_v47 = vld [vmem:[%s13410_s29 + $0xd8] sm:$0xff] }
0x126b   :  { %9391 = vmatmul.mubr.msk.f32.gmra.mrb[76].mxu1 %vm684_vm7, %v3020_v33  ;;  %v3329_v26 = vadd.f32 %v11871_v8, %v3317_v36  ;;  %v3318_v52 = vmul.f32 %v11864_v50, %v3306_v41  ;;  %v9958_v33 = vpack.c.bf16 %v3829_v7, %v3828_v37  ;;  %v3820_v37 = vld [vmem:[%s13410_s29 + $0x70] sm:$0xff]  ;;  %v3821_v7 = vld [vmem:[%s13410_s29 + $0x78] sm:$0xff] }
0x126c   :  { %9937 = vmatpush1.bf16.msra.mxu1 %v9936_v10  ;;  %9393 = vmatprep.mubr.msk.f32.mxu1 %vm10851_vm3, %v10848_v13  ;;  %v10524_v30 = vpop.eup %10523 }
0x126d   :  { %9939 = vmatprep.subr.bf16.mxu1 %v9938_v46  ;;  %v3307_v38 = vmul.f32 %v10524_v30, %v11815_v9  ;;  %v3330_v5 = vadd.f32 %v11871_v8, %v3318_v52  ;;  %v3822_v9 = vld [vmem:[%s13410_s29 + $0x80] sm:$0xff]  ;;  %v3812_v46 = vld [vmem:[%s13410_s29 + $0x30] sm:$0xff]  ;;  %v9966_v30 = vpack.c.bf16 %v3833_v47, %v3832_v31  ;;  %v3817_v52 = vld [vmem:[%s13410_s29 + $0x58] sm:$0xff] }
0x126e   :  { %v9946_v55 = vpack.c.bf16 %v3823_v44, %v3822_v9  ;;  %v9960_v54 = vpack.c.bf16 %v3813_v23, %v3812_v46 }
0x126f   :  { %9394 = vmatmul.mubr.msk.f32.gmra.mrb[78].mxu1 %vm684_vm7, %v3021_v34  ;;  %v3319_v1 = vmul.f32 %v11864_v50, %v3307_v38  ;;  %v9962_v34 = vpack.c.bf16 %v3831_v11, %v3830_v40 }
0x1270   :  { %9941 = vmatpush1.bf16.msra.mxu1 %v9940_v19  ;;  %3445 = vmatprep.mubr.f32.mxu1 %v10848_v13  ;;  %v3351_v19 = vld [vmem:[%s13411_s3] sm:$0x3] }
0x1271   :  { %9943 = vmatprep.subr.bf16.mxu1 %v9942_v56  ;;  %v3331_v0 = vadd.f32 %v11871_v8, %v3319_v1  ;;  %9947 = vmatprep.subr.bf16.mxu0 %v9946_v55  ;;  %v3814_v56 = vld [vmem:[%s13410_s29 + $0x40] sm:$0xff]  ;;  %v11919_v36 = vrot.slane %v3351_v19, %v11173_v18  ;;  %v3835_v1 = vld [vmem:[%s13410_s29 + $0xe8] sm:$0xff] }
0x1272   :  { %v9964_v41 = vpack.c.bf16 %v3815_v59, %v3814_v56 }
0x1274   :  { %9945 = vmatpush1.bf16.msra.mxu1 %v9944_v32  ;;  %v11916_v32 = vrot.slane %v3351_v19, %v11169_v16 }
0x1277   :  { %8466 = vmatmul.mubr.msk.f32.vlgmr.msra.gmra.mrb[80].mxu1 %vm286_vm1, %v3329_v26  ;;  %v3816_v26 = vld [vmem:[%s13410_s29 + $0x50] sm:$0xff] }
0x1278   :  { %3451 = vmatprep.mubr.f32.mxu1 %v10848_v13  ;;  %v9968_v55 = vpack.c.bf16 %v3817_v52, %v3816_v26 }
0x127b   :  { %8467 = vmatmul.mubr.msk.f32.gmra.mrb[82].mxu1 %vm286_vm1, %v3330_v5  ;;  %v3834_v5 = vld [vmem:[%s13410_s29 + $0xe0] sm:$0xff] }
0x127c   :  { %3457 = vmatprep.mubr.f32.mxu1 %v10848_v13  ;;  %v9970_v39 = vpack.c.bf16 %v3835_v1, %v3834_v5 }
0x127f   :  { %8468 = vmatmul.mubr.msk.f32.gmra.mrb[84].mxu1 %vm286_vm1, %v3331_v0 }
0x1280   :  { %3463 = vmatprep.mubr.f32.mxu1 %v10848_v13 }
0x133a   :  { %v3106_v53 = vpop.f32.mrb[74].mxu1 }
0x133b   :  { %v9389_v63 = vpop.f32.mrb[75].mxu1  ;;  %9401 = vmatmul.mubr.msk.f32.vlgmr.msra.gmra.mrb[74].mxu0 %vm585_vm4, %v3106_v53 }
0x133c   :  { %9403 = vmatprep.mubr.msk.f32.mxu0 %vm10851_vm3, %v10848_v13  ;;  %9949 = vmatpush3.bf16.msra.mxu0 %v9948_v49 }
0x133d   :  { %9951 = vmatprep.subr.bf16.mxu0 %v9950_v45 }
0x133e   :  { %v3111_v6 = vpop.f32.mrb[76].mxu1 }
0x133f   :  { %v9392_v10 = vpop.f32.mrb[77].mxu1  ;;  %9404 = vmatmul.mubr.msk.f32.gmra.mrb[76].mxu0 %vm585_vm4, %v3111_v6  ;;  %v9974_v6 = vpack.c.bf16 %v3837_v24, %v3836_v51 }
0x1340   :  { %9406 = vmatprep.mubr.msk.f32.mxu0 %vm10851_vm3, %v10848_v13  ;;  %9953 = vmatpush3.bf16.msra.mxu0 %v9952_v25 }
0x1341   :  { %9955 = vmatprep.subr.bf16.mxu0 %v9954_v2  ;;  %v9972_v2 = vpack.c.bf16 %v3819_v48, %v3818_v27 }
0x1342   :  { %v3116_v62 = vpop.f32.mrb[78].mxu1 }
0x1343   :  { %v9395_v12 = vpop.f32.mrb[79].mxu1  ;;  %9407 = vmatmul.mubr.msk.f32.gmra.mrb[78].mxu0 %vm585_vm4, %v3116_v62 }
0x1344   :  { %9957 = vmatpush3.bf16.msra.mxu0 %v9956_v57  ;;  %v9976_v12 = vpack.c.bf16 %v3821_v7, %v3820_v37 }
0x1345   :  { %9959 = vmatprep.subr.bf16.mxu0 %v9958_v33 }
0x1348   :  { %9961 = vmatpush3.bf16.msra.mxu0 %v9960_v54 }
0x1349   :  { %9963 = vmatprep.subr.bf16.mxu0 %v9962_v34 }
0x134a   :  { %v3447_v38 = vpop.f32.mrb[80].mxu1 }
0x134b   :  { %v11926_v0 = vadd.f32 %v3447_v38, %v11916_v32  ;;  %v3449_v9 = vpop.f32.mrb[81].mxu1 }
0x134c   :  { %v11929_v44 = vadd.f32 %v3449_v9, %v11919_v36  ;;  %9965 = vmatpush3.bf16.msra.mxu0 %v9964_v41 }
0x134d   :  { %v11932_v58 = vmul.f32 0.70710677, %v11926_v0  ;;  %9967 = vmatprep.subr.bf16.mxu0 %v9966_v30 }
0x134e   :  { %v11937_v49 = vmul.f32 0.70710677, %v11929_v44  ;;  %v3453_v45 = vpop.f32.mrb[82].mxu1 }
0x134f   :  { %v3506_v53 = vand.u32 2147483647, %v11932_v58  ;;  %v11943_v28 = vadd.f32 %v3453_v45, %v11916_v32  ;;  %v3455_v21 = vpop.f32.mrb[83].mxu1  ;;  %vm3746_vm8 = vcmp.ge.f32.partialorder %v11932_v58, 0.0  ;;  %v3482_v58 = vmul.f32 0.5, %v11926_v0 }
0x1350   :  { %v3507_v63 = vand.u32 2147483647, %v11937_v49  ;;  %v11947_v25 = vadd.f32 %v3455_v21, %v11919_v36  ;;  %9969 = vmatpush3.bf16.msra.mxu0 %v9968_v55  ;;  %vm3747_vm9 = vcmp.ge.f32.partialorder %v11937_v49, 0.0 }
0x1351   :  { %v3518_v3 = vmul.f32 0.3275911, %v3506_v53  ;;  %v11950_v4 = vmul.f32 0.70710677, %v11943_v28  ;;  %9971 = vmatprep.subr.bf16.mxu0 %v9970_v39  ;;  %v3674_v30 = vsub.f32 0.0, %v3506_v53 }
0x1352   :  { %v3519_v10 = vmul.f32 0.3275911, %v3507_v63  ;;  %v11955_v57 = vmul.f32 0.70710677, %v11947_v25  ;;  %v3459_v23 = vpop.f32.mrb[84].mxu1  ;;  %v3675_v52 = vsub.f32 0.0, %v3507_v63 }
0x1353   :  { %v3530_v33 = vadd.f32 1.0, %v3518_v3  ;;  %v3508_v46 = vand.u32 2147483647, %v11950_v4  ;;  %v3461_v11 = vpop.f32.mrb[85].mxu1  ;;  %v11960_v56 = vadd.f32 %v3459_v23, %v11916_v32  ;;  %v3686_v39 = vmul.f32 %v3674_v30, %v3506_v53 }
0x1354   :  { %v3531_v62 = vadd.f32 1.0, %v3519_v10  ;;  %v3509_v40 = vand.u32 2147483647, %v11955_v57  ;;  %9973 = vmatpush3.bf16.msra.mxu0 %v9972_v2  ;;  %v11963_v31 = vadd.f32 %v3461_v11, %v11919_v36  ;;  %v3687_v24 = vmul.f32 %v3675_v52, %v3507_v63 }
0x1355   :  { %10525 = vrcp.f32 %v3530_v33  ;;  %v3520_v19 = vmul.f32 0.3275911, %v3508_v46  ;;  %9975 = vmatprep.subr.bf16.mxu0 %v9974_v6  ;;  %v11966_v47 = vmul.f32 0.70710677, %v11960_v56  ;;  %v3676_v1 = vsub.f32 0.0, %v3508_v46 }
0x1356   :  { %10527 = vrcp.f32 %v3531_v62  ;;  %v3521_v54 = vmul.f32 0.3275911, %v3509_v40  ;;  %v11970_v41 = vmul.f32 0.70710677, %v11963_v31  ;;  %v3677_v27 = vsub.f32 0.0, %v3509_v40 }
0x1357   :  { %v3532_v34 = vadd.f32 1.0, %v3520_v19  ;;  %v3510_v26 = vand.u32 2147483647, %v11966_v47  ;;  %v3688_v6 = vmul.f32 %v3676_v1, %v3508_v46  ;;  %v3698_v7 = vmul.f32 1.442695, %v3686_v39 }
0x1358   :  { %v3533_v59 = vadd.f32 1.0, %v3521_v54  ;;  %9977 = vmatpush3.bf16.msra.mxu0 %v9976_v12  ;;  %v3511_v38 = vand.u32 2147483647, %v11970_v41  ;;  %v3689_v10 = vmul.f32 %v3677_v27, %v3509_v40  ;;  %v3700_v53 = vmul.f32 1.442695, %v3687_v24 }
0x1359   :  { %10529 = vrcp.f32 %v3532_v34  ;;  %9994 = vmatprep.subr.bf16.mxu0 %v10849_v20  ;;  %v3522_v5 = vmul.f32 0.3275911, %v3510_v26  ;;  %v3678_v12 = vsub.f32 0.0, %v3510_v26  ;;  %v3702_v34 = vmul.f32 1.442695, %v3688_v6 }
0x135a   :  { %10531 = vrcp.f32 %v3533_v59  ;;  %v3523_v9 = vmul.f32 0.3275911, %v3511_v38  ;;  %v3704_v46 = vmul.f32 1.442695, %v3689_v10  ;;  %v3679_v40 = vsub.f32 0.0, %v3511_v38 }
0x135b   :  { %v3534_v48 = vadd.f32 1.0, %v3522_v5  ;;  %vm3748_vm10 = vcmp.ge.f32.partialorder %v11950_v4, 0.0  ;;  %vm3749_vm11 = vcmp.ge.f32.partialorder %v11955_v57, 0.0  ;;  %vm3750_vm12 = vcmp.ge.f32.partialorder %v11966_v47, 0.0 }
0x135c   :  { %v3535_v21 = vadd.f32 1.0, %v3523_v9  ;;  %v3690_v9 = vmul.f32 %v3678_v12, %v3510_v26  ;;  %vm3751_vm13 = vcmp.ge.f32.partialorder %v11970_v41, 0.0 }
0x135d   :  { %10533 = vrcp.f32 %v3534_v48 }
0x135e   :  { %10535 = vrcp.f32 %v3535_v21  ;;  %v3706_v26 = vmul.f32 1.442695, %v3690_v9 }
0x135f   :  { %v10526_v55 = vpop.eup %10525  ;;  %10537 = vpow2.f32 %v3698_v7  ;;  %v3691_v7 = vmul.f32 %v3679_v40, %v3511_v38 }
0x1360   :  { %v10528_v45 = vpop.eup %10527  ;;  %v3566_v51 = vmul.f32 1.0614054, %v10526_v55  ;;  %10539 = vpow2.f32 %v3700_v53 }
0x1361   :  { %v3567_v2 = vmul.f32 1.0614054, %v10528_v45  ;;  %10541 = vpow2.f32 %v3702_v34 }
0x1362   :  { %v3578_v3 = vadd.f32 -1.4531521, %v3566_v51  ;;  %10543 = vpow2.f32 %v3704_v46 }
0x1363   :  { %v11974_v37 = vpop.eup %10529  ;;  %v3579_v33 = vadd.f32 -1.4531521, %v3567_v2  ;;  %10545 = vpow2.f32 %v3706_v26 }
0x1364   :  { %v11976_v23 = vpop.eup %10531  ;;  %v3590_v62 = vmul.f32 %v10526_v55, %v3578_v3  ;;  %v3568_v11 = vmul.f32 1.0614054, %v11974_v37 }
0x1365   :  { %v3591_v19 = vmul.f32 %v10528_v45, %v3579_v33  ;;  %v3569_v63 = vmul.f32 1.0614054, %v11976_v23 }
0x1366   :  { %v3602_v54 = vadd.f32 1.4214138, %v3590_v62  ;;  %v3580_v59 = vadd.f32 -1.4531521, %v3568_v11 }
0x1367   :  { %v3603_v30 = vadd.f32 1.4214138, %v3591_v19  ;;  %v3581_v52 = vadd.f32 -1.4531521, %v3569_v63  ;;  %v11982_v24 = vpop.eup %10533 }
0x1368   :  { %v3614_v5 = vmul.f32 %v10526_v55, %v3602_v54  ;;  %v3592_v1 = vmul.f32 %v11974_v37, %v3580_v59  ;;  %v11984_v3 = vpop.eup %10535  ;;  %v3570_v33 = vmul.f32 1.0614054, %v11982_v24 }
0x1369   :  { %v3615_v39 = vmul.f32 %v10528_v45, %v3603_v30  ;;  %v3593_v27 = vmul.f32 %v11976_v23, %v3581_v52  ;;  %v3571_v11 = vmul.f32 1.0614054, %v11984_v3  ;;  %v3708_v30 = vmul.f32 1.442695, %v3691_v7 }
0x136a   :  { %v3626_v48 = vadd.f32 -0.28449672, %v3614_v5  ;;  %v3604_v51 = vadd.f32 1.4214138, %v3592_v1  ;;  %v3582_v63 = vadd.f32 -1.4531521, %v3570_v33  ;;  %v10538_v5 = vpop.eup %10537 }
0x136b   :  { %v3627_v21 = vadd.f32 -0.28449672, %v3615_v39  ;;  %v3605_v2 = vadd.f32 1.4214138, %v3593_v27  ;;  %v3583_v59 = vadd.f32 -1.4531521, %v3571_v11  ;;  %v10540_v39 = vpop.eup %10539  ;;  %10547 = vpow2.f32 %v3708_v30 }
0x136c   :  { %v3638_v6 = vmul.f32 %v10526_v55, %v3626_v48  ;;  %v3616_v10 = vmul.f32 %v11974_v37, %v3604_v51  ;;  %v3594_v52 = vmul.f32 %v11982_v24, %v3582_v63 }
0x136d   :  { %v3639_v62 = vmul.f32 %v10528_v45, %v3627_v21  ;;  %v3617_v53 = vmul.f32 %v11976_v23, %v3605_v2  ;;  %v3595_v9 = vmul.f32 %v11984_v3, %v3583_v59 }
0x136e   :  { %v3650_v12 = vadd.f32 0.2548296, %v3638_v6  ;;  %v3628_v19 = vadd.f32 -0.28449672, %v3616_v10  ;;  %v3606_v51 = vadd.f32 1.4214138, %v3594_v52 }
0x136f   :  { %v3651_v54 = vadd.f32 0.2548296, %v3639_v62  ;;  %v3629_v34 = vadd.f32 -0.28449672, %v3617_v53  ;;  %v3607_v6 = vadd.f32 1.4214138, %v3595_v9 }
0x1370   :  { %v3662_v46 = vmul.f32 %v10526_v55, %v3650_v12  ;;  %v3640_v38 = vmul.f32 %v11974_v37, %v3628_v19  ;;  %v10542_v55 = vpop.eup %10541  ;;  %v3618_v33 = vmul.f32 %v11982_v24, %v3606_v51 }
0x1371   :  { %v3663_v40 = vmul.f32 %v10528_v45, %v3651_v54  ;;  %v3641_v1 = vmul.f32 %v11976_v23, %v3629_v34  ;;  %v10544_v45 = vpop.eup %10543  ;;  %v3619_v11 = vmul.f32 %v11984_v3, %v3607_v6 }
0x1372   :  { %v3722_v27 = vmul.f32 %v10538_v5, %v3662_v46  ;;  %v3652_v48 = vadd.f32 0.2548296, %v3640_v38  ;;  %v3630_v63 = vadd.f32 -0.28449672, %v3618_v33  ;;  %v3483_v5 = vmul.f32 0.5, %v11929_v44 }
0x1373   :  { %v3723_v21 = vmul.f32 %v10540_v39, %v3663_v40  ;;  %v3653_v2 = vadd.f32 0.2548296, %v3641_v1  ;;  %v3631_v34 = vadd.f32 -0.28449672, %v3619_v11  ;;  %v3484_v33 = vmul.f32 0.5, %v11943_v28 }
0x1374   :  { %v3734_v7 = vsub.f32 1.0, %v3722_v27  ;;  %v3664_v10 = vmul.f32 %v11974_v37, %v3652_v48  ;;  %v3642_v46 = vmul.f32 %v11982_v24, %v3630_v63  ;;  %v3487_v63 = vmul.f32 0.5, %v11963_v31 }
0x1375   :  { %v3735_v62 = vsub.f32 1.0, %v3723_v21  ;;  %v3665_v53 = vmul.f32 %v11976_v23, %v3653_v2  ;;  %v3643_v23 = vmul.f32 %v11984_v3, %v3631_v34  ;;  %v10546_v21 = vpop.eup %10545 }
0x1376   :  { %v3758_v12 = vsub.f32 0.0, %v3734_v7  ;;  %v3724_v19 = vmul.f32 %v10542_v55, %v3664_v10  ;;  %v3654_v9 = vadd.f32 0.2548296, %v3642_v46  ;;  %v3485_v10 = vmul.f32 0.5, %v11947_v25  ;;  %v10780_v46 = vld [vmem:[#allocation2 + $0x18] sm:$0xff] }
0x1377   :  { %v3759_v26 = vsub.f32 0.0, %v3735_v62  ;;  %v3725_v54 = vmul.f32 %v10544_v45, %v3665_v53  ;;  %v3655_v27 = vadd.f32 0.2548296, %v3643_v23  ;;  %v10781_v23 = vld [vmem:[#allocation2 + $0x20] sm:$0xff] }
0x1378   :  { %v3770_v59 = vsel %vm3746_vm8, %v3734_v7, %v3758_v12  ;;  %v3736_v37 = vsub.f32 1.0, %v3724_v19  ;;  %v3666_v51 = vmul.f32 %v11982_v24, %v3654_v9  ;;  %v10548_v7 = vpop.eup %10547 }
0x1379   :  { %v3782_v30 = vadd.f32 1.0, %v3770_v59  ;;  %v3771_v38 = vsel %vm3747_vm9, %v3735_v62, %v3759_v26  ;;  %v3737_v52 = vsub.f32 1.0, %v3725_v54  ;;  %v3667_v44 = vmul.f32 %v11984_v3, %v3655_v27 }
0x137a   :  { %v3783_v40 = vadd.f32 1.0, %v3771_v38  ;;  %v3760_v1 = vsub.f32 0.0, %v3736_v37  ;;  %v3726_v4 = vmul.f32 %v10546_v21, %v3666_v51  ;;  %v3486_v26 = vmul.f32 0.5, %v11960_v56 }
0x137b   :  { %v3761_v39 = vsub.f32 0.0, %v3737_v52  ;;  %v3794_v2 = vmul.f32 %v3782_v30, %v3482_v58  ;;  %v3727_v57 = vmul.f32 %v10548_v7, %v3667_v44  ;;  %v10782_v58 = vld [vmem:[#allocation2 + $0x28] sm:$0xff] }
0x137c   :  { %v3795_v49 = vmul.f32 %v3783_v40, %v3483_v5  ;;  %v3772_v48 = vsel %vm3748_vm10, %v3736_v37, %v3760_v1  ;;  %v3738_v62 = vsub.f32 1.0, %v3726_v4 }
0x137d   :  { %v3773_v6 = vsel %vm3749_vm11, %v3737_v52, %v3761_v39  ;;  %v3784_v55 = vadd.f32 1.0, %v3772_v48  ;;  %v3739_v24 = vsub.f32 1.0, %v3727_v57 }
0x137e   :  { %3902 = vmatprep.mubr.f32.mxu0 %v3795_v49  ;;  %v3785_v0 = vadd.f32 1.0, %v3773_v6  ;;  %v3762_v11 = vsub.f32 0.0, %v3738_v62 }
0x137f   :  { %3903 = vmatmul.mubr.f32.vlgmr.msra.gmra.mrb[80].mxu0 %v3794_v2  ;;  %v3796_v53 = vmul.f32 %v3784_v55, %v3484_v33  ;;  %v3763_v3 = vsub.f32 0.0, %v3739_v24  ;;  %v12033_v2 = vld [vmem:[%s13412_s8] ss:$0 sm:$0xff] }
0x1380   :  { %v3797_v45 = vmul.f32 %v3785_v0, %v3485_v10  ;;  %v3774_v25 = vsel %vm3750_vm12, %v3738_v62, %v3762_v11 }
0x1381   :  { %v3775_v12 = vsel %vm3751_vm13, %v3739_v24, %v3763_v3  ;;  %v3786_v19 = vadd.f32 1.0, %v3774_v25 }
0x1382   :  { %3907 = vmatprep.mubr.f32.mxu0 %v3797_v45  ;;  %v3787_v28 = vadd.f32 1.0, %v3775_v12 }
0x1383   :  { %3908 = vmatmul.mubr.f32.gmra.mrb[82].mxu0 %v3796_v53  ;;  %v3798_v34 = vmul.f32 %v3786_v19, %v3486_v26 }
0x1384   :  { %v3799_v54 = vmul.f32 %v3787_v28, %v3487_v63 }
0x1386   :  { %3912 = vmatprep.mubr.f32.mxu0 %v3799_v54 }
0x1387   :  { %3913 = vmatmul.mubr.f32.gmra.mrb[84].mxu0 %v3798_v34 }
0x140e   :  { %v3195_v59 = vpop.f32.mrb[74].mxu0 }
0x140f   :  { %v3209_v37 = vadd.f32 %v3195_v59, %v11827_v60  ;;  %v9402_v47 = vpop.f32.mrb[75].mxu0 }
0x1411   :  { %v3215_v30 = vadd.f32 %v10780_v46, %v3209_v37 }
0x1412   :  { %v3200_v38 = vpop.f32.mrb[76].mxu0 }
0x1413   :  { %v12016_v41 = vadd.f32 %v11772_v14, %v3215_v30  ;;  %v3210_v52 = vadd.f32 %v3200_v38, %v11830_v17  ;;  %v9405_v31 = vpop.f32.mrb[77].mxu0 }
0x1415   :  { %v3216_v5 = vadd.f32 %v10781_v23, %v3210_v52  ;;  %v3242_v56 = vsel %vm286_vm1, %v12016_v41, 0.0 }
0x1416   :  { %3243 = vadd.xlane.f32.xlu1 %v3242_v56  ;;  %v3205_v40 = vpop.f32.mrb[78].mxu0 }
0x1417   :  { %v12022_v60 = vadd.f32 %v11772_v14, %v3216_v5  ;;  %v3211_v1 = vadd.f32 %v3205_v40, %v11835_v22  ;;  %v9408_v9 = vpop.f32.mrb[79].mxu0 }
0x1419   :  { %v3217_v39 = vadd.f32 %v10782_v58, %v3211_v1  ;;  %v3245_v17 = vsel %vm286_vm1, %v12022_v60, 0.0 }
0x141a   :  { %3246 = vadd.xlane.f32.xlu0 %v3245_v17 }
0x141b   :  { %v12028_v27 = vadd.f32 %v11772_v14, %v3217_v39 }
0x141d   :  { %v3248_v49 = vsel %vm286_vm1, %v12028_v27, 0.0 }
0x141e   :  { %3249 = vadd.xlane.f32.xlu1 %v3248_v49  ;;  %v4057_v49 = vld [vmem:[%s13413_s14 + $0x8] sm:$0xff] }
0x1452   :  { %v8775_v48 = vpop.f32.mrb[80].mxu0 }
0x1453   :  { %v8776_v51 = vpop.f32.mrb[81].mxu0 }
0x1454   :  { %v8777_v21 = vadd.f32 %v8776_v51, %v8775_v48  ;;  %v4059_v48 = vld [vmem:[%s13413_s14 + $0x18] sm:$0xff] }
0x1455   :  { %v9978_v51 = vpack.c.bf16 %v4059_v48, %v4057_v49 }
0x1456   :  { %v3933_v22 = vadd.f32 %v8777_v21, %v11784_v35  ;;  %v8778_v6 = vpop.f32.mrb[82].mxu0  ;;  %v4056_v21 = vld [vmem:[%s13413_s14] sm:$0xff] }
0x1457   :  { %v8779_v55 = vpop.f32.mrb[83].mxu0  ;;  %9979 = vmatprep.subr.bf16.mxu1 %v9978_v51 }
0x1458   :  { %v12037_v44 = vadd.f32 %v12033_v2, %v3933_v22  ;;  %v8780_v7 = vadd.f32 %v8779_v55, %v8778_v6  ;;  %v4058_v22 = vld [vmem:[%s13413_s14 + $0x10] sm:$0xff]  ;;  %v4061_v55 = vld [vmem:[%s13413_s14 + $0x28] sm:$0xff] }
0x1459   :  { %v9980_v6 = vpack.c.bf16 %v4058_v22, %v4056_v21 }
0x145a   :  { %v3934_v14 = vadd.f32 %v8780_v7, %v11791_v43  ;;  %v3954_v10 = vsel %vm286_vm1, %v12037_v44, 0.0  ;;  %v8781_v4 = vpop.f32.mrb[84].mxu0  ;;  %v4063_v7 = vld [vmem:[%s13413_s14 + $0x38] sm:$0xff] }
0x145b   :  { %3955 = vadd.xlane.f32.xlu1 %v3954_v10  ;;  %v8782_v35 = vpop.f32.mrb[85].mxu0  ;;  %9981 = vmatpush1.bf16.msra.mxu1 %v9980_v6  ;;  %v4060_v10 = vld [vmem:[%s13413_s14 + $0x20] sm:$0xff] }
0x145c   :  { %v12043_v0 = vadd.f32 %v12033_v2, %v3934_v14  ;;  %v8783_v57 = vadd.f32 %v8782_v35, %v8781_v4  ;;  %v9982_v14 = vpack.c.bf16 %v4063_v7, %v4061_v55  ;;  %v4062_v4 = vld [vmem:[%s13413_s14 + $0x30] sm:$0xff]  ;;  %v4065_v35 = vld [vmem:[%s13413_s14 + $0x48] sm:$0xff] }
0x145e   :  { %v3957_v33 = vsel %vm286_vm1, %v12043_v0, 0.0  ;;  %v3935_v45 = vadd.f32 %v8783_v57, %v11778_v29  ;;  %9983 = vmatprep.subr.bf16.mxu1 %v9982_v14  ;;  %v4067_v57 = vld [vmem:[%s13413_s14 + $0x58] sm:$0xff] }
0x145f   :  { %3958 = vadd.xlane.f32.xlu0 %v3957_v33  ;;  %v9984_v33 = vpack.c.bf16 %v4062_v4, %v4060_v10  ;;  %v12122_v4 = vld [vmem:[%s13414_s19] ss:$0 sm:$0xff] }
0x1460   :  { %v12049_v62 = vadd.f32 %v12033_v2, %v3935_v45  ;;  %v9986_v45 = vpack.c.bf16 %v4067_v57, %v4065_v35  ;;  %v12126_v35 = vld [vmem:[%s13415_s24] ss:$0 sm:$0xff] }
0x1461   :  { %9985 = vmatpush1.bf16.msra.mxu1 %v9984_v33 }
0x1462   :  { %v3960_v43 = vsel %vm286_vm1, %v12049_v62, 0.0  ;;  %9987 = vmatprep.subr.bf16.mxu1 %v9986_v45 }
0x1463   :  { %3961 = vadd.xlane.f32.xlu1 %v3960_v43  ;;  %v4064_v43 = vld [vmem:[%s13413_s14 + $0x40] sm:$0xff] }
0x14a3   :  { %v3244_v53 = vpop.xlane.xlu1 %3243 }
0x14a4   :  { %v3254_v24 = vmul.f32 0.015625, %v3244_v53  ;;  %v4066_v53 = vld [vmem:[%s13413_s14 + $0x50] sm:$0xff] }
0x14a6   :  { %v12054_v11 = vsub.f32 %v12016_v41, %v3254_v24  ;;  %v9988_v24 = vpack.c.bf16 %v4066_v53, %v4064_v43 }
0x14a7   :  { %v3247_v3 = vpop.xlane.xlu0 %3246 }
0x14a8   :  { %v3255_v25 = vmul.f32 0.015625, %v3247_v3  ;;  %v3266_v12 = vmul.f32 %v12054_v11, %v12054_v11  ;;  %v4069_v3 = vld [vmem:[%s13413_s14 + $0x68] sm:$0xff]  ;;  %9989 = vmatpush1.bf16.msra.mxu1 %v9988_v24 }
0x14aa   :  { %v12059_v19 = vsub.f32 %v12022_v60, %v3255_v25  ;;  %v3278_v29 = vsel %vm286_vm1, %v3266_v12, 0.0  ;;  %v4071_v25 = vld [vmem:[%s13413_s14 + $0x78] sm:$0xff]  ;;  %v4068_v12 = vld [vmem:[%s13413_s14 + $0x60] sm:$0xff] }
0x14ab   :  { %v3250_v63 = vpop.xlane.xlu1 %3249  ;;  %3279 = vadd.xlane.f32.xlu0 %v3278_v29  ;;  %v9990_v29 = vpack.c.bf16 %v4071_v25, %v4069_v3 }
0x14ac   :  { %v3256_v28 = vmul.f32 0.015625, %v3250_v63  ;;  %v3267_v26 = vmul.f32 %v12059_v19, %v12059_v19  ;;  %v4070_v63 = vld [vmem:[%s13413_s14 + $0x70] sm:$0xff] }
0x14ad   :  { %9991 = vmatprep.subr.bf16.mxu1 %v9990_v29 }
0x14ae   :  { %v12065_v54 = vsub.f32 %v12028_v27, %v3256_v28  ;;  %v3281_v34 = vsel %vm286_vm1, %v3267_v26, 0.0  ;;  %v9992_v28 = vpack.c.bf16 %v4070_v63, %v4068_v12 }
0x14af   :  { %3282 = vadd.xlane.f32.xlu1 %v3281_v34 }
0x14b0   :  { %v3268_v59 = vmul.f32 %v12065_v54, %v12065_v54  ;;  %9993 = vmatpush1.bf16.msra.mxu1 %v9992_v28 }
0x14b1   :  { %9998 = vmatprep.subr.bf16.mxu1 %v10849_v20 }
0x14b2   :  { %v3284_v37 = vsel %vm286_vm1, %v3268_v59, 0.0 }
0x14b3   :  { %3285 = vadd.xlane.f32.xlu0 %v3284_v37 }
0x14e8   :  { %v3956_v47 = vpop.xlane.xlu1 %3955 }
0x14e9   :  { %v3972_v46 = vmul.f32 0.015625, %v3956_v47 }
0x14eb   :  { %v12072_v30 = vsub.f32 %v12037_v44, %v3972_v46 }
0x14ec   :  { %v3959_v38 = vpop.xlane.xlu0 %3958 }
0x14ed   :  { %v3973_v52 = vmul.f32 0.015625, %v3959_v38  ;;  %v3984_v31 = vmul.f32 %v12072_v30, %v12072_v30 }
0x14ef   :  { %v12077_v23 = vsub.f32 %v12043_v0, %v3973_v52  ;;  %v3990_v5 = vsel %vm286_vm1, %v3984_v31, 0.0 }
0x14f0   :  { %3991 = vadd.xlane.f32.xlu1 %v3990_v5  ;;  %v3962_v1 = vpop.xlane.xlu1 %3961 }
0x14f1   :  { %v3985_v56 = vmul.f32 %v12077_v23, %v12077_v23  ;;  %v3974_v9 = vmul.f32 0.015625, %v3962_v1 }
0x14f3   :  { %v3993_v40 = vsel %vm286_vm1, %v3985_v56, 0.0  ;;  %v12084_v58 = vsub.f32 %v12049_v62, %v3974_v9 }
0x14f4   :  { %3994 = vadd.xlane.f32.xlu0 %v3993_v40 }
0x14f5   :  { %v3986_v39 = vmul.f32 %v12084_v58, %v12084_v58 }
0x14f7   :  { %v3996_v17 = vsel %vm286_vm1, %v3986_v39, 0.0 }
0x14f8   :  { %3997 = vadd.xlane.f32.xlu1 %v3996_v17 }
0x1538   :  { %v3280_v26 = vpop.xlane.xlu0 %3279 }
0x1539   :  { %v3290_v34 = vmul.f32 0.015625, %v3280_v26 }
0x153b   :  { %v3296_v59 = vadd.f32 1e-06, %v3290_v34 }
0x153c   :  { %v3283_v37 = vpop.xlane.xlu1 %3282 }
0x153d   :  { %10549 = vrsqrt.f32 %v3296_v59  ;;  %v3291_v47 = vmul.f32 0.015625, %v3283_v37 }
0x153f   :  { %v3297_v46 = vadd.f32 1e-06, %v3291_v47 }
0x1540   :  { %v3286_v38 = vpop.xlane.xlu0 %3285 }
0x1541   :  { %10551 = vrsqrt.f32 %v3297_v46  ;;  %v3292_v52 = vmul.f32 0.015625, %v3286_v38 }
0x1543   :  { %v3298_v31 = vadd.f32 1e-06, %v3292_v52 }
0x1545   :  { %10553 = vrsqrt.f32 %v3298_v31 }
0x1547   :  { %v10550_v5 = vpop.eup %10549 }
0x1548   :  { %v3308_v56 = vmul.f32 %v10550_v5, %v12054_v11 }
0x154a   :  { %v3320_v40 = vmul.f32 %v11864_v50, %v3308_v56 }
0x154b   :  { %v10552_v1 = vpop.eup %10551 }
0x154c   :  { %v3332_v9 = vadd.f32 %v11871_v8, %v3320_v40  ;;  %v3309_v39 = vmul.f32 %v10552_v1, %v12059_v19 }
0x154e   :  { %8469 = vmatmul.mubr.msk.f32.gmra.mrb[86].mxu1 %vm286_vm1, %v3332_v9  ;;  %v3321_v17 = vmul.f32 %v11864_v50, %v3309_v39 }
0x154f   :  { %v10554_v49 = vpop.eup %10553  ;;  %3469 = vmatprep.mubr.f32.mxu1 %v10848_v13 }
0x1550   :  { %v3333_v48 = vadd.f32 %v11871_v8, %v3321_v17  ;;  %v3310_v51 = vmul.f32 %v10554_v49, %v12065_v54 }
0x1552   :  { %8470 = vmatmul.mubr.msk.f32.gmra.mrb[88].mxu1 %vm286_vm1, %v3333_v48  ;;  %v3322_v11 = vmul.f32 %v11864_v50, %v3310_v51 }
0x1553   :  { %3475 = vmatprep.mubr.f32.mxu1 %v10848_v13 }
0x1554   :  { %v3334_v19 = vadd.f32 %v11871_v8, %v3322_v11 }
0x1556   :  { %8471 = vmatmul.mubr.msk.f32.gmra.mrb[90].mxu1 %vm286_vm1, %v3334_v19 }
0x1557   :  { %4166 = vmatprep.mubr.f32.mxu1 %v10848_v13 }
0x157d   :  { %v3992_v21 = vpop.xlane.xlu1 %3991 }
0x157e   :  { %v4008_v22 = vmul.f32 0.015625, %v3992_v21 }
0x1580   :  { %v4014_v6 = vadd.f32 1e-06, %v4008_v22 }
0x1581   :  { %v3995_v55 = vpop.xlane.xlu0 %3994 }
0x1582   :  { %10555 = vrsqrt.f32 %v4014_v6  ;;  %v4009_v54 = vmul.f32 0.015625, %v3995_v55 }
0x1584   :  { %v4015_v7 = vadd.f32 1e-06, %v4009_v54 }
0x1585   :  { %v3998_v14 = vpop.xlane.xlu1 %3997 }
0x1586   :  { %10557 = vrsqrt.f32 %v4015_v7  ;;  %v4010_v50 = vmul.f32 0.015625, %v3998_v14 }
0x1588   :  { %v4016_v33 = vadd.f32 1e-06, %v4010_v50 }
0x158a   :  { %10559 = vrsqrt.f32 %v4016_v33 }
0x158c   :  { %v10556_v10 = vpop.eup %10555 }
0x158d   :  { %v4026_v8 = vmul.f32 %v10556_v10, %v12072_v30 }
0x158f   :  { %v4038_v57 = vmul.f32 %v12122_v4, %v4026_v8 }
0x1590   :  { %v10558_v45 = vpop.eup %10557 }
0x1591   :  { %v4050_v43 = vadd.f32 %v12126_v35, %v4038_v57  ;;  %v4027_v53 = vmul.f32 %v10558_v45, %v12077_v23 }
0x1593   :  { %8475 = vmatmul.mubr.msk.f32.vlgmr.msra.gmra.mrb[92].mxu1 %vm286_vm1, %v4050_v43  ;;  %v4039_v24 = vmul.f32 %v12122_v4, %v4027_v53 }
0x1594   :  { %4172 = vmatprep.mubr.f32.mxu1 %v10848_v13  ;;  %v10560_v30 = vpop.eup %10559 }
0x1595   :  { %v4051_v3 = vadd.f32 %v12126_v35, %v4039_v24  ;;  %v4028_v25 = vmul.f32 %v10560_v30, %v12084_v58 }
0x1597   :  { %8476 = vmatmul.mubr.msk.f32.gmra.mrb[94].mxu1 %vm286_vm1, %v4051_v3  ;;  %v4040_v12 = vmul.f32 %v12122_v4, %v4028_v25 }
0x1598   :  { %4178 = vmatprep.mubr.f32.mxu1 %v10848_v13 }
0x1599   :  { %v4052_v29 = vadd.f32 %v12126_v35, %v4040_v12 }
0x159b   :  { %8477 = vmatmul.mubr.msk.f32.gmra.mrb[96].mxu1 %vm286_vm1, %v4052_v29 }
0x159c   :  { %4184 = vmatprep.mubr.f32.mxu1 %v10848_v13 }
0x1621   :  { %v3465_v23 = vpop.f32.mrb[86].mxu1 }
0x1622   :  { %v12143_v63 = vadd.f32 %v3465_v23, %v11916_v32  ;;  %v3467_v28 = vpop.f32.mrb[87].mxu1 }
0x1623   :  { %v12146_v26 = vadd.f32 %v3467_v28, %v11919_v36 }
0x1624   :  { %v12149_v34 = vmul.f32 0.70710677, %v12143_v63 }
0x1625   :  { %v12152_v58 = vmul.f32 0.70710677, %v12146_v26  ;;  %v3471_v59 = vpop.f32.mrb[88].mxu1 }
0x1626   :  { %v3512_v37 = vand.u32 2147483647, %v12149_v34  ;;  %v12156_v47 = vadd.f32 %v3471_v59, %v11916_v32  ;;  %v3473_v46 = vpop.f32.mrb[89].mxu1  ;;  %vm3752_vm14 = vcmp.ge.f32.partialorder %v12149_v34, 0.0  ;;  %v3488_v34 = vmul.f32 0.5, %v12143_v63 }
0x1627   :  { %v3513_v38 = vand.u32 2147483647, %v12152_v58  ;;  %v12160_v52 = vadd.f32 %v3473_v46, %v11919_v36  ;;  %vm3753_vm15 = vcmp.ge.f32.partialorder %v12152_v58, 0.0 }
0x1628   :  { %v3524_v31 = vmul.f32 0.3275911, %v3512_v37  ;;  %v12163_v5 = vmul.f32 0.70710677, %v12156_v47  ;;  %v3680_v7 = vsub.f32 0.0, %v3512_v37 }
0x1629   :  { %v3525_v56 = vmul.f32 0.3275911, %v3513_v38  ;;  %v12166_v40 = vmul.f32 0.70710677, %v12160_v52  ;;  %v3477_v39 = vpop.f32.mrb[90].mxu1  ;;  %v3681_v50 = vsub.f32 0.0, %v3513_v38 }
0x162a   :  { %v3536_v1 = vadd.f32 1.0, %v3524_v31  ;;  %v3514_v9 = vand.u32 2147483647, %v12163_v5  ;;  %v3479_v48 = vpop.f32.mrb[91].mxu1  ;;  %v12171_v21 = vadd.f32 %v3477_v39, %v11916_v32  ;;  %vm3754_vm2 = vcmp.ge.f32.partialorder %v12163_v5, 0.0 }
0x162b   :  { %v3537_v17 = vadd.f32 1.0, %v3525_v56  ;;  %v3515_v49 = vand.u32 2147483647, %v12166_v40  ;;  %v12174_v6 = vadd.f32 %v3479_v48, %v11919_v36  ;;  %v3692_v36 = vmul.f32 %v3680_v7, %v3512_v37 }
0x162c   :  { %10561 = vrcp.f32 %v3536_v1  ;;  %v3526_v51 = vmul.f32 0.3275911, %v3514_v9  ;;  %v12177_v55 = vmul.f32 0.70710677, %v12171_v21  ;;  %v3682_v33 = vsub.f32 0.0, %v3514_v9 }
0x162d   :  { %10563 = vrcp.f32 %v3537_v17  ;;  %v3527_v11 = vmul.f32 0.3275911, %v3515_v49  ;;  %v12180_v54 = vmul.f32 0.70710677, %v12174_v6  ;;  %v3683_v45 = vsub.f32 0.0, %v3515_v49 }
0x162e   :  { %v3538_v19 = vadd.f32 1.0, %v3526_v51  ;;  %v3516_v14 = vand.u32 2147483647, %v12177_v55  ;;  %v3693_v24 = vmul.f32 %v3681_v50, %v3513_v38  ;;  %v3694_v12 = vmul.f32 %v3682_v33, %v3514_v9 }
0x162f   :  { %v3539_v22 = vadd.f32 1.0, %v3527_v11  ;;  %v3517_v10 = vand.u32 2147483647, %v12180_v54  ;;  %v3710_v28 = vmul.f32 1.442695, %v3692_v36  ;;  %v3695_v59 = vmul.f32 %v3683_v45, %v3515_v49 }
0x1630   :  { %10565 = vrcp.f32 %v3538_v19  ;;  %v3528_v32 = vmul.f32 0.3275911, %v3516_v14  ;;  %v3712_v56 = vmul.f32 1.442695, %v3693_v24  ;;  %v3684_v39 = vsub.f32 0.0, %v3516_v14 }
0x1631   :  { %10567 = vrcp.f32 %v3539_v22  ;;  %v3529_v8 = vmul.f32 0.3275911, %v3517_v10  ;;  %v3714_v48 = vmul.f32 1.442695, %v3694_v12  ;;  %v3716_v11 = vmul.f32 1.442695, %v3695_v59 }
0x1632   :  { %v3540_v43 = vadd.f32 1.0, %v3528_v32  ;;  %v3685_v49 = vsub.f32 0.0, %v3517_v10  ;;  %v3696_v32 = vmul.f32 %v3684_v39, %v3516_v14  ;;  %vm3755_vm8 = vcmp.ge.f32.partialorder %v12166_v40, 0.0 }
0x1633   :  { %v3541_v3 = vadd.f32 1.0, %v3529_v8  ;;  %vm3756_vm9 = vcmp.ge.f32.partialorder %v12177_v55, 0.0  ;;  %vm3757_vm10 = vcmp.ge.f32.partialorder %v12180_v54, 0.0  ;;  %v4072_v55 = vld [vmem:[%s13416_s30] sm:$0x3] }
0x1634   :  { %10569 = vrcp.f32 %v3540_v43  ;;  %v3718_v14 = vmul.f32 1.442695, %v3696_v32 }
0x1635   :  { %10571 = vrcp.f32 %v3541_v3 }
0x1636   :  { %v10562_v57 = vpop.eup %10561  ;;  %10573 = vpow2.f32 %v3710_v28 }
0x1637   :  { %v10564_v53 = vpop.eup %10563  ;;  %v3572_v30 = vmul.f32 1.0614054, %v10562_v57  ;;  %10575 = vpow2.f32 %v3712_v56 }
0x1638   :  { %v3573_v25 = vmul.f32 1.0614054, %v10564_v53  ;;  %10577 = vpow2.f32 %v3714_v48 }
0x1639   :  { %v3584_v29 = vadd.f32 -1.4531521, %v3572_v30  ;;  %10579 = vpow2.f32 %v3716_v11 }
0x163a   :  { %v12184_v23 = vpop.eup %10565  ;;  %v3585_v46 = vadd.f32 -1.4531521, %v3573_v25  ;;  %v3697_v25 = vmul.f32 %v3685_v49, %v3517_v10  ;;  %10581 = vpow2.f32 %v3718_v14 }
0x163b   :  { %v12186_v31 = vpop.eup %10567  ;;  %v3596_v37 = vmul.f32 %v10562_v57, %v3584_v29  ;;  %v3574_v1 = vmul.f32 1.0614054, %v12184_v23 }
0x163c   :  { %v3597_v38 = vmul.f32 %v10564_v53, %v3585_v46  ;;  %v3575_v17 = vmul.f32 1.0614054, %v12186_v31 }
0x163d   :  { %v3608_v51 = vadd.f32 1.4214138, %v3596_v37  ;;  %v3586_v9 = vadd.f32 -1.4531521, %v3574_v1 }
0x163e   :  { %v3609_v19 = vadd.f32 1.4214138, %v3597_v38  ;;  %v3587_v22 = vadd.f32 -1.4531521, %v3575_v17  ;;  %v12192_v43 = vpop.eup %10569 }
0x163f   :  { %v3620_v7 = vmul.f32 %v10562_v57, %v3608_v51  ;;  %v3598_v50 = vmul.f32 %v12184_v23, %v3586_v9  ;;  %v12194_v30 = vpop.eup %10571  ;;  %v3576_v28 = vmul.f32 1.0614054, %v12192_v43  ;;  %v3720_v51 = vmul.f32 1.442695, %v3697_v25 }
0x1640   :  { %v3621_v33 = vmul.f32 %v10564_v53, %v3609_v19  ;;  %v3599_v8 = vmul.f32 %v12186_v31, %v3587_v22  ;;  %v3577_v56 = vmul.f32 1.0614054, %v12194_v30  ;;  %v10574_v19 = vpop.eup %10573 }
0x1641   :  { %v3632_v36 = vadd.f32 -0.28449672, %v3620_v7  ;;  %v3610_v45 = vadd.f32 1.4214138, %v3598_v50  ;;  %v3588_v39 = vadd.f32 -1.4531521, %v3576_v28  ;;  %v10576_v50 = vpop.eup %10575  ;;  %10583 = vpow2.f32 %v3720_v51 }
0x1642   :  { %v3633_v24 = vadd.f32 -0.28449672, %v3621_v33  ;;  %v3611_v3 = vadd.f32 1.4214138, %v3599_v8  ;;  %v3589_v48 = vadd.f32 -1.4531521, %v3577_v56 }
0x1643   :  { %v3644_v12 = vmul.f32 %v10562_v57, %v3632_v36  ;;  %v3622_v29 = vmul.f32 %v12184_v23, %v3610_v45  ;;  %v3600_v11 = vmul.f32 %v12192_v43, %v3588_v39 }
0x1644   :  { %v3645_v59 = vmul.f32 %v10564_v53, %v3633_v24  ;;  %v3623_v46 = vmul.f32 %v12186_v31, %v3611_v3  ;;  %v3601_v7 = vmul.f32 %v12194_v30, %v3589_v48  ;;  %v10578_v3 = vpop.eup %10577 }
0x1645   :  { %v3656_v37 = vadd.f32 0.2548296, %v3644_v12  ;;  %v3634_v1 = vadd.f32 -0.28449672, %v3622_v29  ;;  %v3612_v8 = vadd.f32 1.4214138, %v3600_v11 }
0x1646   :  { %v3657_v38 = vadd.f32 0.2548296, %v3645_v59  ;;  %v3635_v17 = vadd.f32 -0.28449672, %v3623_v46  ;;  %v3613_v24 = vadd.f32 1.4214138, %v3601_v7 }
0x1647   :  { %v3668_v9 = vmul.f32 %v10562_v57, %v3656_v37  ;;  %v3646_v10 = vmul.f32 %v12184_v23, %v3634_v1  ;;  %v3624_v12 = vmul.f32 %v12192_v43, %v3612_v8 }
0x1648   :  { %v3669_v22 = vmul.f32 %v10564_v53, %v3657_v38  ;;  %v3647_v49 = vmul.f32 %v12186_v31, %v3635_v17  ;;  %v10580_v53 = vpop.eup %10579  ;;  %v3625_v59 = vmul.f32 %v12194_v30, %v3613_v24 }
0x1649   :  { %v3728_v32 = vmul.f32 %v10574_v19, %v3668_v9  ;;  %v3658_v33 = vadd.f32 0.2548296, %v3646_v10  ;;  %v3636_v37 = vadd.f32 -0.28449672, %v3624_v12  ;;  %v3489_v10 = vmul.f32 0.5, %v12146_v26 }
0x164a   :  { %v3729_v36 = vmul.f32 %v10576_v50, %v3669_v22  ;;  %v3659_v45 = vadd.f32 0.2548296, %v3647_v49  ;;  %v3637_v39 = vadd.f32 -0.28449672, %v3625_v59 }
0x164b   :  { %v3740_v57 = vsub.f32 1.0, %v3728_v32  ;;  %v3670_v25 = vmul.f32 %v12184_v23, %v3658_v33  ;;  %v3648_v17 = vmul.f32 %v12192_v43, %v3636_v37  ;;  %v10582_v33 = vpop.eup %10581 }
0x164c   :  { %v3741_v29 = vsub.f32 1.0, %v3729_v36  ;;  %v3671_v28 = vmul.f32 %v12186_v31, %v3659_v45  ;;  %v3649_v31 = vmul.f32 %v12194_v30, %v3637_v39  ;;  %v10584_v24 = vpop.eup %10583  ;;  %v12228_v39 = vrot.slane %v4072_v55, %v11169_v16 }
0x164d   :  { %v3764_v46 = vsub.f32 0.0, %v3740_v57  ;;  %v3730_v56 = vmul.f32 %v10578_v3, %v3670_v25  ;;  %v3660_v22 = vadd.f32 0.2548296, %v3648_v17  ;;  %v3491_v3 = vmul.f32 0.5, %v12160_v52 }
0x164e   :  { %v3765_v14 = vsub.f32 0.0, %v3741_v29  ;;  %v3731_v1 = vmul.f32 %v10580_v53, %v3671_v28  ;;  %v3661_v58 = vadd.f32 0.2548296, %v3649_v31 }
0x164f   :  { %v3776_v38 = vsel %vm3752_vm14, %v3740_v57, %v3764_v46  ;;  %v3742_v23 = vsub.f32 1.0, %v3730_v56  ;;  %v3672_v32 = vmul.f32 %v12192_v43, %v3660_v22  ;;  %v3490_v57 = vmul.f32 0.5, %v12156_v47 }
0x1650   :  { %v3777_v48 = vsel %vm3753_vm15, %v3741_v29, %v3765_v14  ;;  %v3788_v51 = vadd.f32 1.0, %v3776_v38  ;;  %v3743_v9 = vsub.f32 1.0, %v3731_v1  ;;  %v3673_v26 = vmul.f32 %v12194_v30, %v3661_v58 }
0x1651   :  { %v3789_v11 = vadd.f32 1.0, %v3777_v48  ;;  %v3766_v19 = vsub.f32 0.0, %v3742_v23  ;;  %v3732_v5 = vmul.f32 %v10582_v33, %v3672_v32  ;;  %v3493_v47 = vmul.f32 0.5, %v12174_v6 }
0x1652   :  { %v3767_v49 = vsub.f32 0.0, %v3743_v9  ;;  %v3800_v8 = vmul.f32 %v3788_v51, %v3488_v34  ;;  %v3733_v40 = vmul.f32 %v10584_v24, %v3673_v26  ;;  %v3492_v56 = vmul.f32 0.5, %v12171_v21 }
0x1653   :  { %v3801_v7 = vmul.f32 %v3789_v11, %v3489_v10  ;;  %v3778_v50 = vsel %vm3754_vm2, %v3742_v23, %v3766_v19  ;;  %v3744_v12 = vsub.f32 1.0, %v3732_v5  ;;  %v12231_v38 = vrot.slane %v4072_v55, %v11173_v18 }
0x1654   :  { %v3779_v36 = vsel %vm3755_vm8, %v3743_v9, %v3767_v49  ;;  %v3790_v45 = vadd.f32 1.0, %v3778_v50  ;;  %v3745_v43 = vsub.f32 1.0, %v3733_v40 }
0x1655   :  { %3917 = vmatprep.mubr.f32.mxu0 %v3801_v7  ;;  %v3791_v63 = vadd.f32 1.0, %v3779_v36  ;;  %v3768_v29 = vsub.f32 0.0, %v3744_v12 }
0x1656   :  { %3918 = vmatmul.mubr.f32.gmra.mrb[86].mxu0 %v3800_v8  ;;  %v3802_v53 = vmul.f32 %v3790_v45, %v3490_v57  ;;  %v3769_v30 = vsub.f32 0.0, %v3745_v43 }
0x1657   :  { %v3803_v25 = vmul.f32 %v3791_v63, %v3491_v3  ;;  %v3780_v52 = vsel %vm3756_vm9, %v3744_v12, %v3768_v29 }
0x1658   :  { %v3781_v28 = vsel %vm3757_vm10, %v3745_v43, %v3769_v30  ;;  %v3792_v59 = vadd.f32 1.0, %v3780_v52 }
0x1659   :  { %3922 = vmatprep.mubr.f32.mxu0 %v3803_v25  ;;  %v3793_v46 = vadd.f32 1.0, %v3781_v28 }
0x165a   :  { %3923 = vmatmul.mubr.f32.gmra.mrb[88].mxu0 %v3802_v53  ;;  %v3804_v14 = vmul.f32 %v3792_v59, %v3492_v56 }
0x165b   :  { %v3805_v37 = vmul.f32 %v3793_v46, %v3493_v47 }
0x165d   :  { %3927 = vmatprep.mubr.f32.mxu0 %v3805_v37 }
0x165e   :  { %3928 = vmatmul.mubr.f32.gmra.mrb[90].mxu0 %v3804_v14 }
0x165f   :  { %9415 = vmatprep.mubr.msk.f32.mxu0 %vm10851_vm3, %v10848_v13 }
0x1666   :  { %v4168_v1 = vpop.f32.mrb[92].mxu1 }
0x1667   :  { %v4170_v54 = vpop.f32.mrb[93].mxu1  ;;  %v12234_v23 = vadd.f32 %v4168_v1, %v12228_v39 }
0x1668   :  { %v4171_v48 = vadd.f32 %v4170_v54, %v12231_v38 }
0x166a   :  { %v4174_v6 = vpop.f32.mrb[94].mxu1 }
0x166b   :  { %v12237_v21 = vadd.f32 %v4174_v6, %v12228_v39  ;;  %v4176_v17 = vpop.f32.mrb[95].mxu1 }
0x166c   :  { %v4177_v51 = vadd.f32 %v4176_v17, %v12231_v38 }
0x166d   :  { %v12243_v9 = vpack.i.bf16 %v12237_v21, %v12234_v23 }
0x166e   :  { %v9999_v31 = vpack.c.bf16 %v4177_v51, %v4171_v48  ;;  %v12245_v10 = vpack.i.bf16 %v4177_v51, %v4171_v48  ;;  %v4180_v11 = vpop.f32.mrb[96].mxu1 }
0x166f   :  { %10342 = vrot.lane.b32.xlu0 %v12243_v9, %s10850_s0  ;;  %v12251_v19 = vadd.f32 %v4180_v11, %v12228_v39  ;;  %v4182_v22 = vpop.f32.mrb[97].mxu1 }
0x1670   :  { %10000 = vmatpush3.bf16.msra.mxu1 %v9999_v31  ;;  %v12256_v34 = vadd.f32 %v4182_v22, %v12231_v38 }
0x1671   :  { %9428 = vmatprep.subr.mxu1 %v10848_v13  ;;  %4218 = vrot.lane.b32.xlu1 %v12251_v19, %s10850_s0 }
0x1673   :  { %4440 = vrot.lane.b32.xlu0 %v12234_v23, %s10852_s5 }
0x1674   :  { %9429 = vmatpush3.msra.mxu1 %v12256_v34 }
0x1675   :  { %10005 = vmatprep.subr.bf16.mxu1 %v10849_v20  ;;  %10347 = vrot.lane.b32.xlu1 %v12243_v9, %s10853_s9 }
0x1677   :  { %4444 = vrot.lane.b32.xlu0 %v12251_v19, %s10852_s5 }
0x1679   :  { %4450 = vrot.lane.b32.xlu1 %v12251_v19, %s10853_s9 }
0x167d   :  { %4442 = vrot.lane.b32.xlu1 %v12237_v21, %s10852_s5 }
0x16e1   :  { %v10343_v49 = vpop.permute.xlu0 %10342 }
0x16e2   :  { %v10345_v58 = vunpack.i.h.bf16 %v10343_v49  ;;  %v10344_v7 = vunpack.i.l.bf16 %v10343_v49 }
0x16e3   :  { %v4219_v32 = vpop.permute.xlu1 %4218 }
0x16e4   :  { %v9995_v50 = vpack.c.bf16 %v10345_v58, %v10344_v7 }
0x16e5   :  { %v4441_v24 = vpop.permute.xlu0 %4440 }
0x16e6   :  { %9997 = vmatpush3.bf16.xpose.msk.msra.mxu0 %vm11220_vm5, %v9995_v50 }
0x16e7   :  { %9413 = vmatprep.subr.mxu0 %v10848_v13  ;;  %v10348_v33 = vpop.permute.xlu1 %10347 }
0x16e8   :  { %v10350_v8 = vunpack.i.h.bf16 %v10348_v33  ;;  %v10349_v36 = vunpack.i.l.bf16 %v10348_v33 }
0x16e9   :  { %v4445_v63 = vpop.permute.xlu0 %4444 }
0x16ea   :  { %v10002_v45 = vpack.c.bf16 %v10350_v8, %v10349_v36 }
0x16eb   :  { %v4451_v26 = vpop.permute.xlu1 %4450 }
0x16ee   :  { %9414 = vmatpush3.xpose.msk.msra.mxu0 %vm585_vm4, %v4219_v32 }
0x16ef   :  { %10001 = vmatprep.subr.bf16.mxu0 %v10849_v20  ;;  %v4443_v3 = vpop.permute.xlu1 %4442 }
0x16f1   :  { %9416 = vmatmul.mubr.msk.f32.vlgmr.msra.gmra.mrb[92].mxu0 %vm585_vm4, %v12234_v23 }
0x16f2   :  { %10004 = vmatpush3.bf16.xpose.msk.msra.mxu0 %vm11220_vm5, %v10002_v45  ;;  %9418 = vmatprep.mubr.msk.f32.mxu0 %vm10851_vm3, %v10848_v13 }
0x16f3   :  { %9443 = vmatprep.subr.mxu0 %v10848_v13 }
0x16f5   :  { %9419 = vmatmul.mubr.msk.f32.gmra.mrb[94].mxu0 %vm585_vm4, %v12237_v21 }
0x16f6   :  { %9421 = vmatprep.mubr.msk.f32.mxu0 %vm10851_vm3, %v10848_v13 }
0x16f9   :  { %9422 = vmatmul.mubr.msk.f32.gmra.mrb[96].mxu0 %vm585_vm4, %v12251_v19 }
0x16fa   :  { %9444 = vmatpush3.xpose.msk.msra.mxu0 %vm585_vm4, %v4451_v26  ;;  %9445 = vmatprep.mubr.msk.f32.mxu0 %vm10851_vm3, %v10848_v13 }
0x16fb   :  { %10008 = vmatprep.subr.bf16.mxu0 %v10849_v20 }
0x16fd   :  { %9446 = vmatmul.mubr.msk.f32.vlgmr.msra.gmra.mrb[98].mxu0 %vm585_vm4, %v4441_v24 }
0x16fe   :  { %9448 = vmatprep.mubr.msk.f32.mxu0 %vm10851_vm3, %v10848_v13 }
0x1701   :  { %9449 = vmatmul.mubr.msk.f32.gmra.mrb[100].mxu0 %vm585_vm4, %v4443_v3 }
0x1702   :  { %9451 = vmatprep.mubr.msk.f32.mxu0 %vm10851_vm3, %v10848_v13 }
0x1705   :  { %9452 = vmatmul.mubr.msk.f32.gmra.mrb[102].mxu0 %vm585_vm4, %v4445_v63 }
0x1706   :  { %9473 = vmatprep.mubr.msk.f32.mxu0 %vm10851_vm3, %v10848_v13 }
0x1729   :  { %v8784_v5 = vpop.f32.mrb[86].mxu0 }
0x172a   :  { %v8785_v57 = vpop.f32.mrb[87].mxu0 }
0x172b   :  { %v8786_v40 = vadd.f32 %v8785_v57, %v8784_v5 }
0x172d   :  { %v3936_v25 = vadd.f32 %v8786_v40, %v12016_v41  ;;  %v8787_v12 = vpop.f32.mrb[88].mxu0 }
0x172e   :  { %v8788_v53 = vpop.f32.mrb[89].mxu0 }
0x172f   :  { %v12303_v43 = vadd.f32 %v12033_v2, %v3936_v25  ;;  %v8789_v29 = vadd.f32 %v8788_v53, %v8787_v12 }
0x1731   :  { %v3937_v30 = vadd.f32 %v8789_v29, %v12022_v60  ;;  %v3963_v52 = vsel %vm286_vm1, %v12303_v43, 0.0  ;;  %v8790_v59 = vpop.f32.mrb[90].mxu0 }
0x1732   :  { %3964 = vadd.xlane.f32.xlu1 %v3963_v52  ;;  %v8791_v41 = vpop.f32.mrb[91].mxu0 }
0x1733   :  { %v12309_v28 = vadd.f32 %v12033_v2, %v3937_v30  ;;  %v8792_v46 = vadd.f32 %v8791_v41, %v8790_v59 }
0x1735   :  { %v3966_v47 = vsel %vm286_vm1, %v12309_v28, 0.0  ;;  %v3938_v56 = vadd.f32 %v8792_v46, %v12028_v27 }
0x1736   :  { %3967 = vadd.xlane.f32.xlu0 %v3966_v47 }
0x1737   :  { %v12315_v37 = vadd.f32 %v12033_v2, %v3938_v56 }
0x1739   :  { %v3969_v60 = vsel %vm286_vm1, %v12315_v37, 0.0 }
0x173a   :  { %3970 = vadd.xlane.f32.xlu0 %v3969_v60 }
0x17bf   :  { %v3965_v22 = vpop.xlane.xlu1 %3964 }
0x17c0   :  { %v3975_v50 = vmul.f32 0.015625, %v3965_v22 }
0x17c2   :  { %v12331_v24 = vsub.f32 %v12303_v43, %v3975_v50 }
0x17c3   :  { %v3968_v27 = vpop.xlane.xlu0 %3967 }
0x17c4   :  { %v4298_v14 = vpop.f32.mrb[92].mxu0  ;;  %v3976_v3 = vmul.f32 0.015625, %v3968_v27  ;;  %v3987_v59 = vmul.f32 %v12331_v24, %v12331_v24 }
0x17c5   :  { %v4312_v55 = vmul.f32 0.25, %v4298_v14  ;;  %v9417_v1 = vpop.f32.mrb[93].mxu0 }
0x17c6   :  { %v12337_v53 = vsub.f32 %v12309_v28, %v3976_v3  ;;  %v3999_v56 = vsel %vm286_vm1, %v3987_v59, 0.0 }
0x17c7   :  { %v4315_v54 = vsel %vm315_vm6, %v4312_v55, -1e+30  ;;  %v3971_v8 = vpop.xlane.xlu0 %3970 }
0x17c8   :  { %v4303_v6 = vpop.f32.mrb[94].mxu0  ;;  %v4318_v17 = vsel %vm684_vm7, %v4315_v54, -inf  ;;  %v3977_v63 = vmul.f32 0.015625, %v3971_v8  ;;  %v3988_v55 = vmul.f32 %v12337_v53, %v12337_v53 }
0x17c9   :  { %v4313_v48 = vmul.f32 0.25, %v4303_v6  ;;  %4319 = vmax.xlane.f32.xlu0 %v4318_v17  ;;  %v9420_v51 = vpop.f32.mrb[95].mxu0 }
0x17ca   :  { %v12340_v29 = vsub.f32 %v12315_v37, %v3977_v63  ;;  %v4002_v6 = vsel %vm286_vm1, %v3988_v55, 0.0 }
0x17cb   :  { %v4316_v2 = vsel %vm315_vm6, %v4313_v48, -1e+30 }
0x17cc   :  { %v4308_v31 = vpop.f32.mrb[96].mxu0  ;;  %v4321_v11 = vsel %vm684_vm7, %v4316_v2, -inf  ;;  %v3989_v14 = vmul.f32 %v12340_v29, %v12340_v29 }
0x17cd   :  { %v4314_v49 = vmul.f32 0.25, %v4308_v31  ;;  %4322 = vmax.xlane.f32.xlu1 %v4321_v11  ;;  %v9423_v58 = vpop.f32.mrb[97].mxu0 }
0x17ce   :  { %v4005_v1 = vsel %vm286_vm1, %v3989_v14, 0.0 }
0x17cf   :  { %v4317_v7 = vsel %vm315_vm6, %v4314_v49, -1e+30 }
0x17d0   :  { %v4530_v32 = vpop.f32.mrb[98].mxu0  ;;  %v4324_v33 = vsel %vm684_vm7, %v4317_v7, -inf }
0x17d1   :  { %v4544_v36 = vmul.f32 0.25, %v4530_v32  ;;  %4325 = vmax.xlane.f32.xlu0 %v4324_v33  ;;  %v9447_v45 = vpop.f32.mrb[99].mxu0 }
0x17d3   :  { %v4547_v26 = vsel %vm315_vm6, %v4544_v36, -1e+30 }
0x17d4   :  { %v4535_v5 = vpop.f32.mrb[100].mxu0  ;;  %v4550_v57 = vsel %vm684_vm7, %v4547_v26, -inf }
0x17d5   :  { %v4545_v40 = vmul.f32 0.25, %v4535_v5  ;;  %4551 = vmax.xlane.f32.xlu1 %v4550_v57  ;;  %v9450_v25 = vpop.f32.mrb[101].mxu0 }
0x17d7   :  { %v4548_v12 = vsel %vm315_vm6, %v4545_v40, -1e+30 }
0x17d8   :  { %v4540_v30 = vpop.f32.mrb[102].mxu0  ;;  %v4553_v52 = vsel %vm684_vm7, %v4548_v12, -inf }
0x17d9   :  { %v4546_v47 = vmul.f32 0.25, %v4540_v30  ;;  %4554 = vmax.xlane.f32.xlu0 %v4553_v52  ;;  %v9453_v41 = vpop.f32.mrb[103].mxu0 }
0x17db   :  { %v4549_v46 = vsel %vm315_vm6, %v4546_v47, -1e+30 }
0x17dc   :  { %v4556_v60 = vsel %vm684_vm7, %v4549_v46, -inf }
0x17dd   :  { %4000 = vadd.xlane.f32.xlu0 %v3999_v56  ;;  %4557 = vmax.xlane.f32.xlu1 %v4556_v60 }
0x17e1   :  { %4006 = vadd.xlane.f32.xlu0 %v4005_v1  ;;  %4003 = vadd.xlane.f32.xlu1 %v4002_v6 }
0x1856   :  { %v4320_v17 = vpop.xlane.xlu0 %4319 }
0x1857   :  { %v4327_v48 = vsub.f32 %v4315_v54, %v4320_v17 }
0x1859   :  { %v4330_v51 = vmul.f32 1.442695, %v4327_v48 }
0x185a   :  { %v4323_v27 = vpop.xlane.xlu1 %4322 }
0x185b   :  { %10585 = vpow2.f32 %v4330_v51  ;;  %v4328_v31 = vsub.f32 %v4316_v2, %v4323_v27 }
0x185d   :  { %v4332_v11 = vmul.f32 1.442695, %v4328_v31 }
0x185e   :  { %v4326_v22 = vpop.xlane.xlu0 %4325 }
0x185f   :  { %10587 = vpow2.f32 %v4332_v11  ;;  %v4329_v49 = vsub.f32 %v4317_v7, %v4326_v22 }
0x1861   :  { %v4334_v58 = vmul.f32 1.442695, %v4329_v49 }
0x1862   :  { %v4552_v50 = vpop.xlane.xlu1 %4551 }
0x1863   :  { %10589 = vpow2.f32 %v4334_v58  ;;  %v4559_v32 = vsub.f32 %v4547_v26, %v4552_v50 }
0x1865   :  { %v12355_v33 = vpop.eup %10585  ;;  %v4562_v8 = vmul.f32 1.442695, %v4559_v32 }
0x1866   :  { %v4555_v36 = vpop.xlane.xlu0 %4554  ;;  %v4336_v45 = vsel %vm684_vm7, %v12355_v33, 0.0 }
0x1867   :  { %10591 = vpow2.f32 %v4562_v8  ;;  %v4560_v54 = vsub.f32 %v4548_v12, %v4555_v36  ;;  %4337 = vadd.xlane.f32.xlu1 %v4336_v45 }
0x1869   :  { %v12359_v3 = vpop.eup %10587  ;;  %v4564_v2 = vmul.f32 1.442695, %v4560_v54 }
0x186a   :  { %v4001_v63 = vpop.xlane.xlu0 %4000  ;;  %v4558_v5 = vpop.xlane.xlu1 %4557  ;;  %v4339_v7 = vsel %vm684_vm7, %v12359_v3, 0.0 }
0x186b   :  { %10593 = vpow2.f32 %v4564_v2  ;;  %v4011_v26 = vmul.f32 0.015625, %v4001_v63  ;;  %v4561_v57 = vsub.f32 %v4549_v46, %v4558_v5  ;;  %4340 = vadd.xlane.f32.xlu0 %v4339_v7 }
0x186d   :  { %v12363_v40 = vpop.eup %10589  ;;  %v4017_v25 = vadd.f32 1e-06, %v4011_v26  ;;  %v4566_v30 = vmul.f32 1.442695, %v4561_v57 }
0x186e   :  { %v4007_v52 = vpop.xlane.xlu0 %4006  ;;  %v4004_v59 = vpop.xlane.xlu1 %4003  ;;  %v4342_v12 = vsel %vm684_vm7, %v12363_v40, 0.0 }
0x186f   :  { %10595 = vrsqrt.f32 %v4017_v25  ;;  %v4013_v47 = vmul.f32 0.015625, %v4007_v52  ;;  %v4012_v41 = vmul.f32 0.015625, %v4004_v59  ;;  %4343 = vadd.xlane.f32.xlu1 %v4342_v12  ;;  %v4204_v52 = vld [vmem:[%s13417_s6 + $0x8] sm:$0xff] }
0x1870   :  { %10597 = vpow2.f32 %v4566_v30 }
0x1871   :  { %v12367_v56 = vpop.eup %10591  ;;  %v4019_v60 = vadd.f32 1e-06, %v4013_v47  ;;  %v4018_v14 = vadd.f32 1e-06, %v4012_v41 }
0x1872   :  { %v4568_v46 = vsel %vm684_vm7, %v12367_v56, 0.0 }
0x1873   :  { %10599 = vrsqrt.f32 %v4019_v60  ;;  %4569 = vadd.xlane.f32.xlu0 %v4568_v46 }
0x1874   :  { %10601 = vrsqrt.f32 %v4018_v14 }
0x1875   :  { %v12371_v55 = vpop.eup %10593 }
0x1876   :  { %v4571_v1 = vsel %vm684_vm7, %v12371_v55, 0.0 }
0x1877   :  { %4572 = vadd.xlane.f32.xlu1 %v4571_v1 }
0x1879   :  { %v10596_v6 = vpop.eup %10595 }
0x187a   :  { %v12375_v17 = vpop.eup %10597  ;;  %v4029_v48 = vmul.f32 %v10596_v6, %v12331_v24 }
0x187b   :  { %v4574_v51 = vsel %vm684_vm7, %v12375_v17, 0.0 }
0x187c   :  { %4575 = vadd.xlane.f32.xlu0 %v4574_v51  ;;  %v4041_v27 = vmul.f32 %v12122_v4, %v4029_v48 }
0x187d   :  { %v10600_v31 = vpop.eup %10599 }
0x187e   :  { %v10602_v11 = vpop.eup %10601  ;;  %v4053_v22 = vadd.f32 %v12126_v35, %v4041_v27  ;;  %v4031_v58 = vmul.f32 %v10600_v31, %v12340_v29 }
0x187f   :  { %v4030_v49 = vmul.f32 %v10602_v11, %v12337_v53 }
0x1880   :  { %8478 = vmatmul.mubr.msk.f32.gmra.mrb[98].mxu1 %vm286_vm1, %v4053_v22  ;;  %v4043_v32 = vmul.f32 %v12122_v4, %v4031_v58  ;;  %v4205_v22 = vld [vmem:[%s13417_s6 + $0x10] sm:$0xff] }
0x1881   :  { %4190 = vmatprep.mubr.f32.mxu1 %v10848_v13  ;;  %v4042_v24 = vmul.f32 %v12122_v4, %v4030_v49  ;;  %v4206_v49 = vld [vmem:[%s13417_s6 + $0x18] sm:$0xff] }
0x1882   :  { %v4055_v8 = vadd.f32 %v12126_v35, %v4043_v32  ;;  %v12463_v58 = vpack.c.bf16 %v4206_v49, %v4205_v22 }
0x1883   :  { %v4054_v50 = vadd.f32 %v12126_v35, %v4042_v24 }
0x1884   :  { %10010 = vmatpush3.bf16.msra.mxu0 %v12463_v58 }
0x1885   :  { %8479 = vmatmul.mubr.msk.f32.gmra.mrb[100].mxu1 %vm286_vm1, %v4054_v50  ;;  %10014 = vmatprep.subr.bf16.mxu0 %v10849_v20 }
0x1886   :  { %4196 = vmatprep.mubr.f32.mxu1 %v10848_v13 }
0x1888   :  { %10352 = vrot.lane.b32.xlu1 %v12245_v10, %s10852_s5 }
0x1889   :  { %8480 = vmatmul.mubr.msk.f32.gmra.mrb[102].mxu1 %vm286_vm1, %v4055_v8 }
0x188a   :  { %9430 = vmatprep.mubr.msk.f32.mxu1 %vm10851_vm3, %v10848_v13 }
0x188c   :  { %10357 = vrot.lane.b32.xlu1 %v12243_v9, %s10854_s13 }
0x1890   :  { %4872 = vrot.lane.b32.xlu1 %v12251_v19, %s10854_s13 }
0x1892   :  { %4590 = vrot.lane.b32.xlu0 %v12256_v34, %s10852_s5 }
0x1894   :  { %4862 = vrot.lane.b32.xlu1 %v12234_v23, %s10855_s17 }
0x1896   :  { %4864 = vrot.lane.b32.xlu0 %v12237_v21, %s10855_s17 }
0x1898   :  { %4866 = vrot.lane.b32.xlu1 %v12251_v19, %s10855_s17 }
0x18f4   :  { %v4338_v4 = vpop.xlane.xlu1 %4337 }
0x18f5   :  { %10603 = vrcp.f32 %v4338_v4 }
0x18f8   :  { %v4341_v35 = vpop.xlane.xlu0 %4340 }
0x18f9   :  { %10605 = vrcp.f32 %v4341_v35 }
0x18fc   :  { %v4344_v53 = vpop.xlane.xlu1 %4343 }
0x18fd   :  { %10607 = vrcp.f32 %v4344_v53 }
0x18ff   :  { %v10604_v29 = vpop.eup %10603 }
0x1900   :  { %v4348_v36 = vmul.f32 %v10604_v29, %v12355_v33  ;;  %v4570_v45 = vpop.xlane.xlu0 %4569 }
0x1901   :  { %10609 = vrcp.f32 %v4570_v45 }
0x1902   :  { %9431 = vmatmul.mubr.msk.f32.vlgmr.msra.gmra.mrb[104].mxu1 %vm684_vm7, %v4348_v36 }
0x1903   :  { %v10606_v54 = vpop.eup %10605  ;;  %9433 = vmatprep.mubr.msk.f32.mxu1 %vm10851_vm3, %v10848_v13 }
0x1904   :  { %v4573_v2 = vpop.xlane.xlu1 %4572  ;;  %v4349_v63 = vmul.f32 %v10606_v54, %v12359_v3  ;;  %v4203_v3 = vld [vmem:[%s13417_s6] sm:$0xff] }
0x1905   :  { %10611 = vrcp.f32 %v4573_v2  ;;  %v12424_v12 = vpack.c.bf16 %v4204_v52, %v4203_v3 }
0x1906   :  { %9434 = vmatmul.mubr.msk.f32.gmra.mrb[106].mxu1 %vm684_vm7, %v4349_v63 }
0x1907   :  { %v10608_v5 = vpop.eup %10607  ;;  %9436 = vmatprep.mubr.msk.f32.mxu1 %vm10851_vm3, %v10848_v13 }
0x1908   :  { %v10353_v33 = vpop.permute.xlu1 %10352  ;;  %v4350_v7 = vmul.f32 %v10608_v5, %v12363_v40 }
0x1909   :  { %v4576_v26 = vpop.xlane.xlu0 %4575  ;;  %v10355_v57 = vunpack.i.h.bf16 %v10353_v33  ;;  %v10354_v25 = vunpack.i.l.bf16 %v10353_v33 }
0x190a   :  { %9437 = vmatmul.mubr.msk.f32.gmra.mrb[108].mxu1 %vm684_vm7, %v4350_v7  ;;  %10613 = vrcp.f32 %v4576_v26 }
0x190b   :  { %v10006_v30 = vpack.c.bf16 %v10355_v57, %v10354_v25  ;;  %9460 = vmatprep.mubr.msk.f32.mxu1 %vm10851_vm3, %v10848_v13  ;;  %v10610_v59 = vpop.eup %10609 }
0x190c   :  { %v4580_v40 = vmul.f32 %v10610_v59, %v12367_v56  ;;  %v10358_v35 = vpop.permute.xlu1 %10357 }
0x190d   :  { %10007 = vmatpush3.bf16.msra.mxu1 %v10006_v30  ;;  %v4591_v47 = vpop.permute.xlu0 %4590  ;;  %v10360_v29 = vunpack.i.h.bf16 %v10358_v35  ;;  %v10359_v36 = vunpack.i.l.bf16 %v10358_v35 }
0x190e   :  { %9458 = vmatprep.subr.mxu1 %v10848_v13 }
0x190f   :  { %v10612_v41 = vpop.eup %10611  ;;  %v10015_v45 = vpack.c.bf16 %v10360_v29, %v10359_v36 }
0x1910   :  { %v4581_v60 = vmul.f32 %v10612_v41, %v12371_v55  ;;  %v4873_v33 = vpop.permute.xlu1 %4872 }
0x1911   :  { %9459 = vmatpush3.msra.mxu1 %v4591_v47  ;;  %v4865_v25 = vpop.permute.xlu0 %4864 }
0x1912   :  { %9461 = vmatmul.mubr.msk.f32.vlgmr.msra.gmra.mrb[110].mxu1 %vm684_vm7, %v4580_v40  ;;  %10011 = vmatprep.subr.bf16.mxu1 %v10849_v20 }
0x1913   :  { %9463 = vmatprep.mubr.msk.f32.mxu1 %vm10851_vm3, %v10848_v13  ;;  %10013 = vmatpush3.bf16.msra.mxu1 %v12424_v12 }
0x1914   :  { %10018 = vmatprep.subr.bf16.mxu1 %v10849_v20  ;;  %v10614_v14 = vpop.eup %10613  ;;  %v4863_v57 = vpop.permute.xlu1 %4862 }
0x1915   :  { %v4582_v56 = vmul.f32 %v10614_v14, %v12375_v17 }
0x1916   :  { %9464 = vmatmul.mubr.msk.f32.gmra.mrb[112].mxu1 %vm684_vm7, %v4581_v60 }
0x1917   :  { %9466 = vmatprep.mubr.msk.f32.mxu1 %vm10851_vm3, %v10848_v13 }
0x1918   :  { %v4867_v30 = vpop.permute.xlu1 %4866 }
0x191a   :  { %9467 = vmatmul.mubr.msk.f32.gmra.mrb[114].mxu1 %vm684_vm7, %v4582_v56 }
0x191b   :  { %9486 = vmatprep.mubr.msk.f32.mxu1 %vm10851_vm3, %v10848_v13 }
0x1953   :  { %v12441_v46 = vpop.f32.mrb[98].mxu1 }
0x1954   :  { %v4188_v55 = vpop.f32.mrb[99].mxu1 }
0x1955   :  { %v12446_v48 = vadd.f32 %v4188_v55, %v12231_v38 }
0x1958   :  { %v12443_v1 = vpop.f32.mrb[100].mxu1 }
0x1959   :  { %v4194_v6 = vpop.f32.mrb[101].mxu1 }
0x195a   :  { %v12449_v51 = vadd.f32 %v4194_v6, %v12231_v38 }
0x195c   :  { %v12451_v27 = vpop.f32.mrb[102].mxu1  ;;  %v10039_v17 = vpack.c.bf16 %v12449_v51, %v12446_v48  ;;  %v12457_v31 = vpack.i.bf16 %v12449_v51, %v12446_v48 }
0x195d   :  { %v12459_v11 = vpop.f32.mrb[103].mxu1 }
0x19d5   :  { %v4426_v24 = vpop.f32.mrb[104].mxu1 }
0x19d6   :  { %v9432_v50 = vpop.f32.mrb[105].mxu1  ;;  %9487 = vmatmul.mubr.msk.f32.vlgmr.msra.gmra.mrb[116].mxu1 %vm585_vm4, %v4426_v24 }
0x19d7   :  { %9489 = vmatprep.mubr.msk.f32.mxu1 %vm10851_vm3, %v10848_v13 }
0x19d9   :  { %v4431_v32 = vpop.f32.mrb[106].mxu1 }
0x19da   :  { %v9435_v8 = vpop.f32.mrb[107].mxu1  ;;  %9490 = vmatmul.mubr.msk.f32.gmra.mrb[118].mxu1 %vm585_vm4, %v4431_v32 }
0x19db   :  { %9492 = vmatprep.mubr.msk.f32.mxu1 %vm10851_vm3, %v10848_v13 }
0x19dd   :  { %v4436_v4 = vpop.f32.mrb[108].mxu1 }
0x19de   :  { %v9438_v53 = vpop.f32.mrb[109].mxu1  ;;  %9493 = vmatmul.mubr.msk.f32.gmra.mrb[120].mxu1 %vm585_vm4, %v4436_v4 }
0x19df   :  { %9516 = vmatprep.mubr.msk.f32.mxu1 %vm10851_vm3, %v10848_v13 }
0x19e5   :  { %v4670_v54 = vpop.f32.mrb[110].mxu1 }
0x19e6   :  { %v9462_v2 = vpop.f32.mrb[111].mxu1  ;;  %9474 = vmatmul.mubr.msk.f32.vlgmr.msra.gmra.mrb[104].mxu0 %vm585_vm4, %v4670_v54 }
0x19e7   :  { %10017 = vmatpush3.bf16.xpose.msk.msra.mxu0 %vm11220_vm5, %v10015_v45  ;;  %9476 = vmatprep.mubr.msk.f32.mxu0 %vm10851_vm3, %v10848_v13 }
0x19e8   :  { %9499 = vmatprep.subr.mxu0 %v10848_v13 }
0x19e9   :  { %v4675_v63 = vpop.f32.mrb[112].mxu1 }
0x19ea   :  { %v9465_v5 = vpop.f32.mrb[113].mxu1  ;;  %9477 = vmatmul.mubr.msk.f32.gmra.mrb[106].mxu0 %vm585_vm4, %v4675_v63 }
0x19eb   :  { %9479 = vmatprep.mubr.msk.f32.mxu0 %vm10851_vm3, %v10848_v13 }
0x19ed   :  { %v4680_v7 = vpop.f32.mrb[114].mxu1 }
0x19ee   :  { %v9468_v26 = vpop.f32.mrb[115].mxu1  ;;  %9480 = vmatmul.mubr.msk.f32.gmra.mrb[108].mxu0 %vm585_vm4, %v4680_v7 }
0x19ef   :  { %9500 = vmatpush3.xpose.msk.msra.mxu0 %vm585_vm4, %v4873_v33  ;;  %9501 = vmatprep.mubr.msk.f32.mxu0 %vm10851_vm3, %v10848_v13 }
0x19f0   :  { %10021 = vmatprep.subr.bf16.mxu0 %v10849_v20 }
0x19f2   :  { %9502 = vmatmul.mubr.msk.f32.vlgmr.msra.gmra.mrb[110].mxu0 %vm585_vm4, %v4863_v57 }
0x19f3   :  { %9504 = vmatprep.mubr.msk.f32.mxu0 %vm10851_vm3, %v10848_v13 }
0x19f6   :  { %9505 = vmatmul.mubr.msk.f32.gmra.mrb[112].mxu0 %vm585_vm4, %v4865_v25 }
0x19f7   :  { %9507 = vmatprep.mubr.msk.f32.mxu0 %vm10851_vm3, %v10848_v13 }
0x19fa   :  { %9508 = vmatmul.mubr.msk.f32.gmra.mrb[114].mxu0 %vm585_vm4, %v4867_v30 }
0x19fb   :  { %9529 = vmatprep.mubr.msk.f32.mxu0 %vm10851_vm3, %v10848_v13 }
0x1aa9   :  { %v4848_v3 = vpop.f32.mrb[116].mxu1 }
0x1aaa   :  { %v9488_v52 = vpop.f32.mrb[117].mxu1 }
0x1aad   :  { %v4853_v59 = vpop.f32.mrb[118].mxu1 }
0x1aae   :  { %v9491_v40 = vpop.f32.mrb[119].mxu1 }
0x1ab1   :  { %v4858_v47 = vpop.f32.mrb[120].mxu1 }
0x1ab2   :  { %v9494_v41 = vpop.f32.mrb[121].mxu1 }
0x1ab9   :  { %v4759_v60 = vpop.f32.mrb[104].mxu0 }
0x1aba   :  { %v12499_v14 = vadd.f32 %v4848_v3, %v4759_v60  ;;  %v9475_v56 = vpop.f32.mrb[105].mxu0 }
0x1abd   :  { %v4764_v55 = vpop.f32.mrb[106].mxu0 }
0x1abe   :  { %v12501_v6 = vadd.f32 %v4853_v59, %v4764_v55  ;;  %v9478_v22 = vpop.f32.mrb[107].mxu0 }
0x1ac1   :  { %v4769_v49 = vpop.f32.mrb[108].mxu0 }
0x1ac2   :  { %v12503_v24 = vadd.f32 %v4858_v47, %v4769_v49  ;;  %v9481_v50 = vpop.f32.mrb[109].mxu0 }
0x1ac3   :  { %v4207_v50 = vld [vmem:[%s13417_s6 + $0x20] sm:$0xff] }
0x1ac5   :  { %v4952_v32 = vpop.f32.mrb[110].mxu0 }
0x1ac6   :  { %v4966_v8 = vmul.f32 0.25, %v4952_v32  ;;  %v9503_v4 = vpop.f32.mrb[111].mxu0  ;;  %v4208_v32 = vld [vmem:[%s13417_s6 + $0x28] sm:$0xff] }
0x1ac8   :  { %v4969_v35 = vsel %vm315_vm6, %v4966_v8, -1e+30  ;;  %v12533_v8 = vpack.c.bf16 %v4208_v32, %v4207_v50 }
0x1ac9   :  { %v4957_v53 = vpop.f32.mrb[112].mxu0  ;;  %v4972_v29 = vsel %vm684_vm7, %v4969_v35, -inf }
0x1aca   :  { %v4967_v36 = vmul.f32 0.25, %v4957_v53  ;;  %4973 = vmax.xlane.f32.xlu0 %v4972_v29  ;;  %v9506_v45 = vpop.f32.mrb[113].mxu0  ;;  %10023 = vmatpush3.bf16.msra.mxu0 %v12533_v8 }
0x1acb   :  { %10028 = vmatprep.subr.bf16.mxu0 %v10849_v20 }
0x1acc   :  { %v4970_v54 = vsel %vm315_vm6, %v4967_v36, -1e+30 }
0x1acd   :  { %v4962_v2 = vpop.f32.mrb[114].mxu0  ;;  %v4975_v63 = vsel %vm684_vm7, %v4970_v54, -inf }
0x1ace   :  { %v4968_v5 = vmul.f32 0.25, %v4962_v2  ;;  %4976 = vmax.xlane.f32.xlu1 %v4975_v63  ;;  %v9509_v33 = vpop.f32.mrb[115].mxu0 }
0x1ad0   :  { %v4971_v7 = vsel %vm315_vm6, %v4968_v5, -1e+30 }
0x1ad1   :  { %v4978_v26 = vsel %vm684_vm7, %v4971_v7, -inf }
0x1ad2   :  { %4979 = vmax.xlane.f32.xlu0 %v4978_v26 }
0x1adf   :  { %5009 = vrot.lane.b32.xlu1 %v12256_v34, %s10855_s17 }
0x1ae3   :  { %10367 = vrot.lane.b32.xlu1 %v12243_v9, %s10856_s21 }
0x1ae7   :  { %5205 = vrot.lane.b32.xlu1 %v12251_v19, %s10856_s21 }
0x1b57   :  { %v4974_v57 = vpop.xlane.xlu0 %4973 }
0x1b58   :  { %v4981_v25 = vsub.f32 %v4969_v35, %v4974_v57 }
0x1b5a   :  { %v4984_v30 = vmul.f32 1.442695, %v4981_v25 }
0x1b5b   :  { %v4977_v3 = vpop.xlane.xlu1 %4976 }
0x1b5c   :  { %10615 = vpow2.f32 %v4984_v30  ;;  %v4982_v52 = vsub.f32 %v4970_v54, %v4977_v3 }
0x1b5e   :  { %v4986_v59 = vmul.f32 1.442695, %v4982_v52 }
0x1b5f   :  { %v4980_v40 = vpop.xlane.xlu0 %4979  ;;  %v5010_v4 = vpop.permute.xlu1 %5009 }
0x1b60   :  { %10617 = vpow2.f32 %v4986_v59  ;;  %v4983_v47 = vsub.f32 %v4971_v7, %v4980_v40 }
0x1b62   :  { %v4988_v41 = vmul.f32 1.442695, %v4983_v47 }
0x1b63   :  { %v10368_v35 = vpop.permute.xlu1 %10367 }
0x1b64   :  { %10619 = vpow2.f32 %v4988_v41  ;;  %v10370_v33 = vunpack.i.h.bf16 %v10368_v35  ;;  %v10369_v7 = vunpack.i.l.bf16 %v10368_v35 }
0x1b66   :  { %v10616_v60 = vpop.eup %10615  ;;  %v10025_v25 = vpack.c.bf16 %v10370_v33, %v10369_v7 }
0x1b67   :  { %v4990_v9 = vsel %vm684_vm7, %v10616_v60, 0.0  ;;  %v5206_v53 = vpop.permute.xlu1 %5205 }
0x1b68   :  { %4991 = vadd.xlane.f32.xlu0 %v4990_v9 }
0x1b6a   :  { %v10618_v56 = vpop.eup %10617 }
0x1b6b   :  { %v4993_v55 = vsel %vm684_vm7, %v10618_v56, 0.0 }
0x1b6c   :  { %4994 = vadd.xlane.f32.xlu0 %v4993_v55 }
0x1b6e   :  { %v10620_v22 = vpop.eup %10619 }
0x1b6f   :  { %v4996_v49 = vsel %vm684_vm7, %v10620_v22, 0.0 }
0x1b70   :  { %4997 = vadd.xlane.f32.xlu1 %v4996_v49 }
0x1b81   :  { %5197 = vrot.lane.b32.xlu1 %v12237_v21, %s10857_s25 }
0x1b82   :  { %10362 = vrot.lane.b32.xlu0 %v12245_v10, %s10855_s17 }
0x1b86   :  { %5195 = vrot.lane.b32.xlu0 %v12234_v23, %s10857_s25 }
0x1b8a   :  { %5199 = vrot.lane.b32.xlu0 %v12251_v19, %s10857_s25 }
0x1bf5   :  { %v4992_v21 = vpop.xlane.xlu0 %4991 }
0x1bf6   :  { %10621 = vrcp.f32 %v4992_v21 }
0x1bf9   :  { %v4995_v29 = vpop.xlane.xlu0 %4994 }
0x1bfa   :  { %10623 = vrcp.f32 %v4995_v29 }
0x1bfd   :  { %v4998_v36 = vpop.xlane.xlu1 %4997  ;;  %v10363_v23 = vpop.permute.xlu0 %10362 }
0x1bfe   :  { %v10365_v45 = vunpack.i.h.bf16 %v10363_v23  ;;  %v10364_v54 = vunpack.i.l.bf16 %v10363_v23  ;;  %10625 = vrcp.f32 %v4998_v36 }
0x1c00   :  { %v10019_v19 = vpack.c.bf16 %v10365_v45, %v10364_v54  ;;  %v10622_v2 = vpop.eup %10621 }
0x1c01   :  { %v5002_v63 = vmul.f32 %v10622_v2, %v10616_v60  ;;  %v5196_v3 = vpop.permute.xlu0 %5195  ;;  %v5198_v52 = vpop.permute.xlu1 %5197 }
0x1c02   :  { %10020 = vmatpush3.bf16.msra.mxu1 %v10019_v19 }
0x1c03   :  { %9514 = vmatprep.subr.mxu1 %v10848_v13 }
0x1c04   :  { %v10624_v5 = vpop.eup %10623 }
0x1c05   :  { %v5003_v26 = vmul.f32 %v10624_v5, %v10618_v56  ;;  %v5200_v59 = vpop.permute.xlu0 %5199 }
0x1c06   :  { %9515 = vmatpush3.msra.mxu1 %v5010_v4 }
0x1c07   :  { %9517 = vmatmul.mubr.msk.f32.vlgmr.msra.gmra.mrb[122].mxu1 %vm684_vm7, %v5002_v63  ;;  %10024 = vmatprep.subr.bf16.mxu1 %v10849_v20 }
0x1c08   :  { %9519 = vmatprep.mubr.msk.f32.mxu1 %vm10851_vm3, %v10848_v13  ;;  %v10626_v57 = vpop.eup %10625 }
0x1c09   :  { %v5004_v30 = vmul.f32 %v10626_v57, %v10620_v22 }
0x1c0b   :  { %9520 = vmatmul.mubr.msk.f32.gmra.mrb[124].mxu1 %vm684_vm7, %v5003_v26 }
0x1c0c   :  { %9522 = vmatprep.mubr.msk.f32.mxu1 %vm10851_vm3, %v10848_v13 }
0x1c0d   :  { %10027 = vmatpush3.bf16.xpose.msk.msra.mxu1 %vm11220_vm5, %v10025_v25 }
0x1c0e   :  { %9542 = vmatprep.subr.mxu1 %v10848_v13 }
0x1c0f   :  { %9523 = vmatmul.mubr.msk.f32.gmra.mrb[126].mxu1 %vm684_vm7, %v5004_v30 }
0x1c10   :  { %9544 = vmatprep.mubr.msk.f32.mxu1 %vm10851_vm3, %v10848_v13 }
0x1c15   :  { %9543 = vmatpush3.xpose.msk.msra.mxu1 %vm585_vm4, %v5206_v53 }
0x1c16   :  { %10031 = vmatprep.subr.bf16.mxu1 %v10849_v20 }
0x1c18   :  { %9545 = vmatmul.mubr.msk.f32.vlgmr.msra.gmra.mrb[128].mxu1 %vm585_vm4, %v5196_v3 }
0x1c19   :  { %9547 = vmatprep.mubr.msk.f32.mxu1 %vm10851_vm3, %v10848_v13 }
0x1c1c   :  { %9548 = vmatmul.mubr.msk.f32.gmra.mrb[130].mxu1 %vm585_vm4, %v5198_v52 }
0x1c1d   :  { %9550 = vmatprep.mubr.msk.f32.mxu1 %vm10851_vm3, %v10848_v13 }
0x1c20   :  { %9551 = vmatmul.mubr.msk.f32.gmra.mrb[132].mxu1 %vm585_vm4, %v5200_v59 }
0x1c21   :  { %9572 = vmatprep.mubr.msk.f32.mxu1 %vm10851_vm3, %v10848_v13 }
0x1cda   :  { %v5089_v40 = vpop.f32.mrb[122].mxu1 }
0x1cdb   :  { %v9518_v47 = vpop.f32.mrb[123].mxu1  ;;  %9530 = vmatmul.mubr.msk.f32.vlgmr.msra.gmra.mrb[116].mxu0 %vm585_vm4, %v5089_v40 }
0x1cdc   :  { %9532 = vmatprep.mubr.msk.f32.mxu0 %vm10851_vm3, %v10848_v13 }
0x1cde   :  { %v5094_v41 = vpop.f32.mrb[124].mxu1 }
0x1cdf   :  { %v9521_v60 = vpop.f32.mrb[125].mxu1  ;;  %9533 = vmatmul.mubr.msk.f32.gmra.mrb[118].mxu0 %vm585_vm4, %v5094_v41 }
0x1ce0   :  { %9535 = vmatprep.mubr.msk.f32.mxu0 %vm10851_vm3, %v10848_v13 }
0x1ce2   :  { %v5099_v9 = vpop.f32.mrb[126].mxu1 }
0x1ce3   :  { %v9524_v56 = vpop.f32.mrb[127].mxu1  ;;  %9536 = vmatmul.mubr.msk.f32.gmra.mrb[120].mxu0 %vm585_vm4, %v5099_v9 }
0x1ce4   :  { %9559 = vmatprep.mubr.msk.f32.mxu0 %vm10851_vm3, %v10848_v13 }
0x1ceb   :  { %v5285_v55 = vpop.f32.mrb[128].mxu1 }
0x1cec   :  { %v5299_v22 = vmul.f32 0.25, %v5285_v55  ;;  %v9546_v49 = vpop.f32.mrb[129].mxu1  ;;  %v12588_v55 = vadd.f32 %v12443_v1, %v12228_v39 }
0x1cee   :  { %v5302_v50 = vsel %vm315_vm6, %v5299_v22, -1e+30  ;;  %v12592_v22 = vadd.f32 %v12441_v46, %v12228_v39 }
0x1cef   :  { %v5290_v32 = vpop.f32.mrb[130].mxu1  ;;  %v5305_v4 = vsel %vm684_vm7, %v5302_v50, -inf }
0x1cf0   :  { %v5300_v35 = vmul.f32 0.25, %v5290_v32  ;;  %5306 = vmax.xlane.f32.xlu1 %v5305_v4  ;;  %v9549_v21 = vpop.f32.mrb[131].mxu1  ;;  %v12596_v49 = vpack.i.bf16 %v12588_v55, %v12592_v22 }
0x1cf1   :  { %v4209_v21 = vld [vmem:[%s13417_s6 + $0x30] sm:$0xff] }
0x1cf2   :  { %v5303_v53 = vsel %vm315_vm6, %v5300_v35, -1e+30 }
0x1cf3   :  { %v5295_v29 = vpop.f32.mrb[132].mxu1  ;;  %v5308_v36 = vsel %vm684_vm7, %v5303_v53, -inf }
0x1cf4   :  { %v5301_v23 = vmul.f32 0.25, %v5295_v29  ;;  %5309 = vmax.xlane.f32.xlu0 %v5308_v36  ;;  %v9552_v45 = vpop.f32.mrb[133].mxu1 }
0x1cf6   :  { %v5304_v54 = vsel %vm315_vm6, %v5301_v23, -1e+30 }
0x1cf7   :  { %v5311_v19 = vsel %vm684_vm7, %v5304_v54, -inf }
0x1cf8   :  { %5312 = vmax.xlane.f32.xlu0 %v5311_v19 }
0x1d01   :  { %10372 = vrot.lane.b32.xlu1 %v12245_v10, %s10857_s25 }
0x1d7d   :  { %v5307_v2 = vpop.xlane.xlu1 %5306 }
0x1d7e   :  { %v5314_v63 = vsub.f32 %v5302_v50, %v5307_v2  ;;  %v12602_v50 = vadd.f32 %v12451_v27, %v12228_v39 }
0x1d80   :  { %v5317_v5 = vmul.f32 1.442695, %v5314_v63 }
0x1d81   :  { %v10373_v33 = vpop.permute.xlu1 %10372  ;;  %v5310_v7 = vpop.xlane.xlu0 %5309 }
0x1d82   :  { %10627 = vpow2.f32 %v5317_v5  ;;  %v10375_v26 = vunpack.i.h.bf16 %v10373_v33  ;;  %v10374_v57 = vunpack.i.l.bf16 %v10373_v33  ;;  %v5315_v25 = vsub.f32 %v5303_v53, %v5310_v7  ;;  %v4210_v53 = vld [vmem:[%s13417_s6 + $0x38] sm:$0xff] }
0x1d83   :  { %v12629_v29 = vpack.c.bf16 %v4210_v53, %v4209_v21 }
0x1d84   :  { %v10029_v30 = vpack.c.bf16 %v10375_v26, %v10374_v57  ;;  %v5319_v3 = vmul.f32 1.442695, %v5315_v25 }
0x1d85   :  { %v5313_v52 = vpop.xlane.xlu0 %5312  ;;  %10033 = vmatpush3.bf16.msra.mxu1 %v12629_v29 }
0x1d86   :  { %10629 = vpow2.f32 %v5319_v3  ;;  %v5316_v59 = vsub.f32 %v5304_v54, %v5313_v52  ;;  %10030 = vmatpush3.bf16.msra.mxu0 %v10029_v30  ;;  %10038 = vmatprep.subr.bf16.mxu1 %v10849_v20 }
0x1d87   :  { %9557 = vmatprep.subr.mxu0 %v10848_v13 }
0x1d88   :  { %v5321_v40 = vmul.f32 1.442695, %v5316_v59 }
0x1d8a   :  { %10631 = vpow2.f32 %v5321_v40 }
0x1d8c   :  { %v10628_v10 = vpop.eup %10627 }
0x1d8d   :  { %v5323_v47 = vsel %vm684_vm7, %v10628_v10, 0.0 }
0x1d8e   :  { %5324 = vadd.xlane.f32.xlu0 %v5323_v47 }
0x1d90   :  { %v10630_v41 = vpop.eup %10629 }
0x1d91   :  { %v5326_v60 = vsel %vm684_vm7, %v10630_v41, 0.0 }
0x1d92   :  { %5327 = vadd.xlane.f32.xlu1 %v5326_v60 }
0x1d94   :  { %v10632_v9 = vpop.eup %10631 }
0x1d95   :  { %v5329_v56 = vsel %vm684_vm7, %v10632_v9, 0.0 }
0x1d96   :  { %5330 = vadd.xlane.f32.xlu0 %v5329_v56 }
0x1da3   :  { %10377 = vrot.lane.b32.xlu1 %v12596_v49, %s10850_s0 }
0x1da7   :  { %5535 = vrot.lane.b32.xlu1 %v12602_v50, %s10850_s0  ;;  %s13430_s0 = sld [smem:[#allocation27_spill]] }
0x1dab   :  { %10382 = vrot.lane.b32.xlu1 %v12596_v49, %s10853_s9 }
0x1dac   :  { %5342 = vrot.lane.b32.xlu0 %v12256_v34, %s10857_s25 }
0x1dae   :  { %v5178_v46 = vpop.f32.mrb[116].mxu0 }
0x1daf   :  { %v12611_v1 = vadd.f32 %v5178_v46, %v12499_v14  ;;  %5757 = vrot.lane.b32.xlu1 %v12592_v22, %s10852_s5  ;;  %v9531_v39 = vpop.f32.mrb[117].mxu0 }
0x1db0   :  { %5767 = vrot.lane.b32.xlu0 %v12602_v50, %s10853_s9  ;;  %s13432_s9 = sld [smem:[#allocation29_spill]] }
0x1db2   :  { %v5183_v27 = vpop.f32.mrb[118].mxu0 }
0x1db3   :  { %v12618_v32 = vadd.f32 %v5183_v27, %v12501_v6  ;;  %5761 = vrot.lane.b32.xlu1 %v12602_v50, %s10852_s5  ;;  %v9534_v4 = vpop.f32.mrb[119].mxu0 }
0x1db4   :  { %5759 = vrot.lane.b32.xlu0 %v12588_v55, %s10852_s5 }
0x1db6   :  { %v5188_v34 = vpop.f32.mrb[120].mxu0 }
0x1db7   :  { %v12625_v14 = vadd.f32 %v5188_v34, %v12503_v24  ;;  %v9537_v35 = vpop.f32.mrb[121].mxu0 }
0x1e1b   :  { %v5325_v6 = vpop.xlane.xlu0 %5324 }
0x1e1c   :  { %10633 = vrcp.f32 %v5325_v6 }
0x1e1f   :  { %v5328_v36 = vpop.xlane.xlu1 %5327 }
0x1e20   :  { %10635 = vrcp.f32 %v5328_v36 }
0x1e23   :  { %v5331_v23 = vpop.xlane.xlu0 %5330  ;;  %v10378_v54 = vpop.permute.xlu1 %10377 }
0x1e24   :  { %10637 = vrcp.f32 %v5331_v23  ;;  %v10380_v2 = vunpack.i.h.bf16 %v10378_v54  ;;  %v10379_v63 = vunpack.i.l.bf16 %v10378_v54 }
0x1e26   :  { %v10634_v45 = vpop.eup %10633  ;;  %v10035_v26 = vpack.c.bf16 %v10380_v2, %v10379_v63 }
0x1e27   :  { %v5335_v19 = vmul.f32 %v10634_v45, %v10628_v10  ;;  %v5343_v24 = vpop.permute.xlu0 %5342  ;;  %v5536_v7 = vpop.permute.xlu1 %5535 }
0x1e28   :  { %9558 = vmatpush3.msra.mxu0 %v5343_v24 }
0x1e29   :  { %9560 = vmatmul.mubr.msk.f32.vlgmr.msra.gmra.mrb[122].mxu0 %vm684_vm7, %v5335_v19  ;;  %10034 = vmatprep.subr.bf16.mxu0 %v10849_v20 }
0x1e2a   :  { %v10636_v5 = vpop.eup %10635  ;;  %9562 = vmatprep.mubr.msk.f32.mxu0 %vm10851_vm3, %v10848_v13 }
0x1e2b   :  { %v5336_v33 = vmul.f32 %v10636_v5, %v10630_v41  ;;  %v10383_v30 = vpop.permute.xlu1 %10382  ;;  %v5768_v40 = vpop.permute.xlu0 %5767 }
0x1e2c   :  { %v10385_v3 = vunpack.i.h.bf16 %v10383_v30  ;;  %v10384_v52 = vunpack.i.l.bf16 %v10383_v30 }
0x1e2d   :  { %9563 = vmatmul.mubr.msk.f32.gmra.mrb[124].mxu0 %vm684_vm7, %v5336_v33 }
0x1e2e   :  { %v10638_v57 = vpop.eup %10637  ;;  %9565 = vmatprep.mubr.msk.f32.mxu0 %vm10851_vm3, %v10848_v13  ;;  %v10042_v59 = vpack.c.bf16 %v10385_v3, %v10384_v52 }
0x1e2f   :  { %10037 = vmatpush3.bf16.xpose.msk.msra.mxu0 %vm11220_vm5, %v10035_v26  ;;  %v5337_v25 = vmul.f32 %v10638_v57, %v10632_v9  ;;  %v5758_v10 = vpop.permute.xlu1 %5757  ;;  %v5760_v47 = vpop.permute.xlu0 %5759 }
0x1e30   :  { %9585 = vmatprep.subr.mxu0 %v10848_v13 }
0x1e31   :  { %9566 = vmatmul.mubr.msk.f32.gmra.mrb[126].mxu0 %vm684_vm7, %v5337_v25 }
0x1e32   :  { %9587 = vmatprep.mubr.msk.f32.mxu0 %vm10851_vm3, %v10848_v13 }
0x1e33   :  { %v5762_v41 = vpop.permute.xlu1 %5761 }
0x1e37   :  { %9586 = vmatpush3.xpose.msk.msra.mxu0 %vm585_vm4, %v5536_v7 }
0x1e38   :  { %10041 = vmatprep.subr.bf16.mxu0 %v10849_v20 }
0x1e3a   :  { %9588 = vmatmul.mubr.msk.f32.vlgmr.msra.gmra.mrb[128].mxu0 %vm585_vm4, %v12592_v22 }
0x1e3b   :  { %10044 = vmatpush3.bf16.xpose.msk.msra.mxu0 %vm11220_vm5, %v10042_v59  ;;  %9590 = vmatprep.mubr.msk.f32.mxu0 %vm10851_vm3, %v10848_v13 }
0x1e3c   :  { %9615 = vmatprep.subr.mxu0 %v10848_v13 }
0x1e3e   :  { %9591 = vmatmul.mubr.msk.f32.gmra.mrb[130].mxu0 %vm585_vm4, %v12588_v55 }
0x1e3f   :  { %9593 = vmatprep.mubr.msk.f32.mxu0 %vm10851_vm3, %v10848_v13 }
0x1e42   :  { %9594 = vmatmul.mubr.msk.f32.gmra.mrb[132].mxu0 %vm585_vm4, %v12602_v50 }
0x1e43   :  { %9616 = vmatpush3.xpose.msk.msra.mxu0 %vm585_vm4, %v5768_v40  ;;  %9617 = vmatprep.mubr.msk.f32.mxu0 %vm10851_vm3, %v10848_v13 }
0x1e44   :  { %10048 = vmatprep.subr.bf16.mxu0 %v10849_v20 }
0x1e46   :  { %9618 = vmatmul.mubr.msk.f32.vlgmr.msra.gmra.mrb[134].mxu0 %vm585_vm4, %v5758_v10 }
0x1e47   :  { %9620 = vmatprep.mubr.msk.f32.mxu0 %vm10851_vm3, %v10848_v13  ;;  %10050 = vmatpush3.bf16.msra.mxu0 %v12463_v58  ;;  %v12685_v58 = vadd.f32 %v12459_v11, %v12231_v38 }
0x1e48   :  { %10054 = vmatprep.subr.bf16.mxu0 %v10849_v20 }
0x1e4a   :  { %9621 = vmatmul.mubr.msk.f32.gmra.mrb[136].mxu0 %vm585_vm4, %v5760_v47 }
0x1e4b   :  { %9623 = vmatprep.mubr.msk.f32.mxu0 %vm10851_vm3, %v10848_v13 }
0x1e4e   :  { %9624 = vmatmul.mubr.msk.f32.gmra.mrb[138].mxu0 %vm585_vm4, %v5762_v41 }
0x1e4f   :  { %9645 = vmatprep.mubr.msk.f32.mxu0 %vm10851_vm3, %v10848_v13 }
0x1efc   :  { %v5422_v60 = vpop.f32.mrb[122].mxu0 }
0x1efd   :  { %v9561_v9 = vpop.f32.mrb[123].mxu0  ;;  %9573 = vmatmul.mubr.msk.f32.vlgmr.msra.gmra.mrb[134].mxu1 %vm585_vm4, %v5422_v60 }
0x1efe   :  { %10040 = vmatpush3.bf16.msra.mxu1 %v10039_v17  ;;  %9575 = vmatprep.mubr.msk.f32.mxu1 %vm10851_vm3, %v10848_v13 }
0x1eff   :  { %9600 = vmatprep.subr.mxu1 %v10848_v13 }
0x1f00   :  { %v5427_v56 = vpop.f32.mrb[124].mxu0 }
0x1f01   :  { %v9564_v46 = vpop.f32.mrb[125].mxu0  ;;  %9576 = vmatmul.mubr.msk.f32.gmra.mrb[136].mxu1 %vm585_vm4, %v5427_v56 }
0x1f02   :  { %9601 = vmatpush3.msra.mxu1 %v12685_v58  ;;  %9578 = vmatprep.mubr.msk.f32.mxu1 %vm10851_vm3, %v10848_v13 }
0x1f03   :  { %10045 = vmatprep.subr.bf16.mxu1 %v10849_v20 }
0x1f04   :  { %v5432_v48 = vpop.f32.mrb[126].mxu0 }
0x1f05   :  { %v9567_v51 = vpop.f32.mrb[127].mxu0  ;;  %9579 = vmatmul.mubr.msk.f32.gmra.mrb[138].mxu1 %vm585_vm4, %v5432_v48 }
0x1f06   :  { %9602 = vmatprep.mubr.msk.f32.mxu1 %vm10851_vm3, %v10848_v13 }
0x1f0d   :  { %v5615_v38 = vpop.f32.mrb[128].mxu0 }
0x1f0e   :  { %v5629_v17 = vmul.f32 0.25, %v5615_v38  ;;  %v9589_v11 = vpop.f32.mrb[129].mxu0 }
0x1f10   :  { %v5632_v39 = vsel %vm315_vm6, %v5629_v17, -1e+30 }
0x1f11   :  { %v5620_v27 = vpop.f32.mrb[130].mxu0  ;;  %v5635_v4 = vsel %vm684_vm7, %v5632_v39, -inf }
0x1f12   :  { %v5630_v34 = vmul.f32 0.25, %v5620_v27  ;;  %5636 = vmax.xlane.f32.xlu0 %v5635_v4  ;;  %v9592_v35 = vpop.f32.mrb[131].mxu0 }
0x1f14   :  { %v5633_v21 = vsel %vm315_vm6, %v5630_v34, -1e+30 }
0x1f15   :  { %v5625_v53 = vpop.f32.mrb[132].mxu0  ;;  %v5638_v6 = vsel %vm684_vm7, %v5633_v21, -inf }
0x1f16   :  { %v5631_v36 = vmul.f32 0.25, %v5625_v53  ;;  %5639 = vmax.xlane.f32.xlu1 %v5638_v6  ;;  %v9595_v23 = vpop.f32.mrb[133].mxu0 }
0x1f18   :  { %v5634_v45 = vsel %vm315_vm6, %v5631_v36, -1e+30 }
0x1f19   :  { %v5847_v54 = vpop.f32.mrb[134].mxu0  ;;  %v5641_v19 = vsel %vm684_vm7, %v5634_v45, -inf }
0x1f1a   :  { %v5861_v24 = vmul.f32 0.25, %v5847_v54  ;;  %5642 = vmax.xlane.f32.xlu0 %v5641_v19  ;;  %v9619_v2 = vpop.f32.mrb[135].mxu0 }
0x1f1c   :  { %v5864_v63 = vsel %vm315_vm6, %v5861_v24, -1e+30 }
0x1f1d   :  { %v5852_v5 = vpop.f32.mrb[136].mxu0  ;;  %v5867_v33 = vsel %vm684_vm7, %v5864_v63, -inf }
0x1f1e   :  { %v5862_v7 = vmul.f32 0.25, %v5852_v5  ;;  %5868 = vmax.xlane.f32.xlu0 %v5867_v33  ;;  %v9622_v26 = vpop.f32.mrb[137].mxu0 }
0x1f20   :  { %v5865_v57 = vsel %vm315_vm6, %v5862_v7, -1e+30 }
0x1f21   :  { %v5857_v25 = vpop.f32.mrb[138].mxu0  ;;  %v5870_v30 = vsel %vm684_vm7, %v5865_v57, -inf }
0x1f22   :  { %v5863_v3 = vmul.f32 0.25, %v5857_v25  ;;  %5871 = vmax.xlane.f32.xlu0 %v5870_v30  ;;  %v9625_v52 = vpop.f32.mrb[139].mxu0 }
0x1f24   :  { %v5866_v59 = vsel %vm315_vm6, %v5863_v3, -1e+30 }
0x1f25   :  { %v5873_v40 = vsel %vm684_vm7, %v5866_v59, -inf }
0x1f26   :  { %5874 = vmax.xlane.f32.xlu1 %v5873_v40 }
0x1f9f   :  { %v5637_v10 = vpop.xlane.xlu0 %5636 }
0x1fa0   :  { %v5644_v47 = vsub.f32 %v5632_v39, %v5637_v10 }
0x1fa2   :  { %v5647_v41 = vmul.f32 1.442695, %v5644_v47 }
0x1fa3   :  { %v5640_v60 = vpop.xlane.xlu1 %5639 }
0x1fa4   :  { %10639 = vpow2.f32 %v5647_v41  ;;  %v5645_v9 = vsub.f32 %v5633_v21, %v5640_v60 }
0x1fa6   :  { %v5649_v56 = vmul.f32 1.442695, %v5645_v9 }
0x1fa7   :  { %v5643_v46 = vpop.xlane.xlu0 %5642 }
0x1fa8   :  { %10641 = vpow2.f32 %v5649_v56  ;;  %v5646_v48 = vsub.f32 %v5634_v45, %v5643_v46 }
0x1faa   :  { %v5651_v51 = vmul.f32 1.442695, %v5646_v48 }
0x1fab   :  { %v5869_v38 = vpop.xlane.xlu0 %5868 }
0x1fac   :  { %10643 = vpow2.f32 %v5651_v51  ;;  %v5876_v17 = vsub.f32 %v5864_v63, %v5869_v38 }
0x1fae   :  { %v10640_v11 = vpop.eup %10639  ;;  %v5879_v27 = vmul.f32 1.442695, %v5876_v17 }
0x1faf   :  { %v5872_v4 = vpop.xlane.xlu0 %5871  ;;  %v5653_v34 = vsel %vm684_vm7, %v10640_v11, 0.0 }
0x1fb0   :  { %10645 = vpow2.f32 %v5879_v27  ;;  %v5877_v35 = vsub.f32 %v5865_v57, %v5872_v4  ;;  %5654 = vadd.xlane.f32.xlu0 %v5653_v34 }
0x1fb2   :  { %v10642_v39 = vpop.eup %10641  ;;  %v5881_v53 = vmul.f32 1.442695, %v5877_v35 }
0x1fb3   :  { %v5875_v6 = vpop.xlane.xlu1 %5874  ;;  %v5656_v21 = vsel %vm684_vm7, %v10642_v39, 0.0 }
0x1fb4   :  { %10647 = vpow2.f32 %v5881_v53  ;;  %v5878_v36 = vsub.f32 %v5866_v59, %v5875_v6  ;;  %5657 = vadd.xlane.f32.xlu1 %v5656_v21 }
0x1fb6   :  { %v10644_v23 = vpop.eup %10643  ;;  %v5883_v45 = vmul.f32 1.442695, %v5878_v36 }
0x1fb7   :  { %v5659_v54 = vsel %vm684_vm7, %v10644_v23, 0.0 }
0x1fb8   :  { %10649 = vpow2.f32 %v5883_v45  ;;  %5660 = vadd.xlane.f32.xlu0 %v5659_v54 }
0x1fba   :  { %v10646_v19 = vpop.eup %10645 }
0x1fbb   :  { %v5885_v24 = vsel %vm684_vm7, %v10646_v19, 0.0 }
0x1fbc   :  { %5886 = vadd.xlane.f32.xlu1 %v5885_v24 }
0x1fbe   :  { %v10648_v2 = vpop.eup %10647 }
0x1fbf   :  { %v5888_v63 = vsel %vm684_vm7, %v10648_v2, 0.0 }
0x1fc0   :  { %5889 = vadd.xlane.f32.xlu0 %v5888_v63 }
0x1fc2   :  { %v12718_v5 = vpop.eup %10649 }
0x1fc3   :  { %v5891_v33 = vsel %vm684_vm7, %v12718_v5, 0.0 }
0x1fc4   :  { %5892 = vadd.xlane.f32.xlu1 %v5891_v33 }
0x1fd0   :  { %v5511_v7 = vpop.f32.mrb[134].mxu1 }
0x1fd1   :  { %v12723_v26 = vadd.f32 %v5511_v7, %v12611_v1  ;;  %v9574_v57 = vpop.f32.mrb[135].mxu1 }
0x1fd4   :  { %v5516_v25 = vpop.f32.mrb[136].mxu1 }
0x1fd5   :  { %v12726_v30 = vadd.f32 %v5516_v25, %v12618_v32  ;;  %v9577_v3 = vpop.f32.mrb[137].mxu1  ;;  %5907 = vrot.lane.b32.xlu1 %v12685_v58, %s10852_s5 }
0x1fd6   :  { %10387 = vrot.lane.b32.xlu0 %v12457_v31, %s10852_s5  ;;  %s13431_s5 = sld [smem:[#allocation26_spill]] }
0x1fd8   :  { %v5521_v52 = vpop.f32.mrb[138].mxu1 }
0x1fd9   :  { %v12733_v59 = vadd.f32 %v5521_v52, %v12625_v14  ;;  %v9580_v40 = vpop.f32.mrb[139].mxu1  ;;  %10392 = vrot.lane.b32.xlu1 %v12596_v49, %s10854_s13 }
0x1fda   :  { %6179 = vrot.lane.b32.xlu0 %v12592_v22, %s10855_s17 }
0x1fdd   :  { %6189 = vrot.lane.b32.xlu1 %v12602_v50, %s10854_s13  ;;  %s13433_s13 = sld [smem:[#allocation28_spill]] }
0x1fde   :  { %6183 = vrot.lane.b32.xlu0 %v12602_v50, %s10855_s17 }
0x1fe1   :  { %6181 = vrot.lane.b32.xlu1 %v12588_v55, %s10855_s17 }
0x203d   :  { %v5655_v1 = vpop.xlane.xlu0 %5654 }
0x203e   :  { %10651 = vrcp.f32 %v5655_v1 }
0x2041   :  { %v5658_v32 = vpop.xlane.xlu1 %5657 }
0x2042   :  { %10653 = vrcp.f32 %v5658_v32 }
0x2045   :  { %v5661_v14 = vpop.xlane.xlu0 %5660 }
0x2046   :  { %10655 = vrcp.f32 %v5661_v14 }
0x2048   :  { %v10652_v10 = vpop.eup %10651 }
0x2049   :  { %v5665_v47 = vmul.f32 %v10652_v10, %v10640_v11  ;;  %v5887_v41 = vpop.xlane.xlu1 %5886 }
0x204a   :  { %10657 = vrcp.f32 %v5887_v41 }
0x204b   :  { %9603 = vmatmul.mubr.msk.f32.vlgmr.msra.gmra.mrb[140].mxu1 %vm684_vm7, %v5665_v47 }
0x204c   :  { %v10654_v60 = vpop.eup %10653  ;;  %9605 = vmatprep.mubr.msk.f32.mxu1 %vm10851_vm3, %v10848_v13 }
0x204d   :  { %v5890_v9 = vpop.xlane.xlu0 %5889  ;;  %v5666_v56 = vmul.f32 %v10654_v60, %v10642_v39 }
0x204e   :  { %10659 = vrcp.f32 %v5890_v9 }
0x204f   :  { %9606 = vmatmul.mubr.msk.f32.gmra.mrb[142].mxu1 %vm684_vm7, %v5666_v56 }
0x2050   :  { %v10656_v46 = vpop.eup %10655  ;;  %9608 = vmatprep.mubr.msk.f32.mxu1 %vm10851_vm3, %v10848_v13 }
0x2051   :  { %v10388_v48 = vpop.permute.xlu0 %10387  ;;  %v5893_v51 = vpop.xlane.xlu1 %5892  ;;  %v5667_v38 = vmul.f32 %v10656_v46, %v10644_v23 }
0x2052   :  { %v10390_v17 = vunpack.i.h.bf16 %v10388_v48  ;;  %v10389_v11 = vunpack.i.l.bf16 %v10388_v48  ;;  %10661 = vrcp.f32 %v5893_v51 }
0x2053   :  { %9609 = vmatmul.mubr.msk.f32.gmra.mrb[144].mxu1 %vm684_vm7, %v5667_v38 }
0x2054   :  { %v10046_v27 = vpack.c.bf16 %v10390_v17, %v10389_v11  ;;  %9632 = vmatprep.mubr.msk.f32.mxu1 %vm10851_vm3, %v10848_v13  ;;  %v10658_v4 = vpop.eup %10657 }
0x2055   :  { %v5897_v34 = vmul.f32 %v10658_v4, %v10646_v19  ;;  %v5908_v35 = vpop.permute.xlu1 %5907  ;;  %v6180_v1 = vpop.permute.xlu0 %6179 }
0x2056   :  { %10047 = vmatpush3.bf16.msra.mxu1 %v10046_v27 }
0x2057   :  { %9630 = vmatprep.subr.mxu1 %v10848_v13 }
0x2058   :  { %v10660_v39 = vpop.eup %10659 }
0x2059   :  { %v5898_v53 = vmul.f32 %v10660_v39, %v10648_v2  ;;  %v10393_v19 = vpop.permute.xlu1 %10392  ;;  %v6184_v14 = vpop.permute.xlu0 %6183 }
0x205a   :  { %9631 = vmatpush3.msra.mxu1 %v5908_v35  ;;  %v10395_v2 = vunpack.i.h.bf16 %v10393_v19  ;;  %v10394_v63 = vunpack.i.l.bf16 %v10393_v19 }
0x205b   :  { %9633 = vmatmul.mubr.msk.f32.vlgmr.msra.gmra.mrb[146].mxu1 %vm684_vm7, %v5897_v34  ;;  %10051 = vmatprep.subr.bf16.mxu1 %v10849_v20 }
0x205c   :  { %9635 = vmatprep.mubr.msk.f32.mxu1 %vm10851_vm3, %v10848_v13  ;;  %10053 = vmatpush3.bf16.msra.mxu1 %v12424_v12  ;;  %v10662_v6 = vpop.eup %10661 }
0x205d   :  { %10058 = vmatprep.subr.bf16.mxu1 %v10849_v20  ;;  %v5899_v21 = vmul.f32 %v10662_v6, %v12718_v5  ;;  %v10055_v5 = vpack.c.bf16 %v10395_v2, %v10394_v63  ;;  %v6190_v52 = vpop.permute.xlu1 %6189 }
0x205f   :  { %9636 = vmatmul.mubr.msk.f32.gmra.mrb[148].mxu1 %vm684_vm7, %v5898_v53 }
0x2060   :  { %9638 = vmatprep.mubr.msk.f32.mxu1 %vm10851_vm3, %v10848_v13 }
0x2061   :  { %v6182_v32 = vpop.permute.xlu1 %6181 }
0x2063   :  { %9639 = vmatmul.mubr.msk.f32.gmra.mrb[150].mxu1 %vm684_vm7, %v5899_v21 }
0x2064   :  { %9658 = vmatprep.mubr.msk.f32.mxu1 %vm10851_vm3, %v10848_v13 }
0x211e   :  { %v5743_v36 = vpop.f32.mrb[140].mxu1 }
0x211f   :  { %v9604_v23 = vpop.f32.mrb[141].mxu1  ;;  %9659 = vmatmul.mubr.msk.f32.vlgmr.msra.gmra.mrb[152].mxu1 %vm585_vm4, %v5743_v36 }
0x2120   :  { %9661 = vmatprep.mubr.msk.f32.mxu1 %vm10851_vm3, %v10848_v13 }
0x2122   :  { %v5748_v12 = vpop.f32.mrb[142].mxu1 }
0x2123   :  { %v9607_v45 = vpop.f32.mrb[143].mxu1  ;;  %9662 = vmatmul.mubr.msk.f32.gmra.mrb[154].mxu1 %vm585_vm4, %v5748_v12 }
0x2124   :  { %9664 = vmatprep.mubr.msk.f32.mxu1 %vm10851_vm3, %v10848_v13 }
0x2126   :  { %v5753_v54 = vpop.f32.mrb[144].mxu1 }
0x2127   :  { %v9610_v24 = vpop.f32.mrb[145].mxu1  ;;  %9665 = vmatmul.mubr.msk.f32.gmra.mrb[156].mxu1 %vm585_vm4, %v5753_v54 }
0x2128   :  { %9688 = vmatprep.mubr.msk.f32.mxu1 %vm10851_vm3, %v10848_v13 }
0x212e   :  { %v5987_v33 = vpop.f32.mrb[146].mxu1 }
0x212f   :  { %v9634_v7 = vpop.f32.mrb[147].mxu1  ;;  %9646 = vmatmul.mubr.msk.f32.vlgmr.msra.gmra.mrb[140].mxu0 %vm585_vm4, %v5987_v33 }
0x2130   :  { %10057 = vmatpush3.bf16.xpose.msk.msra.mxu0 %vm11220_vm5, %v10055_v5  ;;  %9648 = vmatprep.mubr.msk.f32.mxu0 %vm10851_vm3, %v10848_v13 }
0x2131   :  { %9671 = vmatprep.subr.mxu0 %v10848_v13 }
0x2132   :  { %v5992_v57 = vpop.f32.mrb[148].mxu1 }
0x2133   :  { %v9637_v25 = vpop.f32.mrb[149].mxu1  ;;  %9649 = vmatmul.mubr.msk.f32.gmra.mrb[142].mxu0 %vm585_vm4, %v5992_v57 }
0x2134   :  { %9651 = vmatprep.mubr.msk.f32.mxu0 %vm10851_vm3, %v10848_v13 }
0x2136   :  { %v5997_v3 = vpop.f32.mrb[150].mxu1 }
0x2137   :  { %v9640_v40 = vpop.f32.mrb[151].mxu1  ;;  %9652 = vmatmul.mubr.msk.f32.gmra.mrb[144].mxu0 %vm585_vm4, %v5997_v3 }
0x2138   :  { %9672 = vmatpush3.xpose.msk.msra.mxu0 %vm585_vm4, %v6190_v52  ;;  %9673 = vmatprep.mubr.msk.f32.mxu0 %vm10851_vm3, %v10848_v13 }
0x2139   :  { %10061 = vmatprep.subr.bf16.mxu0 %v10849_v20 }
0x213b   :  { %9674 = vmatmul.mubr.msk.f32.vlgmr.msra.gmra.mrb[146].mxu0 %vm585_vm4, %v6180_v1 }
0x213c   :  { %9676 = vmatprep.mubr.msk.f32.mxu0 %vm10851_vm3, %v10848_v13  ;;  %10063 = vmatpush3.bf16.msra.mxu0 %v12533_v8 }
0x213d   :  { %10068 = vmatprep.subr.bf16.mxu0 %v10849_v20 }
0x213f   :  { %9677 = vmatmul.mubr.msk.f32.gmra.mrb[148].mxu0 %vm585_vm4, %v6182_v32 }
0x2140   :  { %9679 = vmatprep.mubr.msk.f32.mxu0 %vm10851_vm3, %v10848_v13 }
0x2143   :  { %9680 = vmatmul.mubr.msk.f32.gmra.mrb[150].mxu0 %vm585_vm4, %v6184_v14 }
0x2144   :  { %9701 = vmatprep.mubr.msk.f32.mxu0 %vm10851_vm3, %v10848_v13 }
0x21f2   :  { %v6165_v10 = vpop.f32.mrb[152].mxu1 }
0x21f3   :  { %v9660_v47 = vpop.f32.mrb[153].mxu1 }
0x21f6   :  { %v6170_v41 = vpop.f32.mrb[154].mxu1 }
0x21f7   :  { %v9663_v60 = vpop.f32.mrb[155].mxu1 }
0x21fa   :  { %v6175_v9 = vpop.f32.mrb[156].mxu1 }
0x21fb   :  { %v9666_v8 = vpop.f32.mrb[157].mxu1 }
0x2202   :  { %v6076_v56 = vpop.f32.mrb[140].mxu0 }
0x2203   :  { %v12802_v46 = vadd.f32 %v6165_v10, %v6076_v56  ;;  %v9647_v48 = vpop.f32.mrb[141].mxu0 }
0x2206   :  { %v6081_v51 = vpop.f32.mrb[142].mxu0 }
0x2207   :  { %v12804_v38 = vadd.f32 %v6170_v41, %v6081_v51  ;;  %v9650_v17 = vpop.f32.mrb[143].mxu0 }
0x220a   :  { %v6086_v11 = vpop.f32.mrb[144].mxu0 }
0x220b   :  { %v12806_v27 = vadd.f32 %v6175_v9, %v6086_v11  ;;  %v9653_v4 = vpop.f32.mrb[145].mxu0 }
0x220e   :  { %v6269_v34 = vpop.f32.mrb[146].mxu0 }
0x220f   :  { %v6283_v35 = vmul.f32 0.25, %v6269_v34  ;;  %v9675_v39 = vpop.f32.mrb[147].mxu0 }
0x2211   :  { %v6286_v53 = vsel %vm315_vm6, %v6283_v35, -1e+30 }
0x2212   :  { %v6274_v6 = vpop.f32.mrb[148].mxu0  ;;  %v6289_v21 = vsel %vm684_vm7, %v6286_v53, -inf }
0x2213   :  { %v6284_v36 = vmul.f32 0.25, %v6274_v6  ;;  %6290 = vmax.xlane.f32.xlu1 %v6289_v21  ;;  %v9678_v23 = vpop.f32.mrb[149].mxu0 }
0x2215   :  { %v6287_v12 = vsel %vm315_vm6, %v6284_v36, -1e+30 }
0x2216   :  { %v6279_v45 = vpop.f32.mrb[150].mxu0  ;;  %v6292_v54 = vsel %vm684_vm7, %v6287_v12, -inf }
0x2217   :  { %v6285_v19 = vmul.f32 0.25, %v6279_v45  ;;  %6293 = vmax.xlane.f32.xlu0 %v6292_v54  ;;  %v9681_v24 = vpop.f32.mrb[151].mxu0 }
0x2219   :  { %v6288_v2 = vsel %vm315_vm6, %v6285_v19, -1e+30 }
0x221a   :  { %v6295_v63 = vsel %vm684_vm7, %v6288_v2, -inf }
0x221b   :  { %6296 = vmax.xlane.f32.xlu0 %v6295_v63 }
0x2224   :  { %10397 = vrot.lane.b32.xlu1 %v12457_v31, %s10855_s17 }
0x22a0   :  { %v6291_v5 = vpop.xlane.xlu1 %6290 }
0x22a1   :  { %v6298_v33 = vsub.f32 %v6286_v53, %v6291_v5 }
0x22a3   :  { %v6301_v7 = vmul.f32 1.442695, %v6298_v33 }
0x22a4   :  { %v10398_v57 = vpop.permute.xlu1 %10397  ;;  %v6294_v25 = vpop.xlane.xlu0 %6293 }
0x22a5   :  { %10663 = vpow2.f32 %v6301_v7  ;;  %v10400_v3 = vunpack.i.h.bf16 %v10398_v57  ;;  %v10399_v52 = vunpack.i.l.bf16 %v10398_v57  ;;  %v6299_v40 = vsub.f32 %v6287_v12, %v6294_v25 }
0x22a7   :  { %v10059_v1 = vpack.c.bf16 %v10400_v3, %v10399_v52  ;;  %v6303_v32 = vmul.f32 1.442695, %v6299_v40 }
0x22a8   :  { %v6297_v14 = vpop.xlane.xlu0 %6296 }
0x22a9   :  { %10665 = vpow2.f32 %v6303_v32  ;;  %v6300_v10 = vsub.f32 %v6288_v2, %v6297_v14  ;;  %10060 = vmatpush3.bf16.msra.mxu1 %v10059_v1 }
0x22aa   :  { %9686 = vmatprep.subr.mxu1 %v10848_v13 }
0x22ab   :  { %v6305_v47 = vmul.f32 1.442695, %v6300_v10 }
0x22ad   :  { %10667 = vpow2.f32 %v6305_v47 }
0x22af   :  { %v10664_v41 = vpop.eup %10663 }
0x22b0   :  { %v6307_v60 = vsel %vm684_vm7, %v10664_v41, 0.0 }
0x22b1   :  { %6308 = vadd.xlane.f32.xlu0 %v6307_v60 }
0x22b3   :  { %v10666_v9 = vpop.eup %10665 }
0x22b4   :  { %v6310_v8 = vsel %vm684_vm7, %v10666_v9, 0.0 }
0x22b5   :  { %6311 = vadd.xlane.f32.xlu1 %v6310_v8 }
0x22b7   :  { %v10668_v56 = vpop.eup %10667 }
0x22b8   :  { %v6313_v48 = vsel %vm684_vm7, %v10668_v56, 0.0 }
0x22b9   :  { %6314 = vadd.xlane.f32.xlu0 %v6313_v48 }
0x22c6   :  { %10402 = vrot.lane.b32.xlu1 %v12596_v49, %s10856_s21 }
0x22ca   :  { %6522 = vrot.lane.b32.xlu1 %v12602_v50, %s10856_s21 }
0x22ce   :  { %6512 = vrot.lane.b32.xlu1 %v12592_v22, %s10857_s25 }
0x22cf   :  { %6326 = vrot.lane.b32.xlu0 %v12685_v58, %s10855_s17 }
0x22d2   :  { %6516 = vrot.lane.b32.xlu1 %v12602_v50, %s10857_s25 }
0x22d3   :  { %6514 = vrot.lane.b32.xlu0 %v12588_v55, %s10857_s25 }
0x233e   :  { %v6309_v51 = vpop.xlane.xlu0 %6308 }
0x233f   :  { %10669 = vrcp.f32 %v6309_v51 }
0x2342   :  { %v6312_v17 = vpop.xlane.xlu1 %6311 }
0x2343   :  { %10671 = vrcp.f32 %v6312_v17 }
0x2346   :  { %v6315_v49 = vpop.xlane.xlu0 %6314  ;;  %v10403_v4 = vpop.permute.xlu1 %10402 }
0x2347   :  { %10673 = vrcp.f32 %v6315_v49  ;;  %v10405_v22 = vunpack.i.h.bf16 %v10403_v4  ;;  %v10404_v39 = vunpack.i.l.bf16 %v10403_v4 }
0x2349   :  { %v10670_v11 = vpop.eup %10669  ;;  %v10065_v53 = vpack.c.bf16 %v10405_v22, %v10404_v39 }
0x234a   :  { %v6319_v34 = vmul.f32 %v10670_v11, %v10664_v41  ;;  %v6327_v35 = vpop.permute.xlu0 %6326  ;;  %v6523_v36 = vpop.permute.xlu1 %6522 }
0x234b   :  { %9687 = vmatpush3.msra.mxu1 %v6327_v35 }
0x234c   :  { %9689 = vmatmul.mubr.msk.f32.vlgmr.msra.gmra.mrb[158].mxu1 %vm684_vm7, %v6319_v34  ;;  %10064 = vmatprep.subr.bf16.mxu1 %v10849_v20 }
0x234d   :  { %v10672_v50 = vpop.eup %10671  ;;  %9691 = vmatprep.mubr.msk.f32.mxu1 %vm10851_vm3, %v10848_v13 }
0x234e   :  { %v6320_v55 = vmul.f32 %v10672_v50, %v10666_v9  ;;  %v6513_v23 = vpop.permute.xlu1 %6512  ;;  %v6515_v42 = vpop.permute.xlu0 %6514 }
0x2350   :  { %9692 = vmatmul.mubr.msk.f32.gmra.mrb[160].mxu1 %vm684_vm7, %v6320_v55 }
0x2351   :  { %v10674_v6 = vpop.eup %10673  ;;  %9694 = vmatprep.mubr.msk.f32.mxu1 %vm10851_vm3, %v10848_v13 }
0x2352   :  { %10067 = vmatpush3.bf16.xpose.msk.msra.mxu1 %vm11220_vm5, %v10065_v53  ;;  %v6321_v21 = vmul.f32 %v10674_v6, %v10668_v56  ;;  %v6517_v12 = vpop.permute.xlu1 %6516 }
0x2353   :  { %9714 = vmatprep.subr.mxu1 %v10848_v13 }
0x2354   :  { %9695 = vmatmul.mubr.msk.f32.gmra.mrb[162].mxu1 %vm684_vm7, %v6321_v21 }
0x2355   :  { %9716 = vmatprep.mubr.msk.f32.mxu1 %vm10851_vm3, %v10848_v13 }
0x235a   :  { %9715 = vmatpush3.xpose.msk.msra.mxu1 %vm585_vm4, %v6523_v36 }
0x235b   :  { %10071 = vmatprep.subr.bf16.mxu1 %v10849_v20 }
0x235d   :  { %9717 = vmatmul.mubr.msk.f32.vlgmr.msra.gmra.mrb[164].mxu1 %vm585_vm4, %v6513_v23 }
0x235e   :  { %9719 = vmatprep.mubr.msk.f32.mxu1 %vm10851_vm3, %v10848_v13  ;;  %10073 = vmatpush3.bf16.msra.mxu1 %v12629_v29 }
0x2361   :  { %9720 = vmatmul.mubr.msk.f32.gmra.mrb[166].mxu1 %vm585_vm4, %v6515_v42 }
0x2362   :  { %9722 = vmatprep.mubr.msk.f32.mxu1 %vm10851_vm3, %v10848_v13 }
0x2365   :  { %9723 = vmatmul.mubr.msk.f32.gmra.mrb[168].mxu1 %vm585_vm4, %v6517_v12 }
0x2366   :  { %9744 = vmatprep.mubr.msk.f32.mxu1 %vm10851_vm3, %v10848_v13 }
0x241f   :  { %v6406_v45 = vpop.f32.mrb[158].mxu1 }
0x2420   :  { %v9690_v54 = vpop.f32.mrb[159].mxu1  ;;  %9702 = vmatmul.mubr.msk.f32.vlgmr.msra.gmra.mrb[152].mxu0 %vm585_vm4, %v6406_v45 }
0x2421   :  { %9704 = vmatprep.mubr.msk.f32.mxu0 %vm10851_vm3, %v10848_v13  ;;  %v12895_v54 = vld [vmem:[%s13418_s7] ss:$0 sm:$0xff] }
0x2423   :  { %v6411_v29 = vpop.f32.mrb[160].mxu1 }
0x2424   :  { %v9693_v19 = vpop.f32.mrb[161].mxu1  ;;  %9705 = vmatmul.mubr.msk.f32.gmra.mrb[154].mxu0 %vm585_vm4, %v6411_v29 }
0x2425   :  { %9707 = vmatprep.mubr.msk.f32.mxu0 %vm10851_vm3, %v10848_v13 }
0x2427   :  { %v6416_v24 = vpop.f32.mrb[162].mxu1 }
0x2428   :  { %v9696_v2 = vpop.f32.mrb[163].mxu1  ;;  %9708 = vmatmul.mubr.msk.f32.gmra.mrb[156].mxu0 %vm585_vm4, %v6416_v24 }
0x2429   :  { %9731 = vmatprep.mubr.msk.f32.mxu0 %vm10851_vm3, %v10848_v13 }
0x2430   :  { %v6602_v63 = vpop.f32.mrb[164].mxu1 }
0x2431   :  { %v6616_v5 = vmul.f32 0.25, %v6602_v63  ;;  %v9718_v33 = vpop.f32.mrb[165].mxu1 }
0x2433   :  { %v6619_v7 = vsel %vm315_vm6, %v6616_v5, -1e+30 }
0x2434   :  { %v6607_v57 = vpop.f32.mrb[166].mxu1  ;;  %v6622_v25 = vsel %vm684_vm7, %v6619_v7, -inf }
0x2435   :  { %v6617_v3 = vmul.f32 0.25, %v6607_v57  ;;  %6623 = vmax.xlane.f32.xlu0 %v6622_v25  ;;  %v9721_v52 = vpop.f32.mrb[167].mxu1 }
0x2437   :  { %v6620_v40 = vsel %vm315_vm6, %v6617_v3, -1e+30 }
0x2438   :  { %v6612_v1 = vpop.f32.mrb[168].mxu1  ;;  %v6625_v32 = vsel %vm684_vm7, %v6620_v40, -inf }
0x2439   :  { %v6618_v14 = vmul.f32 0.25, %v6612_v1  ;;  %6626 = vmax.xlane.f32.xlu1 %v6625_v32  ;;  %v9724_v10 = vpop.f32.mrb[169].mxu1 }
0x243b   :  { %v6621_v47 = vsel %vm315_vm6, %v6618_v14, -1e+30 }
0x243c   :  { %v6628_v41 = vsel %vm684_vm7, %v6621_v47, -inf }
0x243d   :  { %6629 = vmax.xlane.f32.xlu0 %v6628_v41 }
0x24c2   :  { %v6624_v60 = vpop.xlane.xlu0 %6623 }
0x24c3   :  { %v6631_v9 = vsub.f32 %v6619_v7, %v6624_v60 }
0x24c5   :  { %v6634_v8 = vmul.f32 1.442695, %v6631_v9 }
0x24c6   :  { %v6627_v56 = vpop.xlane.xlu1 %6626 }
0x24c7   :  { %10675 = vpow2.f32 %v6634_v8  ;;  %v6632_v48 = vsub.f32 %v6620_v40, %v6627_v56 }
0x24c9   :  { %v6636_v51 = vmul.f32 1.442695, %v6632_v48 }
0x24ca   :  { %v6630_v17 = vpop.xlane.xlu0 %6629 }
0x24cb   :  { %10677 = vpow2.f32 %v6636_v51  ;;  %v6633_v49 = vsub.f32 %v6621_v47, %v6630_v17 }
0x24cd   :  { %v6638_v11 = vmul.f32 1.442695, %v6633_v49 }
0x24cf   :  { %10679 = vpow2.f32 %v6638_v11 }
0x24d1   :  { %v10676_v4 = vpop.eup %10675 }
0x24d2   :  { %v6640_v34 = vsel %vm684_vm7, %v10676_v4, 0.0 }
0x24d3   :  { %6641 = vadd.xlane.f32.xlu0 %v6640_v34 }
0x24d5   :  { %v10678_v35 = vpop.eup %10677 }
0x24d6   :  { %v6643_v22 = vsel %vm684_vm7, %v10678_v35, 0.0 }
0x24d7   :  { %6644 = vadd.xlane.f32.xlu0 %v6643_v22 }
0x24d9   :  { %v10680_v39 = vpop.eup %10679 }
0x24da   :  { %v6646_v50 = vsel %vm684_vm7, %v10680_v39, 0.0 }
0x24db   :  { %6647 = vadd.xlane.f32.xlu1 %v6646_v50 }
0x24ec   :  { %6659 = vrot.lane.b32.xlu1 %v12685_v58, %s10857_s25  ;;  %v6846_v58 = vadd.f32 %v12726_v30, %v12043_v0 }
0x24ed   :  { %10407 = vrot.lane.b32.xlu0 %v12457_v31, %s10857_s25  ;;  %v6845_v31 = vadd.f32 %v12723_v26, %v12037_v44 }
0x24ef   :  { %v12905_v29 = vadd.f32 %v12895_v54, %v6845_v31 }
0x24f1   :  { %v6866_v44 = vsel %vm286_vm1, %v12905_v29, 0.0 }
0x24f3   :  { %v6495_v55 = vpop.f32.mrb[152].mxu0 }
0x24f4   :  { %v6509_v53 = vadd.f32 %v6495_v55, %v12802_v46  ;;  %v9703_v6 = vpop.f32.mrb[153].mxu0  ;;  %v12900_v46 = vadd.f32 %v12895_v54, %v6846_v58 }
0x24f6   :  { %v6869_v0 = vsel %vm286_vm1, %v12900_v46, 0.0 }
0x24f7   :  { %v6500_v21 = vpop.f32.mrb[154].mxu0 }
0x24f8   :  { %v12887_v36 = vadd.f32 %v6500_v21, %v12804_v38  ;;  %v9706_v23 = vpop.f32.mrb[155].mxu0  ;;  %v6847_v38 = vadd.f32 %v12733_v59, %v12049_v62 }
0x24fb   :  { %v6505_v42 = vpop.f32.mrb[156].mxu0 }
0x24fc   :  { %v12890_v12 = vadd.f32 %v6505_v42, %v12806_v27  ;;  %v9709_v45 = vpop.f32.mrb[157].mxu0  ;;  %v12908_v27 = vadd.f32 %v12895_v54, %v6847_v38 }
0x24fe   :  { %v6872_v30 = vsel %vm286_vm1, %v12908_v27, 0.0 }
0x250c   :  { %6870 = vadd.xlane.f32.xlu0 %v6869_v0 }
0x2510   :  { %6873 = vadd.xlane.f32.xlu0 %v6872_v30  ;;  %6867 = vadd.xlane.f32.xlu1 %v6866_v44  ;;  %v6969_v30 = vld [vmem:[%s13419_s10 + $0x8] sm:$0xff]  ;;  %v6971_v44 = vld [vmem:[%s13419_s10 + $0x18] sm:$0xff] }
0x2560   :  { %v6642_v26 = vpop.xlane.xlu0 %6641 }
0x2561   :  { %10681 = vrcp.f32 %v6642_v26  ;;  %v10074_v26 = vpack.c.bf16 %v6971_v44, %v6969_v30  ;;  %v13006_v30 = vld [vmem:[%s13420_s11] ss:$0 sm:$0xff] }
0x2564   :  { %v6645_v62 = vpop.xlane.xlu0 %6644 }
0x2565   :  { %10683 = vrcp.f32 %v6645_v62  ;;  %v6968_v62 = vld [vmem:[%s13419_s10] sm:$0xff] }
0x2568   :  { %v6648_v59 = vpop.xlane.xlu1 %6647  ;;  %v10408_v19 = vpop.permute.xlu0 %10407 }
0x2569   :  { %v10410_v24 = vunpack.i.h.bf16 %v10408_v19  ;;  %v10409_v2 = vunpack.i.l.bf16 %v10408_v19  ;;  %10685 = vrcp.f32 %v6648_v59  ;;  %v6970_v59 = vld [vmem:[%s13419_s10 + $0x10] sm:$0xff] }
0x256a   :  { %v10076_v19 = vpack.c.bf16 %v6970_v59, %v6968_v62 }
0x256b   :  { %v10069_v63 = vpack.c.bf16 %v10410_v24, %v10409_v2  ;;  %v10682_v5 = vpop.eup %10681  ;;  %v6973_v24 = vld [vmem:[%s13419_s10 + $0x28] sm:$0xff]  ;;  %v6975_v2 = vld [vmem:[%s13419_s10 + $0x38] sm:$0xff] }
0x256c   :  { %v6652_v33 = vmul.f32 %v10682_v5, %v10676_v4  ;;  %v6660_v7 = vpop.permute.xlu1 %6659  ;;  %v6972_v5 = vld [vmem:[%s13419_s10 + $0x20] sm:$0xff] }
0x256d   :  { %10070 = vmatpush3.bf16.msra.mxu0 %v10069_v63  ;;  %v10078_v63 = vpack.c.bf16 %v6975_v2, %v6973_v24 }
0x256e   :  { %9729 = vmatprep.subr.mxu0 %v10848_v13 }
0x256f   :  { %v10684_v57 = vpop.eup %10683 }
0x2570   :  { %v6653_v25 = vmul.f32 %v10684_v57, %v10678_v35  ;;  %v6977_v57 = vld [vmem:[%s13419_s10 + $0x48] sm:$0xff] }
0x2571   :  { %9730 = vmatpush3.msra.mxu0 %v6660_v7 }
0x2572   :  { %9732 = vmatmul.mubr.msk.f32.vlgmr.msra.gmra.mrb[158].mxu0 %vm684_vm7, %v6652_v33  ;;  %10075 = vmatprep.subr.bf16.mxu0 %v10074_v26  ;;  %v6974_v33 = vld [vmem:[%s13419_s10 + $0x30] sm:$0xff]  ;;  %v13010_v26 = vld [vmem:[%s13421_s15] ss:$0 sm:$0xff] }
0x2573   :  { %9734 = vmatprep.mubr.msk.f32.mxu0 %vm10851_vm3, %v10848_v13  ;;  %v10686_v3 = vpop.eup %10685  ;;  %10077 = vmatpush1.bf16.msra.mxu0 %v10076_v19  ;;  %v10080_v7 = vpack.c.bf16 %v6974_v33, %v6972_v5 }
0x2574   :  { %v6654_v52 = vmul.f32 %v10686_v3, %v10680_v39  ;;  %10079 = vmatprep.subr.bf16.mxu0 %v10078_v63 }
0x2576   :  { %9735 = vmatmul.mubr.msk.f32.gmra.mrb[160].mxu0 %vm684_vm7, %v6653_v25  ;;  %v6979_v25 = vld [vmem:[%s13419_s10 + $0x58] sm:$0xff] }
0x2577   :  { %9737 = vmatprep.mubr.msk.f32.mxu0 %vm10851_vm3, %v10848_v13  ;;  %10081 = vmatpush1.bf16.msra.mxu0 %v10080_v7  ;;  %v10082_v3 = vpack.c.bf16 %v6979_v25, %v6977_v57  ;;  %v7456_v7 = vld [vmem:[%s13422_s16 + $0x88] sm:$0xff]  ;;  %v7439_v25 = vld [vmem:[%s13422_s16] sm:$0xff] }
0x2579   :  { %10083 = vmatprep.subr.bf16.mxu0 %v10082_v3  ;;  %v7440_v3 = vld [vmem:[%s13422_s16 + $0x8] sm:$0xff] }
0x257a   :  { %9738 = vmatmul.mubr.msk.f32.gmra.mrb[162].mxu0 %vm684_vm7, %v6654_v52  ;;  %v6976_v52 = vld [vmem:[%s13419_s10 + $0x40] sm:$0xff] }
0x257b   :  { %7078 = vmatprep.mubr.f32.mxu0 %v10848_v13 }
0x2599   :  { %v6871_v41 = vpop.xlane.xlu0 %6870 }
0x259a   :  { %v6885_v35 = vmul.f32 0.015625, %v6871_v41  ;;  %v6982_v41 = vld [vmem:[%s13419_s10 + $0x70] sm:$0xff] }
0x259d   :  { %v6868_v60 = vpop.xlane.xlu1 %6867  ;;  %v6874_v17 = vpop.xlane.xlu0 %6873 }
0x259e   :  { %v6884_v48 = vmul.f32 0.015625, %v6868_v60  ;;  %v6886_v39 = vmul.f32 0.015625, %v6874_v17 }
0x25a0   :  { %v12938_v22 = vsub.f32 %v12905_v29, %v6884_v48  ;;  %v12951_v23 = vsub.f32 %v12908_v27, %v6886_v39 }
0x25a2   :  { %v6896_v45 = vmul.f32 %v12938_v22, %v12938_v22 }
0x25a4   :  { %v6902_v58 = vsel %vm286_vm1, %v6896_v45, 0.0 }
0x2645   :  { %v6739_v40 = vpop.f32.mrb[158].mxu0 }
0x2646   :  { %v9733_v1 = vpop.f32.mrb[159].mxu0  ;;  %9745 = vmatmul.mubr.msk.f32.vlgmr.msra.gmra.mrb[170].mxu1 %vm585_vm4, %v6739_v40  ;;  %v6978_v40 = vld [vmem:[%s13419_s10 + $0x50] sm:$0xff] }
0x2647   :  { %9747 = vmatprep.mubr.msk.f32.mxu1 %vm10851_vm3, %v10848_v13  ;;  %v10084_v1 = vpack.c.bf16 %v6978_v40, %v6976_v52  ;;  %v10092_v52 = vpack.c.bf16 %v7440_v3, %v7439_v25  ;;  %v7457_v40 = vld [vmem:[%s13422_s16 + $0x90] sm:$0xff] }
0x2648   :  { %v7469_v3 = vld [vmem:[%s13422_s16 + $0xf0] sm:$0xff] }
0x2649   :  { %v6744_v32 = vpop.f32.mrb[160].mxu0  ;;  %10085 = vmatpush1.bf16.msra.mxu0 %v10084_v1  ;;  %v7458_v1 = vld [vmem:[%s13422_s16 + $0x98] sm:$0xff] }
0x264a   :  { %v9736_v14 = vpop.f32.mrb[161].mxu0  ;;  %9748 = vmatmul.mubr.msk.f32.gmra.mrb[172].mxu1 %vm585_vm4, %v6744_v32  ;;  %v6981_v32 = vld [vmem:[%s13419_s10 + $0x68] sm:$0xff] }
0x264b   :  { %9750 = vmatprep.mubr.msk.f32.mxu1 %vm10851_vm3, %v10848_v13  ;;  %v6983_v14 = vld [vmem:[%s13419_s10 + $0x78] sm:$0xff] }
0x264d   :  { %v6749_v10 = vpop.f32.mrb[162].mxu0 }
0x264e   :  { %v9739_v47 = vpop.f32.mrb[163].mxu0  ;;  %9751 = vmatmul.mubr.msk.f32.gmra.mrb[174].mxu1 %vm585_vm4, %v6749_v10  ;;  %v10086_v10 = vpack.c.bf16 %v6983_v14, %v6981_v32  ;;  %v10094_v32 = vpack.c.bf16 %v7458_v1, %v7457_v40  ;;  %v7441_v14 = vld [vmem:[%s13422_s16 + $0x10] sm:$0xff] }
0x264f   :  { %v6980_v47 = vld [vmem:[%s13419_s10 + $0x60] sm:$0xff]  ;;  %v7453_v40 = vld [vmem:[%s13422_s16 + $0x70] sm:$0xff] }
0x2650   :  { %v10088_v60 = vpack.c.bf16 %v6982_v41, %v6980_v47  ;;  %10087 = vmatprep.subr.bf16.mxu0 %v10086_v10  ;;  %v7442_v10 = vld [vmem:[%s13422_s16 + $0x18] sm:$0xff]  ;;  %v7459_v41 = vld [vmem:[%s13422_s16 + $0xa0] sm:$0xff] }
0x2651   :  { %v10096_v47 = vpack.c.bf16 %v7442_v10, %v7441_v14 }
0x2652   :  { %10089 = vmatpush1.bf16.msra.mxu0 %v10088_v60  ;;  %v7460_v60 = vld [vmem:[%s13422_s16 + $0xa8] sm:$0xff] }
0x2653   :  { %10122 = vmatprep.subr.bf16.mxu0 %v10849_v20 }
0x2719   :  { %v6828_v9 = vpop.f32.mrb[170].mxu1 }
0x271a   :  { %v6842_v8 = vadd.f32 %v6828_v9, %v6509_v53  ;;  %v9746_v56 = vpop.f32.mrb[171].mxu1 }
0x271c   :  { %v6848_v51 = vadd.f32 %v6842_v8, %v12303_v43 }
0x271d   :  { %v6833_v49 = vpop.f32.mrb[172].mxu1 }
0x271e   :  { %v12934_v11 = vadd.f32 %v12895_v54, %v6848_v51  ;;  %v6843_v4 = vadd.f32 %v6833_v49, %v12887_v36  ;;  %v9749_v34 = vpop.f32.mrb[173].mxu1  ;;  %v12948_v36 = vsub.f32 %v12900_v46, %v6885_v35 }
0x2720   :  { %v6849_v50 = vadd.f32 %v6843_v4, %v12309_v28  ;;  %v6875_v55 = vsel %vm286_vm1, %v12934_v11, 0.0  ;;  %v6897_v38 = vmul.f32 %v12948_v36, %v12948_v36 }
0x2721   :  { %6876 = vadd.xlane.f32.xlu1 %v6875_v55  ;;  %v6838_v43 = vpop.f32.mrb[174].mxu1 }
0x2722   :  { %v12944_v53 = vadd.f32 %v12895_v54, %v6849_v50  ;;  %v6844_v6 = vadd.f32 %v6838_v43, %v12890_v12  ;;  %v9752_v21 = vpop.f32.mrb[175].mxu1 }
0x2724   :  { %v6850_v28 = vadd.f32 %v6844_v6, %v12315_v37  ;;  %v6878_v42 = vsel %vm286_vm1, %v12944_v53, 0.0  ;;  %v6898_v37 = vmul.f32 %v12951_v23, %v12951_v23 }
0x2725   :  { %6879 = vadd.xlane.f32.xlu0 %v6878_v42 }
0x2726   :  { %v12959_v12 = vadd.f32 %v12895_v54, %v6850_v28  ;;  %v6908_v0 = vsel %vm286_vm1, %v6898_v37, 0.0  ;;  %v6905_v54 = vsel %vm286_vm1, %v6897_v38, 0.0 }
0x2728   :  { %v6881_v31 = vsel %vm286_vm1, %v12959_v12, 0.0 }
0x2729   :  { %6903 = vadd.xlane.f32.xlu0 %v6902_v58  ;;  %6882 = vadd.xlane.f32.xlu1 %v6881_v31 }
0x272d   :  { %6909 = vadd.xlane.f32.xlu0 %v6908_v0  ;;  %6906 = vadd.xlane.f32.xlu1 %v6905_v54 }
0x27ae   :  { %v6877_v9 = vpop.xlane.xlu1 %6876 }
0x27af   :  { %v6887_v8 = vmul.f32 0.015625, %v6877_v9  ;;  %v10098_v9 = vpack.c.bf16 %v7460_v60, %v7459_v41 }
0x27b1   :  { %v12988_v56 = vsub.f32 %v12934_v11, %v6887_v8  ;;  %v7443_v8 = vld [vmem:[%s13422_s16 + $0x20] sm:$0xff] }
0x27b2   :  { %v6880_v48 = vpop.xlane.xlu0 %6879 }
0x27b3   :  { %v6888_v51 = vmul.f32 0.015625, %v6880_v48  ;;  %v6899_v17 = vmul.f32 %v12988_v56, %v12988_v56  ;;  %v7444_v48 = vld [vmem:[%s13422_s16 + $0x28] sm:$0xff] }
0x27b5   :  { %v12993_v49 = vsub.f32 %v12944_v53, %v6888_v51  ;;  %v6911_v4 = vsel %vm286_vm1, %v6899_v17, 0.0  ;;  %v10100_v51 = vpack.c.bf16 %v7444_v48, %v7443_v8  ;;  %v7461_v17 = vld [vmem:[%s13422_s16 + $0xb0] sm:$0xff] }
0x27b6   :  { %v6904_v34 = vpop.xlane.xlu0 %6903  ;;  %6912 = vadd.xlane.f32.xlu1 %v6911_v4  ;;  %v6883_v35 = vpop.xlane.xlu1 %6882  ;;  %v7462_v4 = vld [vmem:[%s13422_s16 + $0xb8] sm:$0xff] }
0x27b7   :  { %v6920_v39 = vmul.f32 0.015625, %v6904_v34  ;;  %v6889_v50 = vmul.f32 0.015625, %v6883_v35  ;;  %v6900_v55 = vmul.f32 %v12993_v49, %v12993_v49  ;;  %v10102_v34 = vpack.c.bf16 %v7462_v4, %v7461_v17  ;;  %v7445_v35 = vld [vmem:[%s13422_s16 + $0x30] sm:$0xff] }
0x27b9   :  { %v6926_v43 = vadd.f32 1e-06, %v6920_v39  ;;  %v12999_v6 = vsub.f32 %v12959_v12, %v6889_v50  ;;  %v6914_v21 = vsel %vm286_vm1, %v6900_v55, 0.0  ;;  %v7446_v39 = vld [vmem:[%s13422_s16 + $0x38] sm:$0xff] }
0x27ba   :  { %6915 = vadd.xlane.f32.xlu0 %v6914_v21  ;;  %v6910_v28 = vpop.xlane.xlu0 %6909  ;;  %v6907_v42 = vpop.xlane.xlu1 %6906  ;;  %v10104_v55 = vpack.c.bf16 %v7446_v39, %v7445_v35  ;;  %v7463_v21 = vld [vmem:[%s13422_s16 + $0xc0] sm:$0xff] }
0x27bb   :  { %10687 = vrsqrt.f32 %v6926_v43  ;;  %v6922_v45 = vmul.f32 0.015625, %v6910_v28  ;;  %v6921_v58 = vmul.f32 0.015625, %v6907_v42  ;;  %v6901_v31 = vmul.f32 %v12999_v6, %v12999_v6  ;;  %v7464_v28 = vld [vmem:[%s13422_s16 + $0xc8] sm:$0xff] }
0x27bd   :  { %v6928_v37 = vadd.f32 1e-06, %v6922_v45  ;;  %v6927_v38 = vadd.f32 1e-06, %v6921_v58  ;;  %v6917_v0 = vsel %vm286_vm1, %v6901_v31, 0.0  ;;  %v10106_v45 = vpack.c.bf16 %v7464_v28, %v7463_v21  ;;  %v7447_v58 = vld [vmem:[%s13422_s16 + $0x40] sm:$0xff] }
0x27be   :  { %6918 = vadd.xlane.f32.xlu1 %v6917_v0  ;;  %v7448_v31 = vld [vmem:[%s13422_s16 + $0x48] sm:$0xff] }
0x27bf   :  { %10689 = vrsqrt.f32 %v6928_v37 }
0x27c0   :  { %10691 = vrsqrt.f32 %v6927_v38  ;;  %v10108_v38 = vpack.c.bf16 %v7448_v31, %v7447_v58 }
0x27c5   :  { %v10688_v54 = vpop.eup %10687 }
0x27c6   :  { %v6938_v44 = vmul.f32 %v10688_v54, %v12938_v22  ;;  %v7465_v54 = vld [vmem:[%s13422_s16 + $0xd0] sm:$0xff] }
0x27c8   :  { %v6950_v62 = vmul.f32 %v13006_v30, %v6938_v44  ;;  %v7466_v44 = vld [vmem:[%s13422_s16 + $0xd8] sm:$0xff] }
0x27c9   :  { %v10690_v59 = vpop.eup %10689 }
0x27ca   :  { %v10692_v19 = vpop.eup %10691  ;;  %v6962_v24 = vadd.f32 %v13010_v26, %v6950_v62  ;;  %v6940_v63 = vmul.f32 %v10690_v59, %v12951_v23  ;;  %v7455_v23 = vld [vmem:[%s13422_s16 + $0x80] sm:$0xff]  ;;  %v10110_v59 = vpack.c.bf16 %v7466_v44, %v7465_v54 }
0x27cb   :  { %v6939_v2 = vmul.f32 %v10692_v19, %v12948_v36  ;;  %v10090_v57 = vpack.c.bf16 %v7456_v7, %v7455_v23  ;;  %v7449_v19 = vld [vmem:[%s13422_s16 + $0x50] sm:$0xff]  ;;  %v7451_v7 = vld [vmem:[%s13422_s16 + $0x60] sm:$0xff] }
0x27cc   :  { %8580 = vmatmul.mubr.msk.f32.vlgmr.msra.gmra.mrb[164].mxu0 %vm286_vm1, %v6962_v24  ;;  %v6952_v33 = vmul.f32 %v13006_v30, %v6940_v63  ;;  %v7450_v24 = vld [vmem:[%s13422_s16 + $0x58] sm:$0xff] }
0x27cd   :  { %7084 = vmatprep.mubr.f32.mxu0 %v10848_v13  ;;  %v6951_v22 = vmul.f32 %v13006_v30, %v6939_v2  ;;  %10091 = vmatprep.subr.bf16.mxu1 %v10090_v57  ;;  %v10112_v63 = vpack.c.bf16 %v7450_v24, %v7449_v19  ;;  %v7452_v57 = vld [vmem:[%s13422_s16 + $0x68] sm:$0xff] }
0x27ce   :  { %v6964_v36 = vadd.f32 %v13010_v26, %v6952_v33  ;;  %10093 = vmatpush3.bf16.msra.mxu1 %v10092_v52  ;;  %v7468_v33 = vld [vmem:[%s13422_s16 + $0xe8] sm:$0xff]  ;;  %v10116_v25 = vpack.c.bf16 %v7452_v57, %v7451_v7  ;;  %v7470_v52 = vld [vmem:[%s13422_s16 + $0xf8] sm:$0xff] }
0x27cf   :  { %v6963_v5 = vadd.f32 %v13010_v26, %v6951_v22  ;;  %10095 = vmatprep.subr.bf16.mxu1 %v10094_v32  ;;  %v10118_v1 = vpack.c.bf16 %v7470_v52, %v7469_v3  ;;  %v7454_v32 = vld [vmem:[%s13422_s16 + $0x78] sm:$0xff] }
0x27d0   :  { %v10120_v10 = vpack.c.bf16 %v7454_v32, %v7453_v40 }
0x27d1   :  { %8581 = vmatmul.mubr.msk.f32.gmra.mrb[166].mxu0 %vm286_vm1, %v6963_v5  ;;  %v7467_v5 = vld [vmem:[%s13422_s16 + $0xe0] sm:$0xff] }
0x27d2   :  { %7090 = vmatprep.mubr.f32.mxu0 %v10848_v13  ;;  %10097 = vmatpush3.bf16.msra.mxu1 %v10096_v47  ;;  %v10114_v23 = vpack.c.bf16 %v7468_v33, %v7467_v5 }
0x27d3   :  { %10099 = vmatprep.subr.bf16.mxu1 %v10098_v9 }
0x27d5   :  { %8582 = vmatmul.mubr.msk.f32.gmra.mrb[168].mxu0 %vm286_vm1, %v6964_v36 }
0x27d6   :  { %7096 = vmatprep.mubr.f32.mxu0 %v10848_v13  ;;  %10101 = vmatpush3.bf16.msra.mxu1 %v10100_v51 }
0x27d7   :  { %10103 = vmatprep.subr.bf16.mxu1 %v10102_v34 }
0x27da   :  { %10105 = vmatpush3.bf16.msra.mxu1 %v10104_v55 }
0x27db   :  { %10107 = vmatprep.subr.bf16.mxu1 %v10106_v45 }
0x27de   :  { %10109 = vmatpush3.bf16.msra.mxu1 %v10108_v38 }
0x27df   :  { %10111 = vmatprep.subr.bf16.mxu1 %v10110_v59 }
0x27e2   :  { %10113 = vmatpush3.bf16.msra.mxu1 %v10112_v63 }
0x27e3   :  { %10115 = vmatprep.subr.bf16.mxu1 %v10114_v23 }
0x27e6   :  { %10117 = vmatpush3.bf16.msra.mxu1 %v10116_v25 }
0x27e7   :  { %10119 = vmatprep.subr.bf16.mxu1 %v10118_v1 }
0x27ea   :  { %10121 = vmatpush3.bf16.msra.mxu1 %v10120_v10 }
0x2843   :  { %v6913_v50 = vpop.xlane.xlu1 %6912 }
0x2844   :  { %v6923_v43 = vmul.f32 0.015625, %v6913_v50 }
0x2846   :  { %v6929_v42 = vadd.f32 1e-06, %v6923_v43 }
0x2847   :  { %v6916_v37 = vpop.xlane.xlu0 %6915 }
0x2848   :  { %10693 = vrsqrt.f32 %v6929_v42  ;;  %v6924_v0 = vmul.f32 0.015625, %v6916_v37 }
0x284a   :  { %v6930_v62 = vadd.f32 1e-06, %v6924_v0 }
0x284b   :  { %v6919_v2 = vpop.xlane.xlu1 %6918 }
0x284c   :  { %10695 = vrsqrt.f32 %v6930_v62  ;;  %v6925_v22 = vmul.f32 0.015625, %v6919_v2 }
0x284e   :  { %v6931_v36 = vadd.f32 1e-06, %v6925_v22 }
0x2850   :  { %10697 = vrsqrt.f32 %v6931_v36 }
0x2852   :  { %v10694_v14 = vpop.eup %10693 }
0x2853   :  { %v6941_v47 = vmul.f32 %v10694_v14, %v12988_v56 }
0x2855   :  { %v6953_v41 = vmul.f32 %v13006_v30, %v6941_v47 }
0x2856   :  { %v10696_v60 = vpop.eup %10695 }
0x2857   :  { %v6965_v9 = vadd.f32 %v13010_v26, %v6953_v41  ;;  %v6942_v8 = vmul.f32 %v10696_v60, %v12993_v49  ;;  %v6984_v49 = vld [vmem:[%s13423_s18] sm:$0x3] }
0x2858   :  { %v13076_v35 = vrot.slane %v6984_v49, %v11169_v16  ;;  %v13079_v39 = vrot.slane %v6984_v49, %v11173_v18 }
0x2859   :  { %8583 = vmatmul.mubr.msk.f32.gmra.mrb[170].mxu0 %vm286_vm1, %v6965_v9  ;;  %v6954_v48 = vmul.f32 %v13006_v30, %v6942_v8 }
0x285a   :  { %v10698_v51 = vpop.eup %10697  ;;  %7102 = vmatprep.mubr.f32.mxu0 %v10848_v13 }
0x285b   :  { %v6966_v17 = vadd.f32 %v13010_v26, %v6954_v48  ;;  %v6943_v56 = vmul.f32 %v10698_v51, %v12999_v6 }
0x285d   :  { %8584 = vmatmul.mubr.msk.f32.gmra.mrb[172].mxu0 %vm286_vm1, %v6966_v17  ;;  %v6955_v4 = vmul.f32 %v13006_v30, %v6943_v56 }
0x285e   :  { %7108 = vmatprep.mubr.f32.mxu0 %v10848_v13 }
0x285f   :  { %v6967_v34 = vadd.f32 %v13010_v26, %v6955_v4 }
0x2861   :  { %8585 = vmatmul.mubr.msk.f32.gmra.mrb[174].mxu0 %vm286_vm1, %v6967_v34 }
0x2862   :  { %9765 = vmatprep.mubr.msk.f32.mxu0 %vm10851_vm3, %v10848_v13 }
0x289f   :  { %v7080_v6 = vpop.f32.mrb[164].mxu0 }
0x28a0   :  { %v13082_v50 = vadd.f32 %v7080_v6, %v13076_v35  ;;  %v7082_v30 = vpop.f32.mrb[165].mxu0 }
0x28a1   :  { %v13085_v55 = vadd.f32 %v7082_v30, %v13079_v39 }
0x28a2   :  { %v13088_v26 = vmul.f32 0.70710677, %v13082_v50 }
0x28a3   :  { %v13091_v43 = vmul.f32 0.70710677, %v13085_v55 }
0x28a4   :  { %v7139_v21 = vand.u32 2147483647, %v13088_v26  ;;  %v7086_v28 = vpop.f32.mrb[166].mxu0  ;;  %vm7379_vm4 = vcmp.ge.f32.partialorder %v13088_v26, 0.0  ;;  %v7115_v26 = vmul.f32 0.5, %v13082_v50 }
0x28a5   :  { %v7140_v42 = vand.u32 2147483647, %v13091_v43  ;;  %v13096_v45 = vadd.f32 %v7086_v28, %v13076_v35  ;;  %v7088_v58 = vpop.f32.mrb[167].mxu0  ;;  %vm7380_vm5 = vcmp.ge.f32.partialorder %v13091_v43, 0.0 }
0x28a6   :  { %v7151_v31 = vmul.f32 0.3275911, %v7139_v21  ;;  %v13099_v37 = vadd.f32 %v7088_v58, %v13079_v39  ;;  %v7307_v25 = vsub.f32 0.0, %v7139_v21 }
0x28a7   :  { %v7152_v38 = vmul.f32 0.3275911, %v7140_v42  ;;  %v13102_v0 = vmul.f32 0.70710677, %v13096_v45  ;;  %v7308_v52 = vsub.f32 0.0, %v7140_v42 }
0x28a8   :  { %v7163_v54 = vadd.f32 1.0, %v7151_v31  ;;  %v13105_v44 = vmul.f32 0.70710677, %v13099_v37  ;;  %v7092_v62 = vpop.f32.mrb[168].mxu0  ;;  %v7319_v10 = vmul.f32 %v7307_v25, %v7139_v21 }
0x28a9   :  { %v7164_v59 = vadd.f32 1.0, %v7152_v38  ;;  %v7141_v19 = vand.u32 2147483647, %v13102_v0  ;;  %v7094_v24 = vpop.f32.mrb[169].mxu0  ;;  %v13110_v5 = vadd.f32 %v7092_v62, %v13076_v35  ;;  %v7320_v8 = vmul.f32 %v7308_v52, %v7140_v42 }
0x28aa   :  { %10699 = vrcp.f32 %v7163_v54  ;;  %v7142_v2 = vand.u32 2147483647, %v13105_v44  ;;  %v13113_v36 = vadd.f32 %v7094_v24, %v13079_v39  ;;  %v7331_v4 = vmul.f32 1.442695, %v7319_v10 }
0x28ab   :  { %10701 = vrcp.f32 %v7164_v59  ;;  %v7153_v63 = vmul.f32 0.3275911, %v7141_v19  ;;  %v13116_v7 = vmul.f32 0.70710677, %v13110_v5  ;;  %v7309_v47 = vsub.f32 0.0, %v7141_v19 }
0x28ac   :  { %v7154_v22 = vmul.f32 0.3275911, %v7142_v2  ;;  %v13119_v57 = vmul.f32 0.70710677, %v13113_v36  ;;  %v7310_v51 = vsub.f32 0.0, %v7142_v2  ;;  %vm7381_vm6 = vcmp.ge.f32.partialorder %v13102_v0, 0.0 }
0x28ad   :  { %v7165_v33 = vadd.f32 1.0, %v7153_v63  ;;  %v7143_v3 = vand.u32 2147483647, %v13116_v7  ;;  %v7321_v34 = vmul.f32 %v7309_v47, %v7141_v19  ;;  %v7333_v28 = vmul.f32 1.442695, %v7320_v8 }
0x28ae   :  { %v7166_v23 = vadd.f32 1.0, %v7154_v22  ;;  %v7144_v40 = vand.u32 2147483647, %v13119_v57  ;;  %v7322_v21 = vmul.f32 %v7310_v51, %v7142_v2  ;;  %vm7382_vm7 = vcmp.ge.f32.partialorder %v13105_v44, 0.0 }
0x28af   :  { %10703 = vrcp.f32 %v7165_v33  ;;  %v7155_v1 = vmul.f32 0.3275911, %v7143_v3  ;;  %v7311_v54 = vsub.f32 0.0, %v7143_v3  ;;  %v7335_v59 = vmul.f32 1.442695, %v7321_v34 }
0x28b0   :  { %10705 = vrcp.f32 %v7166_v23  ;;  %v7156_v32 = vmul.f32 0.3275911, %v7144_v40  ;;  %v7312_v22 = vsub.f32 0.0, %v7144_v40  ;;  %v7337_v23 = vmul.f32 1.442695, %v7322_v21 }
0x28b1   :  { %v7167_v41 = vadd.f32 1.0, %v7155_v1  ;;  %v7323_v1 = vmul.f32 %v7311_v54, %v7143_v3  ;;  %vm7383_vm11 = vcmp.ge.f32.partialorder %v13116_v7, 0.0  ;;  %vm7384_vm12 = vcmp.ge.f32.partialorder %v13119_v57, 0.0 }
0x28b2   :  { %v7168_v48 = vadd.f32 1.0, %v7156_v32 }
0x28b3   :  { %10707 = vrcp.f32 %v7167_v41 }
0x28b4   :  { %v10700_v14 = vpop.eup %10699  ;;  %10709 = vrcp.f32 %v7168_v48  ;;  %v7324_v48 = vmul.f32 %v7312_v22, %v7144_v40 }
0x28b5   :  { %v10702_v60 = vpop.eup %10701  ;;  %v7199_v9 = vmul.f32 1.0614054, %v10700_v14  ;;  %10711 = vpow2.f32 %v7331_v4 }
0x28b6   :  { %v7200_v17 = vmul.f32 1.0614054, %v10702_v60  ;;  %10713 = vpow2.f32 %v7333_v28  ;;  %v7341_v54 = vmul.f32 1.442695, %v7324_v48 }
0x28b7   :  { %v7211_v56 = vadd.f32 -1.4531521, %v7199_v9  ;;  %10715 = vpow2.f32 %v7335_v59 }
0x28b8   :  { %v7212_v49 = vadd.f32 -1.4531521, %v7200_v17  ;;  %10717 = vpow2.f32 %v7337_v23 }
0x28b9   :  { %v13123_v6 = vpop.eup %10703  ;;  %v7223_v30 = vmul.f32 %v10700_v14, %v7211_v56 }
0x28ba   :  { %v13125_v58 = vpop.eup %10705  ;;  %v7224_v31 = vmul.f32 %v10702_v60, %v7212_v49  ;;  %v7201_v38 = vmul.f32 1.0614054, %v13123_v6  ;;  %v7339_v49 = vmul.f32 1.442695, %v7323_v1 }
0x28bb   :  { %v7235_v42 = vadd.f32 1.4214138, %v7223_v30  ;;  %v7202_v62 = vmul.f32 1.0614054, %v13125_v58 }
0x28bc   :  { %v7236_v24 = vadd.f32 1.4214138, %v7224_v31  ;;  %v7213_v63 = vadd.f32 -1.4531521, %v7201_v38  ;;  %10719 = vpow2.f32 %v7339_v49 }
0x28bd   :  { %v7247_v19 = vmul.f32 %v10700_v14, %v7235_v42  ;;  %v7214_v33 = vadd.f32 -1.4531521, %v7202_v62  ;;  %v13131_v10 = vpop.eup %10707  ;;  %10721 = vpow2.f32 %v7341_v54 }
0x28be   :  { %v7248_v25 = vmul.f32 %v10702_v60, %v7236_v24  ;;  %v7225_v52 = vmul.f32 %v13123_v6, %v7213_v63  ;;  %v13133_v9 = vpop.eup %10709  ;;  %v7203_v17 = vmul.f32 1.0614054, %v13131_v10 }
0x28bf   :  { %v7259_v2 = vadd.f32 -0.28449672, %v7247_v19  ;;  %v7226_v32 = vmul.f32 %v13125_v58, %v7214_v33  ;;  %v7204_v3 = vmul.f32 1.0614054, %v13133_v9  ;;  %v10712_v59 = vpop.eup %10711 }
0x28c0   :  { %v7260_v47 = vadd.f32 -0.28449672, %v7248_v25  ;;  %v7237_v41 = vadd.f32 1.4214138, %v7225_v52  ;;  %v7215_v28 = vadd.f32 -1.4531521, %v7203_v17  ;;  %v10714_v22 = vpop.eup %10713 }
0x28c1   :  { %v7271_v8 = vmul.f32 %v10700_v14, %v7259_v2  ;;  %v7238_v51 = vadd.f32 1.4214138, %v7226_v32  ;;  %v7216_v38 = vadd.f32 -1.4531521, %v7204_v3 }
0x28c2   :  { %v7272_v56 = vmul.f32 %v10702_v60, %v7260_v47  ;;  %v7249_v4 = vmul.f32 %v13123_v6, %v7237_v41  ;;  %v7227_v62 = vmul.f32 %v13131_v10, %v7215_v28  ;;  %v10716_v41 = vpop.eup %10715 }
0x28c3   :  { %v7283_v34 = vadd.f32 0.2548296, %v7271_v8  ;;  %v7250_v30 = vmul.f32 %v13125_v58, %v7238_v51  ;;  %v7228_v19 = vmul.f32 %v13133_v9, %v7216_v38 }
0x28c4   :  { %v7284_v21 = vadd.f32 0.2548296, %v7272_v56  ;;  %v7261_v31 = vadd.f32 -0.28449672, %v7249_v4  ;;  %v7239_v25 = vadd.f32 1.4214138, %v7227_v62  ;;  %v10718_v4 = vpop.eup %10717 }
0x28c5   :  { %v7295_v42 = vmul.f32 %v10700_v14, %v7283_v34  ;;  %v7262_v40 = vadd.f32 -0.28449672, %v7250_v30  ;;  %v7240_v1 = vadd.f32 1.4214138, %v7228_v19 }
0x28c6   :  { %v7296_v24 = vmul.f32 %v10702_v60, %v7284_v21  ;;  %v7273_v63 = vmul.f32 %v13123_v6, %v7261_v31  ;;  %v7251_v47 = vmul.f32 %v13131_v10, %v7239_v25 }
0x28c7   :  { %v7355_v33 = vmul.f32 %v10712_v59, %v7295_v42  ;;  %v7274_v23 = vmul.f32 %v13125_v58, %v7262_v40  ;;  %v7252_v48 = vmul.f32 %v13133_v9, %v7240_v1  ;;  %v7118_v1 = vmul.f32 0.5, %v13099_v37 }
0x28c8   :  { %v7356_v52 = vmul.f32 %v10714_v22, %v7296_v24  ;;  %v7285_v2 = vadd.f32 0.2548296, %v7273_v63  ;;  %v7263_v56 = vadd.f32 -0.28449672, %v7251_v47  ;;  %v10720_v22 = vpop.eup %10719 }
0x28c9   :  { %v7367_v14 = vsub.f32 1.0, %v7355_v33  ;;  %v7286_v32 = vadd.f32 0.2548296, %v7274_v23  ;;  %v7264_v49 = vadd.f32 -0.28449672, %v7252_v48  ;;  %v10722_v25 = vpop.eup %10721 }
0x28ca   :  { %v7368_v60 = vsub.f32 1.0, %v7356_v52  ;;  %v7297_v8 = vmul.f32 %v13123_v6, %v7285_v2  ;;  %v7275_v21 = vmul.f32 %v13131_v10, %v7263_v56 }
0x28cb   :  { %v7391_v51 = vsub.f32 0.0, %v7367_v14  ;;  %v7298_v17 = vmul.f32 %v13125_v58, %v7286_v32  ;;  %v7276_v42 = vmul.f32 %v13133_v9, %v7264_v49  ;;  %v7116_v58 = vmul.f32 0.5, %v13085_v55 }
0x28cc   :  { %v7392_v3 = vsub.f32 0.0, %v7368_v60  ;;  %v7357_v34 = vmul.f32 %v10716_v41, %v7297_v8  ;;  %v7287_v62 = vadd.f32 0.2548296, %v7275_v21  ;;  %v7117_v32 = vmul.f32 0.5, %v13096_v45 }
0x28cd   :  { %v7403_v30 = vsel %vm7379_vm4, %v7367_v14, %v7391_v51  ;;  %v7358_v28 = vmul.f32 %v10718_v4, %v7298_v17  ;;  %v7288_v24 = vadd.f32 0.2548296, %v7276_v42  ;;  %v7120_v51 = vmul.f32 0.5, %v13113_v36 }
0x28ce   :  { %v7415_v31 = vadd.f32 1.0, %v7403_v30  ;;  %v7404_v6 = vsel %vm7380_vm5, %v7368_v60, %v7392_v3  ;;  %v7369_v38 = vsub.f32 1.0, %v7357_v34  ;;  %v7299_v19 = vmul.f32 %v13131_v10, %v7287_v62 }
0x28cf   :  { %v7416_v54 = vadd.f32 1.0, %v7404_v6  ;;  %v7370_v40 = vsub.f32 1.0, %v7358_v28  ;;  %v7300_v55 = vmul.f32 %v13133_v9, %v7288_v24  ;;  %v7119_v45 = vmul.f32 0.5, %v13110_v5 }
0x28d0   :  { %v7393_v59 = vsub.f32 0.0, %v7369_v38  ;;  %v7427_v33 = vmul.f32 %v7415_v31, %v7115_v26  ;;  %v7359_v50 = vmul.f32 %v10720_v22, %v7299_v19  ;;  %vm7770_vm4 = vcmask 517120  }
0x28d1   :  { %v7428_v43 = vmul.f32 %v7416_v54, %v7116_v58  ;;  %v7394_v63 = vsub.f32 0.0, %v7370_v40  ;;  %v7360_v14 = vmul.f32 %v10722_v25, %v7300_v55 }
0x28d2   :  { %v7405_v23 = vsel %vm7381_vm6, %v7369_v38, %v7393_v59  ;;  %v7371_v10 = vsub.f32 1.0, %v7359_v50 }
0x28d3   :  { %7535 = vmatprep.mubr.f32.mxu1 %v7428_v43  ;;  %v7406_v52 = vsel %vm7382_vm7, %v7370_v40, %v7394_v63  ;;  %v7417_v2 = vadd.f32 1.0, %v7405_v23  ;;  %v7372_v41 = vsub.f32 1.0, %v7360_v14 }
0x28d4   :  { %7536 = vmatmul.mubr.f32.vlgmr.msra.gmra.mrb[176].mxu1 %v7427_v33  ;;  %v7418_v0 = vadd.f32 1.0, %v7406_v52  ;;  %v7395_v44 = vsub.f32 0.0, %v7371_v10 }
0x28d5   :  { %v7429_v60 = vmul.f32 %v7417_v2, %v7117_v32  ;;  %v7396_v9 = vsub.f32 0.0, %v7372_v41 }
0x28d6   :  { %v7430_v47 = vmul.f32 %v7418_v0, %v7118_v1  ;;  %v7407_v8 = vsel %vm7383_vm11, %v7371_v10, %v7395_v44 }
0x28d7   :  { %v7408_v48 = vsel %vm7384_vm12, %v7372_v41, %v7396_v9  ;;  %v7419_v37 = vadd.f32 1.0, %v7407_v8 }
0x28d8   :  { %7540 = vmatprep.mubr.f32.mxu1 %v7430_v47  ;;  %v7420_v17 = vadd.f32 1.0, %v7408_v48 }
0x28d9   :  { %7541 = vmatmul.mubr.f32.gmra.mrb[178].mxu1 %v7429_v60  ;;  %v7431_v4 = vmul.f32 %v7419_v37, %v7119_v45 }
0x28da   :  { %v7432_v56 = vmul.f32 %v7420_v17, %v7120_v51 }
0x28dc   :  { %7545 = vmatprep.mubr.f32.mxu1 %v7432_v56 }
0x28dd   :  { %7546 = vmatmul.mubr.f32.gmra.mrb[180].mxu1 %v7431_v4 }
0x292c   :  { %v7098_v3 = vpop.f32.mrb[170].mxu0 }
0x292d   :  { %v13164_v7 = vadd.f32 %v7098_v3, %v13076_v35  ;;  %v7100_v34 = vpop.f32.mrb[171].mxu0 }
0x292e   :  { %v13167_v57 = vadd.f32 %v7100_v34, %v13079_v39 }
0x292f   :  { %v13170_v49 = vmul.f32 0.70710677, %v13164_v7 }
0x2930   :  { %v13173_v36 = vmul.f32 0.70710677, %v13167_v57  ;;  %v7104_v30 = vpop.f32.mrb[172].mxu0 }
0x2931   :  { %v7145_v5 = vand.u32 2147483647, %v13170_v49  ;;  %v13177_v28 = vadd.f32 %v7104_v30, %v13076_v35  ;;  %v7106_v21 = vpop.f32.mrb[173].mxu0  ;;  %vm7385_vm13 = vcmp.ge.f32.partialorder %v13170_v49, 0.0  ;;  %v7121_v49 = vmul.f32 0.5, %v13164_v7 }
0x2932   :  { %v7146_v31 = vand.u32 2147483647, %v13173_v36  ;;  %v13181_v6 = vadd.f32 %v7106_v21, %v13079_v39  ;;  %vm7386_vm14 = vcmp.ge.f32.partialorder %v13173_v36, 0.0 }
0x2933   :  { %v7157_v38 = vmul.f32 0.3275911, %v7145_v5  ;;  %v13184_v42 = vmul.f32 0.70710677, %v13177_v28  ;;  %v7313_v2 = vsub.f32 0.0, %v7145_v5 }
0x2934   :  { %v7158_v58 = vmul.f32 0.3275911, %v7146_v31  ;;  %v13187_v54 = vmul.f32 0.70710677, %v13181_v6  ;;  %v7110_v26 = vpop.f32.mrb[174].mxu0  ;;  %v7314_v1 = vsub.f32 0.0, %v7146_v31 }
0x2935   :  { %v7169_v40 = vadd.f32 1.0, %v7157_v38  ;;  %v7147_v62 = vand.u32 2147483647, %v13184_v42  ;;  %v7112_v43 = vpop.f32.mrb[175].mxu0  ;;  %v13192_v33 = vadd.f32 %v7110_v26, %v13076_v35  ;;  %vm7387_vm15 = vcmp.ge.f32.partialorder %v13184_v42, 0.0 }
0x2936   :  { %v7170_v59 = vadd.f32 1.0, %v7158_v58  ;;  %v7148_v24 = vand.u32 2147483647, %v13187_v54  ;;  %v13195_v55 = vadd.f32 %v7112_v43, %v13079_v39  ;;  %v7325_v39 = vmul.f32 %v7313_v2, %v7145_v5 }
0x2937   :  { %10723 = vrcp.f32 %v7169_v40  ;;  %v7159_v63 = vmul.f32 0.3275911, %v7147_v62  ;;  %v13198_v25 = vmul.f32 0.70710677, %v13192_v33  ;;  %v7315_v14 = vsub.f32 0.0, %v7147_v62 }
0x2938   :  { %10725 = vrcp.f32 %v7170_v59  ;;  %v7160_v19 = vmul.f32 0.3275911, %v7148_v24  ;;  %v13201_v52 = vmul.f32 0.70710677, %v13195_v55  ;;  %v7316_v47 = vsub.f32 0.0, %v7148_v24 }
0x2939   :  { %v7171_v22 = vadd.f32 1.0, %v7159_v63  ;;  %v7149_v50 = vand.u32 2147483647, %v13198_v25  ;;  %v7326_v44 = vmul.f32 %v7314_v1, %v7146_v31  ;;  %v7327_v37 = vmul.f32 %v7315_v14, %v7147_v62 }
0x293a   :  { %v7172_v23 = vadd.f32 1.0, %v7160_v19  ;;  %v7150_v0 = vand.u32 2147483647, %v13201_v52  ;;  %v7343_v45 = vmul.f32 1.442695, %v7325_v39  ;;  %v7328_v56 = vmul.f32 %v7316_v47, %v7148_v24 }
0x293b   :  { %10727 = vrcp.f32 %v7171_v22  ;;  %v7161_v35 = vmul.f32 0.3275911, %v7149_v50  ;;  %v7345_v34 = vmul.f32 1.442695, %v7326_v44  ;;  %v7317_v21 = vsub.f32 0.0, %v7149_v50 }
0x293c   :  { %10729 = vrcp.f32 %v7172_v23  ;;  %v7162_v32 = vmul.f32 0.3275911, %v7150_v0  ;;  %v7347_v58 = vmul.f32 1.442695, %v7327_v37  ;;  %v7349_v26 = vmul.f32 1.442695, %v7328_v56 }
0x293d   :  { %v7173_v41 = vadd.f32 1.0, %v7161_v35  ;;  %v7318_v24 = vsub.f32 0.0, %v7150_v0  ;;  %v7329_v22 = vmul.f32 %v7317_v21, %v7149_v50  ;;  %vm7388_vm2 = vcmp.ge.f32.partialorder %v13187_v54, 0.0 }
0x293e   :  { %v7174_v9 = vadd.f32 1.0, %v7162_v32  ;;  %vm7389_vm8 = vcmp.ge.f32.partialorder %v13198_v25, 0.0  ;;  %vm7390_vm9 = vcmp.ge.f32.partialorder %v13201_v52, 0.0 }
0x293f   :  { %10731 = vrcp.f32 %v7173_v41  ;;  %v7330_v41 = vmul.f32 %v7318_v24, %v7150_v0  ;;  %v7351_v50 = vmul.f32 1.442695, %v7329_v22 }
0x2940   :  { %10733 = vrcp.f32 %v7174_v9 }
0x2941   :  { %v10724_v10 = vpop.eup %10723  ;;  %10735 = vpow2.f32 %v7343_v45  ;;  %v7353_v21 = vmul.f32 1.442695, %v7330_v41 }
0x2942   :  { %v10726_v60 = vpop.eup %10725  ;;  %v7205_v8 = vmul.f32 1.0614054, %v10724_v10  ;;  %10737 = vpow2.f32 %v7345_v34 }
0x2943   :  { %v7206_v48 = vmul.f32 1.0614054, %v10726_v60  ;;  %10739 = vpow2.f32 %v7347_v58 }
0x2944   :  { %v7217_v51 = vadd.f32 -1.4531521, %v7205_v8  ;;  %10741 = vpow2.f32 %v7349_v26 }
0x2945   :  { %v13205_v17 = vpop.eup %10727  ;;  %v7218_v4 = vadd.f32 -1.4531521, %v7206_v48  ;;  %10743 = vpow2.f32 %v7351_v50 }
0x2946   :  { %v13207_v3 = vpop.eup %10729  ;;  %v7229_v30 = vmul.f32 %v10724_v10, %v7217_v51  ;;  %v7207_v5 = vmul.f32 1.0614054, %v13205_v17  ;;  %10745 = vpow2.f32 %v7353_v21 }
0x2947   :  { %v7230_v31 = vmul.f32 %v10726_v60, %v7218_v4  ;;  %v7208_v38 = vmul.f32 1.0614054, %v13207_v3 }
0x2948   :  { %v7241_v40 = vadd.f32 1.4214138, %v7229_v30  ;;  %v7219_v62 = vadd.f32 -1.4531521, %v7207_v5 }
0x2949   :  { %v7242_v59 = vadd.f32 1.4214138, %v7230_v31  ;;  %v7220_v43 = vadd.f32 -1.4531521, %v7208_v38  ;;  %v13213_v14 = vpop.eup %10731 }
0x294a   :  { %v7253_v63 = vmul.f32 %v10724_v10, %v7241_v40  ;;  %v7231_v19 = vmul.f32 %v13205_v17, %v7219_v62  ;;  %v13215_v47 = vpop.eup %10733  ;;  %v7209_v8 = vmul.f32 1.0614054, %v13213_v14 }
0x294b   :  { %v7254_v23 = vmul.f32 %v10726_v60, %v7242_v59  ;;  %v7232_v2 = vmul.f32 %v13207_v3, %v7220_v43  ;;  %v7210_v51 = vmul.f32 1.0614054, %v13215_v47  ;;  %v10736_v58 = vpop.eup %10735 }
0x294c   :  { %v7265_v1 = vadd.f32 -0.28449672, %v7253_v63  ;;  %v7243_v35 = vadd.f32 1.4214138, %v7231_v19  ;;  %v7221_v4 = vadd.f32 -1.4531521, %v7209_v8  ;;  %v10738_v59 = vpop.eup %10737 }
0x294d   :  { %v7266_v32 = vadd.f32 -0.28449672, %v7254_v23  ;;  %v7244_v39 = vadd.f32 1.4214138, %v7232_v2  ;;  %v7222_v5 = vadd.f32 -1.4531521, %v7210_v51  ;;  %v10740_v2 = vpop.eup %10739 }
0x294e   :  { %v7277_v44 = vmul.f32 %v10724_v10, %v7265_v1  ;;  %v7255_v9 = vmul.f32 %v13205_v17, %v7243_v35  ;;  %v7233_v38 = vmul.f32 %v13213_v14, %v7221_v4 }
0x294f   :  { %v7278_v48 = vmul.f32 %v10726_v60, %v7266_v32  ;;  %v7256_v37 = vmul.f32 %v13207_v3, %v7244_v39  ;;  %v7234_v26 = vmul.f32 %v13215_v47, %v7222_v5 }
0x2950   :  { %v7289_v45 = vadd.f32 0.2548296, %v7277_v44  ;;  %v7267_v56 = vadd.f32 -0.28449672, %v7255_v9  ;;  %v7245_v63 = vadd.f32 1.4214138, %v7233_v38 }
0x2951   :  { %v7290_v34 = vadd.f32 0.2548296, %v7278_v48  ;;  %v7268_v30 = vadd.f32 -0.28449672, %v7256_v37  ;;  %v7246_v23 = vadd.f32 1.4214138, %v7234_v26 }
0x2952   :  { %v7301_v31 = vmul.f32 %v10724_v10, %v7289_v45  ;;  %v7279_v0 = vmul.f32 %v13205_v17, %v7267_v56  ;;  %v7257_v35 = vmul.f32 %v13213_v14, %v7245_v63  ;;  %v7124_v63 = vmul.f32 0.5, %v13181_v6 }
0x2953   :  { %v7302_v40 = vmul.f32 %v10726_v60, %v7290_v34  ;;  %v7280_v62 = vmul.f32 %v13207_v3, %v7268_v30  ;;  %v10742_v60 = vpop.eup %10741  ;;  %v7258_v41 = vmul.f32 %v13215_v47, %v7246_v23  ;;  %v7122_v30 = vmul.f32 0.5, %v13167_v57 }
0x2954   :  { %v7361_v43 = vmul.f32 %v10736_v58, %v7301_v31  ;;  %v7291_v24 = vadd.f32 0.2548296, %v7279_v0  ;;  %v7269_v8 = vadd.f32 -0.28449672, %v7257_v35 }
0x2955   :  { %v7362_v19 = vmul.f32 %v10738_v59, %v7302_v40  ;;  %v7292_v22 = vadd.f32 0.2548296, %v7280_v62  ;;  %v7270_v37 = vadd.f32 -0.28449672, %v7258_v41  ;;  %v10744_v62 = vpop.eup %10743 }
0x2956   :  { %v7373_v10 = vsub.f32 1.0, %v7361_v43  ;;  %v7303_v1 = vmul.f32 %v13205_v17, %v7291_v24  ;;  %v7281_v45 = vmul.f32 %v13213_v14, %v7269_v8  ;;  %v10746_v24 = vpop.eup %10745  ;;  %v8586_v8 = vld [vmem:[%s13424_s22] ss:$0 sm:$0xff] }
0x2957   :  { %v7374_v32 = vsub.f32 1.0, %v7362_v19  ;;  %v7304_v39 = vmul.f32 %v13207_v3, %v7292_v22  ;;  %v7282_v3 = vmul.f32 %v13215_v47, %v7270_v37  ;;  %v7123_v19 = vmul.f32 0.5, %v13177_v28 }
0x2958   :  { %v7397_v44 = vsub.f32 0.0, %v7373_v10  ;;  %v7363_v9 = vmul.f32 %v10740_v2, %v7303_v1  ;;  %v7293_v31 = vadd.f32 0.2548296, %v7281_v45  ;;  %v7126_v28 = vmul.f32 0.5, %v13195_v55 }
0x2959   :  { %v7398_v50 = vsub.f32 0.0, %v7374_v32  ;;  %v7364_v48 = vmul.f32 %v10742_v60, %v7304_v39  ;;  %v7294_v36 = vadd.f32 0.2548296, %v7282_v3 }
0x295a   :  { %v7409_v51 = vsel %vm7385_vm13, %v7373_v10, %v7397_v44  ;;  %v7375_v17 = vsub.f32 1.0, %v7363_v9  ;;  %v7305_v40 = vmul.f32 %v13213_v14, %v7293_v31 }
0x295b   :  { %v7410_v56 = vsel %vm7386_vm14, %v7374_v32, %v7398_v50  ;;  %v7421_v4 = vadd.f32 1.0, %v7409_v51  ;;  %v7376_v34 = vsub.f32 1.0, %v7364_v48  ;;  %v7306_v57 = vmul.f32 %v13215_v47, %v7294_v36 }
0x295c   :  { %v7422_v5 = vadd.f32 1.0, %v7410_v56  ;;  %v7399_v21 = vsub.f32 0.0, %v7375_v17  ;;  %v7365_v42 = vmul.f32 %v10744_v62, %v7305_v40  ;;  %v7125_v32 = vmul.f32 0.5, %v13192_v33 }
0x295d   :  { %v7400_v0 = vsub.f32 0.0, %v7376_v34  ;;  %v7433_v26 = vmul.f32 %v7421_v4, %v7121_v49  ;;  %v7366_v54 = vmul.f32 %v10746_v24, %v7306_v57 }
0x295e   :  { %v7434_v38 = vmul.f32 %v7422_v5, %v7122_v30  ;;  %v7411_v58 = vsel %vm7387_vm15, %v7375_v17, %v7399_v21  ;;  %v7377_v23 = vsub.f32 1.0, %v7365_v42 }
0x295f   :  { %v7412_v59 = vsel %vm7388_vm2, %v7376_v34, %v7400_v0  ;;  %v7423_v43 = vadd.f32 1.0, %v7411_v58  ;;  %v7378_v14 = vsub.f32 1.0, %v7366_v54 }
0x2960   :  { %7550 = vmatprep.mubr.f32.mxu1 %v7434_v38  ;;  %v7424_v7 = vadd.f32 1.0, %v7412_v59  ;;  %v7401_v10 = vsub.f32 0.0, %v7377_v23 }
0x2961   :  { %7551 = vmatmul.mubr.f32.gmra.mrb[182].mxu1 %v7433_v26  ;;  %v7435_v2 = vmul.f32 %v7423_v43, %v7123_v19  ;;  %v7402_v47 = vsub.f32 0.0, %v7378_v14 }
0x2962   :  { %v7436_v22 = vmul.f32 %v7424_v7, %v7124_v63  ;;  %v7413_v6 = vsel %vm7389_vm8, %v7377_v23, %v7401_v10 }
0x2963   :  { %v7414_v1 = vsel %vm7390_vm9, %v7378_v14, %v7402_v47  ;;  %v7425_v35 = vadd.f32 1.0, %v7413_v6 }
0x2964   :  { %7555 = vmatprep.mubr.f32.mxu1 %v7436_v22  ;;  %v7426_v60 = vadd.f32 1.0, %v7414_v1 }
0x2965   :  { %7556 = vmatmul.mubr.f32.gmra.mrb[184].mxu1 %v7435_v2  ;;  %v7437_v41 = vmul.f32 %v7425_v35, %v7125_v32 }
0x2966   :  { %v7438_v39 = vmul.f32 %v7426_v60, %v7126_v28 }
0x2968   :  { %7560 = vmatprep.mubr.f32.mxu1 %v7438_v39 }
0x2969   :  { %7561 = vmatmul.mubr.f32.gmra.mrb[186].mxu1 %v7437_v41 }
0x29a7   :  { %v8961_v44 = vpop.f32.mrb[176].mxu1 }
0x29a8   :  { %v8962_v9 = vpop.f32.mrb[177].mxu1 }
0x29a9   :  { %v8963_v25 = vadd.f32 %v8962_v9, %v8961_v44 }
0x29ab   :  { %v7566_v50 = vadd.f32 %v8963_v25, %v12905_v29 }
0x29ac   :  { %v8964_v48 = vpop.f32.mrb[178].mxu1 }
0x29ad   :  { %v8965_v52 = vpop.f32.mrb[179].mxu1  ;;  %v7579_v37 = vadd.f32 %v8586_v8, %v7566_v50 }
0x29ae   :  { %v8966_v51 = vadd.f32 %v8965_v52, %v8964_v48 }
0x29af   :  { %v7587_v17 = vsel %vm286_vm1, %v7579_v37, 0.0 }
0x29b0   :  { %v7567_v55 = vadd.f32 %v8966_v51, %v12900_v46  ;;  %7588 = vadd.xlane.f32.xlu0 %v7587_v17  ;;  %v8967_v45 = vpop.f32.mrb[180].mxu1 }
0x29b1   :  { %v8968_v56 = vpop.f32.mrb[181].mxu1 }
0x29b2   :  { %v7580_v33 = vadd.f32 %v8586_v8, %v7567_v55  ;;  %v8969_v34 = vadd.f32 %v8968_v56, %v8967_v45 }
0x29b4   :  { %v7590_v4 = vsel %vm286_vm1, %v7580_v33, 0.0  ;;  %v7568_v3 = vadd.f32 %v8969_v34, %v12908_v27 }
0x29b5   :  { %7591 = vadd.xlane.f32.xlu1 %v7590_v4 }
0x29b6   :  { %v7581_v30 = vadd.f32 %v8586_v8, %v7568_v3 }
0x29b8   :  { %v7593_v29 = vsel %vm286_vm1, %v7581_v30, 0.0 }
0x29b9   :  { %7594 = vadd.xlane.f32.xlu0 %v7593_v29 }
0x2a34   :  { %v8970_v5 = vpop.f32.mrb[182].mxu1 }
0x2a35   :  { %v8971_v21 = vpop.f32.mrb[183].mxu1 }
0x2a36   :  { %v8972_v31 = vadd.f32 %v8971_v21, %v8970_v5 }
0x2a38   :  { %v7569_v49 = vadd.f32 %v8972_v31, %v12934_v11  ;;  %v8973_v46 = vpop.f32.mrb[184].mxu1  ;;  %v8588_v31 = vld [vmem:[%s13426_s26] ss:$0 sm:$0xff] }
0x2a39   :  { %v8974_v0 = vpop.f32.mrb[185].mxu1 }
0x2a3a   :  { %v8975_v36 = vadd.f32 %v8974_v0, %v8973_v46  ;;  %v7582_v38 = vadd.f32 %v8586_v8, %v7569_v49 }
0x2a3c   :  { %v7570_v58 = vadd.f32 %v8975_v36, %v12944_v53  ;;  %v7596_v40 = vsel %vm286_vm1, %v7582_v38, 0.0  ;;  %v8976_v59 = vpop.f32.mrb[186].mxu1 }
0x2a3d   :  { %7597 = vadd.xlane.f32.xlu1 %v7596_v40  ;;  %v7589_v62 = vpop.xlane.xlu0 %7588  ;;  %v8977_v24 = vpop.f32.mrb[187].mxu1 }
0x2a3e   :  { %v7605_v27 = vmul.f32 0.015625, %v7589_v62  ;;  %v7583_v26 = vadd.f32 %v8586_v8, %v7570_v58  ;;  %v8978_v63 = vadd.f32 %v8977_v24, %v8976_v59 }
0x2a40   :  { %v7611_v43 = vsub.f32 %v7579_v37, %v7605_v27  ;;  %v7599_v57 = vsel %vm286_vm1, %v7583_v26, 0.0  ;;  %v7571_v19 = vadd.f32 %v8978_v63, %v12959_v12 }
0x2a41   :  { %7600 = vadd.xlane.f32.xlu0 %v7599_v57 }
0x2a42   :  { %v7592_v11 = vpop.xlane.xlu1 %7591  ;;  %v7617_v7 = vmul.f32 %v7611_v43, %v7611_v43  ;;  %v7584_v22 = vadd.f32 %v8586_v8, %v7571_v19 }
0x2a43   :  { %v7606_v42 = vmul.f32 0.015625, %v7592_v11 }
0x2a44   :  { %v7623_v53 = vsel %vm286_vm1, %v7617_v7, 0.0  ;;  %v7602_v2 = vsel %vm286_vm1, %v7584_v22, 0.0 }
0x2a45   :  { %v7612_v54 = vsub.f32 %v7580_v33, %v7606_v42  ;;  %7624 = vadd.xlane.f32.xlu0 %v7623_v53  ;;  %7603 = vadd.xlane.f32.xlu1 %v7602_v2 }
0x2a46   :  { %v7595_v14 = vpop.xlane.xlu0 %7594 }
0x2a47   :  { %v7618_v23 = vmul.f32 %v7612_v54, %v7612_v54  ;;  %v7607_v10 = vmul.f32 0.015625, %v7595_v14 }
0x2a49   :  { %v7626_v47 = vsel %vm286_vm1, %v7618_v23, 0.0  ;;  %v7613_v6 = vsub.f32 %v7581_v30, %v7607_v10  ;;  %v8587_v30 = vld [vmem:[%s13425_s23] ss:$0 sm:$0xff] }
0x2a4a   :  { %7627 = vadd.xlane.f32.xlu1 %v7626_v47 }
0x2a4b   :  { %v7619_v1 = vmul.f32 %v7613_v6, %v7613_v6 }
0x2a4d   :  { %v7629_v35 = vsel %vm286_vm1, %v7619_v1, 0.0  ;;  %v7691_v1 = vmul.u32 24, %v11166_v15 }
0x2a4e   :  { %7630 = vadd.xlane.f32.xlu0 %v7629_v35 }
0x2aca   :  { %v7598_v12 = vpop.xlane.xlu1 %7597 }
0x2acb   :  { %v7608_v28 = vmul.f32 0.015625, %v7598_v12 }
0x2acd   :  { %v7614_v60 = vsub.f32 %v7582_v38, %v7608_v28  ;;  %v7692_v28 = vadd.s32 16, %v7691_v1  ;;  %v7956_v1 = vld [vmem:[%s13430_s0 + $0x10] sm:$0xff] }
0x2ace   :  { %v7601_v32 = vpop.xlane.xlu0 %7600 }
0x2acf   :  { %v7609_v39 = vmul.f32 0.015625, %v7601_v32  ;;  %v7620_v41 = vmul.f32 %v7614_v60, %v7614_v60  ;;  %vm7693_vm10 = vcmp.eq.s32.totalorder %v11282_v61, %v7692_v28  ;;  %v7975_v28 = vld [vmem:[%s13430_s0 + $0xa8] sm:$0xff] }
0x2ad1   :  { %v7615_v44 = vsub.f32 %v7583_v26, %v7609_v39  ;;  %v7632_v9 = vsel %vm286_vm1, %v7620_v41, 0.0 }
0x2ad2   :  { %7633 = vadd.xlane.f32.xlu1 %v7632_v9  ;;  %v7625_v25 = vpop.xlane.xlu0 %7624  ;;  %v7604_v37 = vpop.xlane.xlu1 %7603 }
0x2ad3   :  { %v7641_v8 = vmul.f32 0.015625, %v7625_v25  ;;  %v7621_v50 = vmul.f32 %v7615_v44, %v7615_v44  ;;  %v7610_v51 = vmul.f32 0.015625, %v7604_v37  ;;  %v7799_v37 = vld [vmem:[%s13427_s28 + $0x8] sm:$0xff] }
0x2ad5   :  { %v7647_v48 = vadd.f32 1e-06, %v7641_v8  ;;  %v7635_v52 = vsel %vm286_vm1, %v7621_v50, 0.0  ;;  %v7616_v17 = vsub.f32 %v7584_v22, %v7610_v51  ;;  %v7801_v51 = vld [vmem:[%s13427_s28 + $0x18] sm:$0xff] }
0x2ad6   :  { %7636 = vadd.xlane.f32.xlu0 %v7635_v52 }
0x2ad7   :  { %10747 = vrsqrt.f32 %v7647_v48  ;;  %v7628_v55 = vpop.xlane.xlu1 %7627  ;;  %v7622_v45 = vmul.f32 %v7616_v17, %v7616_v17 }
0x2ad8   :  { %v7642_v33 = vmul.f32 0.015625, %v7628_v55  ;;  %v7798_v55 = vld [vmem:[%s13427_s28] sm:$0xff] }
0x2ad9   :  { %v7638_v4 = vsel %vm286_vm1, %v7622_v45, 0.0 }
0x2ada   :  { %v7648_v56 = vadd.f32 1e-06, %v7642_v33  ;;  %7639 = vadd.xlane.f32.xlu1 %v7638_v4  ;;  %v7800_v33 = vld [vmem:[%s13427_s28 + $0x10] sm:$0xff]  ;;  %v7805_v4 = vld [vmem:[%s13427_s28 + $0x38] sm:$0xff] }
0x2adb   :  { %v7631_v38 = vpop.xlane.xlu0 %7630  ;;  %v10133_v45 = vpack.c.bf16 %v7800_v33, %v7798_v55  ;;  %v7980_v55 = vld [vmem:[%s13430_s0 + $0xd0] sm:$0xff]  ;;  %v7981_v33 = vld [vmem:[%s13430_s0 + $0xd8] sm:$0xff] }
0x2adc   :  { %10749 = vrsqrt.f32 %v7648_v56  ;;  %v7643_v58 = vmul.f32 0.015625, %v7631_v38  ;;  %v7803_v56 = vld [vmem:[%s13427_s28 + $0x28] sm:$0xff]  ;;  %v7813_v38 = vld [vmem:[%s13427_s28 + $0x78] sm:$0xff] }
0x2ade   :  { %v7649_v40 = vadd.f32 1e-06, %v7643_v58 }
0x2ae0   :  { %10751 = vrsqrt.f32 %v7649_v40  ;;  %v7810_v40 = vld [vmem:[%s13427_s28 + $0x60] sm:$0xff] }
0x2ae1   :  { %v10748_v34 = vpop.eup %10747 }
0x2ae2   :  { %v7659_v3 = vmul.f32 %v10748_v34, %v7611_v43  ;;  %v10135_v34 = vpack.c.bf16 %v7805_v4, %v7803_v56  ;;  %v7964_v56 = vld [vmem:[%s13430_s0 + $0x50] sm:$0xff]  ;;  %v7965_v4 = vld [vmem:[%s13430_s0 + $0x58] sm:$0xff] }
0x2ae4   :  { %v7671_v21 = vmul.f32 %v8587_v30, %v7659_v3  ;;  %v7802_v3 = vld [vmem:[%s13427_s28 + $0x20] sm:$0xff] }
0x2ae6   :  { %v10750_v29 = vpop.eup %10749  ;;  %v7683_v46 = vadd.f32 %v8588_v31, %v7671_v21  ;;  %v7809_v21 = vld [vmem:[%s13427_s28 + $0x58] sm:$0xff] }
0x2ae7   :  { %v7660_v5 = vmul.f32 %v10750_v29, %v7612_v54 }
0x2ae9   :  { %v7672_v49 = vmul.f32 %v8587_v30, %v7660_v5  ;;  %v7807_v5 = vld [vmem:[%s13427_s28 + $0x48] sm:$0xff] }
0x2aea   :  { %v10752_v24 = vpop.eup %10751 }
0x2aeb   :  { %v7684_v0 = vadd.f32 %v8588_v31, %v7672_v49  ;;  %v7661_v63 = vmul.f32 %v10752_v24, %v7613_v6  ;;  %v7806_v49 = vld [vmem:[%s13427_s28 + $0x40] sm:$0xff] }
0x2aec   :  { %v8590_v24 = vld [vmem:[%s13428_s1] ss:$0 sm:$0xff] }
0x2aed   :  { %v10123_v36 = vpack.c.bf16 %v7684_v0, %v7683_v46  ;;  %v7673_v54 = vmul.f32 %v8587_v30, %v7661_v63  ;;  %v7808_v46 = vld [vmem:[%s13427_s28 + $0x50] sm:$0xff] }
0x2aee   :  { %v10141_v0 = vpack.c.bf16 %v7808_v46, %v7806_v49  ;;  %v7984_v49 = vld [vmem:[%s13430_s0 + $0xf0] sm:$0xff]  ;;  %v7985_v46 = vld [vmem:[%s13430_s0 + $0xf8] sm:$0xff] }
0x2aef   :  { %10124 = vmatpush3.bf16.msra.mxu0 %v10123_v36  ;;  %v7685_v23 = vadd.f32 %v8588_v31, %v7673_v54  ;;  %v7811_v36 = vld [vmem:[%s13427_s28 + $0x68] sm:$0xff] }
0x2af0   :  { %10125 = vmatprep.subr.bf16.mxu0 %v10849_v20  ;;  %v10143_v58 = vpack.c.bf16 %v7813_v38, %v7811_v36  ;;  %v7968_v36 = vld [vmem:[%s13430_s0 + $0x70] sm:$0xff]  ;;  %v7969_v38 = vld [vmem:[%s13430_s0 + $0x78] sm:$0xff] }
0x2b5f   :  { %v7634_v62 = vpop.xlane.xlu1 %7633 }
0x2b60   :  { %v7644_v27 = vmul.f32 0.015625, %v7634_v62  ;;  %v7812_v62 = vld [vmem:[%s13427_s28 + $0x70] sm:$0xff] }
0x2b62   :  { %v7650_v26 = vadd.f32 1e-06, %v7644_v27  ;;  %v10145_v27 = vpack.c.bf16 %v7812_v62, %v7810_v40  ;;  %v7814_v40 = vld [vmem:[%s13431_s5] sm:$0x3] }
0x2b63   :  { %v7637_v59 = vpop.xlane.xlu0 %7636  ;;  %v7819_v62 = vrot.slane %v7814_v40, %v11169_v16 }
0x2b64   :  { %10753 = vrsqrt.f32 %v7650_v26  ;;  %v7645_v43 = vmul.f32 0.015625, %v7637_v59 }
0x2b66   :  { %v7651_v57 = vadd.f32 1e-06, %v7645_v43 }
0x2b67   :  { %v7640_v11 = vpop.xlane.xlu1 %7639 }
0x2b68   :  { %10755 = vrsqrt.f32 %v7651_v57  ;;  %v7646_v7 = vmul.f32 0.015625, %v7640_v11  ;;  %v8591_v11 = vld [vmem:[%s13429_s2] ss:$0 sm:$0xff] }
0x2b6a   :  { %v7652_v19 = vadd.f32 1e-06, %v7646_v7 }
0x2b6c   :  { %10757 = vrsqrt.f32 %v7652_v19  ;;  %v7970_v19 = vld [vmem:[%s13430_s0 + $0x80] sm:$0xff] }
0x2b6e   :  { %v10754_v42 = vpop.eup %10753 }
0x2b6f   :  { %v7662_v53 = vmul.f32 %v10754_v42, %v7614_v60 }
0x2b71   :  { %v7674_v22 = vmul.f32 %v8587_v30, %v7662_v53  ;;  %v7971_v53 = vld [vmem:[%s13430_s0 + $0x88] sm:$0xff] }
0x2b72   :  { %v10756_v14 = vpop.eup %10755  ;;  %v10147_v54 = vpack.c.bf16 %v7971_v53, %v7970_v19 }
0x2b73   :  { %v7686_v2 = vadd.f32 %v8588_v31, %v7674_v22  ;;  %v7663_v47 = vmul.f32 %v10756_v14, %v7615_v44  ;;  %v7694_v44 = vsel %vm7693_vm10, 1.0, %v10848_v13  ;;  %v7954_v22 = vld [vmem:[%s13430_s0] sm:$0xff]  ;;  %v7972_v14 = vld [vmem:[%s13430_s0 + $0x90] sm:$0xff] }
0x2b74   :  { %10148 = vmatprep.subr.bf16.mxu1 %v10147_v54 }
0x2b75   :  { %v10126_v10 = vpack.c.bf16 %v7686_v2, %v7685_v23  ;;  %v7675_v12 = vmul.f32 %v8587_v30, %v7663_v47  ;;  %v7955_v23 = vld [vmem:[%s13430_s0 + $0x8] sm:$0xff] }
0x2b76   :  { %v10758_v35 = vpop.eup %10757  ;;  %v10149_v2 = vpack.c.bf16 %v7955_v23, %v7954_v22 }
0x2b77   :  { %10127 = vmatpush3.bf16.msra.mxu0 %v10126_v10  ;;  %v7664_v6 = vmul.f32 %v10758_v35, %v7616_v17  ;;  %v7687_v39 = vadd.f32 %v8588_v31, %v7675_v12  ;;  %v10131_v17 = vpack.c.bf16 %v7801_v51, %v7799_v37  ;;  %v7973_v10 = vld [vmem:[%s13430_s0 + $0x98] sm:$0xff]  ;;  %v7974_v12 = vld [vmem:[%s13430_s0 + $0xa0] sm:$0xff]  ;;  %v7963_v51 = vld [vmem:[%s13430_s0 + $0x48] sm:$0xff] }
0x2b78   :  { %10128 = vmatprep.subr.bf16.mxu0 %v10849_v20  ;;  %10150 = vmatpush3.bf16.msra.mxu1 %v10149_v2  ;;  %v10151_v47 = vpack.c.bf16 %v7973_v10, %v7972_v14  ;;  %v7957_v35 = vld [vmem:[%s13430_s0 + $0x18] sm:$0xff]  ;;  %v7962_v37 = vld [vmem:[%s13430_s0 + $0x40] sm:$0xff] }
0x2b79   :  { %v7676_v32 = vmul.f32 %v8587_v30, %v7664_v6  ;;  %v7804_v30 = vld [vmem:[%s13427_s28 + $0x30] sm:$0xff]  ;;  %v10153_v6 = vpack.c.bf16 %v7957_v35, %v7956_v1 }
0x2b7a   :  { %v10137_v29 = vpack.c.bf16 %v7804_v30, %v7802_v3  ;;  %10152 = vmatprep.subr.bf16.mxu1 %v10151_v47  ;;  %v7982_v3 = vld [vmem:[%s13430_s0 + $0xe0] sm:$0xff]  ;;  %v7983_v30 = vld [vmem:[%s13430_s0 + $0xe8] sm:$0xff] }
0x2b7b   :  { %v7688_v60 = vadd.f32 %v8588_v31, %v7676_v32  ;;  %v10139_v31 = vpack.c.bf16 %v7809_v21, %v7807_v5  ;;  %v10155_v32 = vpack.c.bf16 %v7975_v28, %v7974_v12  ;;  %v7966_v5 = vld [vmem:[%s13430_s0 + $0x60] sm:$0xff]  ;;  %v7967_v21 = vld [vmem:[%s13430_s0 + $0x68] sm:$0xff] }
0x2b7c   :  { %10154 = vmatpush3.bf16.msra.mxu1 %v10153_v6 }
0x2b7d   :  { %v10129_v41 = vpack.c.bf16 %v7688_v60, %v7687_v39  ;;  %v7958_v39 = vld [vmem:[%s13430_s0 + $0x20] sm:$0xff]  ;;  %v7959_v60 = vld [vmem:[%s13430_s0 + $0x28] sm:$0xff]  ;;  %10156 = vmatprep.subr.bf16.mxu1 %v10155_v32 }
0x2b7f   :  { %10130 = vmatpush3.bf16.msra.mxu0 %v10129_v41  ;;  %v10157_v41 = vpack.c.bf16 %v7959_v60, %v7958_v39 }
0x2b80   :  { %10132 = vmatprep.subr.bf16.mxu0 %v10131_v17  ;;  %v10165_v17 = vpack.c.bf16 %v7963_v51, %v7962_v37 }
0x2b81   :  { %10158 = vmatpush3.bf16.msra.mxu1 %v10157_v41 }
0x2b82   :  { %9766 = vmatmul.mubr.msk.f32.vlgmr.msra.gmra.mrb[176].mxu0 %vm188_vm0, %v7694_v44  ;;  %v7976_v44 = vld [vmem:[%s13430_s0 + $0xb0] sm:$0xff] }
0x2b83   :  { %7893 = vmatprep.mubr.f32.mxu0 %v10848_v13  ;;  %10134 = vmatpush1.bf16.msra.mxu0 %v10133_v45  ;;  %v10167_v45 = vpack.c.bf16 %v7981_v33, %v7980_v55 }
0x2b84   :  { %10136 = vmatprep.subr.bf16.mxu0 %v10135_v34  ;;  %v10169_v34 = vpack.c.bf16 %v7965_v4, %v7964_v56 }
0x2b87   :  { %10138 = vmatpush1.bf16.msra.mxu0 %v10137_v29  ;;  %v10171_v29 = vpack.c.bf16 %v7983_v30, %v7982_v3 }
0x2b88   :  { %10140 = vmatprep.subr.bf16.mxu0 %v10139_v31  ;;  %v10173_v31 = vpack.c.bf16 %v7967_v21, %v7966_v5 }
0x2b8b   :  { %10142 = vmatpush1.bf16.msra.mxu0 %v10141_v0  ;;  %v10175_v0 = vpack.c.bf16 %v7985_v46, %v7984_v49  ;;  %v8090_v46 = vld [vmem:[%s13432_s9] sm:$0xff] }
0x2b8c   :  { %10144 = vmatprep.subr.bf16.mxu0 %v10143_v58  ;;  %v10177_v58 = vpack.c.bf16 %v7969_v38, %v7968_v36  ;;  %v8092_v38 = vld [vmem:[%s13432_s9 + $0x10] sm:$0xff] }
0x2b8f   :  { %10146 = vmatpush1.bf16.msra.mxu0 %v10145_v27  ;;  %v7823_v27 = vrot.slane %v7814_v40, %v11173_v18 }
0x2b90   :  { %10179 = vmatprep.subr.bf16.mxu0 %v10849_v20 }
0x2c55   :  { %v7764_v15 = vpop.f32.mrb[176].mxu0 }
0x2c56   :  { %v7771_v9 = vsel %vm7770_vm4, %v7764_v15, 0.0  ;;  %v9767_v25 = vpop.f32.mrb[177].mxu0 }
0x2c57   :  { %7772 = vadd.xlane.f32.xlu0 %v7771_v9  ;;  %v7960_v25 = vld [vmem:[%s13430_s0 + $0x30] sm:$0xff] }
0x2ce4   :  { %v7773_v61 = vpop.xlane.xlu0 %7772 }
0x2ce5   :  { %v7774_v8 = vmul.f32 0.015625, %v7773_v61  ;;  %v7961_v61 = vld [vmem:[%s13430_s0 + $0x38] sm:$0xff] }
0x2ce7   :  { %v7775_v50 = vsub.f32 %v7764_v15, %v7774_v8  ;;  %v7977_v15 = vld [vmem:[%s13430_s0 + $0xb8] sm:$0xff]  ;;  %v10161_v8 = vpack.c.bf16 %v7961_v61, %v7960_v25 }
0x2ce8   :  { %v10159_v9 = vpack.c.bf16 %v7977_v15, %v7976_v44 }
0x2ce9   :  { %v7776_v48 = vmul.f32 %v7775_v50, %v7775_v50 }
0x2cea   :  { %10160 = vmatprep.subr.bf16.mxu1 %v10159_v9 }
0x2ceb   :  { %v7777_v52 = vsel %vm7770_vm4, %v7776_v48, 0.0  ;;  %10162 = vmatpush3.bf16.msra.mxu1 %v10161_v8  ;;  %v7979_v48 = vld [vmem:[%s13430_s0 + $0xc8] sm:$0xff] }
0x2cec   :  { %7778 = vadd.xlane.f32.xlu1 %v7777_v52 }
0x2d79   :  { %v7779_v26 = vpop.xlane.xlu1 %7778 }
0x2d7a   :  { %v7780_v59 = vmul.f32 0.015625, %v7779_v26 }
0x2d7c   :  { %v7781_v43 = vadd.f32 1e-05, %v7780_v59 }
0x2d7e   :  { %10759 = vrsqrt.f32 %v7781_v43 }
0x2d88   :  { %v10760_v57 = vpop.eup %10759 }
0x2d89   :  { %v7783_v63 = vmul.f32 %v10760_v57, %v7775_v50  ;;  %v7978_v50 = vld [vmem:[%s13430_s0 + $0xc0] sm:$0xff] }
0x2d8a   :  { %v10163_v52 = vpack.c.bf16 %v7979_v48, %v7978_v50 }
0x2d8b   :  { %v7790_v7 = vmul.f32 %v8590_v24, %v7783_v63 }
0x2d8c   :  { %10164 = vmatprep.subr.bf16.mxu1 %v10163_v52 }
0x2d8d   :  { %v7797_v42 = vadd.f32 %v8591_v11, %v7790_v7  ;;  %10166 = vmatpush3.bf16.msra.mxu1 %v10165_v17 }
0x2d8e   :  { %10168 = vmatprep.subr.bf16.mxu1 %v10167_v45 }
0x2d8f   :  { %8592 = vmatmul.mubr.msk.f32.vlgmr.msra.gmra.mrb[178].mxu0 %vm286_vm1, %v7797_v42 }
0x2d90   :  { %9800 = vmatprep.mubr.msk.f32.mxu0 %vm10851_vm3, %v10848_v13 }
0x2d91   :  { %10170 = vmatpush3.bf16.msra.mxu1 %v10169_v34 }
0x2d92   :  { %10172 = vmatprep.subr.bf16.mxu1 %v10171_v29 }
0x2d95   :  { %10174 = vmatpush3.bf16.msra.mxu1 %v10173_v31 }
0x2d96   :  { %10176 = vmatprep.subr.bf16.mxu1 %v10175_v0  ;;  %v8091_v0 = vld [vmem:[%s13432_s9 + $0x8] sm:$0xff] }
0x2d97   :  { %v10180_v36 = vpack.c.bf16 %v8091_v0, %v8090_v46  ;;  %v8216_v46 = vld [vmem:[%s11062_s20 + $0x30] sm:$0xff]  ;;  %v8217_v0 = vld [vmem:[%s11062_s20 + $0x38] sm:$0xff] }
0x2d99   :  { %10178 = vmatpush3.bf16.msra.mxu1 %v10177_v58  ;;  %10181 = vmatpush3.bf16.msra.mxu0 %v10180_v36  ;;  %v8093_v58 = vld [vmem:[%s13432_s9 + $0x18] sm:$0xff]  ;;  %v10213_v36 = vpack.c.bf16 %v8217_v0, %v8216_v46 }
0x2d9a   :  { %10203 = vmatprep.subr.bf16.mxu1 %v10849_v20  ;;  %10182 = vmatprep.subr.bf16.mxu0 %v10849_v20  ;;  %v10183_v40 = vpack.c.bf16 %v8093_v58, %v8092_v38  ;;  %v8594_v38 = vld [vmem:[%s11057_s12] ss:$0 sm:$0xff]  ;;  %s10858_s12 = smov [#allocation3]  }
0x2d9d   :  { %10184 = vmatpush3.bf16.msra.mxu0 %v10183_v40 }
0x2d9e   :  { %10185 = vmatprep.subr.bf16.mxu0 %v10849_v20 }
0x2e62   :  { %v7895_v26 = vpop.f32.mrb[178].mxu0 }
0x2e63   :  { %v7896_v59 = vadd.f32 %v7895_v26, %v7819_v62  ;;  %v7897_v43 = vpop.f32.mrb[179].mxu0  ;;  %v8094_v62 = vld [vmem:[%s13432_s9 + $0x20] sm:$0xff]  ;;  %v8096_v26 = vld [vmem:[%s13432_s9 + $0x30] sm:$0xff] }
0x2e64   :  { %v7898_v57 = vadd.f32 %v7897_v43, %v7823_v27 }
0x2e65   :  { %v7902_v24 = vmul.f32 0.70710677, %v7896_v59  ;;  %v7900_v21 = vmul.f32 0.5, %v7896_v59  ;;  %v8097_v59 = vld [vmem:[%s13432_s9 + $0x38] sm:$0xff] }
0x2e66   :  { %v7903_v63 = vmul.f32 0.70710677, %v7898_v57  ;;  %v7901_v29 = vmul.f32 0.5, %v7898_v57  ;;  %v10189_v43 = vpack.c.bf16 %v8097_v59, %v8096_v26  ;;  %v8098_v57 = vld [vmem:[%s13432_s9 + $0x40] sm:$0xff] }
0x2e67   :  { %v7904_v11 = vand.u32 2147483647, %v7902_v24  ;;  %vm7944_vm0 = vcmp.ge.f32.partialorder %v7902_v24, 0.0  ;;  %v8099_v24 = vld [vmem:[%s13432_s9 + $0x48] sm:$0xff] }
0x2e68   :  { %v7905_v7 = vand.u32 2147483647, %v7903_v63  ;;  %vm7945_vm5 = vcmp.ge.f32.partialorder %v7903_v63, 0.0  ;;  %v10192_v63 = vpack.c.bf16 %v8099_v24, %v8098_v57 }
0x2e69   :  { %v7906_v42 = vmul.f32 0.3275911, %v7904_v11  ;;  %v7932_v22 = vsub.f32 0.0, %v7904_v11 }
0x2e6a   :  { %v7907_v19 = vmul.f32 0.3275911, %v7905_v7  ;;  %v7933_v23 = vsub.f32 0.0, %v7905_v7 }
0x2e6b   :  { %v7908_v53 = vadd.f32 1.0, %v7906_v42  ;;  %v7934_v16 = vmul.f32 %v7932_v22, %v7904_v11  ;;  %v8100_v11 = vld [vmem:[%s13432_s9 + $0x50] sm:$0xff] }
0x2e6c   :  { %v7909_v54 = vadd.f32 1.0, %v7907_v19  ;;  %v7935_v10 = vmul.f32 %v7933_v23, %v7905_v7  ;;  %v8101_v7 = vld [vmem:[%s13432_s9 + $0x58] sm:$0xff]  ;;  %v8102_v19 = vld [vmem:[%s13432_s9 + $0x60] sm:$0xff]  ;;  %v8104_v22 = vld [vmem:[%s13432_s9 + $0x70] sm:$0xff] }
0x2e6d   :  { %10761 = vrcp.f32 %v7908_v53  ;;  %v7936_v35 = vmul.f32 1.442695, %v7934_v16  ;;  %v10195_v42 = vpack.c.bf16 %v8101_v7, %v8100_v11  ;;  %v8103_v53 = vld [vmem:[%s13432_s9 + $0x68] sm:$0xff]  ;;  %v8105_v23 = vld [vmem:[%s13432_s9 + $0x78] sm:$0xff] }
0x2e6e   :  { %10763 = vrcp.f32 %v7909_v54  ;;  %v7938_v28 = vmul.f32 1.442695, %v7935_v10  ;;  %v10198_v54 = vpack.c.bf16 %v8103_v53, %v8102_v19 }
0x2e6f   :  { %10765 = vpow2.f32 %v7936_v35 }
0x2e70   :  { %10767 = vpow2.f32 %v7938_v28 }
0x2e77   :  { %v10762_v2 = vpop.eup %10761 }
0x2e78   :  { %v10764_v14 = vpop.eup %10763  ;;  %v7914_v18 = vmul.f32 1.0614054, %v10762_v2 }
0x2e79   :  { %v7915_v47 = vmul.f32 1.0614054, %v10764_v14  ;;  %v10766_v52 = vpop.eup %10765 }
0x2e7a   :  { %v7916_v1 = vadd.f32 -1.4531521, %v7914_v18  ;;  %v10768_v51 = vpop.eup %10767 }
0x2e7b   :  { %v7917_v6 = vadd.f32 -1.4531521, %v7915_v47 }
0x2e7c   :  { %v7918_v12 = vmul.f32 %v10762_v2, %v7916_v1 }
0x2e7d   :  { %v7919_v32 = vmul.f32 %v10764_v14, %v7917_v6 }
0x2e7e   :  { %v7920_v39 = vadd.f32 1.4214138, %v7918_v12 }
0x2e7f   :  { %v7921_v60 = vadd.f32 1.4214138, %v7919_v32 }
0x2e80   :  { %v7922_v41 = vmul.f32 %v10762_v2, %v7920_v39 }
0x2e81   :  { %v7923_v44 = vmul.f32 %v10764_v14, %v7921_v60 }
0x2e82   :  { %v7924_v15 = vadd.f32 -0.28449672, %v7922_v41 }
0x2e83   :  { %v7925_v9 = vadd.f32 -0.28449672, %v7923_v44 }
0x2e84   :  { %v7926_v25 = vmul.f32 %v10762_v2, %v7924_v15 }
0x2e85   :  { %v7927_v61 = vmul.f32 %v10764_v14, %v7925_v9 }
0x2e86   :  { %v7928_v8 = vadd.f32 0.2548296, %v7926_v25 }
0x2e87   :  { %v7929_v50 = vadd.f32 0.2548296, %v7927_v61 }
0x2e88   :  { %v7930_v48 = vmul.f32 %v10762_v2, %v7928_v8  ;;  %v10201_v2 = vpack.c.bf16 %v8105_v23, %v8104_v22 }
0x2e89   :  { %v7931_v37 = vmul.f32 %v10764_v14, %v7929_v50  ;;  %v8593_v14 = vld [vmem:[%s13433_s13] ss:$0 sm:$0xff] }
0x2e8a   :  { %v7940_v17 = vmul.f32 %v10766_v52, %v7930_v48 }
0x2e8b   :  { %v7941_v55 = vmul.f32 %v10768_v51, %v7931_v37 }
0x2e8c   :  { %v7942_v33 = vsub.f32 1.0, %v7940_v17 }
0x2e8d   :  { %v7943_v45 = vsub.f32 1.0, %v7941_v55 }
0x2e8e   :  { %v7946_v56 = vsub.f32 0.0, %v7942_v33 }
0x2e8f   :  { %v7947_v4 = vsub.f32 0.0, %v7943_v45 }
0x2e90   :  { %v7948_v34 = vsel %vm7944_vm0, %v7942_v33, %v7946_v56 }
0x2e91   :  { %v7950_v3 = vadd.f32 1.0, %v7948_v34  ;;  %v7949_v30 = vsel %vm7945_vm5, %v7943_v45, %v7947_v4  ;;  %v8210_v4 = vld [vmem:[%s11062_s20] sm:$0xff]  ;;  %v8211_v34 = vld [vmem:[%s11062_s20 + $0x8] sm:$0xff] }
0x2e92   :  { %v7951_v5 = vadd.f32 1.0, %v7949_v30  ;;  %v8212_v30 = vld [vmem:[%s11062_s20 + $0x10] sm:$0xff] }
0x2e93   :  { %v7952_v49 = vmul.f32 %v7950_v3, %v7900_v21  ;;  %v10204_v3 = vpack.c.bf16 %v8211_v34, %v8210_v4  ;;  %v8214_v21 = vld [vmem:[%s11062_s20 + $0x20] sm:$0xff] }
0x2e94   :  { %v7953_v31 = vmul.f32 %v7951_v5, %v7901_v29  ;;  %v8213_v29 = vld [vmem:[%s11062_s20 + $0x18] sm:$0xff] }
0x2e95   :  { %v10207_v5 = vpack.c.bf16 %v8213_v29, %v8212_v30 }
0x2e96   :  { %8057 = vmatprep.mubr.f32.mxu1 %v7953_v31  ;;  %v8215_v31 = vld [vmem:[%s11062_s20 + $0x28] sm:$0xff]  ;;  %s8305_s20 = sshll.u32 %s10858_s12, 4  ;;  %s8306_s20 = int_to_ptr.vmem [resolvable:$true] %s8305_s20 }
0x2e97   :  { %8058 = vmatmul.mubr.f32.vlgmr.msra.gmra.mrb[188].mxu1 %v7952_v49  ;;  %v10210_v49 = vpack.c.bf16 %v8215_v31, %v8214_v21  ;;  %s10783_s17 = scalar_lea.vmem %s8306_s20, 32  ;;  %p10788_p1 = scmp.lt.s32.totalorder %s8306_s20, %s8306_s20 }
0x2e98   :  { %9819 = vmatprep.mubr.msk.f32.mxu1 %vm10851_vm3, %v10848_v13  ;;  %v8095_v13 = vld [vmem:[%s13432_s9 + $0x28] sm:$0xff]  ;;  %10205 = vmatpush3.bf16.msra.mxu1 %v10204_v3  ;;  %p10784_p0 = scmp.ne.s32.totalorder %s8306_s20, %s10783_s17  ;;  %p10789_p2 = scmp.lt.s32.totalorder %s10783_s17, %s10783_s17 }
0x2e99   :  { %v10186_v27 = vpack.c.bf16 %v8095_v13, %v8094_v62  ;;  %10206 = vmatprep.subr.bf16.mxu1 %v10849_v20 }
0x2e9a   :  { %p10790_p3 = por %p10789_p2, %p10788_p1 }
0x2e9b   :  { %10187 = vmatpush3.bf16.msra.mxu0 %v10186_v27 }
0x2e9c   :  { %10188 = vmatprep.subr.bf16.mxu0 %v10849_v20  ;;  %10208 = vmatpush3.bf16.msra.mxu1 %v10207_v5  ;;  %p10791_p4 = pnand %p10790_p3, %p10784_p0 }
0x2e9d   :  { %10209 = vmatprep.subr.bf16.mxu1 %v10849_v20 }
0x2e9f   :  { %10190 = vmatpush3.bf16.msra.mxu0 %v10189_v43 }
0x2ea0   :  { %10191 = vmatprep.subr.bf16.mxu0 %v10849_v20  ;;  %10211 = vmatpush3.bf16.msra.mxu1 %v10210_v49 }
0x2ea1   :  { %10212 = vmatprep.subr.bf16.mxu1 %v10849_v20 }
0x2ea3   :  { %10193 = vmatpush3.bf16.msra.mxu0 %v10192_v63 }
0x2ea4   :  { %10194 = vmatprep.subr.bf16.mxu0 %v10849_v20  ;;  %10214 = vmatpush3.bf16.msra.mxu1 %v10213_v36 }
0x2ea7   :  { %10196 = vmatpush3.bf16.msra.mxu0 %v10195_v42 }
0x2ea8   :  { %10197 = vmatprep.subr.bf16.mxu0 %v10849_v20 }
0x2eab   :  { %10199 = vmatpush3.bf16.msra.mxu0 %v10198_v54 }
0x2eac   :  { %10200 = vmatprep.subr.bf16.mxu0 %v10849_v20 }
0x2eaf   :  { %10202 = vmatpush3.bf16.msra.mxu0 %v10201_v2 }
0x2f6a   :  { %v9018_v16 = vpop.f32.mrb[188].mxu1 }
0x2f6b   :  { %v9019_v18 = vpop.f32.mrb[189].mxu1 }
0x2f6c   :  { %v9020_v10 = vadd.f32 %v9019_v18, %v9018_v16 }
0x2f6e   :  { %v8060_v47 = vadd.f32 %v9020_v10, %v8593_v14 }
0x2f70   :  { %v8064_v1 = vmul.f32 0.70710677, %v8060_v47  ;;  %v8063_v33 = vmul.f32 0.5, %v8060_v47 }
0x2f72   :  { %v8065_v35 = vand.u32 2147483647, %v8064_v1  ;;  %vm8085_vm3 = vcmp.ge.f32.partialorder %v8064_v1, 0.0 }
0x2f74   :  { %v8066_v6 = vmul.f32 0.3275911, %v8065_v35  ;;  %v8079_v28 = vsub.f32 0.0, %v8065_v35 }
0x2f76   :  { %v8067_v12 = vadd.f32 1.0, %v8066_v6  ;;  %v8080_v39 = vmul.f32 %v8079_v28, %v8065_v35  ;;  %v8595_v6 = vld [vmem:[%s11067_s27] ss:$0 sm:$0xff] }
0x2f78   :  { %10769 = vrcp.f32 %v8067_v12  ;;  %v8081_v44 = vmul.f32 1.442695, %v8080_v39 }
0x2f7a   :  { %10771 = vpow2.f32 %v8081_v44 }
0x2f82   :  { %v10770_v32 = vpop.eup %10769 }
0x2f83   :  { %v8070_v60 = vmul.f32 1.0614054, %v10770_v32 }
0x2f84   :  { %v10772_v52 = vpop.eup %10771 }
0x2f85   :  { %v8071_v41 = vadd.f32 -1.4531521, %v8070_v60 }
0x2f87   :  { %v8072_v15 = vmul.f32 %v10770_v32, %v8071_v41 }
0x2f89   :  { %v8073_v9 = vadd.f32 1.4214138, %v8072_v15 }
0x2f8b   :  { %v8074_v25 = vmul.f32 %v10770_v32, %v8073_v9 }
0x2f8d   :  { %v8075_v61 = vadd.f32 -0.28449672, %v8074_v25 }
0x2f8f   :  { %v8076_v8 = vmul.f32 %v10770_v32, %v8075_v61 }
0x2f91   :  { %v8077_v50 = vadd.f32 0.2548296, %v8076_v8 }
0x2f93   :  { %v8078_v48 = vmul.f32 %v10770_v32, %v8077_v50 }
0x2f95   :  { %v8083_v37 = vmul.f32 %v10772_v52, %v8078_v48 }
0x2f97   :  { %v8084_v51 = vsub.f32 1.0, %v8083_v37 }
0x2f99   :  { %v8086_v17 = vsub.f32 0.0, %v8084_v51 }
0x2f9b   :  { %v8087_v55 = vsel %vm8085_vm3, %v8084_v51, %v8086_v17 }
0x2f9c   :  { %v8088_v45 = vadd.f32 1.0, %v8087_v55 }
0x2f9e   :  { %v8089_v56 = vmul.f32 %v8088_v45, %v8063_v33 }
0x2fa0   :  { %9801 = vmatmul.mubr.f32.vlgmr.msra.gmra.mrb[180].mxu0 %v8089_v56 }
0x3073   :  { %v8179_v58 = vpop.f32.mrb[180].mxu0 }
0x3074   :  { %v8180_v40 = vadd.f32 %v8594_v38, %v8179_v58  ;;  %v9802_v62 = vpop.f32.mrb[181].mxu0 }
0x3076   :  { %v8184_v13 = vmul.f32 0.70710677, %v8180_v40  ;;  %v8183_v47 = vmul.f32 0.5, %v8180_v40 }
0x3078   :  { %v8185_v27 = vand.u32 2147483647, %v8184_v13  ;;  %vm8205_vm6 = vcmp.ge.f32.partialorder %v8184_v13, 0.0 }
0x307a   :  { %v8186_v26 = vmul.f32 0.3275911, %v8185_v27  ;;  %v8199_v43 = vsub.f32 0.0, %v8185_v27 }
0x307c   :  { %v8187_v59 = vadd.f32 1.0, %v8186_v26  ;;  %v8200_v24 = vmul.f32 %v8199_v43, %v8185_v27 }
0x307e   :  { %10773 = vrcp.f32 %v8187_v59  ;;  %v8201_v7 = vmul.f32 1.442695, %v8200_v24 }
0x3080   :  { %10775 = vpow2.f32 %v8201_v7 }
0x3088   :  { %v10774_v57 = vpop.eup %10773 }
0x3089   :  { %v8190_v63 = vmul.f32 1.0614054, %v10774_v57 }
0x308a   :  { %v10776_v2 = vpop.eup %10775 }
0x308b   :  { %v8191_v11 = vadd.f32 -1.4531521, %v8190_v63 }
0x308d   :  { %v8192_v20 = vmul.f32 %v10774_v57, %v8191_v11 }
0x308f   :  { %v8193_v42 = vadd.f32 1.4214138, %v8192_v20 }
0x3091   :  { %v8194_v19 = vmul.f32 %v10774_v57, %v8193_v42 }
0x3093   :  { %v8195_v53 = vadd.f32 -0.28449672, %v8194_v19 }
0x3095   :  { %v8196_v54 = vmul.f32 %v10774_v57, %v8195_v53 }
0x3097   :  { %v8197_v22 = vadd.f32 0.2548296, %v8196_v54 }
0x3099   :  { %v8198_v23 = vmul.f32 %v10774_v57, %v8197_v22 }
0x309b   :  { %v8203_v16 = vmul.f32 %v10776_v2, %v8198_v23 }
0x309d   :  { %v8204_v14 = vsub.f32 1.0, %v8203_v16 }
0x309f   :  { %v8206_v18 = vsub.f32 0.0, %v8204_v14 }
0x30a1   :  { %v8207_v10 = vsel %vm8205_vm6, %v8204_v14, %v8206_v18 }
0x30a2   :  { %v8208_v1 = vadd.f32 1.0, %v8207_v10 }
0x30a4   :  { %v8209_v35 = vmul.f32 %v8208_v1, %v8183_v47 }
0x30a6   :  { %9820 = vmatmul.mubr.msk.f32.vlgmr.msra.gmra.mrb[190].mxu1 %vm286_vm1, %v8209_v35 }
0x3179   :  { %v8294_v12 = vpop.f32.mrb[190].mxu1 }
0x317a   :  { %v8295_v28 = vadd.f32 %v8595_v6, %v8294_v12  ;;  %v9821_v32 = vpop.f32.mrb[191].mxu1 }
0x317c   :  { %8298 = vst [vmem:[#allocation3] sm:$0x3] %v8295_v28 }
0x317d   :  { %10794 = shalt.err (!%p10791_p4)
}
0x317e   :  { %s10795_s21 = scalar_lea.hbm %s11072_s4, 32 }
0x317f   :  { %p10796_p5 = scmp.ne.s32.totalorder %s11072_s4, %s10795_s21  ;;  %p10799_p6 = scmp.lt.u32.totalorder %s10795_s21, %s11072_s4 }
0x3181   :  { %p10801_p7 = pnand %p10799_p6, %p10796_p5 }
0x3183   :  { %10804 = shalt.err (!%p10801_p7)
}
0x3184   :  { %8308 = dma.vmem_to_hbm [thread:$0]  %s8306_s20, 32, %s11072_s4, [#allocation4]  }
0x3185   :  { %10805 = dma.done.wait [#allocation4], 32  }
0x3186   :  { %10806 = vsyncadd [#allocation4], 4294967264 }
0x3187   :  { %8312 = vsyncpa [#allocation4], 1 }

</bundles_post_ra>
